<compile_context>
chip_gen: v7x
topology: tpu7x:2x2x1
jax: 0.10.0
libtpu: 0.0.40
codegen_flags: <defaults>
</compile_context>

<pallas_src>
import jax
import jax.numpy as jnp
from jax import lax
from jax.experimental import pallas as pl
from jax.experimental.pallas import tpu as pltpu

# ----------------------------- toy model config ------------------------------
BATCH = 2
HIDDEN = 128
N_HEADS = 4
HEAD_DIM = HIDDEN // N_HEADS            # 32
MLP_HIDDEN = 256
N_LAYERS = 2
VOCAB = 128
IMG_C, IMG_H, IMG_W = 3, 16, 16
PATCH = 4
N_PATCHES = (IMG_H // PATCH) * (IMG_W // PATCH)       # 16 image tokens
PATCH_FEAT = IMG_C * PATCH * PATCH                    # 48
PF_PAD = 128                                          # lane-dense padded patch features
PROMPT_LEN = 8                                        # synthetic "Describe this image."
MAX_NEW_TOKENS = 8                                    # original uses 128; toy scale
PREFIX_LEN = N_PATCHES + PROMPT_LEN                   # 24
S_MAX = PREFIX_LEN + MAX_NEW_TOKENS                   # 32 padded sequence / cache length
EPS = 1e-6
SCALE = 1.0 / (HEAD_DIM ** 0.5)
NEG_INF = -1e9

_WHOLE = pl.BlockSpec(memory_space=pltpu.MemorySpace.VMEM)   # full array, VMEM resident
_SMEM = pl.BlockSpec(memory_space=pltpu.MemorySpace.SMEM)    # scalar inputs


# ------------------------------ kernel helpers --------------------------------
def _rmsnorm(x, w):
    var = jnp.mean(x * x, axis=-1, keepdims=True)
    return x * lax.rsqrt(var + EPS) * w


def _mm(a, w_bf16):
    """bf16 MXU matmul with f32 accumulation (weights stored in bf16)."""
    return jnp.dot(a.astype(jnp.bfloat16), w_bf16, preferred_element_type=jnp.float32)


def _split_heads(x):
    """[S, HIDDEN] -> [H, S, D] via static lane slices + leading-dim concat."""
    return jnp.concatenate(
        [x[:, h * HEAD_DIM:(h + 1) * HEAD_DIM][None] for h in range(N_HEADS)], axis=0)


def _merge_heads(x):
    """[H, S, D] -> [S, HIDDEN] via lane concat."""
    return jnp.concatenate([x[h] for h in range(N_HEADS)], axis=-1)


def _rope(x, cos, sin):
    """x: [H, S, D]; cos/sin: [S, D] (or [1, D] in decode)."""
    half = HEAD_DIM // 2
    x1 = x[..., :half]
    x2 = x[..., half:]
    rot = jnp.concatenate([-x2, x1], axis=-1)
    return x * cos[None] + rot * sin[None]


def _attention(q3, k_b, v_b, mask):
    """Batched-over-heads attention.

    q3: [H, Sq, D] f32 (already RoPE'd and scaled); k_b/v_b: [H, Sk, D] bf16;
    mask: [Sq or 1, Sk] additive f32.  Returns [H, Sq, D] f32.
    """
    s = jnp.einsum('hqd,hkd->hqk', q3.astype(jnp.bfloat16), k_b,
                   preferred_element_type=jnp.float32)
    s = s + mask[None]
    m = jnp.max(s, axis=-1, keepdims=True)
    e = jnp.exp(s - m)
    denom = jnp.sum(e, axis=-1, keepdims=True)
    p = e * pl.reciprocal(denom, approx=True)
    return jnp.einsum('hqk,hkd->hqd', p.astype(jnp.bfloat16), v_b,
                      preferred_element_type=jnp.float32)


def _silu(g):
    return g * pl.reciprocal(1.0 + jnp.exp(-g), approx=True)


# --------------------------------- kernels ------------------------------------
def prefill_kernel(
    patches_ref, prompt_ref, wpatch_ref, bpatch_ref, cos_ref, sin_ref,
    ln1_ref, wq_ref, bq_ref, wk_ref, bk_ref, wv_ref, bv_ref, wo_ref,
    ln2_ref, wg_ref, wu_ref, wd_ref, fnorm_ref, wlm_ref,
    kcache_ref, vcache_ref, logits_ref,
):
    """Fused: patch embed + full-prefix decoder stack + KV cache fill + LM head."""
    cos = cos_ref[...]                              # [S_MAX, HEAD_DIM]
    sin = sin_ref[...]

    # --- build the embedded sequence: [img patches | prompt | zero padding] ---
    img = _mm(patches_ref[...], wpatch_ref[...]) + bpatch_ref[...]     # [16, HID]
    x = jnp.concatenate(
        [img, prompt_ref[...],
         jnp.zeros((S_MAX - PREFIX_LEN, HIDDEN), jnp.float32)], axis=0)  # [S, HID]

    # --- causal mask built in-kernel ---
    ri = lax.broadcasted_iota(jnp.int32, (S_MAX, S_MAX), 0)
    ci = lax.broadcasted_iota(jnp.int32, (S_MAX, S_MAX), 1)
    mask = jnp.where(ci <= ri, 0.0, NEG_INF).astype(jnp.float32)         # [S, S]

    # TODO(synk): at real Qwen2-VL sizes the layer loop would become a grid axis
    # streaming per-layer weights via BlockSpec instead of holding all in VMEM.
    for l in range(N_LAYERS):
        h = _rmsnorm(x, ln1_ref[l])
        q = _mm(h, wq_ref[l]) + bq_ref[l]
        k = _mm(h, wk_ref[l]) + bk_ref[l]
        v = _mm(h, wv_ref[l]) + bv_ref[l]
        q3 = _rope(_split_heads(q), cos, sin) * SCALE                    # [H,S,D]
        k3b = _rope(_split_heads(k), cos, sin).astype(jnp.bfloat16)
        v3b = _split_heads(v).astype(jnp.bfloat16)
        kcache_ref[l] = k3b                                              # fill KV cache
        vcache_ref[l] = v3b
        ctx = _attention(q3, k3b, v3b, mask)                             # [H,S,D]
        x = x + _mm(_merge_heads(ctx), wo_ref[l])
        h2 = _rmsnorm(x, ln2_ref[l])
        g = _mm(h2, wg_ref[l])
        u = _mm(h2, wu_ref[l])
        x = x + _mm(_silu(g) * u, wd_ref[l])

    # LM head on the last real prefix row only.
    last = x[PREFIX_LEN - 1:PREFIX_LEN, :]                               # [1, HID]
    row_logits = _mm(_rmsnorm(last, fnorm_ref[...]), wlm_ref[...])       # [1, V]
    logits_ref[...] = jnp.broadcast_to(row_logits, (8, VOCAB))


def decode_kernel(
    pos_ref, tok_ref, kcache_ref, vcache_ref, tok_emb_ref, cos_ref, sin_ref,
    ln1_ref, wq_ref, bq_ref, wk_ref, bk_ref, wv_ref, bv_ref, wo_ref,
    ln2_ref, wg_ref, wu_ref, wd_ref, fnorm_ref, wlm_ref,
    logits_ref, kout_ref, vout_ref,
):
    """Single-token decode step for one batch element (grid over batch)."""
    b = pl.program_id(0)
    pos = pos_ref[0]                                   # scalar position of the fed token
    tok = tok_ref[b]                                   # scalar token id for this sample

    x = tok_emb_ref[pl.ds(tok, 1), :]                  # [1, HID] embedding row
    cos = cos_ref[pl.ds(pos, 1), :]                    # [1, HEAD_DIM]
    sin = sin_ref[pl.ds(pos, 1), :]

    kiota = lax.broadcasted_iota(jnp.int32, (1, S_MAX), 1)
    mask = jnp.where(kiota <= pos, 0.0, NEG_INF).astype(jnp.float32)      # [1, S]
    row_sel = lax.broadcasted_iota(jnp.int32, (1, S_MAX, HEAD_DIM), 1) == pos

    for l in range(N_LAYERS):
        h = _rmsnorm(x, ln1_ref[l])
        q = _mm(h, wq_ref[l]) + bq_ref[l]              # [1, HID]
        k = _mm(h, wk_ref[l]) + bk_ref[l]
        v = _mm(h, wv_ref[l]) + bv_ref[l]
        q3 = _rope(_split_heads(q), cos, sin) * SCALE  # [H,1,D]
        k3b = _rope(_split_heads(k), cos, sin).astype(jnp.bfloat16)
        v3b = _split_heads(v).astype(jnp.bfloat16)
        # KV cache update (row `pos`) + full-slab writeback of the aliased cache.
        # TODO(synk): at real scale only the new row would be DMA'd, not the slab.
        kc = jnp.where(row_sel, k3b, kcache_ref[l])    # [H,S,D] bf16
        vc = jnp.where(row_sel, v3b, vcache_ref[l])
        kout_ref[l] = kc
        vout_ref[l] = vc
        ctx = _attention(q3, kc, vc, mask)             # [H,1,D]
        x = x + _mm(_merge_heads(ctx), wo_ref[l])
        h2 = _rmsnorm(x, ln2_ref[l])
        g = _mm(h2, wg_ref[l])
        u = _mm(h2, wu_ref[l])
        x = x + _mm(_silu(g) * u, wd_ref[l])

    row_logits = _mm(_rmsnorm(x, fnorm_ref[...]), wlm_ref[...])           # [1, V]
    logits_ref[...] = jnp.broadcast_to(row_logits, (8, VOCAB))


# ------------------------------ pallas wrappers --------------------------------
def _layer_weight_list(params):
    return [params[k] for k in
            ("ln1", "wq", "bq", "wk", "bk", "wv", "bv", "wo",
             "ln2", "wg", "wu", "wd")]


_CACHE_SPEC = pl.BlockSpec((None, N_LAYERS, N_HEADS, S_MAX, HEAD_DIM),
                           lambda b: (b, 0, 0, 0, 0))
_LOGITS_SPEC = pl.BlockSpec((None, 8, VOCAB), lambda b: (b, 0, 0))


def prefill_call(patches, prompt_emb, params, cos, sin):
    b = patches.shape[0]
    in_specs = [
        pl.BlockSpec((None, N_PATCHES, PF_PAD), lambda i: (i, 0, 0)),
        pl.BlockSpec((None, PROMPT_LEN, HIDDEN), lambda i: (i, 0, 0)),
    ] + [_WHOLE] * 18
    out_shape = (
        jax.ShapeDtypeStruct((b, N_LAYERS, N_HEADS, S_MAX, HEAD_DIM), jnp.bfloat16),
        jax.ShapeDtypeStruct((b, N_LAYERS, N_HEADS, S_MAX, HEAD_DIM), jnp.bfloat16),
        jax.ShapeDtypeStruct((b, 8, VOCAB), jnp.float32),
    )
    kc, vc, logits = pl.pallas_call(
        prefill_kernel,
        grid=(b,),
        in_specs=in_specs,
        out_specs=(_CACHE_SPEC, _CACHE_SPEC, _LOGITS_SPEC),
        out_shape=out_shape,
        compiler_params=pltpu.CompilerParams(dimension_semantics=("parallel",)),
    )(patches, prompt_emb, params["patch_w"], params["patch_b"], cos, sin,
      *_layer_weight_list(params), params["final_norm"], params["w_lm"])
    return kc, vc, logits[:, 0, :]


def decode_call(pos, tok, k_cache, v_cache, params, cos, sin):
    b = tok.shape[0]
    in_specs = [_SMEM, _SMEM, _CACHE_SPEC, _CACHE_SPEC] + [_WHOLE] * 17
    out_shape = (
        jax.ShapeDtypeStruct((b, 8, VOCAB), jnp.float32),
        jax.ShapeDtypeStruct(k_cache.shape, k_cache.dtype),
        jax.ShapeDtypeStruct(v_cache.shape, v_cache.dtype),
    )
    logits, kc, vc = pl.pallas_call(
        decode_kernel,
        grid=(b,),
        in_specs=in_specs,
        out_specs=(_LOGITS_SPEC, _CACHE_SPEC, _CACHE_SPEC),
        out_shape=out_shape,
        input_output_aliases={2: 1, 3: 2},     # KV caches updated in place
        compiler_params=pltpu.CompilerParams(dimension_semantics=("parallel",)),
    )(pos, tok, k_cache, v_cache, params["tok_emb"], cos, sin,
      *_layer_weight_list(params), params["final_norm"], params["w_lm"])
    return logits[:, 0, :], kc, vc


# ------------------------------- params / glue ---------------------------------
def make_rope_consts():
    half = HEAD_DIM // 2
    inv_freq = 1.0 / (10000.0 ** (jnp.arange(half, dtype=jnp.float32) / half))
    pos = jnp.arange(S_MAX, dtype=jnp.float32)
    freqs = pos[:, None] * inv_freq[None, :]
    emb = jnp.concatenate([freqs, freqs], axis=-1)       # [S_MAX, HEAD_DIM]
    return jnp.cos(emb), jnp.sin(emb)


def init_params(key):
    def nrm(k, shape, dtype=jnp.float32):
        return (0.02 * jax.random.normal(k, shape, jnp.float32)).astype(dtype)

    bf = jnp.bfloat16
    ks = jax.random.split(key, 16)
    L = N_LAYERS
    return dict(
        tok_emb=nrm(ks[0], (VOCAB, HIDDEN)),                        # f32 (dynamic row gathers)
        patch_w=nrm(ks[1], (PF_PAD, HIDDEN), bf),                   # padded rows hit zero features
        patch_b=nrm(ks[2], (1, HIDDEN)),
        ln1=jnp.ones((L, 1, HIDDEN), jnp.float32),
        wq=nrm(ks[3], (L, HIDDEN, HIDDEN), bf),
        bq=nrm(ks[4], (L, 1, HIDDEN)),
        wk=nrm(ks[5], (L, HIDDEN, HIDDEN), bf),
        bk=nrm(ks[6], (L, 1, HIDDEN)),
        wv=nrm(ks[7], (L, HIDDEN, HIDDEN), bf),
        bv=nrm(ks[8], (L, 1, HIDDEN)),
        wo=nrm(ks[9], (L, HIDDEN, HIDDEN), bf),
        ln2=jnp.ones((L, 1, HIDDEN), jnp.float32),
        wg=nrm(ks[10], (L, HIDDEN, MLP_HIDDEN), bf),
        wu=nrm(ks[11], (L, HIDDEN, MLP_HIDDEN), bf),
        wd=nrm(ks[12], (L, MLP_HIDDEN, HIDDEN), bf),
        final_norm=jnp.ones((1, HIDDEN), jnp.float32),
        w_lm=nrm(ks[13], (HIDDEN, VOCAB), bf),
    )


@jax.jit
def vlm_generate(images, prompt_ids, params, cos, sin):
    """Mirrors VLM.forward: images + prompt -> greedy generation (device-side)."""
    b = images.shape[0]
    # patchify NCHW -> [B, N_PATCHES, C*P*P] (Conv2d patch-embed order), pad lanes.
    x = images.reshape(b, IMG_C, IMG_H // PATCH, PATCH, IMG_W // PATCH, PATCH)
    x = jnp.transpose(x, (0, 2, 4, 1, 3, 5))
    patches = x.reshape(b, N_PATCHES, PATCH_FEAT)
    patches = jnp.pad(patches, ((0, 0), (0, 0), (0, PF_PAD - PATCH_FEAT)))
    prompt_emb = params["tok_emb"][prompt_ids]           # [B, PROMPT_LEN, HIDDEN]

    # ---- prefill: one fused pallas_call (patch embed + all layers + LM head) ----
    k_cache, v_cache, logits0 = prefill_call(patches, prompt_emb, params, cos, sin)
    tok = jnp.argmax(logits0, axis=-1).astype(jnp.int32)                 # [B]
    gen = jnp.zeros((b, MAX_NEW_TOKENS), jnp.int32).at[:, 0].set(tok)

    # ---- decode: device-side loop, one fused pallas_call per new token ----
    def body(i, carry):
        gen_ids, cur_tok, kc, vc, _ = carry
        pos = jnp.reshape(i + (PREFIX_LEN - 1), (1,)).astype(jnp.int32)
        logits, kc, vc = decode_call(pos, cur_tok, kc, vc, params, cos, sin)
        cur_tok = jnp.argmax(logits, axis=-1).astype(jnp.int32)
        gen_ids = gen_ids.at[:, i].set(cur_tok)
        return (gen_ids, cur_tok, kc, vc, logits)

    gen, tok, k_cache, v_cache, last_logits = lax.fori_loop(
        1, MAX_NEW_TOKENS, body, (gen, tok, k_cache, v_cache, logits0))
    return gen, last_logits


# ----------------------------------- main --------------------------------------
if __name__ == "__main__":
    # TODO(synk): pretrained Qwen2-VL weights, chat template, processor and the
    # tokenizer's batch_decode have no Pallas equivalent; a deterministic
    # synthetic model of the same structure + synthetic token strings are used.
    key = jax.random.PRNGKey(0)
    k_img, k_par = jax.random.split(key)

    params = init_params(k_par)
    cos, sin = make_rope_consts()

    images = jax.random.normal(k_img, (BATCH, IMG_C, IMG_H, IMG_W), jnp.float32)
    prompt_ids = jnp.stack(
        [(jnp.arange(PROMPT_LEN) + b) % VOCAB for b in range(BATCH)]).astype(jnp.int32)

    gen_ids, last_logits = vlm_generate(images, prompt_ids, params, cos, sin)
    jax.block_until_ready(gen_ids)

    gen_np = jax.device_get(gen_ids)
    texts = [" ".join(f"<tok_{int(t)}>" for t in row) for row in gen_np]
    assert len(texts) == BATCH and all(isinstance(t, str) and t for t in texts)
    assert bool(jnp.all(jnp.isfinite(last_logits)))
    print("KERNEL_OK")
</pallas_src>

<mosaic_0001>
module attributes {stable_mosaic.version = 11 : i64} {
  func.func @decode_kernel(%arg0: i32, %arg1: memref<1xi32, #tpu.memory_space<smem>>, %arg2: memref<2xi32, #tpu.memory_space<smem>>, %arg3: memref<1x2x4x32x32xbf16, #tpu.memory_space<vmem>>, %arg4: memref<1x2x4x32x32xbf16, #tpu.memory_space<vmem>>, %arg5: memref<128x128xf32, #tpu.memory_space<vmem>>, %arg6: memref<32x32xf32, #tpu.memory_space<vmem>>, %arg7: memref<32x32xf32, #tpu.memory_space<vmem>>, %arg8: memref<2x1x128xf32, #tpu.memory_space<vmem>>, %arg9: memref<2x128x128xbf16, #tpu.memory_space<vmem>>, %arg10: memref<2x1x128xf32, #tpu.memory_space<vmem>>, %arg11: memref<2x128x128xbf16, #tpu.memory_space<vmem>>, %arg12: memref<2x1x128xf32, #tpu.memory_space<vmem>>, %arg13: memref<2x128x128xbf16, #tpu.memory_space<vmem>>, %arg14: memref<2x1x128xf32, #tpu.memory_space<vmem>>, %arg15: memref<2x128x128xbf16, #tpu.memory_space<vmem>>, %arg16: memref<2x1x128xf32, #tpu.memory_space<vmem>>, %arg17: memref<2x128x256xbf16, #tpu.memory_space<vmem>>, %arg18: memref<2x128x256xbf16, #tpu.memory_space<vmem>>, %arg19: memref<2x256x128xbf16, #tpu.memory_space<vmem>>, %arg20: memref<1x128xf32, #tpu.memory_space<vmem>>, %arg21: memref<128x128xbf16, #tpu.memory_space<vmem>>, %arg22: memref<1x8x128xf32, #tpu.memory_space<vmem>>, %arg23: memref<1x2x4x32x32xbf16, #tpu.memory_space<vmem>>, %arg24: memref<1x2x4x32x32xbf16, #tpu.memory_space<vmem>>) attributes {dimension_semantics = [#tpu.dimension_semantics<parallel>], iteration_bounds = array<i64: 2>, scalar_prefetch = 0 : i64, scratch_operands = 0 : i64, tpu.core_type = #tpu.core_type<tc>, window_params = [{transform_indices = @transform_0, window_bounds = array<i64: 1>}, {transform_indices = @transform_1, window_bounds = array<i64: 2>}, {transform_indices = @transform_2, window_bounds = array<i64: 1, 2, 4, 32, 32>}, {transform_indices = @transform_3, window_bounds = array<i64: 1, 2, 4, 32, 32>}, {pipeline_mode = #tpu.pipeline_mode<synchronous>, transform_indices = @transform_4, window_bounds = array<i64: 128, 128>}, {pipeline_mode = #tpu.pipeline_mode<synchronous>, transform_indices = @transform_5, window_bounds = array<i64: 32, 32>}, {pipeline_mode = #tpu.pipeline_mode<synchronous>, transform_indices = @transform_6, window_bounds = array<i64: 32, 32>}, {pipeline_mode = #tpu.pipeline_mode<synchronous>, transform_indices = @transform_7, window_bounds = array<i64: 2, 1, 128>}, {pipeline_mode = #tpu.pipeline_mode<synchronous>, transform_indices = @transform_8, window_bounds = array<i64: 2, 128, 128>}, {pipeline_mode = #tpu.pipeline_mode<synchronous>, transform_indices = @transform_9, window_bounds = array<i64: 2, 1, 128>}, {pipeline_mode = #tpu.pipeline_mode<synchronous>, transform_indices = @transform_10, window_bounds = array<i64: 2, 128, 128>}, {pipeline_mode = #tpu.pipeline_mode<synchronous>, transform_indices = @transform_11, window_bounds = array<i64: 2, 1, 128>}, {pipeline_mode = #tpu.pipeline_mode<synchronous>, transform_indices = @transform_12, window_bounds = array<i64: 2, 128, 128>}, {pipeline_mode = #tpu.pipeline_mode<synchronous>, transform_indices = @transform_13, window_bounds = array<i64: 2, 1, 128>}, {pipeline_mode = #tpu.pipeline_mode<synchronous>, transform_indices = @transform_14, window_bounds = array<i64: 2, 128, 128>}, {pipeline_mode = #tpu.pipeline_mode<synchronous>, transform_indices = @transform_15, window_bounds = array<i64: 2, 1, 128>}, {pipeline_mode = #tpu.pipeline_mode<synchronous>, transform_indices = @transform_16, window_bounds = array<i64: 2, 128, 256>}, {pipeline_mode = #tpu.pipeline_mode<synchronous>, transform_indices = @transform_17, window_bounds = array<i64: 2, 128, 256>}, {pipeline_mode = #tpu.pipeline_mode<synchronous>, transform_indices = @transform_18, window_bounds = array<i64: 2, 256, 128>}, {pipeline_mode = #tpu.pipeline_mode<synchronous>, transform_indices = @transform_19, window_bounds = array<i64: 1, 128>}, {pipeline_mode = #tpu.pipeline_mode<synchronous>, transform_indices = @transform_20, window_bounds = array<i64: 128, 128>}, {transform_indices = @transform_21, window_bounds = array<i64: 1, 8, 128>}, {transform_indices = @transform_22, window_bounds = array<i64: 1, 2, 4, 32, 32>}, {transform_indices = @transform_23, window_bounds = array<i64: 1, 2, 4, 32, 32>}]} {
    %c0 = arith.constant 0 : index
    %0 = memref.load %arg1[%c0] : memref<1xi32, #tpu.memory_space<smem>>
    %1 = arith.index_cast %arg0 : i32 to index
    %2 = memref.load %arg2[%1] : memref<2xi32, #tpu.memory_space<smem>>
    %3 = arith.index_cast %2 : i32 to index
    %c0_0 = arith.constant 0 : index
    %4 = vector.load %arg5[%3, %c0_0] : memref<128x128xf32, #tpu.memory_space<vmem>>, vector<1x128xf32>
    %5 = arith.index_cast %0 : i32 to index
    %c0_1 = arith.constant 0 : index
    %6 = vector.load %arg6[%5, %c0_1] : memref<32x32xf32, #tpu.memory_space<vmem>>, vector<1x32xf32>
    %7 = arith.index_cast %0 : i32 to index
    %c0_2 = arith.constant 0 : index
    %8 = vector.load %arg7[%7, %c0_2] : memref<32x32xf32, #tpu.memory_space<vmem>>, vector<1x32xf32>
    %9 = tpu.iota {dimensions = array<i32: 1>} : vector<1x32xi32>
    %10 = vector.broadcast %0 : i32 to vector<1x32xi32>
    %11 = arith.cmpi sle, %9, %10 : vector<1x32xi32>
    %cst = arith.constant 0.000000e+00 : f32
    %cst_3 = arith.constant -1.000000e+09 : f32
    %12 = vector.broadcast %cst : f32 to vector<1x32xf32>
    %13 = vector.broadcast %cst_3 : f32 to vector<1x32xf32>
    %14 = arith.select %11, %12, %13 : vector<1x32xi1>, vector<1x32xf32>
    %15 = tpu.iota {dimensions = array<i32: 1>} : vector<1x32x32xi32>
    %16 = vector.broadcast %0 : i32 to vector<1x32x32xi32>
    %17 = arith.cmpi eq, %15, %16 : vector<1x32x32xi32>
    %c0_4 = arith.constant 0 : index
    %c0_5 = arith.constant 0 : index
    %c0_6 = arith.constant 0 : index
    %18 = vector.load %arg8[%c0_4, %c0_5, %c0_6] : memref<2x1x128xf32, #tpu.memory_space<vmem>>, vector<1x1x128xf32>
    %19 = vector.shape_cast %18 : vector<1x1x128xf32> to vector<1x128xf32>
    %20 = arith.mulf %4, %4 : vector<1x128xf32>
    %cst_7 = arith.constant dense<0.000000e+00> : vector<1xf32>
    %21 = vector.multi_reduction <add>, %20, %cst_7 [1] : vector<1x128xf32> to vector<1xf32>
    %22 = vector.shape_cast %21 : vector<1xf32> to vector<1x1xf32>
    %cst_8 = arith.constant 1.280000e+02 : f32
    %23 = vector.broadcast %cst_8 : f32 to vector<1x1xf32>
    %24 = arith.divf %22, %23 : vector<1x1xf32>
    %cst_9 = arith.constant 9.99999997E-7 : f32
    %25 = vector.broadcast %cst_9 : f32 to vector<1x1xf32>
    %26 = arith.addf %24, %25 : vector<1x1xf32>
    %27 = math.rsqrt %26 : vector<1x1xf32>
    %28 = vector.broadcast %27 : vector<1x1xf32> to vector<1x128xf32>
    %29 = arith.mulf %4, %28 : vector<1x128xf32>
    %30 = arith.mulf %29, %19 : vector<1x128xf32>
    %c0_10 = arith.constant 0 : index
    %c0_11 = arith.constant 0 : index
    %c0_12 = arith.constant 0 : index
    %31 = vector.load %arg9[%c0_10, %c0_11, %c0_12] : memref<2x128x128xbf16, #tpu.memory_space<vmem>>, vector<1x128x128xbf16>
    %32 = vector.shape_cast %31 : vector<1x128x128xbf16> to vector<128x128xbf16>
    %33 = arith.truncf %30 : vector<1x128xf32> to vector<1x128xbf16>
    %cst_13 = arith.constant dense<0.000000e+00> : vector<1x128xf32>
    %34 = tpu.matmul %33, %32, %cst_13 {dimension_numbers = #tpu.dot_dimension_numbers<[1], [0], [0], [1], [0, 0, 1, 1], [], []>} : vector<1x128xbf16>, vector<128x128xbf16>, vector<1x128xf32> -> vector<1x128xf32>
    %c0_14 = arith.constant 0 : index
    %c0_15 = arith.constant 0 : index
    %c0_16 = arith.constant 0 : index
    %35 = vector.load %arg10[%c0_14, %c0_15, %c0_16] : memref<2x1x128xf32, #tpu.memory_space<vmem>>, vector<1x1x128xf32>
    %36 = vector.shape_cast %35 : vector<1x1x128xf32> to vector<1x128xf32>
    %37 = arith.addf %34, %36 : vector<1x128xf32>
    %c0_17 = arith.constant 0 : index
    %c0_18 = arith.constant 0 : index
    %c0_19 = arith.constant 0 : index
    %38 = vector.load %arg11[%c0_17, %c0_18, %c0_19] : memref<2x128x128xbf16, #tpu.memory_space<vmem>>, vector<1x128x128xbf16>
    %39 = vector.shape_cast %38 : vector<1x128x128xbf16> to vector<128x128xbf16>
    %40 = arith.truncf %30 : vector<1x128xf32> to vector<1x128xbf16>
    %cst_20 = arith.constant dense<0.000000e+00> : vector<1x128xf32>
    %41 = tpu.matmul %40, %39, %cst_20 {dimension_numbers = #tpu.dot_dimension_numbers<[1], [0], [0], [1], [0, 0, 1, 1], [], []>} : vector<1x128xbf16>, vector<128x128xbf16>, vector<1x128xf32> -> vector<1x128xf32>
    %c0_21 = arith.constant 0 : index
    %c0_22 = arith.constant 0 : index
    %c0_23 = arith.constant 0 : index
    %42 = vector.load %arg12[%c0_21, %c0_22, %c0_23] : memref<2x1x128xf32, #tpu.memory_space<vmem>>, vector<1x1x128xf32>
    %43 = vector.shape_cast %42 : vector<1x1x128xf32> to vector<1x128xf32>
    %44 = arith.addf %41, %43 : vector<1x128xf32>
    %c0_24 = arith.constant 0 : index
    %c0_25 = arith.constant 0 : index
    %c0_26 = arith.constant 0 : index
    %45 = vector.load %arg13[%c0_24, %c0_25, %c0_26] : memref<2x128x128xbf16, #tpu.memory_space<vmem>>, vector<1x128x128xbf16>
    %46 = vector.shape_cast %45 : vector<1x128x128xbf16> to vector<128x128xbf16>
    %47 = arith.truncf %30 : vector<1x128xf32> to vector<1x128xbf16>
    %cst_27 = arith.constant dense<0.000000e+00> : vector<1x128xf32>
    %48 = tpu.matmul %47, %46, %cst_27 {dimension_numbers = #tpu.dot_dimension_numbers<[1], [0], [0], [1], [0, 0, 1, 1], [], []>} : vector<1x128xbf16>, vector<128x128xbf16>, vector<1x128xf32> -> vector<1x128xf32>
    %c0_28 = arith.constant 0 : index
    %c0_29 = arith.constant 0 : index
    %c0_30 = arith.constant 0 : index
    %49 = vector.load %arg14[%c0_28, %c0_29, %c0_30] : memref<2x1x128xf32, #tpu.memory_space<vmem>>, vector<1x1x128xf32>
    %50 = vector.shape_cast %49 : vector<1x1x128xf32> to vector<1x128xf32>
    %51 = arith.addf %48, %50 : vector<1x128xf32>
    %52 = vector.extract_strided_slice %37 {offsets = [0, 0], sizes = [1, 32], strides = [1, 1]} : vector<1x128xf32> to vector<1x32xf32>
    %53 = vector.shape_cast %52 : vector<1x32xf32> to vector<1x1x32xf32>
    %54 = vector.extract_strided_slice %37 {offsets = [0, 32], sizes = [1, 32], strides = [1, 1]} : vector<1x128xf32> to vector<1x32xf32>
    %55 = vector.shape_cast %54 : vector<1x32xf32> to vector<1x1x32xf32>
    %56 = vector.extract_strided_slice %37 {offsets = [0, 64], sizes = [1, 32], strides = [1, 1]} : vector<1x128xf32> to vector<1x32xf32>
    %57 = vector.shape_cast %56 : vector<1x32xf32> to vector<1x1x32xf32>
    %58 = vector.extract_strided_slice %37 {offsets = [0, 96], sizes = [1, 32], strides = [1, 1]} : vector<1x128xf32> to vector<1x32xf32>
    %59 = vector.shape_cast %58 : vector<1x32xf32> to vector<1x1x32xf32>
    %60 = tpu.concatenate %53, %55, %57, %59 in 0 : vector<1x1x32xf32>, vector<1x1x32xf32>, vector<1x1x32xf32>, vector<1x1x32xf32> -> vector<4x1x32xf32>
    %61 = vector.extract_strided_slice %60 {offsets = [0, 0, 0], sizes = [4, 1, 16], strides = [1, 1, 1]} : vector<4x1x32xf32> to vector<4x1x16xf32>
    %62 = vector.extract_strided_slice %60 {offsets = [0, 0, 16], sizes = [4, 1, 16], strides = [1, 1, 1]} : vector<4x1x32xf32> to vector<4x1x16xf32>
    %cst_31 = arith.constant 0.000000e+00 : f32
    %63 = vector.broadcast %cst_31 : f32 to vector<4x1x16xf32>
    %64 = arith.subf %63, %62 : vector<4x1x16xf32>
    %65 = tpu.concatenate %64, %61 in 2 : vector<4x1x16xf32>, vector<4x1x16xf32> -> vector<4x1x32xf32>
    %66 = vector.shape_cast %6 : vector<1x32xf32> to vector<1x1x32xf32>
    %67 = vector.broadcast %66 : vector<1x1x32xf32> to vector<4x1x32xf32>
    %68 = arith.mulf %60, %67 : vector<4x1x32xf32>
    %69 = vector.shape_cast %8 : vector<1x32xf32> to vector<1x1x32xf32>
    %70 = vector.broadcast %69 : vector<1x1x32xf32> to vector<4x1x32xf32>
    %71 = arith.mulf %65, %70 : vector<4x1x32xf32>
    %72 = arith.addf %68, %71 : vector<4x1x32xf32>
    %cst_32 = arith.constant 0.176776692 : f32
    %73 = vector.broadcast %cst_32 : f32 to vector<4x1x32xf32>
    %74 = arith.mulf %72, %73 : vector<4x1x32xf32>
    %75 = vector.extract_strided_slice %44 {offsets = [0, 0], sizes = [1, 32], strides = [1, 1]} : vector<1x128xf32> to vector<1x32xf32>
    %76 = vector.shape_cast %75 : vector<1x32xf32> to vector<1x1x32xf32>
    %77 = vector.extract_strided_slice %44 {offsets = [0, 32], sizes = [1, 32], strides = [1, 1]} : vector<1x128xf32> to vector<1x32xf32>
    %78 = vector.shape_cast %77 : vector<1x32xf32> to vector<1x1x32xf32>
    %79 = vector.extract_strided_slice %44 {offsets = [0, 64], sizes = [1, 32], strides = [1, 1]} : vector<1x128xf32> to vector<1x32xf32>
    %80 = vector.shape_cast %79 : vector<1x32xf32> to vector<1x1x32xf32>
    %81 = vector.extract_strided_slice %44 {offsets = [0, 96], sizes = [1, 32], strides = [1, 1]} : vector<1x128xf32> to vector<1x32xf32>
    %82 = vector.shape_cast %81 : vector<1x32xf32> to vector<1x1x32xf32>
    %83 = tpu.concatenate %76, %78, %80, %82 in 0 : vector<1x1x32xf32>, vector<1x1x32xf32>, vector<1x1x32xf32>, vector<1x1x32xf32> -> vector<4x1x32xf32>
    %84 = vector.extract_strided_slice %83 {offsets = [0, 0, 0], sizes = [4, 1, 16], strides = [1, 1, 1]} : vector<4x1x32xf32> to vector<4x1x16xf32>
    %85 = vector.extract_strided_slice %83 {offsets = [0, 0, 16], sizes = [4, 1, 16], strides = [1, 1, 1]} : vector<4x1x32xf32> to vector<4x1x16xf32>
    %cst_33 = arith.constant 0.000000e+00 : f32
    %86 = vector.broadcast %cst_33 : f32 to vector<4x1x16xf32>
    %87 = arith.subf %86, %85 : vector<4x1x16xf32>
    %88 = tpu.concatenate %87, %84 in 2 : vector<4x1x16xf32>, vector<4x1x16xf32> -> vector<4x1x32xf32>
    %89 = vector.shape_cast %6 : vector<1x32xf32> to vector<1x1x32xf32>
    %90 = vector.broadcast %89 : vector<1x1x32xf32> to vector<4x1x32xf32>
    %91 = arith.mulf %83, %90 : vector<4x1x32xf32>
    %92 = vector.shape_cast %8 : vector<1x32xf32> to vector<1x1x32xf32>
    %93 = vector.broadcast %92 : vector<1x1x32xf32> to vector<4x1x32xf32>
    %94 = arith.mulf %88, %93 : vector<4x1x32xf32>
    %95 = arith.addf %91, %94 : vector<4x1x32xf32>
    %96 = arith.truncf %95 : vector<4x1x32xf32> to vector<4x1x32xbf16>
    %97 = vector.extract_strided_slice %51 {offsets = [0, 0], sizes = [1, 32], strides = [1, 1]} : vector<1x128xf32> to vector<1x32xf32>
    %98 = vector.shape_cast %97 : vector<1x32xf32> to vector<1x1x32xf32>
    %99 = vector.extract_strided_slice %51 {offsets = [0, 32], sizes = [1, 32], strides = [1, 1]} : vector<1x128xf32> to vector<1x32xf32>
    %100 = vector.shape_cast %99 : vector<1x32xf32> to vector<1x1x32xf32>
    %101 = vector.extract_strided_slice %51 {offsets = [0, 64], sizes = [1, 32], strides = [1, 1]} : vector<1x128xf32> to vector<1x32xf32>
    %102 = vector.shape_cast %101 : vector<1x32xf32> to vector<1x1x32xf32>
    %103 = vector.extract_strided_slice %51 {offsets = [0, 96], sizes = [1, 32], strides = [1, 1]} : vector<1x128xf32> to vector<1x32xf32>
    %104 = vector.shape_cast %103 : vector<1x32xf32> to vector<1x1x32xf32>
    %105 = tpu.concatenate %98, %100, %102, %104 in 0 : vector<1x1x32xf32>, vector<1x1x32xf32>, vector<1x1x32xf32>, vector<1x1x32xf32> -> vector<4x1x32xf32>
    %106 = arith.truncf %105 : vector<4x1x32xf32> to vector<4x1x32xbf16>
    %c0_34 = arith.constant 0 : index
    %c0_35 = arith.constant 0 : index
    %c0_36 = arith.constant 0 : index
    %c0_37 = arith.constant 0 : index
    %c0_38 = arith.constant 0 : index
    %107 = vector.load %arg3[%c0_34, %c0_35, %c0_36, %c0_37, %c0_38] : memref<1x2x4x32x32xbf16, #tpu.memory_space<vmem>>, vector<1x1x4x32x32xbf16>
    %108 = vector.shape_cast %107 : vector<1x1x4x32x32xbf16> to vector<4x32x32xbf16>
    %109 = vector.shape_cast %17 : vector<1x32x32xi1> to vector<1x32x32xi1>
    %110 = vector.broadcast %109 : vector<1x32x32xi1> to vector<4x32x32xi1>
    %111 = vector.shape_cast %96 : vector<4x1x32xbf16> to vector<4x1x32xbf16>
    %112 = vector.broadcast %111 : vector<4x1x32xbf16> to vector<4x32x32xbf16>
    %113 = arith.select %110, %112, %108 : vector<4x32x32xi1>, vector<4x32x32xbf16>
    %c0_39 = arith.constant 0 : index
    %c0_40 = arith.constant 0 : index
    %c0_41 = arith.constant 0 : index
    %c0_42 = arith.constant 0 : index
    %c0_43 = arith.constant 0 : index
    %114 = vector.load %arg4[%c0_39, %c0_40, %c0_41, %c0_42, %c0_43] : memref<1x2x4x32x32xbf16, #tpu.memory_space<vmem>>, vector<1x1x4x32x32xbf16>
    %115 = vector.shape_cast %114 : vector<1x1x4x32x32xbf16> to vector<4x32x32xbf16>
    %116 = vector.shape_cast %17 : vector<1x32x32xi1> to vector<1x32x32xi1>
    %117 = vector.broadcast %116 : vector<1x32x32xi1> to vector<4x32x32xi1>
    %118 = vector.shape_cast %106 : vector<4x1x32xbf16> to vector<4x1x32xbf16>
    %119 = vector.broadcast %118 : vector<4x1x32xbf16> to vector<4x32x32xbf16>
    %120 = arith.select %117, %119, %115 : vector<4x32x32xi1>, vector<4x32x32xbf16>
    %c0_44 = arith.constant 0 : index
    %c0_45 = arith.constant 0 : index
    %c0_46 = arith.constant 0 : index
    %c0_47 = arith.constant 0 : index
    %c0_48 = arith.constant 0 : index
    %121 = vector.load %arg23[%c0_44, %c0_45, %c0_46, %c0_47, %c0_48] : memref<1x2x4x32x32xbf16, #tpu.memory_space<vmem>>, vector<1x1x4x32x32xbf16>
    %122 = vector.shape_cast %121 : vector<1x1x4x32x32xbf16> to vector<4x32x32xbf16>
    %123 = vector.shape_cast %113 : vector<4x32x32xbf16> to vector<1x1x4x32x32xbf16>
    tpu.vector_store %arg23[%c0_44, %c0_45, %c0_46, %c0_47, %c0_48], %123 {strides = array<i32>} : memref<1x2x4x32x32xbf16, #tpu.memory_space<vmem>>, vector<1x1x4x32x32xbf16>,
    %c0_49 = arith.constant 0 : index
    %c0_50 = arith.constant 0 : index
    %c0_51 = arith.constant 0 : index
    %c0_52 = arith.constant 0 : index
    %c0_53 = arith.constant 0 : index
    %124 = vector.load %arg24[%c0_49, %c0_50, %c0_51, %c0_52, %c0_53] : memref<1x2x4x32x32xbf16, #tpu.memory_space<vmem>>, vector<1x1x4x32x32xbf16>
    %125 = vector.shape_cast %124 : vector<1x1x4x32x32xbf16> to vector<4x32x32xbf16>
    %126 = vector.shape_cast %120 : vector<4x32x32xbf16> to vector<1x1x4x32x32xbf16>
    tpu.vector_store %arg24[%c0_49, %c0_50, %c0_51, %c0_52, %c0_53], %126 {strides = array<i32>} : memref<1x2x4x32x32xbf16, #tpu.memory_space<vmem>>, vector<1x1x4x32x32xbf16>,
    %127 = arith.truncf %74 : vector<4x1x32xf32> to vector<4x1x32xbf16>
    "tpu.trace_start"() <{level = 10 : i32, message = "hqd,hkd->hqk"}> : () -> ()
    %cst_54 = arith.constant dense<0.000000e+00> : vector<4x1x32xf32>
    %128 = tpu.matmul %127, %113, %cst_54 {dimension_numbers = #tpu.dot_dimension_numbers<[2], [2], [1], [1], [0, 0, 0, 1, 1, 1], [0], [0]>} : vector<4x1x32xbf16>, vector<4x32x32xbf16>, vector<4x1x32xf32> -> vector<4x1x32xf32>
    "tpu.trace_stop"() : () -> ()
    %129 = vector.shape_cast %14 : vector<1x32xf32> to vector<1x1x32xf32>
    %130 = vector.broadcast %129 : vector<1x1x32xf32> to vector<4x1x32xf32>
    %131 = arith.addf %128, %130 : vector<4x1x32xf32>
    %cst_55 = arith.constant dense<0xFF800000> : vector<4x1xf32>
    %132 = vector.multi_reduction <maximumf>, %131, %cst_55 [2] : vector<4x1x32xf32> to vector<4x1xf32>
    %133 = vector.shape_cast %132 : vector<4x1xf32> to vector<4x1x1xf32>
    %134 = vector.broadcast %133 : vector<4x1x1xf32> to vector<4x1x32xf32>
    %135 = arith.subf %131, %134 : vector<4x1x32xf32>
    %136 = math.exp %135 : vector<4x1x32xf32>
    %cst_56 = arith.constant dense<0.000000e+00> : vector<4x1xf32>
    %137 = vector.multi_reduction <add>, %136, %cst_56 [2] : vector<4x1x32xf32> to vector<4x1xf32>
    %138 = vector.shape_cast %137 : vector<4x1xf32> to vector<4x1x1xf32>
    %139 = tpu.reciprocal %138 {approx = true} : vector<4x1x1xf32> -> vector<4x1x1xf32>
    %140 = vector.broadcast %139 : vector<4x1x1xf32> to vector<4x1x32xf32>
    %141 = arith.mulf %136, %140 : vector<4x1x32xf32>
    %142 = arith.truncf %141 : vector<4x1x32xf32> to vector<4x1x32xbf16>
    "tpu.trace_start"() <{level = 10 : i32, message = "hqk,hkd->hqd"}> : () -> ()
    %cst_57 = arith.constant dense<0.000000e+00> : vector<4x1x32xf32>
    %143 = tpu.matmul %142, %120, %cst_57 {dimension_numbers = #tpu.dot_dimension_numbers<[2], [1], [1], [2], [0, 0, 0, 1, 1, 2], [0], [0]>} : vector<4x1x32xbf16>, vector<4x32x32xbf16>, vector<4x1x32xf32> -> vector<4x1x32xf32>
    "tpu.trace_stop"() : () -> ()
    %144 = vector.extract_strided_slice %143 {offsets = [0, 0, 0], sizes = [1, 1, 32], strides = [1, 1, 1]} : vector<4x1x32xf32> to vector<1x1x32xf32>
    %145 = vector.shape_cast %144 : vector<1x1x32xf32> to vector<1x32xf32>
    %146 = vector.extract_strided_slice %143 {offsets = [1, 0, 0], sizes = [1, 1, 32], strides = [1, 1, 1]} : vector<4x1x32xf32> to vector<1x1x32xf32>
    %147 = vector.shape_cast %146 : vector<1x1x32xf32> to vector<1x32xf32>
    %148 = vector.extract_strided_slice %143 {offsets = [2, 0, 0], sizes = [1, 1, 32], strides = [1, 1, 1]} : vector<4x1x32xf32> to vector<1x1x32xf32>
    %149 = vector.shape_cast %148 : vector<1x1x32xf32> to vector<1x32xf32>
    %150 = vector.extract_strided_slice %143 {offsets = [3, 0, 0], sizes = [1, 1, 32], strides = [1, 1, 1]} : vector<4x1x32xf32> to vector<1x1x32xf32>
    %151 = vector.shape_cast %150 : vector<1x1x32xf32> to vector<1x32xf32>
    %152 = tpu.concatenate %145, %147, %149, %151 in 1 : vector<1x32xf32>, vector<1x32xf32>, vector<1x32xf32>, vector<1x32xf32> -> vector<1x128xf32>
    %c0_58 = arith.constant 0 : index
    %c0_59 = arith.constant 0 : index
    %c0_60 = arith.constant 0 : index
    %153 = vector.load %arg15[%c0_58, %c0_59, %c0_60] : memref<2x128x128xbf16, #tpu.memory_space<vmem>>, vector<1x128x128xbf16>
    %154 = vector.shape_cast %153 : vector<1x128x128xbf16> to vector<128x128xbf16>
    %155 = arith.truncf %152 : vector<1x128xf32> to vector<1x128xbf16>
    %cst_61 = arith.constant dense<0.000000e+00> : vector<1x128xf32>
    %156 = tpu.matmul %155, %154, %cst_61 {dimension_numbers = #tpu.dot_dimension_numbers<[1], [0], [0], [1], [0, 0, 1, 1], [], []>} : vector<1x128xbf16>, vector<128x128xbf16>, vector<1x128xf32> -> vector<1x128xf32>
    %157 = arith.addf %4, %156 : vector<1x128xf32>
    %c0_62 = arith.constant 0 : index
    %c0_63 = arith.constant 0 : index
    %c0_64 = arith.constant 0 : index
    %158 = vector.load %arg16[%c0_62, %c0_63, %c0_64] : memref<2x1x128xf32, #tpu.memory_space<vmem>>, vector<1x1x128xf32>
    %159 = vector.shape_cast %158 : vector<1x1x128xf32> to vector<1x128xf32>
    %160 = arith.mulf %157, %157 : vector<1x128xf32>
    %cst_65 = arith.constant dense<0.000000e+00> : vector<1xf32>
    %161 = vector.multi_reduction <add>, %160, %cst_65 [1] : vector<1x128xf32> to vector<1xf32>
    %162 = vector.shape_cast %161 : vector<1xf32> to vector<1x1xf32>
    %cst_66 = arith.constant 1.280000e+02 : f32
    %163 = vector.broadcast %cst_66 : f32 to vector<1x1xf32>
    %164 = arith.divf %162, %163 : vector<1x1xf32>
    %cst_67 = arith.constant 9.99999997E-7 : f32
    %165 = vector.broadcast %cst_67 : f32 to vector<1x1xf32>
    %166 = arith.addf %164, %165 : vector<1x1xf32>
    %167 = math.rsqrt %166 : vector<1x1xf32>
    %168 = vector.broadcast %167 : vector<1x1xf32> to vector<1x128xf32>
    %169 = arith.mulf %157, %168 : vector<1x128xf32>
    %170 = arith.mulf %169, %159 : vector<1x128xf32>
    %c0_68 = arith.constant 0 : index
    %c0_69 = arith.constant 0 : index
    %c0_70 = arith.constant 0 : index
    %171 = vector.load %arg17[%c0_68, %c0_69, %c0_70] : memref<2x128x256xbf16, #tpu.memory_space<vmem>>, vector<1x128x256xbf16>
    %172 = vector.shape_cast %171 : vector<1x128x256xbf16> to vector<128x256xbf16>
    %173 = arith.truncf %170 : vector<1x128xf32> to vector<1x128xbf16>
    %cst_71 = arith.constant dense<0.000000e+00> : vector<1x256xf32>
    %174 = tpu.matmul %173, %172, %cst_71 {dimension_numbers = #tpu.dot_dimension_numbers<[1], [0], [0], [1], [0, 0, 1, 1], [], []>} : vector<1x128xbf16>, vector<128x256xbf16>, vector<1x256xf32> -> vector<1x256xf32>
    %c0_72 = arith.constant 0 : index
    %c0_73 = arith.constant 0 : index
    %c0_74 = arith.constant 0 : index
    %175 = vector.load %arg18[%c0_72, %c0_73, %c0_74] : memref<2x128x256xbf16, #tpu.memory_space<vmem>>, vector<1x128x256xbf16>
    %176 = vector.shape_cast %175 : vector<1x128x256xbf16> to vector<128x256xbf16>
    %177 = arith.truncf %170 : vector<1x128xf32> to vector<1x128xbf16>
    %cst_75 = arith.constant dense<0.000000e+00> : vector<1x256xf32>
    %178 = tpu.matmul %177, %176, %cst_75 {dimension_numbers = #tpu.dot_dimension_numbers<[1], [0], [0], [1], [0, 0, 1, 1], [], []>} : vector<1x128xbf16>, vector<128x256xbf16>, vector<1x256xf32> -> vector<1x256xf32>
    %cst_76 = arith.constant 0.000000e+00 : f32
    %179 = vector.broadcast %cst_76 : f32 to vector<1x256xf32>
    %180 = arith.subf %179, %174 : vector<1x256xf32>
    %181 = math.exp %180 : vector<1x256xf32>
    %cst_77 = arith.constant 1.000000e+00 : f32
    %182 = vector.broadcast %cst_77 : f32 to vector<1x256xf32>
    %183 = arith.addf %182, %181 : vector<1x256xf32>
    %184 = tpu.reciprocal %183 {approx = true} : vector<1x256xf32> -> vector<1x256xf32>
    %185 = arith.mulf %174, %184 : vector<1x256xf32>
    %186 = arith.mulf %185, %178 : vector<1x256xf32>
    %c0_78 = arith.constant 0 : index
    %c0_79 = arith.constant 0 : index
    %c0_80 = arith.constant 0 : index
    %187 = vector.load %arg19[%c0_78, %c0_79, %c0_80] : memref<2x256x128xbf16, #tpu.memory_space<vmem>>, vector<1x256x128xbf16>
    %188 = vector.shape_cast %187 : vector<1x256x128xbf16> to vector<256x128xbf16>
    %189 = arith.truncf %186 : vector<1x256xf32> to vector<1x256xbf16>
    %cst_81 = arith.constant dense<0.000000e+00> : vector<1x128xf32>
    %190 = tpu.matmul %189, %188, %cst_81 {dimension_numbers = #tpu.dot_dimension_numbers<[1], [0], [0], [1], [0, 0, 1, 1], [], []>} : vector<1x256xbf16>, vector<256x128xbf16>, vector<1x128xf32> -> vector<1x128xf32>
    %191 = arith.addf %157, %190 : vector<1x128xf32>
    %c1 = arith.constant 1 : index
    %c0_82 = arith.constant 0 : index
    %c0_83 = arith.constant 0 : index
    %192 = vector.load %arg8[%c1, %c0_82, %c0_83] : memref<2x1x128xf32, #tpu.memory_space<vmem>>, vector<1x1x128xf32>
    %193 = vector.shape_cast %192 : vector<1x1x128xf32> to vector<1x128xf32>
    %194 = arith.mulf %191, %191 : vector<1x128xf32>
    %cst_84 = arith.constant dense<0.000000e+00> : vector<1xf32>
    %195 = vector.multi_reduction <add>, %194, %cst_84 [1] : vector<1x128xf32> to vector<1xf32>
    %196 = vector.shape_cast %195 : vector<1xf32> to vector<1x1xf32>
    %cst_85 = arith.constant 1.280000e+02 : f32
    %197 = vector.broadcast %cst_85 : f32 to vector<1x1xf32>
    %198 = arith.divf %196, %197 : vector<1x1xf32>
    %cst_86 = arith.constant 9.99999997E-7 : f32
    %199 = vector.broadcast %cst_86 : f32 to vector<1x1xf32>
    %200 = arith.addf %198, %199 : vector<1x1xf32>
    %201 = math.rsqrt %200 : vector<1x1xf32>
    %202 = vector.broadcast %201 : vector<1x1xf32> to vector<1x128xf32>
    %203 = arith.mulf %191, %202 : vector<1x128xf32>
    %204 = arith.mulf %203, %193 : vector<1x128xf32>
    %c1_87 = arith.constant 1 : index
    %c0_88 = arith.constant 0 : index
    %c0_89 = arith.constant 0 : index
    %205 = vector.load %arg9[%c1_87, %c0_88, %c0_89] : memref<2x128x128xbf16, #tpu.memory_space<vmem>>, vector<1x128x128xbf16>
    %206 = vector.shape_cast %205 : vector<1x128x128xbf16> to vector<128x128xbf16>
    %207 = arith.truncf %204 : vector<1x128xf32> to vector<1x128xbf16>
    %cst_90 = arith.constant dense<0.000000e+00> : vector<1x128xf32>
    %208 = tpu.matmul %207, %206, %cst_90 {dimension_numbers = #tpu.dot_dimension_numbers<[1], [0], [0], [1], [0, 0, 1, 1], [], []>} : vector<1x128xbf16>, vector<128x128xbf16>, vector<1x128xf32> -> vector<1x128xf32>
    %c1_91 = arith.constant 1 : index
    %c0_92 = arith.constant 0 : index
    %c0_93 = arith.constant 0 : index
    %209 = vector.load %arg10[%c1_91, %c0_92, %c0_93] : memref<2x1x128xf32, #tpu.memory_space<vmem>>, vector<1x1x128xf32>
    %210 = vector.shape_cast %209 : vector<1x1x128xf32> to vector<1x128xf32>
    %211 = arith.addf %208, %210 : vector<1x128xf32>
    %c1_94 = arith.constant 1 : index
    %c0_95 = arith.constant 0 : index
    %c0_96 = arith.constant 0 : index
    %212 = vector.load %arg11[%c1_94, %c0_95, %c0_96] : memref<2x128x128xbf16, #tpu.memory_space<vmem>>, vector<1x128x128xbf16>
    %213 = vector.shape_cast %212 : vector<1x128x128xbf16> to vector<128x128xbf16>
    %214 = arith.truncf %204 : vector<1x128xf32> to vector<1x128xbf16>
    %cst_97 = arith.constant dense<0.000000e+00> : vector<1x128xf32>
    %215 = tpu.matmul %214, %213, %cst_97 {dimension_numbers = #tpu.dot_dimension_numbers<[1], [0], [0], [1], [0, 0, 1, 1], [], []>} : vector<1x128xbf16>, vector<128x128xbf16>, vector<1x128xf32> -> vector<1x128xf32>
    %c1_98 = arith.constant 1 : index
    %c0_99 = arith.constant 0 : index
    %c0_100 = arith.constant 0 : index
    %216 = vector.load %arg12[%c1_98, %c0_99, %c0_100] : memref<2x1x128xf32, #tpu.memory_space<vmem>>, vector<1x1x128xf32>
    %217 = vector.shape_cast %216 : vector<1x1x128xf32> to vector<1x128xf32>
    %218 = arith.addf %215, %217 : vector<1x128xf32>
    %c1_101 = arith.constant 1 : index
    %c0_102 = arith.constant 0 : index
    %c0_103 = arith.constant 0 : index
    %219 = vector.load %arg13[%c1_101, %c0_102, %c0_103] : memref<2x128x128xbf16, #tpu.memory_space<vmem>>, vector<1x128x128xbf16>
    %220 = vector.shape_cast %219 : vector<1x128x128xbf16> to vector<128x128xbf16>
    %221 = arith.truncf %204 : vector<1x128xf32> to vector<1x128xbf16>
    %cst_104 = arith.constant dense<0.000000e+00> : vector<1x128xf32>
    %222 = tpu.matmul %221, %220, %cst_104 {dimension_numbers = #tpu.dot_dimension_numbers<[1], [0], [0], [1], [0, 0, 1, 1], [], []>} : vector<1x128xbf16>, vector<128x128xbf16>, vector<1x128xf32> -> vector<1x128xf32>
    %c1_105 = arith.constant 1 : index
    %c0_106 = arith.constant 0 : index
    %c0_107 = arith.constant 0 : index
    %223 = vector.load %arg14[%c1_105, %c0_106, %c0_107] : memref<2x1x128xf32, #tpu.memory_space<vmem>>, vector<1x1x128xf32>
    %224 = vector.shape_cast %223 : vector<1x1x128xf32> to vector<1x128xf32>
    %225 = arith.addf %222, %224 : vector<1x128xf32>
    %226 = vector.extract_strided_slice %211 {offsets = [0, 0], sizes = [1, 32], strides = [1, 1]} : vector<1x128xf32> to vector<1x32xf32>
    %227 = vector.shape_cast %226 : vector<1x32xf32> to vector<1x1x32xf32>
    %228 = vector.extract_strided_slice %211 {offsets = [0, 32], sizes = [1, 32], strides = [1, 1]} : vector<1x128xf32> to vector<1x32xf32>
    %229 = vector.shape_cast %228 : vector<1x32xf32> to vector<1x1x32xf32>
    %230 = vector.extract_strided_slice %211 {offsets = [0, 64], sizes = [1, 32], strides = [1, 1]} : vector<1x128xf32> to vector<1x32xf32>
    %231 = vector.shape_cast %230 : vector<1x32xf32> to vector<1x1x32xf32>
    %232 = vector.extract_strided_slice %211 {offsets = [0, 96], sizes = [1, 32], strides = [1, 1]} : vector<1x128xf32> to vector<1x32xf32>
    %233 = vector.shape_cast %232 : vector<1x32xf32> to vector<1x1x32xf32>
    %234 = tpu.concatenate %227, %229, %231, %233 in 0 : vector<1x1x32xf32>, vector<1x1x32xf32>, vector<1x1x32xf32>, vector<1x1x32xf32> -> vector<4x1x32xf32>
    %235 = vector.extract_strided_slice %234 {offsets = [0, 0, 0], sizes = [4, 1, 16], strides = [1, 1, 1]} : vector<4x1x32xf32> to vector<4x1x16xf32>
    %236 = vector.extract_strided_slice %234 {offsets = [0, 0, 16], sizes = [4, 1, 16], strides = [1, 1, 1]} : vector<4x1x32xf32> to vector<4x1x16xf32>
    %cst_108 = arith.constant 0.000000e+00 : f32
    %237 = vector.broadcast %cst_108 : f32 to vector<4x1x16xf32>
    %238 = arith.subf %237, %236 : vector<4x1x16xf32>
    %239 = tpu.concatenate %238, %235 in 2 : vector<4x1x16xf32>, vector<4x1x16xf32> -> vector<4x1x32xf32>
    %240 = vector.shape_cast %6 : vector<1x32xf32> to vector<1x1x32xf32>
    %241 = vector.broadcast %240 : vector<1x1x32xf32> to vector<4x1x32xf32>
    %242 = arith.mulf %234, %241 : vector<4x1x32xf32>
    %243 = vector.shape_cast %8 : vector<1x32xf32> to vector<1x1x32xf32>
    %244 = vector.broadcast %243 : vector<1x1x32xf32> to vector<4x1x32xf32>
    %245 = arith.mulf %239, %244 : vector<4x1x32xf32>
    %246 = arith.addf %242, %245 : vector<4x1x32xf32>
    %cst_109 = arith.constant 0.176776692 : f32
    %247 = vector.broadcast %cst_109 : f32 to vector<4x1x32xf32>
    %248 = arith.mulf %246, %247 : vector<4x1x32xf32>
    %249 = vector.extract_strided_slice %218 {offsets = [0, 0], sizes = [1, 32], strides = [1, 1]} : vector<1x128xf32> to vector<1x32xf32>
    %250 = vector.shape_cast %249 : vector<1x32xf32> to vector<1x1x32xf32>
    %251 = vector.extract_strided_slice %218 {offsets = [0, 32], sizes = [1, 32], strides = [1, 1]} : vector<1x128xf32> to vector<1x32xf32>
    %252 = vector.shape_cast %251 : vector<1x32xf32> to vector<1x1x32xf32>
    %253 = vector.extract_strided_slice %218 {offsets = [0, 64], sizes = [1, 32], strides = [1, 1]} : vector<1x128xf32> to vector<1x32xf32>
    %254 = vector.shape_cast %253 : vector<1x32xf32> to vector<1x1x32xf32>
    %255 = vector.extract_strided_slice %218 {offsets = [0, 96], sizes = [1, 32], strides = [1, 1]} : vector<1x128xf32> to vector<1x32xf32>
    %256 = vector.shape_cast %255 : vector<1x32xf32> to vector<1x1x32xf32>
    %257 = tpu.concatenate %250, %252, %254, %256 in 0 : vector<1x1x32xf32>, vector<1x1x32xf32>, vector<1x1x32xf32>, vector<1x1x32xf32> -> vector<4x1x32xf32>
    %258 = vector.extract_strided_slice %257 {offsets = [0, 0, 0], sizes = [4, 1, 16], strides = [1, 1, 1]} : vector<4x1x32xf32> to vector<4x1x16xf32>
    %259 = vector.extract_strided_slice %257 {offsets = [0, 0, 16], sizes = [4, 1, 16], strides = [1, 1, 1]} : vector<4x1x32xf32> to vector<4x1x16xf32>
    %cst_110 = arith.constant 0.000000e+00 : f32
    %260 = vector.broadcast %cst_110 : f32 to vector<4x1x16xf32>
    %261 = arith.subf %260, %259 : vector<4x1x16xf32>
    %262 = tpu.concatenate %261, %258 in 2 : vector<4x1x16xf32>, vector<4x1x16xf32> -> vector<4x1x32xf32>
    %263 = vector.shape_cast %6 : vector<1x32xf32> to vector<1x1x32xf32>
    %264 = vector.broadcast %263 : vector<1x1x32xf32> to vector<4x1x32xf32>
    %265 = arith.mulf %257, %264 : vector<4x1x32xf32>
    %266 = vector.shape_cast %8 : vector<1x32xf32> to vector<1x1x32xf32>
    %267 = vector.broadcast %266 : vector<1x1x32xf32> to vector<4x1x32xf32>
    %268 = arith.mulf %262, %267 : vector<4x1x32xf32>
    %269 = arith.addf %265, %268 : vector<4x1x32xf32>
    %270 = arith.truncf %269 : vector<4x1x32xf32> to vector<4x1x32xbf16>
    %271 = vector.extract_strided_slice %225 {offsets = [0, 0], sizes = [1, 32], strides = [1, 1]} : vector<1x128xf32> to vector<1x32xf32>
    %272 = vector.shape_cast %271 : vector<1x32xf32> to vector<1x1x32xf32>
    %273 = vector.extract_strided_slice %225 {offsets = [0, 32], sizes = [1, 32], strides = [1, 1]} : vector<1x128xf32> to vector<1x32xf32>
    %274 = vector.shape_cast %273 : vector<1x32xf32> to vector<1x1x32xf32>
    %275 = vector.extract_strided_slice %225 {offsets = [0, 64], sizes = [1, 32], strides = [1, 1]} : vector<1x128xf32> to vector<1x32xf32>
    %276 = vector.shape_cast %275 : vector<1x32xf32> to vector<1x1x32xf32>
    %277 = vector.extract_strided_slice %225 {offsets = [0, 96], sizes = [1, 32], strides = [1, 1]} : vector<1x128xf32> to vector<1x32xf32>
    %278 = vector.shape_cast %277 : vector<1x32xf32> to vector<1x1x32xf32>
    %279 = tpu.concatenate %272, %274, %276, %278 in 0 : vector<1x1x32xf32>, vector<1x1x32xf32>, vector<1x1x32xf32>, vector<1x1x32xf32> -> vector<4x1x32xf32>
    %280 = arith.truncf %279 : vector<4x1x32xf32> to vector<4x1x32xbf16>
    %c0_111 = arith.constant 0 : index
    %c1_112 = arith.constant 1 : index
    %c0_113 = arith.constant 0 : index
    %c0_114 = arith.constant 0 : index
    %c0_115 = arith.constant 0 : index
    %281 = vector.load %arg3[%c0_111, %c1_112, %c0_113, %c0_114, %c0_115] : memref<1x2x4x32x32xbf16, #tpu.memory_space<vmem>>, vector<1x1x4x32x32xbf16>
    %282 = vector.shape_cast %281 : vector<1x1x4x32x32xbf16> to vector<4x32x32xbf16>
    %283 = vector.shape_cast %17 : vector<1x32x32xi1> to vector<1x32x32xi1>
    %284 = vector.broadcast %283 : vector<1x32x32xi1> to vector<4x32x32xi1>
    %285 = vector.shape_cast %270 : vector<4x1x32xbf16> to vector<4x1x32xbf16>
    %286 = vector.broadcast %285 : vector<4x1x32xbf16> to vector<4x32x32xbf16>
    %287 = arith.select %284, %286, %282 : vector<4x32x32xi1>, vector<4x32x32xbf16>
    %c0_116 = arith.constant 0 : index
    %c1_117 = arith.constant 1 : index
    %c0_118 = arith.constant 0 : index
    %c0_119 = arith.constant 0 : index
    %c0_120 = arith.constant 0 : index
    %288 = vector.load %arg4[%c0_116, %c1_117, %c0_118, %c0_119, %c0_120] : memref<1x2x4x32x32xbf16, #tpu.memory_space<vmem>>, vector<1x1x4x32x32xbf16>
    %289 = vector.shape_cast %288 : vector<1x1x4x32x32xbf16> to vector<4x32x32xbf16>
    %290 = vector.shape_cast %17 : vector<1x32x32xi1> to vector<1x32x32xi1>
    %291 = vector.broadcast %290 : vector<1x32x32xi1> to vector<4x32x32xi1>
    %292 = vector.shape_cast %280 : vector<4x1x32xbf16> to vector<4x1x32xbf16>
    %293 = vector.broadcast %292 : vector<4x1x32xbf16> to vector<4x32x32xbf16>
    %294 = arith.select %291, %293, %289 : vector<4x32x32xi1>, vector<4x32x32xbf16>
    %c0_121 = arith.constant 0 : index
    %c1_122 = arith.constant 1 : index
    %c0_123 = arith.constant 0 : index
    %c0_124 = arith.constant 0 : index
    %c0_125 = arith.constant 0 : index
    %295 = vector.load %arg23[%c0_121, %c1_122, %c0_123, %c0_124, %c0_125] : memref<1x2x4x32x32xbf16, #tpu.memory_space<vmem>>, vector<1x1x4x32x32xbf16>
    %296 = vector.shape_cast %295 : vector<1x1x4x32x32xbf16> to vector<4x32x32xbf16>
    %297 = vector.shape_cast %287 : vector<4x32x32xbf16> to vector<1x1x4x32x32xbf16>
    tpu.vector_store %arg23[%c0_121, %c1_122, %c0_123, %c0_124, %c0_125], %297 {strides = array<i32>} : memref<1x2x4x32x32xbf16, #tpu.memory_space<vmem>>, vector<1x1x4x32x32xbf16>,
    %c0_126 = arith.constant 0 : index
    %c1_127 = arith.constant 1 : index
    %c0_128 = arith.constant 0 : index
    %c0_129 = arith.constant 0 : index
    %c0_130 = arith.constant 0 : index
    %298 = vector.load %arg24[%c0_126, %c1_127, %c0_128, %c0_129, %c0_130] : memref<1x2x4x32x32xbf16, #tpu.memory_space<vmem>>, vector<1x1x4x32x32xbf16>
    %299 = vector.shape_cast %298 : vector<1x1x4x32x32xbf16> to vector<4x32x32xbf16>
    %300 = vector.shape_cast %294 : vector<4x32x32xbf16> to vector<1x1x4x32x32xbf16>
    tpu.vector_store %arg24[%c0_126, %c1_127, %c0_128, %c0_129, %c0_130], %300 {strides = array<i32>} : memref<1x2x4x32x32xbf16, #tpu.memory_space<vmem>>, vector<1x1x4x32x32xbf16>,
    %301 = arith.truncf %248 : vector<4x1x32xf32> to vector<4x1x32xbf16>
    "tpu.trace_start"() <{level = 10 : i32, message = "hqd,hkd->hqk"}> : () -> ()
    %cst_131 = arith.constant dense<0.000000e+00> : vector<4x1x32xf32>
    %302 = tpu.matmul %301, %287, %cst_131 {dimension_numbers = #tpu.dot_dimension_numbers<[2], [2], [1], [1], [0, 0, 0, 1, 1, 1], [0], [0]>} : vector<4x1x32xbf16>, vector<4x32x32xbf16>, vector<4x1x32xf32> -> vector<4x1x32xf32>
    "tpu.trace_stop"() : () -> ()
    %303 = vector.shape_cast %14 : vector<1x32xf32> to vector<1x1x32xf32>
    %304 = vector.broadcast %303 : vector<1x1x32xf32> to vector<4x1x32xf32>
    %305 = arith.addf %302, %304 : vector<4x1x32xf32>
    %cst_132 = arith.constant dense<0xFF800000> : vector<4x1xf32>
    %306 = vector.multi_reduction <maximumf>, %305, %cst_132 [2] : vector<4x1x32xf32> to vector<4x1xf32>
    %307 = vector.shape_cast %306 : vector<4x1xf32> to vector<4x1x1xf32>
    %308 = vector.broadcast %307 : vector<4x1x1xf32> to vector<4x1x32xf32>
    %309 = arith.subf %305, %308 : vector<4x1x32xf32>
    %310 = math.exp %309 : vector<4x1x32xf32>
    %cst_133 = arith.constant dense<0.000000e+00> : vector<4x1xf32>
    %311 = vector.multi_reduction <add>, %310, %cst_133 [2] : vector<4x1x32xf32> to vector<4x1xf32>
    %312 = vector.shape_cast %311 : vector<4x1xf32> to vector<4x1x1xf32>
    %313 = tpu.reciprocal %312 {approx = true} : vector<4x1x1xf32> -> vector<4x1x1xf32>
    %314 = vector.broadcast %313 : vector<4x1x1xf32> to vector<4x1x32xf32>
    %315 = arith.mulf %310, %314 : vector<4x1x32xf32>
    %316 = arith.truncf %315 : vector<4x1x32xf32> to vector<4x1x32xbf16>
    "tpu.trace_start"() <{level = 10 : i32, message = "hqk,hkd->hqd"}> : () -> ()
    %cst_134 = arith.constant dense<0.000000e+00> : vector<4x1x32xf32>
    %317 = tpu.matmul %316, %294, %cst_134 {dimension_numbers = #tpu.dot_dimension_numbers<[2], [1], [1], [2], [0, 0, 0, 1, 1, 2], [0], [0]>} : vector<4x1x32xbf16>, vector<4x32x32xbf16>, vector<4x1x32xf32> -> vector<4x1x32xf32>
    "tpu.trace_stop"() : () -> ()
    %318 = vector.extract_strided_slice %317 {offsets = [0, 0, 0], sizes = [1, 1, 32], strides = [1, 1, 1]} : vector<4x1x32xf32> to vector<1x1x32xf32>
    %319 = vector.shape_cast %318 : vector<1x1x32xf32> to vector<1x32xf32>
    %320 = vector.extract_strided_slice %317 {offsets = [1, 0, 0], sizes = [1, 1, 32], strides = [1, 1, 1]} : vector<4x1x32xf32> to vector<1x1x32xf32>
    %321 = vector.shape_cast %320 : vector<1x1x32xf32> to vector<1x32xf32>
    %322 = vector.extract_strided_slice %317 {offsets = [2, 0, 0], sizes = [1, 1, 32], strides = [1, 1, 1]} : vector<4x1x32xf32> to vector<1x1x32xf32>
    %323 = vector.shape_cast %322 : vector<1x1x32xf32> to vector<1x32xf32>
    %324 = vector.extract_strided_slice %317 {offsets = [3, 0, 0], sizes = [1, 1, 32], strides = [1, 1, 1]} : vector<4x1x32xf32> to vector<1x1x32xf32>
    %325 = vector.shape_cast %324 : vector<1x1x32xf32> to vector<1x32xf32>
    %326 = tpu.concatenate %319, %321, %323, %325 in 1 : vector<1x32xf32>, vector<1x32xf32>, vector<1x32xf32>, vector<1x32xf32> -> vector<1x128xf32>
    %c1_135 = arith.constant 1 : index
    %c0_136 = arith.constant 0 : index
    %c0_137 = arith.constant 0 : index
    %327 = vector.load %arg15[%c1_135, %c0_136, %c0_137] : memref<2x128x128xbf16, #tpu.memory_space<vmem>>, vector<1x128x128xbf16>
    %328 = vector.shape_cast %327 : vector<1x128x128xbf16> to vector<128x128xbf16>
    %329 = arith.truncf %326 : vector<1x128xf32> to vector<1x128xbf16>
    %cst_138 = arith.constant dense<0.000000e+00> : vector<1x128xf32>
    %330 = tpu.matmul %329, %328, %cst_138 {dimension_numbers = #tpu.dot_dimension_numbers<[1], [0], [0], [1], [0, 0, 1, 1], [], []>} : vector<1x128xbf16>, vector<128x128xbf16>, vector<1x128xf32> -> vector<1x128xf32>
    %331 = arith.addf %191, %330 : vector<1x128xf32>
    %c1_139 = arith.constant 1 : index
    %c0_140 = arith.constant 0 : index
    %c0_141 = arith.constant 0 : index
    %332 = vector.load %arg16[%c1_139, %c0_140, %c0_141] : memref<2x1x128xf32, #tpu.memory_space<vmem>>, vector<1x1x128xf32>
    %333 = vector.shape_cast %332 : vector<1x1x128xf32> to vector<1x128xf32>
    %334 = arith.mulf %331, %331 : vector<1x128xf32>
    %cst_142 = arith.constant dense<0.000000e+00> : vector<1xf32>
    %335 = vector.multi_reduction <add>, %334, %cst_142 [1] : vector<1x128xf32> to vector<1xf32>
    %336 = vector.shape_cast %335 : vector<1xf32> to vector<1x1xf32>
    %cst_143 = arith.constant 1.280000e+02 : f32
    %337 = vector.broadcast %cst_143 : f32 to vector<1x1xf32>
    %338 = arith.divf %336, %337 : vector<1x1xf32>
    %cst_144 = arith.constant 9.99999997E-7 : f32
    %339 = vector.broadcast %cst_144 : f32 to vector<1x1xf32>
    %340 = arith.addf %338, %339 : vector<1x1xf32>
    %341 = math.rsqrt %340 : vector<1x1xf32>
    %342 = vector.broadcast %341 : vector<1x1xf32> to vector<1x128xf32>
    %343 = arith.mulf %331, %342 : vector<1x128xf32>
    %344 = arith.mulf %343, %333 : vector<1x128xf32>
    %c1_145 = arith.constant 1 : index
    %c0_146 = arith.constant 0 : index
    %c0_147 = arith.constant 0 : index
    %345 = vector.load %arg17[%c1_145, %c0_146, %c0_147] : memref<2x128x256xbf16, #tpu.memory_space<vmem>>, vector<1x128x256xbf16>
    %346 = vector.shape_cast %345 : vector<1x128x256xbf16> to vector<128x256xbf16>
    %347 = arith.truncf %344 : vector<1x128xf32> to vector<1x128xbf16>
    %cst_148 = arith.constant dense<0.000000e+00> : vector<1x256xf32>
    %348 = tpu.matmul %347, %346, %cst_148 {dimension_numbers = #tpu.dot_dimension_numbers<[1], [0], [0], [1], [0, 0, 1, 1], [], []>} : vector<1x128xbf16>, vector<128x256xbf16>, vector<1x256xf32> -> vector<1x256xf32>
    %c1_149 = arith.constant 1 : index
    %c0_150 = arith.constant 0 : index
    %c0_151 = arith.constant 0 : index
    %349 = vector.load %arg18[%c1_149, %c0_150, %c0_151] : memref<2x128x256xbf16, #tpu.memory_space<vmem>>, vector<1x128x256xbf16>
    %350 = vector.shape_cast %349 : vector<1x128x256xbf16> to vector<128x256xbf16>
    %351 = arith.truncf %344 : vector<1x128xf32> to vector<1x128xbf16>
    %cst_152 = arith.constant dense<0.000000e+00> : vector<1x256xf32>
    %352 = tpu.matmul %351, %350, %cst_152 {dimension_numbers = #tpu.dot_dimension_numbers<[1], [0], [0], [1], [0, 0, 1, 1], [], []>} : vector<1x128xbf16>, vector<128x256xbf16>, vector<1x256xf32> -> vector<1x256xf32>
    %cst_153 = arith.constant 0.000000e+00 : f32
    %353 = vector.broadcast %cst_153 : f32 to vector<1x256xf32>
    %354 = arith.subf %353, %348 : vector<1x256xf32>
    %355 = math.exp %354 : vector<1x256xf32>
    %cst_154 = arith.constant 1.000000e+00 : f32
    %356 = vector.broadcast %cst_154 : f32 to vector<1x256xf32>
    %357 = arith.addf %356, %355 : vector<1x256xf32>
    %358 = tpu.reciprocal %357 {approx = true} : vector<1x256xf32> -> vector<1x256xf32>
    %359 = arith.mulf %348, %358 : vector<1x256xf32>
    %360 = arith.mulf %359, %352 : vector<1x256xf32>
    %c1_155 = arith.constant 1 : index
    %c0_156 = arith.constant 0 : index
    %c0_157 = arith.constant 0 : index
    %361 = vector.load %arg19[%c1_155, %c0_156, %c0_157] : memref<2x256x128xbf16, #tpu.memory_space<vmem>>, vector<1x256x128xbf16>
    %362 = vector.shape_cast %361 : vector<1x256x128xbf16> to vector<256x128xbf16>
    %363 = arith.truncf %360 : vector<1x256xf32> to vector<1x256xbf16>
    %cst_158 = arith.constant dense<0.000000e+00> : vector<1x128xf32>
    %364 = tpu.matmul %363, %362, %cst_158 {dimension_numbers = #tpu.dot_dimension_numbers<[1], [0], [0], [1], [0, 0, 1, 1], [], []>} : vector<1x256xbf16>, vector<256x128xbf16>, vector<1x128xf32> -> vector<1x128xf32>
    %365 = arith.addf %331, %364 : vector<1x128xf32>
    %c0_159 = arith.constant 0 : index
    %c0_160 = arith.constant 0 : index
    %366 = vector.load %arg20[%c0_159, %c0_160] : memref<1x128xf32, #tpu.memory_space<vmem>>, vector<1x128xf32>
    %367 = arith.mulf %365, %365 : vector<1x128xf32>
    %cst_161 = arith.constant dense<0.000000e+00> : vector<1xf32>
    %368 = vector.multi_reduction <add>, %367, %cst_161 [1] : vector<1x128xf32> to vector<1xf32>
    %369 = vector.shape_cast %368 : vector<1xf32> to vector<1x1xf32>
    %cst_162 = arith.constant 1.280000e+02 : f32
    %370 = vector.broadcast %cst_162 : f32 to vector<1x1xf32>
    %371 = arith.divf %369, %370 : vector<1x1xf32>
    %cst_163 = arith.constant 9.99999997E-7 : f32
    %372 = vector.broadcast %cst_163 : f32 to vector<1x1xf32>
    %373 = arith.addf %371, %372 : vector<1x1xf32>
    %374 = math.rsqrt %373 : vector<1x1xf32>
    %375 = vector.broadcast %374 : vector<1x1xf32> to vector<1x128xf32>
    %376 = arith.mulf %365, %375 : vector<1x128xf32>
    %377 = arith.mulf %376, %366 : vector<1x128xf32>
    %c0_164 = arith.constant 0 : index
    %c0_165 = arith.constant 0 : index
    %378 = vector.load %arg21[%c0_164, %c0_165] : memref<128x128xbf16, #tpu.memory_space<vmem>>, vector<128x128xbf16>
    %379 = arith.truncf %377 : vector<1x128xf32> to vector<1x128xbf16>
    %cst_166 = arith.constant dense<0.000000e+00> : vector<1x128xf32>
    %380 = tpu.matmul %379, %378, %cst_166 {dimension_numbers = #tpu.dot_dimension_numbers<[1], [0], [0], [1], [0, 0, 1, 1], [], []>} : vector<1x128xbf16>, vector<128x128xbf16>, vector<1x128xf32> -> vector<1x128xf32>
    %381 = vector.shape_cast %380 : vector<1x128xf32> to vector<1x128xf32>
    %382 = vector.broadcast %381 : vector<1x128xf32> to vector<8x128xf32>
    %c0_167 = arith.constant 0 : index
    %c0_168 = arith.constant 0 : index
    %c0_169 = arith.constant 0 : index
    %383 = vector.load %arg22[%c0_167, %c0_168, %c0_169] : memref<1x8x128xf32, #tpu.memory_space<vmem>>, vector<1x8x128xf32>
    %384 = vector.shape_cast %383 : vector<1x8x128xf32> to vector<8x128xf32>
    %385 = vector.shape_cast %382 : vector<8x128xf32> to vector<1x8x128xf32>
    tpu.vector_store %arg22[%c0_167, %c0_168, %c0_169], %385 {strides = array<i32>} : memref<1x8x128xf32, #tpu.memory_space<vmem>>, vector<1x8x128xf32>,
    return
  }
  func.func @transform_0(%arg0: i32) -> i32 {
    %c0_i32 = arith.constant 0 : i32
    %c0_i32_0 = arith.constant 0 : i32
    return %c0_i32 : i32
  }
  func.func @transform_1(%arg0: i32) -> i32 {
    %c0_i32 = arith.constant 0 : i32
    %c0_i32_0 = arith.constant 0 : i32
    return %c0_i32 : i32
  }
  func.func @transform_2(%arg0: i32) -> (i32, i32, i32, i32, i32) {
    %c0_i32 = arith.constant 0 : i32
    %c0_i32_0 = arith.constant 0 : i32
    %c0_i32_1 = arith.constant 0 : i32
    %c0_i32_2 = arith.constant 0 : i32
    %c0_i32_3 = arith.constant 0 : i32
    return %arg0, %c0_i32, %c0_i32_0, %c0_i32_1, %c0_i32_2 : i32, i32, i32, i32, i32
  }
  func.func @transform_3(%arg0: i32) -> (i32, i32, i32, i32, i32) {
    %c0_i32 = arith.constant 0 : i32
    %c0_i32_0 = arith.constant 0 : i32
    %c0_i32_1 = arith.constant 0 : i32
    %c0_i32_2 = arith.constant 0 : i32
    %c0_i32_3 = arith.constant 0 : i32
    return %arg0, %c0_i32, %c0_i32_0, %c0_i32_1, %c0_i32_2 : i32, i32, i32, i32, i32
  }
  func.func @transform_4(%arg0: i32) -> (i32, i32) {
    %c0_i32 = arith.constant 0 : i32
    %c0_i32_0 = arith.constant 0 : i32
    %c0_i32_1 = arith.constant 0 : i32
    return %c0_i32, %c0_i32_0 : i32, i32
  }
  func.func @transform_5(%arg0: i32) -> (i32, i32) {
    %c0_i32 = arith.constant 0 : i32
    %c0_i32_0 = arith.constant 0 : i32
    %c0_i32_1 = arith.constant 0 : i32
    return %c0_i32, %c0_i32_0 : i32, i32
  }
  func.func @transform_6(%arg0: i32) -> (i32, i32) {
    %c0_i32 = arith.constant 0 : i32
    %c0_i32_0 = arith.constant 0 : i32
    %c0_i32_1 = arith.constant 0 : i32
    return %c0_i32, %c0_i32_0 : i32, i32
  }
  func.func @transform_7(%arg0: i32) -> (i32, i32, i32) {
    %c0_i32 = arith.constant 0 : i32
    %c0_i32_0 = arith.constant 0 : i32
    %c0_i32_1 = arith.constant 0 : i32
    %c0_i32_2 = arith.constant 0 : i32
    return %c0_i32, %c0_i32_0, %c0_i32_1 : i32, i32, i32
  }
  func.func @transform_8(%arg0: i32) -> (i32, i32, i32) {
    %c0_i32 = arith.constant 0 : i32
    %c0_i32_0 = arith.constant 0 : i32
    %c0_i32_1 = arith.constant 0 : i32
    %c0_i32_2 = arith.constant 0 : i32
    return %c0_i32, %c0_i32_0, %c0_i32_1 : i32, i32, i32
  }
  func.func @transform_9(%arg0: i32) -> (i32, i32, i32) {
    %c0_i32 = arith.constant 0 : i32
    %c0_i32_0 = arith.constant 0 : i32
    %c0_i32_1 = arith.constant 0 : i32
    %c0_i32_2 = arith.constant 0 : i32
    return %c0_i32, %c0_i32_0, %c0_i32_1 : i32, i32, i32
  }
  func.func @transform_10(%arg0: i32) -> (i32, i32, i32) {
    %c0_i32 = arith.constant 0 : i32
    %c0_i32_0 = arith.constant 0 : i32
    %c0_i32_1 = arith.constant 0 : i32
    %c0_i32_2 = arith.constant 0 : i32
    return %c0_i32, %c0_i32_0, %c0_i32_1 : i32, i32, i32
  }
  func.func @transform_11(%arg0: i32) -> (i32, i32, i32) {
    %c0_i32 = arith.constant 0 : i32
    %c0_i32_0 = arith.constant 0 : i32
    %c0_i32_1 = arith.constant 0 : i32
    %c0_i32_2 = arith.constant 0 : i32
    return %c0_i32, %c0_i32_0, %c0_i32_1 : i32, i32, i32
  }
  func.func @transform_12(%arg0: i32) -> (i32, i32, i32) {
    %c0_i32 = arith.constant 0 : i32
    %c0_i32_0 = arith.constant 0 : i32
    %c0_i32_1 = arith.constant 0 : i32
    %c0_i32_2 = arith.constant 0 : i32
    return %c0_i32, %c0_i32_0, %c0_i32_1 : i32, i32, i32
  }
  func.func @transform_13(%arg0: i32) -> (i32, i32, i32) {
    %c0_i32 = arith.constant 0 : i32
    %c0_i32_0 = arith.constant 0 : i32
    %c0_i32_1 = arith.constant 0 : i32
    %c0_i32_2 = arith.constant 0 : i32
    return %c0_i32, %c0_i32_0, %c0_i32_1 : i32, i32, i32
  }
  func.func @transform_14(%arg0: i32) -> (i32, i32, i32) {
    %c0_i32 = arith.constant 0 : i32
    %c0_i32_0 = arith.constant 0 : i32
    %c0_i32_1 = arith.constant 0 : i32
    %c0_i32_2 = arith.constant 0 : i32
    return %c0_i32, %c0_i32_0, %c0_i32_1 : i32, i32, i32
  }
  func.func @transform_15(%arg0: i32) -> (i32, i32, i32) {
    %c0_i32 = arith.constant 0 : i32
    %c0_i32_0 = arith.constant 0 : i32
    %c0_i32_1 = arith.constant 0 : i32
    %c0_i32_2 = arith.constant 0 : i32
    return %c0_i32, %c0_i32_0, %c0_i32_1 : i32, i32, i32
  }
  func.func @transform_16(%arg0: i32) -> (i32, i32, i32) {
    %c0_i32 = arith.constant 0 : i32
    %c0_i32_0 = arith.constant 0 : i32
    %c0_i32_1 = arith.constant 0 : i32
    %c0_i32_2 = arith.constant 0 : i32
    return %c0_i32, %c0_i32_0, %c0_i32_1 : i32, i32, i32
  }
  func.func @transform_17(%arg0: i32) -> (i32, i32, i32) {
    %c0_i32 = arith.constant 0 : i32
    %c0_i32_0 = arith.constant 0 : i32
    %c0_i32_1 = arith.constant 0 : i32
    %c0_i32_2 = arith.constant 0 : i32
    return %c0_i32, %c0_i32_0, %c0_i32_1 : i32, i32, i32
  }
  func.func @transform_18(%arg0: i32) -> (i32, i32, i32) {
    %c0_i32 = arith.constant 0 : i32
    %c0_i32_0 = arith.constant 0 : i32
    %c0_i32_1 = arith.constant 0 : i32
    %c0_i32_2 = arith.constant 0 : i32
    return %c0_i32, %c0_i32_0, %c0_i32_1 : i32, i32, i32
  }
  func.func @transform_19(%arg0: i32) -> (i32, i32) {
    %c0_i32 = arith.constant 0 : i32
    %c0_i32_0 = arith.constant 0 : i32
    %c0_i32_1 = arith.constant 0 : i32
    return %c0_i32, %c0_i32_0 : i32, i32
  }
  func.func @transform_20(%arg0: i32) -> (i32, i32) {
    %c0_i32 = arith.constant 0 : i32
    %c0_i32_0 = arith.constant 0 : i32
    %c0_i32_1 = arith.constant 0 : i32
    return %c0_i32, %c0_i32_0 : i32, i32
  }
  func.func @transform_21(%arg0: i32) -> (i32, i32, i32) {
    %c0_i32 = arith.constant 0 : i32
    %c0_i32_0 = arith.constant 0 : i32
    %c0_i32_1 = arith.constant 0 : i32
    return %arg0, %c0_i32, %c0_i32_0 : i32, i32, i32
  }
  func.func @transform_22(%arg0: i32) -> (i32, i32, i32, i32, i32) {
    %c0_i32 = arith.constant 0 : i32
    %c0_i32_0 = arith.constant 0 : i32
    %c0_i32_1 = arith.constant 0 : i32
    %c0_i32_2 = arith.constant 0 : i32
    %c0_i32_3 = arith.constant 0 : i32
    return %arg0, %c0_i32, %c0_i32_0, %c0_i32_1, %c0_i32_2 : i32, i32, i32, i32, i32
  }
  func.func @transform_23(%arg0: i32) -> (i32, i32, i32, i32, i32) {
    %c0_i32 = arith.constant 0 : i32
    %c0_i32_0 = arith.constant 0 : i32
    %c0_i32_1 = arith.constant 0 : i32
    %c0_i32_2 = arith.constant 0 : i32
    %c0_i32_3 = arith.constant 0 : i32
    return %arg0, %c0_i32, %c0_i32_0, %c0_i32_1, %c0_i32_2 : i32, i32, i32, i32, i32
  }
}

module attributes {stable_mosaic.version = 11 : i64} {
  func.func @prefill_kernel(%arg0: i32, %arg1: memref<1x16x128xf32, #tpu.memory_space<vmem>>, %arg2: memref<1x8x128xf32, #tpu.memory_space<vmem>>, %arg3: memref<128x128xbf16, #tpu.memory_space<vmem>>, %arg4: memref<1x128xf32, #tpu.memory_space<vmem>>, %arg5: memref<32x32xf32, #tpu.memory_space<vmem>>, %arg6: memref<32x32xf32, #tpu.memory_space<vmem>>, %arg7: memref<2x1x128xf32, #tpu.memory_space<vmem>>, %arg8: memref<2x128x128xbf16, #tpu.memory_space<vmem>>, %arg9: memref<2x1x128xf32, #tpu.memory_space<vmem>>, %arg10: memref<2x128x128xbf16, #tpu.memory_space<vmem>>, %arg11: memref<2x1x128xf32, #tpu.memory_space<vmem>>, %arg12: memref<2x128x128xbf16, #tpu.memory_space<vmem>>, %arg13: memref<2x1x128xf32, #tpu.memory_space<vmem>>, %arg14: memref<2x128x128xbf16, #tpu.memory_space<vmem>>, %arg15: memref<2x1x128xf32, #tpu.memory_space<vmem>>, %arg16: memref<2x128x256xbf16, #tpu.memory_space<vmem>>, %arg17: memref<2x128x256xbf16, #tpu.memory_space<vmem>>, %arg18: memref<2x256x128xbf16, #tpu.memory_space<vmem>>, %arg19: memref<1x128xf32, #tpu.memory_space<vmem>>, %arg20: memref<128x128xbf16, #tpu.memory_space<vmem>>, %arg21: memref<1x2x4x32x32xbf16, #tpu.memory_space<vmem>>, %arg22: memref<1x2x4x32x32xbf16, #tpu.memory_space<vmem>>, %arg23: memref<1x8x128xf32, #tpu.memory_space<vmem>>) attributes {dimension_semantics = [#tpu.dimension_semantics<parallel>], iteration_bounds = array<i64: 2>, scalar_prefetch = 0 : i64, scratch_operands = 0 : i64, tpu.core_type = #tpu.core_type<tc>, window_params = [{transform_indices = @transform_0, window_bounds = array<i64: 1, 16, 128>}, {transform_indices = @transform_1, window_bounds = array<i64: 1, 8, 128>}, {pipeline_mode = #tpu.pipeline_mode<synchronous>, transform_indices = @transform_2, window_bounds = array<i64: 128, 128>}, {pipeline_mode = #tpu.pipeline_mode<synchronous>, transform_indices = @transform_3, window_bounds = array<i64: 1, 128>}, {pipeline_mode = #tpu.pipeline_mode<synchronous>, transform_indices = @transform_4, window_bounds = array<i64: 32, 32>}, {pipeline_mode = #tpu.pipeline_mode<synchronous>, transform_indices = @transform_5, window_bounds = array<i64: 32, 32>}, {pipeline_mode = #tpu.pipeline_mode<synchronous>, transform_indices = @transform_6, window_bounds = array<i64: 2, 1, 128>}, {pipeline_mode = #tpu.pipeline_mode<synchronous>, transform_indices = @transform_7, window_bounds = array<i64: 2, 128, 128>}, {pipeline_mode = #tpu.pipeline_mode<synchronous>, transform_indices = @transform_8, window_bounds = array<i64: 2, 1, 128>}, {pipeline_mode = #tpu.pipeline_mode<synchronous>, transform_indices = @transform_9, window_bounds = array<i64: 2, 128, 128>}, {pipeline_mode = #tpu.pipeline_mode<synchronous>, transform_indices = @transform_10, window_bounds = array<i64: 2, 1, 128>}, {pipeline_mode = #tpu.pipeline_mode<synchronous>, transform_indices = @transform_11, window_bounds = array<i64: 2, 128, 128>}, {pipeline_mode = #tpu.pipeline_mode<synchronous>, transform_indices = @transform_12, window_bounds = array<i64: 2, 1, 128>}, {pipeline_mode = #tpu.pipeline_mode<synchronous>, transform_indices = @transform_13, window_bounds = array<i64: 2, 128, 128>}, {pipeline_mode = #tpu.pipeline_mode<synchronous>, transform_indices = @transform_14, window_bounds = array<i64: 2, 1, 128>}, {pipeline_mode = #tpu.pipeline_mode<synchronous>, transform_indices = @transform_15, window_bounds = array<i64: 2, 128, 256>}, {pipeline_mode = #tpu.pipeline_mode<synchronous>, transform_indices = @transform_16, window_bounds = array<i64: 2, 128, 256>}, {pipeline_mode = #tpu.pipeline_mode<synchronous>, transform_indices = @transform_17, window_bounds = array<i64: 2, 256, 128>}, {pipeline_mode = #tpu.pipeline_mode<synchronous>, transform_indices = @transform_18, window_bounds = array<i64: 1, 128>}, {pipeline_mode = #tpu.pipeline_mode<synchronous>, transform_indices = @transform_19, window_bounds = array<i64: 128, 128>}, {transform_indices = @transform_20, window_bounds = array<i64: 1, 2, 4, 32, 32>}, {transform_indices = @transform_21, window_bounds = array<i64: 1, 2, 4, 32, 32>}, {transform_indices = @transform_22, window_bounds = array<i64: 1, 8, 128>}]} {
    %c0 = arith.constant 0 : index
    %c0_0 = arith.constant 0 : index
    %0 = vector.load %arg5[%c0, %c0_0] : memref<32x32xf32, #tpu.memory_space<vmem>>, vector<32x32xf32>
    %c0_1 = arith.constant 0 : index
    %c0_2 = arith.constant 0 : index
    %1 = vector.load %arg6[%c0_1, %c0_2] : memref<32x32xf32, #tpu.memory_space<vmem>>, vector<32x32xf32>
    %c0_3 = arith.constant 0 : index
    %c0_4 = arith.constant 0 : index
    %c0_5 = arith.constant 0 : index
    %2 = vector.load %arg1[%c0_3, %c0_4, %c0_5] : memref<1x16x128xf32, #tpu.memory_space<vmem>>, vector<1x16x128xf32>
    %3 = vector.shape_cast %2 : vector<1x16x128xf32> to vector<16x128xf32>
    %c0_6 = arith.constant 0 : index
    %c0_7 = arith.constant 0 : index
    %4 = vector.load %arg3[%c0_6, %c0_7] : memref<128x128xbf16, #tpu.memory_space<vmem>>, vector<128x128xbf16>
    %5 = arith.truncf %3 : vector<16x128xf32> to vector<16x128xbf16>
    %cst = arith.constant dense<0.000000e+00> : vector<16x128xf32>
    %6 = tpu.matmul %5, %4, %cst {dimension_numbers = #tpu.dot_dimension_numbers<[1], [0], [0], [1], [0, 0, 1, 1], [], []>} : vector<16x128xbf16>, vector<128x128xbf16>, vector<16x128xf32> -> vector<16x128xf32>
    %c0_8 = arith.constant 0 : index
    %c0_9 = arith.constant 0 : index
    %7 = vector.load %arg4[%c0_8, %c0_9] : memref<1x128xf32, #tpu.memory_space<vmem>>, vector<1x128xf32>
    %8 = vector.broadcast %7 : vector<1x128xf32> to vector<16x128xf32>
    %9 = arith.addf %6, %8 : vector<16x128xf32>
    %c0_10 = arith.constant 0 : index
    %c0_11 = arith.constant 0 : index
    %c0_12 = arith.constant 0 : index
    %10 = vector.load %arg2[%c0_10, %c0_11, %c0_12] : memref<1x8x128xf32, #tpu.memory_space<vmem>>, vector<1x8x128xf32>
    %11 = vector.shape_cast %10 : vector<1x8x128xf32> to vector<8x128xf32>
    %cst_13 = arith.constant 0.000000e+00 : f32
    %12 = vector.broadcast %cst_13 : f32 to vector<8x128xf32>
    %13 = tpu.concatenate %9, %11, %12 in 0 : vector<16x128xf32>, vector<8x128xf32>, vector<8x128xf32> -> vector<32x128xf32>
    %14 = tpu.iota {dimensions = array<i32: 0>} : vector<32x32xi32>
    %15 = tpu.iota {dimensions = array<i32: 1>} : vector<32x32xi32>
    %16 = arith.cmpi sle, %15, %14 : vector<32x32xi32>
    %cst_14 = arith.constant 0.000000e+00 : f32
    %cst_15 = arith.constant -1.000000e+09 : f32
    %17 = vector.broadcast %cst_14 : f32 to vector<32x32xf32>
    %18 = vector.broadcast %cst_15 : f32 to vector<32x32xf32>
    %19 = arith.select %16, %17, %18 : vector<32x32xi1>, vector<32x32xf32>
    %c0_16 = arith.constant 0 : index
    %c0_17 = arith.constant 0 : index
    %c0_18 = arith.constant 0 : index
    %20 = vector.load %arg7[%c0_16, %c0_17, %c0_18] : memref<2x1x128xf32, #tpu.memory_space<vmem>>, vector<1x1x128xf32>
    %21 = vector.shape_cast %20 : vector<1x1x128xf32> to vector<1x128xf32>
    %22 = arith.mulf %13, %13 : vector<32x128xf32>
    %cst_19 = arith.constant dense<0.000000e+00> : vector<32xf32>
    %23 = vector.multi_reduction <add>, %22, %cst_19 [1] : vector<32x128xf32> to vector<32xf32>
    %24 = vector.shape_cast %23 : vector<32xf32> to vector<32x1xf32>
    %cst_20 = arith.constant 1.280000e+02 : f32
    %25 = vector.broadcast %cst_20 : f32 to vector<32x1xf32>
    %26 = arith.divf %24, %25 : vector<32x1xf32>
    %cst_21 = arith.constant 9.99999997E-7 : f32
    %27 = vector.broadcast %cst_21 : f32 to vector<32x1xf32>
    %28 = arith.addf %26, %27 : vector<32x1xf32>
    %29 = math.rsqrt %28 : vector<32x1xf32>
    %30 = vector.broadcast %29 : vector<32x1xf32> to vector<32x128xf32>
    %31 = arith.mulf %13, %30 : vector<32x128xf32>
    %32 = vector.broadcast %21 : vector<1x128xf32> to vector<32x128xf32>
    %33 = arith.mulf %31, %32 : vector<32x128xf32>
    %c0_22 = arith.constant 0 : index
    %c0_23 = arith.constant 0 : index
    %c0_24 = arith.constant 0 : index
    %34 = vector.load %arg8[%c0_22, %c0_23, %c0_24] : memref<2x128x128xbf16, #tpu.memory_space<vmem>>, vector<1x128x128xbf16>
    %35 = vector.shape_cast %34 : vector<1x128x128xbf16> to vector<128x128xbf16>
    %36 = arith.truncf %33 : vector<32x128xf32> to vector<32x128xbf16>
    %cst_25 = arith.constant dense<0.000000e+00> : vector<32x128xf32>
    %37 = tpu.matmul %36, %35, %cst_25 {dimension_numbers = #tpu.dot_dimension_numbers<[1], [0], [0], [1], [0, 0, 1, 1], [], []>} : vector<32x128xbf16>, vector<128x128xbf16>, vector<32x128xf32> -> vector<32x128xf32>
    %c0_26 = arith.constant 0 : index
    %c0_27 = arith.constant 0 : index
    %c0_28 = arith.constant 0 : index
    %38 = vector.load %arg9[%c0_26, %c0_27, %c0_28] : memref<2x1x128xf32, #tpu.memory_space<vmem>>, vector<1x1x128xf32>
    %39 = vector.shape_cast %38 : vector<1x1x128xf32> to vector<1x128xf32>
    %40 = vector.broadcast %39 : vector<1x128xf32> to vector<32x128xf32>
    %41 = arith.addf %37, %40 : vector<32x128xf32>
    %c0_29 = arith.constant 0 : index
    %c0_30 = arith.constant 0 : index
    %c0_31 = arith.constant 0 : index
    %42 = vector.load %arg10[%c0_29, %c0_30, %c0_31] : memref<2x128x128xbf16, #tpu.memory_space<vmem>>, vector<1x128x128xbf16>
    %43 = vector.shape_cast %42 : vector<1x128x128xbf16> to vector<128x128xbf16>
    %44 = arith.truncf %33 : vector<32x128xf32> to vector<32x128xbf16>
    %cst_32 = arith.constant dense<0.000000e+00> : vector<32x128xf32>
    %45 = tpu.matmul %44, %43, %cst_32 {dimension_numbers = #tpu.dot_dimension_numbers<[1], [0], [0], [1], [0, 0, 1, 1], [], []>} : vector<32x128xbf16>, vector<128x128xbf16>, vector<32x128xf32> -> vector<32x128xf32>
    %c0_33 = arith.constant 0 : index
    %c0_34 = arith.constant 0 : index
    %c0_35 = arith.constant 0 : index
    %46 = vector.load %arg11[%c0_33, %c0_34, %c0_35] : memref<2x1x128xf32, #tpu.memory_space<vmem>>, vector<1x1x128xf32>
    %47 = vector.shape_cast %46 : vector<1x1x128xf32> to vector<1x128xf32>
    %48 = vector.broadcast %47 : vector<1x128xf32> to vector<32x128xf32>
    %49 = arith.addf %45, %48 : vector<32x128xf32>
    %c0_36 = arith.constant 0 : index
    %c0_37 = arith.constant 0 : index
    %c0_38 = arith.constant 0 : index
    %50 = vector.load %arg12[%c0_36, %c0_37, %c0_38] : memref<2x128x128xbf16, #tpu.memory_space<vmem>>, vector<1x128x128xbf16>
    %51 = vector.shape_cast %50 : vector<1x128x128xbf16> to vector<128x128xbf16>
    %52 = arith.truncf %33 : vector<32x128xf32> to vector<32x128xbf16>
    %cst_39 = arith.constant dense<0.000000e+00> : vector<32x128xf32>
    %53 = tpu.matmul %52, %51, %cst_39 {dimension_numbers = #tpu.dot_dimension_numbers<[1], [0], [0], [1], [0, 0, 1, 1], [], []>} : vector<32x128xbf16>, vector<128x128xbf16>, vector<32x128xf32> -> vector<32x128xf32>
    %c0_40 = arith.constant 0 : index
    %c0_41 = arith.constant 0 : index
    %c0_42 = arith.constant 0 : index
    %54 = vector.load %arg13[%c0_40, %c0_41, %c0_42] : memref<2x1x128xf32, #tpu.memory_space<vmem>>, vector<1x1x128xf32>
    %55 = vector.shape_cast %54 : vector<1x1x128xf32> to vector<1x128xf32>
    %56 = vector.broadcast %55 : vector<1x128xf32> to vector<32x128xf32>
    %57 = arith.addf %53, %56 : vector<32x128xf32>
    %58 = vector.extract_strided_slice %41 {offsets = [0, 0], sizes = [32, 32], strides = [1, 1]} : vector<32x128xf32> to vector<32x32xf32>
    %59 = vector.shape_cast %58 : vector<32x32xf32> to vector<1x32x32xf32>
    %60 = vector.extract_strided_slice %41 {offsets = [0, 32], sizes = [32, 32], strides = [1, 1]} : vector<32x128xf32> to vector<32x32xf32>
    %61 = vector.shape_cast %60 : vector<32x32xf32> to vector<1x32x32xf32>
    %62 = vector.extract_strided_slice %41 {offsets = [0, 64], sizes = [32, 32], strides = [1, 1]} : vector<32x128xf32> to vector<32x32xf32>
    %63 = vector.shape_cast %62 : vector<32x32xf32> to vector<1x32x32xf32>
    %64 = vector.extract_strided_slice %41 {offsets = [0, 96], sizes = [32, 32], strides = [1, 1]} : vector<32x128xf32> to vector<32x32xf32>
    %65 = vector.shape_cast %64 : vector<32x32xf32> to vector<1x32x32xf32>
    %66 = tpu.concatenate %59, %61, %63, %65 in 0 : vector<1x32x32xf32>, vector<1x32x32xf32>, vector<1x32x32xf32>, vector<1x32x32xf32> -> vector<4x32x32xf32>
    %67 = vector.extract_strided_slice %66 {offsets = [0, 0, 0], sizes = [4, 32, 16], strides = [1, 1, 1]} : vector<4x32x32xf32> to vector<4x32x16xf32>
    %68 = vector.extract_strided_slice %66 {offsets = [0, 0, 16], sizes = [4, 32, 16], strides = [1, 1, 1]} : vector<4x32x32xf32> to vector<4x32x16xf32>
    %cst_43 = arith.constant 0.000000e+00 : f32
    %69 = vector.broadcast %cst_43 : f32 to vector<4x32x16xf32>
    %70 = arith.subf %69, %68 : vector<4x32x16xf32>
    %71 = tpu.concatenate %70, %67 in 2 : vector<4x32x16xf32>, vector<4x32x16xf32> -> vector<4x32x32xf32>
    %72 = vector.shape_cast %0 : vector<32x32xf32> to vector<1x32x32xf32>
    %73 = vector.broadcast %72 : vector<1x32x32xf32> to vector<4x32x32xf32>
    %74 = arith.mulf %66, %73 : vector<4x32x32xf32>
    %75 = vector.shape_cast %1 : vector<32x32xf32> to vector<1x32x32xf32>
    %76 = vector.broadcast %75 : vector<1x32x32xf32> to vector<4x32x32xf32>
    %77 = arith.mulf %71, %76 : vector<4x32x32xf32>
    %78 = arith.addf %74, %77 : vector<4x32x32xf32>
    %cst_44 = arith.constant 0.176776692 : f32
    %79 = vector.broadcast %cst_44 : f32 to vector<4x32x32xf32>
    %80 = arith.mulf %78, %79 : vector<4x32x32xf32>
    %81 = vector.extract_strided_slice %49 {offsets = [0, 0], sizes = [32, 32], strides = [1, 1]} : vector<32x128xf32> to vector<32x32xf32>
    %82 = vector.shape_cast %81 : vector<32x32xf32> to vector<1x32x32xf32>
    %83 = vector.extract_strided_slice %49 {offsets = [0, 32], sizes = [32, 32], strides = [1, 1]} : vector<32x128xf32> to vector<32x32xf32>
    %84 = vector.shape_cast %83 : vector<32x32xf32> to vector<1x32x32xf32>
    %85 = vector.extract_strided_slice %49 {offsets = [0, 64], sizes = [32, 32], strides = [1, 1]} : vector<32x128xf32> to vector<32x32xf32>
    %86 = vector.shape_cast %85 : vector<32x32xf32> to vector<1x32x32xf32>
    %87 = vector.extract_strided_slice %49 {offsets = [0, 96], sizes = [32, 32], strides = [1, 1]} : vector<32x128xf32> to vector<32x32xf32>
    %88 = vector.shape_cast %87 : vector<32x32xf32> to vector<1x32x32xf32>
    %89 = tpu.concatenate %82, %84, %86, %88 in 0 : vector<1x32x32xf32>, vector<1x32x32xf32>, vector<1x32x32xf32>, vector<1x32x32xf32> -> vector<4x32x32xf32>
    %90 = vector.extract_strided_slice %89 {offsets = [0, 0, 0], sizes = [4, 32, 16], strides = [1, 1, 1]} : vector<4x32x32xf32> to vector<4x32x16xf32>
    %91 = vector.extract_strided_slice %89 {offsets = [0, 0, 16], sizes = [4, 32, 16], strides = [1, 1, 1]} : vector<4x32x32xf32> to vector<4x32x16xf32>
    %cst_45 = arith.constant 0.000000e+00 : f32
    %92 = vector.broadcast %cst_45 : f32 to vector<4x32x16xf32>
    %93 = arith.subf %92, %91 : vector<4x32x16xf32>
    %94 = tpu.concatenate %93, %90 in 2 : vector<4x32x16xf32>, vector<4x32x16xf32> -> vector<4x32x32xf32>
    %95 = vector.shape_cast %0 : vector<32x32xf32> to vector<1x32x32xf32>
    %96 = vector.broadcast %95 : vector<1x32x32xf32> to vector<4x32x32xf32>
    %97 = arith.mulf %89, %96 : vector<4x32x32xf32>
    %98 = vector.shape_cast %1 : vector<32x32xf32> to vector<1x32x32xf32>
    %99 = vector.broadcast %98 : vector<1x32x32xf32> to vector<4x32x32xf32>
    %100 = arith.mulf %94, %99 : vector<4x32x32xf32>
    %101 = arith.addf %97, %100 : vector<4x32x32xf32>
    %102 = arith.truncf %101 : vector<4x32x32xf32> to vector<4x32x32xbf16>
    %103 = vector.extract_strided_slice %57 {offsets = [0, 0], sizes = [32, 32], strides = [1, 1]} : vector<32x128xf32> to vector<32x32xf32>
    %104 = vector.shape_cast %103 : vector<32x32xf32> to vector<1x32x32xf32>
    %105 = vector.extract_strided_slice %57 {offsets = [0, 32], sizes = [32, 32], strides = [1, 1]} : vector<32x128xf32> to vector<32x32xf32>
    %106 = vector.shape_cast %105 : vector<32x32xf32> to vector<1x32x32xf32>
    %107 = vector.extract_strided_slice %57 {offsets = [0, 64], sizes = [32, 32], strides = [1, 1]} : vector<32x128xf32> to vector<32x32xf32>
    %108 = vector.shape_cast %107 : vector<32x32xf32> to vector<1x32x32xf32>
    %109 = vector.extract_strided_slice %57 {offsets = [0, 96], sizes = [32, 32], strides = [1, 1]} : vector<32x128xf32> to vector<32x32xf32>
    %110 = vector.shape_cast %109 : vector<32x32xf32> to vector<1x32x32xf32>
    %111 = tpu.concatenate %104, %106, %108, %110 in 0 : vector<1x32x32xf32>, vector<1x32x32xf32>, vector<1x32x32xf32>, vector<1x32x32xf32> -> vector<4x32x32xf32>
    %112 = arith.truncf %111 : vector<4x32x32xf32> to vector<4x32x32xbf16>
    %c0_46 = arith.constant 0 : index
    %c0_47 = arith.constant 0 : index
    %c0_48 = arith.constant 0 : index
    %c0_49 = arith.constant 0 : index
    %c0_50 = arith.constant 0 : index
    %113 = vector.load %arg21[%c0_46, %c0_47, %c0_48, %c0_49, %c0_50] : memref<1x2x4x32x32xbf16, #tpu.memory_space<vmem>>, vector<1x1x4x32x32xbf16>
    %114 = vector.shape_cast %113 : vector<1x1x4x32x32xbf16> to vector<4x32x32xbf16>
    %115 = vector.shape_cast %102 : vector<4x32x32xbf16> to vector<1x1x4x32x32xbf16>
    tpu.vector_store %arg21[%c0_46, %c0_47, %c0_48, %c0_49, %c0_50], %115 {strides = array<i32>} : memref<1x2x4x32x32xbf16, #tpu.memory_space<vmem>>, vector<1x1x4x32x32xbf16>,
    %c0_51 = arith.constant 0 : index
    %c0_52 = arith.constant 0 : index
    %c0_53 = arith.constant 0 : index
    %c0_54 = arith.constant 0 : index
    %c0_55 = arith.constant 0 : index
    %116 = vector.load %arg22[%c0_51, %c0_52, %c0_53, %c0_54, %c0_55] : memref<1x2x4x32x32xbf16, #tpu.memory_space<vmem>>, vector<1x1x4x32x32xbf16>
    %117 = vector.shape_cast %116 : vector<1x1x4x32x32xbf16> to vector<4x32x32xbf16>
    %118 = vector.shape_cast %112 : vector<4x32x32xbf16> to vector<1x1x4x32x32xbf16>
    tpu.vector_store %arg22[%c0_51, %c0_52, %c0_53, %c0_54, %c0_55], %118 {strides = array<i32>} : memref<1x2x4x32x32xbf16, #tpu.memory_space<vmem>>, vector<1x1x4x32x32xbf16>,
    %119 = arith.truncf %80 : vector<4x32x32xf32> to vector<4x32x32xbf16>
    "tpu.trace_start"() <{level = 10 : i32, message = "hqd,hkd->hqk"}> : () -> ()
    %cst_56 = arith.constant dense<0.000000e+00> : vector<4x32x32xf32>
    %120 = tpu.matmul %119, %102, %cst_56 {dimension_numbers = #tpu.dot_dimension_numbers<[2], [2], [1], [1], [0, 0, 0, 1, 1, 1], [0], [0]>} : vector<4x32x32xbf16>, vector<4x32x32xbf16>, vector<4x32x32xf32> -> vector<4x32x32xf32>
    "tpu.trace_stop"() : () -> ()
    %121 = vector.shape_cast %19 : vector<32x32xf32> to vector<1x32x32xf32>
    %122 = vector.broadcast %121 : vector<1x32x32xf32> to vector<4x32x32xf32>
    %123 = arith.addf %120, %122 : vector<4x32x32xf32>
    %cst_57 = arith.constant dense<0xFF800000> : vector<4x32xf32>
    %124 = vector.multi_reduction <maximumf>, %123, %cst_57 [2] : vector<4x32x32xf32> to vector<4x32xf32>
    %125 = vector.shape_cast %124 : vector<4x32xf32> to vector<4x32x1xf32>
    %126 = vector.broadcast %125 : vector<4x32x1xf32> to vector<4x32x32xf32>
    %127 = arith.subf %123, %126 : vector<4x32x32xf32>
    %128 = math.exp %127 : vector<4x32x32xf32>
    %cst_58 = arith.constant dense<0.000000e+00> : vector<4x32xf32>
    %129 = vector.multi_reduction <add>, %128, %cst_58 [2] : vector<4x32x32xf32> to vector<4x32xf32>
    %130 = vector.shape_cast %129 : vector<4x32xf32> to vector<4x32x1xf32>
    %131 = tpu.reciprocal %130 {approx = true} : vector<4x32x1xf32> -> vector<4x32x1xf32>
    %132 = vector.broadcast %131 : vector<4x32x1xf32> to vector<4x32x32xf32>
    %133 = arith.mulf %128, %132 : vector<4x32x32xf32>
    %134 = arith.truncf %133 : vector<4x32x32xf32> to vector<4x32x32xbf16>
    "tpu.trace_start"() <{level = 10 : i32, message = "hqk,hkd->hqd"}> : () -> ()
    %cst_59 = arith.constant dense<0.000000e+00> : vector<4x32x32xf32>
    %135 = tpu.matmul %134, %112, %cst_59 {dimension_numbers = #tpu.dot_dimension_numbers<[2], [1], [1], [2], [0, 0, 0, 1, 1, 2], [0], [0]>} : vector<4x32x32xbf16>, vector<4x32x32xbf16>, vector<4x32x32xf32> -> vector<4x32x32xf32>
    "tpu.trace_stop"() : () -> ()
    %136 = vector.extract_strided_slice %135 {offsets = [0, 0, 0], sizes = [1, 32, 32], strides = [1, 1, 1]} : vector<4x32x32xf32> to vector<1x32x32xf32>
    %137 = vector.shape_cast %136 : vector<1x32x32xf32> to vector<32x32xf32>
    %138 = vector.extract_strided_slice %135 {offsets = [1, 0, 0], sizes = [1, 32, 32], strides = [1, 1, 1]} : vector<4x32x32xf32> to vector<1x32x32xf32>
    %139 = vector.shape_cast %138 : vector<1x32x32xf32> to vector<32x32xf32>
    %140 = vector.extract_strided_slice %135 {offsets = [2, 0, 0], sizes = [1, 32, 32], strides = [1, 1, 1]} : vector<4x32x32xf32> to vector<1x32x32xf32>
    %141 = vector.shape_cast %140 : vector<1x32x32xf32> to vector<32x32xf32>
    %142 = vector.extract_strided_slice %135 {offsets = [3, 0, 0], sizes = [1, 32, 32], strides = [1, 1, 1]} : vector<4x32x32xf32> to vector<1x32x32xf32>
    %143 = vector.shape_cast %142 : vector<1x32x32xf32> to vector<32x32xf32>
    %144 = tpu.concatenate %137, %139, %141, %143 in 1 : vector<32x32xf32>, vector<32x32xf32>, vector<32x32xf32>, vector<32x32xf32> -> vector<32x128xf32>
    %c0_60 = arith.constant 0 : index
    %c0_61 = arith.constant 0 : index
    %c0_62 = arith.constant 0 : index
    %145 = vector.load %arg14[%c0_60, %c0_61, %c0_62] : memref<2x128x128xbf16, #tpu.memory_space<vmem>>, vector<1x128x128xbf16>
    %146 = vector.shape_cast %145 : vector<1x128x128xbf16> to vector<128x128xbf16>
    %147 = arith.truncf %144 : vector<32x128xf32> to vector<32x128xbf16>
    %cst_63 = arith.constant dense<0.000000e+00> : vector<32x128xf32>
    %148 = tpu.matmul %147, %146, %cst_63 {dimension_numbers = #tpu.dot_dimension_numbers<[1], [0], [0], [1], [0, 0, 1, 1], [], []>} : vector<32x128xbf16>, vector<128x128xbf16>, vector<32x128xf32> -> vector<32x128xf32>
    %149 = arith.addf %13, %148 : vector<32x128xf32>
    %c0_64 = arith.constant 0 : index
    %c0_65 = arith.constant 0 : index
    %c0_66 = arith.constant 0 : index
    %150 = vector.load %arg15[%c0_64, %c0_65, %c0_66] : memref<2x1x128xf32, #tpu.memory_space<vmem>>, vector<1x1x128xf32>
    %151 = vector.shape_cast %150 : vector<1x1x128xf32> to vector<1x128xf32>
    %152 = arith.mulf %149, %149 : vector<32x128xf32>
    %cst_67 = arith.constant dense<0.000000e+00> : vector<32xf32>
    %153 = vector.multi_reduction <add>, %152, %cst_67 [1] : vector<32x128xf32> to vector<32xf32>
    %154 = vector.shape_cast %153 : vector<32xf32> to vector<32x1xf32>
    %cst_68 = arith.constant 1.280000e+02 : f32
    %155 = vector.broadcast %cst_68 : f32 to vector<32x1xf32>
    %156 = arith.divf %154, %155 : vector<32x1xf32>
    %cst_69 = arith.constant 9.99999997E-7 : f32
    %157 = vector.broadcast %cst_69 : f32 to vector<32x1xf32>
    %158 = arith.addf %156, %157 : vector<32x1xf32>
    %159 = math.rsqrt %158 : vector<32x1xf32>
    %160 = vector.broadcast %159 : vector<32x1xf32> to vector<32x128xf32>
    %161 = arith.mulf %149, %160 : vector<32x128xf32>
    %162 = vector.broadcast %151 : vector<1x128xf32> to vector<32x128xf32>
    %163 = arith.mulf %161, %162 : vector<32x128xf32>
    %c0_70 = arith.constant 0 : index
    %c0_71 = arith.constant 0 : index
    %c0_72 = arith.constant 0 : index
    %164 = vector.load %arg16[%c0_70, %c0_71, %c0_72] : memref<2x128x256xbf16, #tpu.memory_space<vmem>>, vector<1x128x256xbf16>
    %165 = vector.shape_cast %164 : vector<1x128x256xbf16> to vector<128x256xbf16>
    %166 = arith.truncf %163 : vector<32x128xf32> to vector<32x128xbf16>
    %cst_73 = arith.constant dense<0.000000e+00> : vector<32x256xf32>
    %167 = tpu.matmul %166, %165, %cst_73 {dimension_numbers = #tpu.dot_dimension_numbers<[1], [0], [0], [1], [0, 0, 1, 1], [], []>} : vector<32x128xbf16>, vector<128x256xbf16>, vector<32x256xf32> -> vector<32x256xf32>
    %c0_74 = arith.constant 0 : index
    %c0_75 = arith.constant 0 : index
    %c0_76 = arith.constant 0 : index
    %168 = vector.load %arg17[%c0_74, %c0_75, %c0_76] : memref<2x128x256xbf16, #tpu.memory_space<vmem>>, vector<1x128x256xbf16>
    %169 = vector.shape_cast %168 : vector<1x128x256xbf16> to vector<128x256xbf16>
    %170 = arith.truncf %163 : vector<32x128xf32> to vector<32x128xbf16>
    %cst_77 = arith.constant dense<0.000000e+00> : vector<32x256xf32>
    %171 = tpu.matmul %170, %169, %cst_77 {dimension_numbers = #tpu.dot_dimension_numbers<[1], [0], [0], [1], [0, 0, 1, 1], [], []>} : vector<32x128xbf16>, vector<128x256xbf16>, vector<32x256xf32> -> vector<32x256xf32>
    %cst_78 = arith.constant 0.000000e+00 : f32
    %172 = vector.broadcast %cst_78 : f32 to vector<32x256xf32>
    %173 = arith.subf %172, %167 : vector<32x256xf32>
    %174 = math.exp %173 : vector<32x256xf32>
    %cst_79 = arith.constant 1.000000e+00 : f32
    %175 = vector.broadcast %cst_79 : f32 to vector<32x256xf32>
    %176 = arith.addf %175, %174 : vector<32x256xf32>
    %177 = tpu.reciprocal %176 {approx = true} : vector<32x256xf32> -> vector<32x256xf32>
    %178 = arith.mulf %167, %177 : vector<32x256xf32>
    %179 = arith.mulf %178, %171 : vector<32x256xf32>
    %c0_80 = arith.constant 0 : index
    %c0_81 = arith.constant 0 : index
    %c0_82 = arith.constant 0 : index
    %180 = vector.load %arg18[%c0_80, %c0_81, %c0_82] : memref<2x256x128xbf16, #tpu.memory_space<vmem>>, vector<1x256x128xbf16>
    %181 = vector.shape_cast %180 : vector<1x256x128xbf16> to vector<256x128xbf16>
    %182 = arith.truncf %179 : vector<32x256xf32> to vector<32x256xbf16>
    %cst_83 = arith.constant dense<0.000000e+00> : vector<32x128xf32>
    %183 = tpu.matmul %182, %181, %cst_83 {dimension_numbers = #tpu.dot_dimension_numbers<[1], [0], [0], [1], [0, 0, 1, 1], [], []>} : vector<32x256xbf16>, vector<256x128xbf16>, vector<32x128xf32> -> vector<32x128xf32>
    %184 = arith.addf %149, %183 : vector<32x128xf32>
    %c1 = arith.constant 1 : index
    %c0_84 = arith.constant 0 : index
    %c0_85 = arith.constant 0 : index
    %185 = vector.load %arg7[%c1, %c0_84, %c0_85] : memref<2x1x128xf32, #tpu.memory_space<vmem>>, vector<1x1x128xf32>
    %186 = vector.shape_cast %185 : vector<1x1x128xf32> to vector<1x128xf32>
    %187 = arith.mulf %184, %184 : vector<32x128xf32>
    %cst_86 = arith.constant dense<0.000000e+00> : vector<32xf32>
    %188 = vector.multi_reduction <add>, %187, %cst_86 [1] : vector<32x128xf32> to vector<32xf32>
    %189 = vector.shape_cast %188 : vector<32xf32> to vector<32x1xf32>
    %cst_87 = arith.constant 1.280000e+02 : f32
    %190 = vector.broadcast %cst_87 : f32 to vector<32x1xf32>
    %191 = arith.divf %189, %190 : vector<32x1xf32>
    %cst_88 = arith.constant 9.99999997E-7 : f32
    %192 = vector.broadcast %cst_88 : f32 to vector<32x1xf32>
    %193 = arith.addf %191, %192 : vector<32x1xf32>
    %194 = math.rsqrt %193 : vector<32x1xf32>
    %195 = vector.broadcast %194 : vector<32x1xf32> to vector<32x128xf32>
    %196 = arith.mulf %184, %195 : vector<32x128xf32>
    %197 = vector.broadcast %186 : vector<1x128xf32> to vector<32x128xf32>
    %198 = arith.mulf %196, %197 : vector<32x128xf32>
    %c1_89 = arith.constant 1 : index
    %c0_90 = arith.constant 0 : index
    %c0_91 = arith.constant 0 : index
    %199 = vector.load %arg8[%c1_89, %c0_90, %c0_91] : memref<2x128x128xbf16, #tpu.memory_space<vmem>>, vector<1x128x128xbf16>
    %200 = vector.shape_cast %199 : vector<1x128x128xbf16> to vector<128x128xbf16>
    %201 = arith.truncf %198 : vector<32x128xf32> to vector<32x128xbf16>
    %cst_92 = arith.constant dense<0.000000e+00> : vector<32x128xf32>
    %202 = tpu.matmul %201, %200, %cst_92 {dimension_numbers = #tpu.dot_dimension_numbers<[1], [0], [0], [1], [0, 0, 1, 1], [], []>} : vector<32x128xbf16>, vector<128x128xbf16>, vector<32x128xf32> -> vector<32x128xf32>
    %c1_93 = arith.constant 1 : index
    %c0_94 = arith.constant 0 : index
    %c0_95 = arith.constant 0 : index
    %203 = vector.load %arg9[%c1_93, %c0_94, %c0_95] : memref<2x1x128xf32, #tpu.memory_space<vmem>>, vector<1x1x128xf32>
    %204 = vector.shape_cast %203 : vector<1x1x128xf32> to vector<1x128xf32>
    %205 = vector.broadcast %204 : vector<1x128xf32> to vector<32x128xf32>
    %206 = arith.addf %202, %205 : vector<32x128xf32>
    %c1_96 = arith.constant 1 : index
    %c0_97 = arith.constant 0 : index
    %c0_98 = arith.constant 0 : index
    %207 = vector.load %arg10[%c1_96, %c0_97, %c0_98] : memref<2x128x128xbf16, #tpu.memory_space<vmem>>, vector<1x128x128xbf16>
    %208 = vector.shape_cast %207 : vector<1x128x128xbf16> to vector<128x128xbf16>
    %209 = arith.truncf %198 : vector<32x128xf32> to vector<32x128xbf16>
    %cst_99 = arith.constant dense<0.000000e+00> : vector<32x128xf32>
    %210 = tpu.matmul %209, %208, %cst_99 {dimension_numbers = #tpu.dot_dimension_numbers<[1], [0], [0], [1], [0, 0, 1, 1], [], []>} : vector<32x128xbf16>, vector<128x128xbf16>, vector<32x128xf32> -> vector<32x128xf32>
    %c1_100 = arith.constant 1 : index
    %c0_101 = arith.constant 0 : index
    %c0_102 = arith.constant 0 : index
    %211 = vector.load %arg11[%c1_100, %c0_101, %c0_102] : memref<2x1x128xf32, #tpu.memory_space<vmem>>, vector<1x1x128xf32>
    %212 = vector.shape_cast %211 : vector<1x1x128xf32> to vector<1x128xf32>
    %213 = vector.broadcast %212 : vector<1x128xf32> to vector<32x128xf32>
    %214 = arith.addf %210, %213 : vector<32x128xf32>
    %c1_103 = arith.constant 1 : index
    %c0_104 = arith.constant 0 : index
    %c0_105 = arith.constant 0 : index
    %215 = vector.load %arg12[%c1_103, %c0_104, %c0_105] : memref<2x128x128xbf16, #tpu.memory_space<vmem>>, vector<1x128x128xbf16>
    %216 = vector.shape_cast %215 : vector<1x128x128xbf16> to vector<128x128xbf16>
    %217 = arith.truncf %198 : vector<32x128xf32> to vector<32x128xbf16>
    %cst_106 = arith.constant dense<0.000000e+00> : vector<32x128xf32>
    %218 = tpu.matmul %217, %216, %cst_106 {dimension_numbers = #tpu.dot_dimension_numbers<[1], [0], [0], [1], [0, 0, 1, 1], [], []>} : vector<32x128xbf16>, vector<128x128xbf16>, vector<32x128xf32> -> vector<32x128xf32>
    %c1_107 = arith.constant 1 : index
    %c0_108 = arith.constant 0 : index
    %c0_109 = arith.constant 0 : index
    %219 = vector.load %arg13[%c1_107, %c0_108, %c0_109] : memref<2x1x128xf32, #tpu.memory_space<vmem>>, vector<1x1x128xf32>
    %220 = vector.shape_cast %219 : vector<1x1x128xf32> to vector<1x128xf32>
    %221 = vector.broadcast %220 : vector<1x128xf32> to vector<32x128xf32>
    %222 = arith.addf %218, %221 : vector<32x128xf32>
    %223 = vector.extract_strided_slice %206 {offsets = [0, 0], sizes = [32, 32], strides = [1, 1]} : vector<32x128xf32> to vector<32x32xf32>
    %224 = vector.shape_cast %223 : vector<32x32xf32> to vector<1x32x32xf32>
    %225 = vector.extract_strided_slice %206 {offsets = [0, 32], sizes = [32, 32], strides = [1, 1]} : vector<32x128xf32> to vector<32x32xf32>
    %226 = vector.shape_cast %225 : vector<32x32xf32> to vector<1x32x32xf32>
    %227 = vector.extract_strided_slice %206 {offsets = [0, 64], sizes = [32, 32], strides = [1, 1]} : vector<32x128xf32> to vector<32x32xf32>
    %228 = vector.shape_cast %227 : vector<32x32xf32> to vector<1x32x32xf32>
    %229 = vector.extract_strided_slice %206 {offsets = [0, 96], sizes = [32, 32], strides = [1, 1]} : vector<32x128xf32> to vector<32x32xf32>
    %230 = vector.shape_cast %229 : vector<32x32xf32> to vector<1x32x32xf32>
    %231 = tpu.concatenate %224, %226, %228, %230 in 0 : vector<1x32x32xf32>, vector<1x32x32xf32>, vector<1x32x32xf32>, vector<1x32x32xf32> -> vector<4x32x32xf32>
    %232 = vector.extract_strided_slice %231 {offsets = [0, 0, 0], sizes = [4, 32, 16], strides = [1, 1, 1]} : vector<4x32x32xf32> to vector<4x32x16xf32>
    %233 = vector.extract_strided_slice %231 {offsets = [0, 0, 16], sizes = [4, 32, 16], strides = [1, 1, 1]} : vector<4x32x32xf32> to vector<4x32x16xf32>
    %cst_110 = arith.constant 0.000000e+00 : f32
    %234 = vector.broadcast %cst_110 : f32 to vector<4x32x16xf32>
    %235 = arith.subf %234, %233 : vector<4x32x16xf32>
    %236 = tpu.concatenate %235, %232 in 2 : vector<4x32x16xf32>, vector<4x32x16xf32> -> vector<4x32x32xf32>
    %237 = vector.shape_cast %0 : vector<32x32xf32> to vector<1x32x32xf32>
    %238 = vector.broadcast %237 : vector<1x32x32xf32> to vector<4x32x32xf32>
    %239 = arith.mulf %231, %238 : vector<4x32x32xf32>
    %240 = vector.shape_cast %1 : vector<32x32xf32> to vector<1x32x32xf32>
    %241 = vector.broadcast %240 : vector<1x32x32xf32> to vector<4x32x32xf32>
    %242 = arith.mulf %236, %241 : vector<4x32x32xf32>
    %243 = arith.addf %239, %242 : vector<4x32x32xf32>
    %cst_111 = arith.constant 0.176776692 : f32
    %244 = vector.broadcast %cst_111 : f32 to vector<4x32x32xf32>
    %245 = arith.mulf %243, %244 : vector<4x32x32xf32>
    %246 = vector.extract_strided_slice %214 {offsets = [0, 0], sizes = [32, 32], strides = [1, 1]} : vector<32x128xf32> to vector<32x32xf32>
    %247 = vector.shape_cast %246 : vector<32x32xf32> to vector<1x32x32xf32>
    %248 = vector.extract_strided_slice %214 {offsets = [0, 32], sizes = [32, 32], strides = [1, 1]} : vector<32x128xf32> to vector<32x32xf32>
    %249 = vector.shape_cast %248 : vector<32x32xf32> to vector<1x32x32xf32>
    %250 = vector.extract_strided_slice %214 {offsets = [0, 64], sizes = [32, 32], strides = [1, 1]} : vector<32x128xf32> to vector<32x32xf32>
    %251 = vector.shape_cast %250 : vector<32x32xf32> to vector<1x32x32xf32>
    %252 = vector.extract_strided_slice %214 {offsets = [0, 96], sizes = [32, 32], strides = [1, 1]} : vector<32x128xf32> to vector<32x32xf32>
    %253 = vector.shape_cast %252 : vector<32x32xf32> to vector<1x32x32xf32>
    %254 = tpu.concatenate %247, %249, %251, %253 in 0 : vector<1x32x32xf32>, vector<1x32x32xf32>, vector<1x32x32xf32>, vector<1x32x32xf32> -> vector<4x32x32xf32>
    %255 = vector.extract_strided_slice %254 {offsets = [0, 0, 0], sizes = [4, 32, 16], strides = [1, 1, 1]} : vector<4x32x32xf32> to vector<4x32x16xf32>
    %256 = vector.extract_strided_slice %254 {offsets = [0, 0, 16], sizes = [4, 32, 16], strides = [1, 1, 1]} : vector<4x32x32xf32> to vector<4x32x16xf32>
    %cst_112 = arith.constant 0.000000e+00 : f32
    %257 = vector.broadcast %cst_112 : f32 to vector<4x32x16xf32>
    %258 = arith.subf %257, %256 : vector<4x32x16xf32>
    %259 = tpu.concatenate %258, %255 in 2 : vector<4x32x16xf32>, vector<4x32x16xf32> -> vector<4x32x32xf32>
    %260 = vector.shape_cast %0 : vector<32x32xf32> to vector<1x32x32xf32>
    %261 = vector.broadcast %260 : vector<1x32x32xf32> to vector<4x32x32xf32>
    %262 = arith.mulf %254, %261 : vector<4x32x32xf32>
    %263 = vector.shape_cast %1 : vector<32x32xf32> to vector<1x32x32xf32>
    %264 = vector.broadcast %263 : vector<1x32x32xf32> to vector<4x32x32xf32>
    %265 = arith.mulf %259, %264 : vector<4x32x32xf32>
    %266 = arith.addf %262, %265 : vector<4x32x32xf32>
    %267 = arith.truncf %266 : vector<4x32x32xf32> to vector<4x32x32xbf16>
    %268 = vector.extract_strided_slice %222 {offsets = [0, 0], sizes = [32, 32], strides = [1, 1]} : vector<32x128xf32> to vector<32x32xf32>
    %269 = vector.shape_cast %268 : vector<32x32xf32> to vector<1x32x32xf32>
    %270 = vector.extract_strided_slice %222 {offsets = [0, 32], sizes = [32, 32], strides = [1, 1]} : vector<32x128xf32> to vector<32x32xf32>
    %271 = vector.shape_cast %270 : vector<32x32xf32> to vector<1x32x32xf32>
    %272 = vector.extract_strided_slice %222 {offsets = [0, 64], sizes = [32, 32], strides = [1, 1]} : vector<32x128xf32> to vector<32x32xf32>
    %273 = vector.shape_cast %272 : vector<32x32xf32> to vector<1x32x32xf32>
    %274 = vector.extract_strided_slice %222 {offsets = [0, 96], sizes = [32, 32], strides = [1, 1]} : vector<32x128xf32> to vector<32x32xf32>
    %275 = vector.shape_cast %274 : vector<32x32xf32> to vector<1x32x32xf32>
    %276 = tpu.concatenate %269, %271, %273, %275 in 0 : vector<1x32x32xf32>, vector<1x32x32xf32>, vector<1x32x32xf32>, vector<1x32x32xf32> -> vector<4x32x32xf32>
    %277 = arith.truncf %276 : vector<4x32x32xf32> to vector<4x32x32xbf16>
    %c0_113 = arith.constant 0 : index
    %c1_114 = arith.constant 1 : index
    %c0_115 = arith.constant 0 : index
    %c0_116 = arith.constant 0 : index
    %c0_117 = arith.constant 0 : index
    %278 = vector.load %arg21[%c0_113, %c1_114, %c0_115, %c0_116, %c0_117] : memref<1x2x4x32x32xbf16, #tpu.memory_space<vmem>>, vector<1x1x4x32x32xbf16>
    %279 = vector.shape_cast %278 : vector<1x1x4x32x32xbf16> to vector<4x32x32xbf16>
    %280 = vector.shape_cast %267 : vector<4x32x32xbf16> to vector<1x1x4x32x32xbf16>
    tpu.vector_store %arg21[%c0_113, %c1_114, %c0_115, %c0_116, %c0_117], %280 {strides = array<i32>} : memref<1x2x4x32x32xbf16, #tpu.memory_space<vmem>>, vector<1x1x4x32x32xbf16>,
    %c0_118 = arith.constant 0 : index
    %c1_119 = arith.constant 1 : index
    %c0_120 = arith.constant 0 : index
    %c0_121 = arith.constant 0 : index
    %c0_122 = arith.constant 0 : index
    %281 = vector.load %arg22[%c0_118, %c1_119, %c0_120, %c0_121, %c0_122] : memref<1x2x4x32x32xbf16, #tpu.memory_space<vmem>>, vector<1x1x4x32x32xbf16>
    %282 = vector.shape_cast %281 : vector<1x1x4x32x32xbf16> to vector<4x32x32xbf16>
    %283 = vector.shape_cast %277 : vector<4x32x32xbf16> to vector<1x1x4x32x32xbf16>
    tpu.vector_store %arg22[%c0_118, %c1_119, %c0_120, %c0_121, %c0_122], %283 {strides = array<i32>} : memref<1x2x4x32x32xbf16, #tpu.memory_space<vmem>>, vector<1x1x4x32x32xbf16>,
    %284 = arith.truncf %245 : vector<4x32x32xf32> to vector<4x32x32xbf16>
    "tpu.trace_start"() <{level = 10 : i32, message = "hqd,hkd->hqk"}> : () -> ()
    %cst_123 = arith.constant dense<0.000000e+00> : vector<4x32x32xf32>
    %285 = tpu.matmul %284, %267, %cst_123 {dimension_numbers = #tpu.dot_dimension_numbers<[2], [2], [1], [1], [0, 0, 0, 1, 1, 1], [0], [0]>} : vector<4x32x32xbf16>, vector<4x32x32xbf16>, vector<4x32x32xf32> -> vector<4x32x32xf32>
    "tpu.trace_stop"() : () -> ()
    %286 = vector.shape_cast %19 : vector<32x32xf32> to vector<1x32x32xf32>
    %287 = vector.broadcast %286 : vector<1x32x32xf32> to vector<4x32x32xf32>
    %288 = arith.addf %285, %287 : vector<4x32x32xf32>
    %cst_124 = arith.constant dense<0xFF800000> : vector<4x32xf32>
    %289 = vector.multi_reduction <maximumf>, %288, %cst_124 [2] : vector<4x32x32xf32> to vector<4x32xf32>
    %290 = vector.shape_cast %289 : vector<4x32xf32> to vector<4x32x1xf32>
    %291 = vector.broadcast %290 : vector<4x32x1xf32> to vector<4x32x32xf32>
    %292 = arith.subf %288, %291 : vector<4x32x32xf32>
    %293 = math.exp %292 : vector<4x32x32xf32>
    %cst_125 = arith.constant dense<0.000000e+00> : vector<4x32xf32>
    %294 = vector.multi_reduction <add>, %293, %cst_125 [2] : vector<4x32x32xf32> to vector<4x32xf32>
    %295 = vector.shape_cast %294 : vector<4x32xf32> to vector<4x32x1xf32>
    %296 = tpu.reciprocal %295 {approx = true} : vector<4x32x1xf32> -> vector<4x32x1xf32>
    %297 = vector.broadcast %296 : vector<4x32x1xf32> to vector<4x32x32xf32>
    %298 = arith.mulf %293, %297 : vector<4x32x32xf32>
    %299 = arith.truncf %298 : vector<4x32x32xf32> to vector<4x32x32xbf16>
    "tpu.trace_start"() <{level = 10 : i32, message = "hqk,hkd->hqd"}> : () -> ()
    %cst_126 = arith.constant dense<0.000000e+00> : vector<4x32x32xf32>
    %300 = tpu.matmul %299, %277, %cst_126 {dimension_numbers = #tpu.dot_dimension_numbers<[2], [1], [1], [2], [0, 0, 0, 1, 1, 2], [0], [0]>} : vector<4x32x32xbf16>, vector<4x32x32xbf16>, vector<4x32x32xf32> -> vector<4x32x32xf32>
    "tpu.trace_stop"() : () -> ()
    %301 = vector.extract_strided_slice %300 {offsets = [0, 0, 0], sizes = [1, 32, 32], strides = [1, 1, 1]} : vector<4x32x32xf32> to vector<1x32x32xf32>
    %302 = vector.shape_cast %301 : vector<1x32x32xf32> to vector<32x32xf32>
    %303 = vector.extract_strided_slice %300 {offsets = [1, 0, 0], sizes = [1, 32, 32], strides = [1, 1, 1]} : vector<4x32x32xf32> to vector<1x32x32xf32>
    %304 = vector.shape_cast %303 : vector<1x32x32xf32> to vector<32x32xf32>
    %305 = vector.extract_strided_slice %300 {offsets = [2, 0, 0], sizes = [1, 32, 32], strides = [1, 1, 1]} : vector<4x32x32xf32> to vector<1x32x32xf32>
    %306 = vector.shape_cast %305 : vector<1x32x32xf32> to vector<32x32xf32>
    %307 = vector.extract_strided_slice %300 {offsets = [3, 0, 0], sizes = [1, 32, 32], strides = [1, 1, 1]} : vector<4x32x32xf32> to vector<1x32x32xf32>
    %308 = vector.shape_cast %307 : vector<1x32x32xf32> to vector<32x32xf32>
    %309 = tpu.concatenate %302, %304, %306, %308 in 1 : vector<32x32xf32>, vector<32x32xf32>, vector<32x32xf32>, vector<32x32xf32> -> vector<32x128xf32>
    %c1_127 = arith.constant 1 : index
    %c0_128 = arith.constant 0 : index
    %c0_129 = arith.constant 0 : index
    %310 = vector.load %arg14[%c1_127, %c0_128, %c0_129] : memref<2x128x128xbf16, #tpu.memory_space<vmem>>, vector<1x128x128xbf16>
    %311 = vector.shape_cast %310 : vector<1x128x128xbf16> to vector<128x128xbf16>
    %312 = arith.truncf %309 : vector<32x128xf32> to vector<32x128xbf16>
    %cst_130 = arith.constant dense<0.000000e+00> : vector<32x128xf32>
    %313 = tpu.matmul %312, %311, %cst_130 {dimension_numbers = #tpu.dot_dimension_numbers<[1], [0], [0], [1], [0, 0, 1, 1], [], []>} : vector<32x128xbf16>, vector<128x128xbf16>, vector<32x128xf32> -> vector<32x128xf32>
    %314 = arith.addf %184, %313 : vector<32x128xf32>
    %c1_131 = arith.constant 1 : index
    %c0_132 = arith.constant 0 : index
    %c0_133 = arith.constant 0 : index
    %315 = vector.load %arg15[%c1_131, %c0_132, %c0_133] : memref<2x1x128xf32, #tpu.memory_space<vmem>>, vector<1x1x128xf32>
    %316 = vector.shape_cast %315 : vector<1x1x128xf32> to vector<1x128xf32>
    %317 = arith.mulf %314, %314 : vector<32x128xf32>
    %cst_134 = arith.constant dense<0.000000e+00> : vector<32xf32>
    %318 = vector.multi_reduction <add>, %317, %cst_134 [1] : vector<32x128xf32> to vector<32xf32>
    %319 = vector.shape_cast %318 : vector<32xf32> to vector<32x1xf32>
    %cst_135 = arith.constant 1.280000e+02 : f32
    %320 = vector.broadcast %cst_135 : f32 to vector<32x1xf32>
    %321 = arith.divf %319, %320 : vector<32x1xf32>
    %cst_136 = arith.constant 9.99999997E-7 : f32
    %322 = vector.broadcast %cst_136 : f32 to vector<32x1xf32>
    %323 = arith.addf %321, %322 : vector<32x1xf32>
    %324 = math.rsqrt %323 : vector<32x1xf32>
    %325 = vector.broadcast %324 : vector<32x1xf32> to vector<32x128xf32>
    %326 = arith.mulf %314, %325 : vector<32x128xf32>
    %327 = vector.broadcast %316 : vector<1x128xf32> to vector<32x128xf32>
    %328 = arith.mulf %326, %327 : vector<32x128xf32>
    %c1_137 = arith.constant 1 : index
    %c0_138 = arith.constant 0 : index
    %c0_139 = arith.constant 0 : index
    %329 = vector.load %arg16[%c1_137, %c0_138, %c0_139] : memref<2x128x256xbf16, #tpu.memory_space<vmem>>, vector<1x128x256xbf16>
    %330 = vector.shape_cast %329 : vector<1x128x256xbf16> to vector<128x256xbf16>
    %331 = arith.truncf %328 : vector<32x128xf32> to vector<32x128xbf16>
    %cst_140 = arith.constant dense<0.000000e+00> : vector<32x256xf32>
    %332 = tpu.matmul %331, %330, %cst_140 {dimension_numbers = #tpu.dot_dimension_numbers<[1], [0], [0], [1], [0, 0, 1, 1], [], []>} : vector<32x128xbf16>, vector<128x256xbf16>, vector<32x256xf32> -> vector<32x256xf32>
    %c1_141 = arith.constant 1 : index
    %c0_142 = arith.constant 0 : index
    %c0_143 = arith.constant 0 : index
    %333 = vector.load %arg17[%c1_141, %c0_142, %c0_143] : memref<2x128x256xbf16, #tpu.memory_space<vmem>>, vector<1x128x256xbf16>
    %334 = vector.shape_cast %333 : vector<1x128x256xbf16> to vector<128x256xbf16>
    %335 = arith.truncf %328 : vector<32x128xf32> to vector<32x128xbf16>
    %cst_144 = arith.constant dense<0.000000e+00> : vector<32x256xf32>
    %336 = tpu.matmul %335, %334, %cst_144 {dimension_numbers = #tpu.dot_dimension_numbers<[1], [0], [0], [1], [0, 0, 1, 1], [], []>} : vector<32x128xbf16>, vector<128x256xbf16>, vector<32x256xf32> -> vector<32x256xf32>
    %cst_145 = arith.constant 0.000000e+00 : f32
    %337 = vector.broadcast %cst_145 : f32 to vector<32x256xf32>
    %338 = arith.subf %337, %332 : vector<32x256xf32>
    %339 = math.exp %338 : vector<32x256xf32>
    %cst_146 = arith.constant 1.000000e+00 : f32
    %340 = vector.broadcast %cst_146 : f32 to vector<32x256xf32>
    %341 = arith.addf %340, %339 : vector<32x256xf32>
    %342 = tpu.reciprocal %341 {approx = true} : vector<32x256xf32> -> vector<32x256xf32>
    %343 = arith.mulf %332, %342 : vector<32x256xf32>
    %344 = arith.mulf %343, %336 : vector<32x256xf32>
    %c1_147 = arith.constant 1 : index
    %c0_148 = arith.constant 0 : index
    %c0_149 = arith.constant 0 : index
    %345 = vector.load %arg18[%c1_147, %c0_148, %c0_149] : memref<2x256x128xbf16, #tpu.memory_space<vmem>>, vector<1x256x128xbf16>
    %346 = vector.shape_cast %345 : vector<1x256x128xbf16> to vector<256x128xbf16>
    %347 = arith.truncf %344 : vector<32x256xf32> to vector<32x256xbf16>
    %cst_150 = arith.constant dense<0.000000e+00> : vector<32x128xf32>
    %348 = tpu.matmul %347, %346, %cst_150 {dimension_numbers = #tpu.dot_dimension_numbers<[1], [0], [0], [1], [0, 0, 1, 1], [], []>} : vector<32x256xbf16>, vector<256x128xbf16>, vector<32x128xf32> -> vector<32x128xf32>
    %349 = arith.addf %314, %348 : vector<32x128xf32>
    %350 = vector.extract_strided_slice %349 {offsets = [23, 0], sizes = [1, 128], strides = [1, 1]} : vector<32x128xf32> to vector<1x128xf32>
    %c0_151 = arith.constant 0 : index
    %c0_152 = arith.constant 0 : index
    %351 = vector.load %arg19[%c0_151, %c0_152] : memref<1x128xf32, #tpu.memory_space<vmem>>, vector<1x128xf32>
    %352 = arith.mulf %350, %350 : vector<1x128xf32>
    %cst_153 = arith.constant dense<0.000000e+00> : vector<1xf32>
    %353 = vector.multi_reduction <add>, %352, %cst_153 [1] : vector<1x128xf32> to vector<1xf32>
    %354 = vector.shape_cast %353 : vector<1xf32> to vector<1x1xf32>
    %cst_154 = arith.constant 1.280000e+02 : f32
    %355 = vector.broadcast %cst_154 : f32 to vector<1x1xf32>
    %356 = arith.divf %354, %355 : vector<1x1xf32>
    %cst_155 = arith.constant 9.99999997E-7 : f32
    %357 = vector.broadcast %cst_155 : f32 to vector<1x1xf32>
    %358 = arith.addf %356, %357 : vector<1x1xf32>
    %359 = math.rsqrt %358 : vector<1x1xf32>
    %360 = vector.broadcast %359 : vector<1x1xf32> to vector<1x128xf32>
    %361 = arith.mulf %350, %360 : vector<1x128xf32>
    %362 = arith.mulf %361, %351 : vector<1x128xf32>
    %c0_156 = arith.constant 0 : index
    %c0_157 = arith.constant 0 : index
    %363 = vector.load %arg20[%c0_156, %c0_157] : memref<128x128xbf16, #tpu.memory_space<vmem>>, vector<128x128xbf16>
    %364 = arith.truncf %362 : vector<1x128xf32> to vector<1x128xbf16>
    %cst_158 = arith.constant dense<0.000000e+00> : vector<1x128xf32>
    %365 = tpu.matmul %364, %363, %cst_158 {dimension_numbers = #tpu.dot_dimension_numbers<[1], [0], [0], [1], [0, 0, 1, 1], [], []>} : vector<1x128xbf16>, vector<128x128xbf16>, vector<1x128xf32> -> vector<1x128xf32>
    %366 = vector.shape_cast %365 : vector<1x128xf32> to vector<1x128xf32>
    %367 = vector.broadcast %366 : vector<1x128xf32> to vector<8x128xf32>
    %c0_159 = arith.constant 0 : index
    %c0_160 = arith.constant 0 : index
    %c0_161 = arith.constant 0 : index
    %368 = vector.load %arg23[%c0_159, %c0_160, %c0_161] : memref<1x8x128xf32, #tpu.memory_space<vmem>>, vector<1x8x128xf32>
    %369 = vector.shape_cast %368 : vector<1x8x128xf32> to vector<8x128xf32>
    %370 = vector.shape_cast %367 : vector<8x128xf32> to vector<1x8x128xf32>
    tpu.vector_store %arg23[%c0_159, %c0_160, %c0_161], %370 {strides = array<i32>} : memref<1x8x128xf32, #tpu.memory_space<vmem>>, vector<1x8x128xf32>,
    return
  }
  func.func @transform_0(%arg0: i32) -> (i32, i32, i32) {
    %c0_i32 = arith.constant 0 : i32
    %c0_i32_0 = arith.constant 0 : i32
    %c0_i32_1 = arith.constant 0 : i32
    return %arg0, %c0_i32, %c0_i32_0 : i32, i32, i32
  }
  func.func @transform_1(%arg0: i32) -> (i32, i32, i32) {
    %c0_i32 = arith.constant 0 : i32
    %c0_i32_0 = arith.constant 0 : i32
    %c0_i32_1 = arith.constant 0 : i32
    return %arg0, %c0_i32, %c0_i32_0 : i32, i32, i32
  }
  func.func @transform_2(%arg0: i32) -> (i32, i32) {
    %c0_i32 = arith.constant 0 : i32
    %c0_i32_0 = arith.constant 0 : i32
    %c0_i32_1 = arith.constant 0 : i32
    return %c0_i32, %c0_i32_0 : i32, i32
  }
  func.func @transform_3(%arg0: i32) -> (i32, i32) {
    %c0_i32 = arith.constant 0 : i32
    %c0_i32_0 = arith.constant 0 : i32
    %c0_i32_1 = arith.constant 0 : i32
    return %c0_i32, %c0_i32_0 : i32, i32
  }
  func.func @transform_4(%arg0: i32) -> (i32, i32) {
    %c0_i32 = arith.constant 0 : i32
    %c0_i32_0 = arith.constant 0 : i32
    %c0_i32_1 = arith.constant 0 : i32
    return %c0_i32, %c0_i32_0 : i32, i32
  }
  func.func @transform_5(%arg0: i32) -> (i32, i32) {
    %c0_i32 = arith.constant 0 : i32
    %c0_i32_0 = arith.constant 0 : i32
    %c0_i32_1 = arith.constant 0 : i32
    return %c0_i32, %c0_i32_0 : i32, i32
  }
  func.func @transform_6(%arg0: i32) -> (i32, i32, i32) {
    %c0_i32 = arith.constant 0 : i32
    %c0_i32_0 = arith.constant 0 : i32
    %c0_i32_1 = arith.constant 0 : i32
    %c0_i32_2 = arith.constant 0 : i32
    return %c0_i32, %c0_i32_0, %c0_i32_1 : i32, i32, i32
  }
  func.func @transform_7(%arg0: i32) -> (i32, i32, i32) {
    %c0_i32 = arith.constant 0 : i32
    %c0_i32_0 = arith.constant 0 : i32
    %c0_i32_1 = arith.constant 0 : i32
    %c0_i32_2 = arith.constant 0 : i32
    return %c0_i32, %c0_i32_0, %c0_i32_1 : i32, i32, i32
  }
  func.func @transform_8(%arg0: i32) -> (i32, i32, i32) {
    %c0_i32 = arith.constant 0 : i32
    %c0_i32_0 = arith.constant 0 : i32
    %c0_i32_1 = arith.constant 0 : i32
    %c0_i32_2 = arith.constant 0 : i32
    return %c0_i32, %c0_i32_0, %c0_i32_1 : i32, i32, i32
  }
  func.func @transform_9(%arg0: i32) -> (i32, i32, i32) {
    %c0_i32 = arith.constant 0 : i32
    %c0_i32_0 = arith.constant 0 : i32
    %c0_i32_1 = arith.constant 0 : i32
    %c0_i32_2 = arith.constant 0 : i32
    return %c0_i32, %c0_i32_0, %c0_i32_1 : i32, i32, i32
  }
  func.func @transform_10(%arg0: i32) -> (i32, i32, i32) {
    %c0_i32 = arith.constant 0 : i32
    %c0_i32_0 = arith.constant 0 : i32
    %c0_i32_1 = arith.constant 0 : i32
    %c0_i32_2 = arith.constant 0 : i32
    return %c0_i32, %c0_i32_0, %c0_i32_1 : i32, i32, i32
  }
  func.func @transform_11(%arg0: i32) -> (i32, i32, i32) {
    %c0_i32 = arith.constant 0 : i32
    %c0_i32_0 = arith.constant 0 : i32
    %c0_i32_1 = arith.constant 0 : i32
    %c0_i32_2 = arith.constant 0 : i32
    return %c0_i32, %c0_i32_0, %c0_i32_1 : i32, i32, i32
  }
  func.func @transform_12(%arg0: i32) -> (i32, i32, i32) {
    %c0_i32 = arith.constant 0 : i32
    %c0_i32_0 = arith.constant 0 : i32
    %c0_i32_1 = arith.constant 0 : i32
    %c0_i32_2 = arith.constant 0 : i32
    return %c0_i32, %c0_i32_0, %c0_i32_1 : i32, i32, i32
  }
  func.func @transform_13(%arg0: i32) -> (i32, i32, i32) {
    %c0_i32 = arith.constant 0 : i32
    %c0_i32_0 = arith.constant 0 : i32
    %c0_i32_1 = arith.constant 0 : i32
    %c0_i32_2 = arith.constant 0 : i32
    return %c0_i32, %c0_i32_0, %c0_i32_1 : i32, i32, i32
  }
  func.func @transform_14(%arg0: i32) -> (i32, i32, i32) {
    %c0_i32 = arith.constant 0 : i32
    %c0_i32_0 = arith.constant 0 : i32
    %c0_i32_1 = arith.constant 0 : i32
    %c0_i32_2 = arith.constant 0 : i32
    return %c0_i32, %c0_i32_0, %c0_i32_1 : i32, i32, i32
  }
  func.func @transform_15(%arg0: i32) -> (i32, i32, i32) {
    %c0_i32 = arith.constant 0 : i32
    %c0_i32_0 = arith.constant 0 : i32
    %c0_i32_1 = arith.constant 0 : i32
    %c0_i32_2 = arith.constant 0 : i32
    return %c0_i32, %c0_i32_0, %c0_i32_1 : i32, i32, i32
  }
  func.func @transform_16(%arg0: i32) -> (i32, i32, i32) {
    %c0_i32 = arith.constant 0 : i32
    %c0_i32_0 = arith.constant 0 : i32
    %c0_i32_1 = arith.constant 0 : i32
    %c0_i32_2 = arith.constant 0 : i32
    return %c0_i32, %c0_i32_0, %c0_i32_1 : i32, i32, i32
  }
  func.func @transform_17(%arg0: i32) -> (i32, i32, i32) {
    %c0_i32 = arith.constant 0 : i32
    %c0_i32_0 = arith.constant 0 : i32
    %c0_i32_1 = arith.constant 0 : i32
    %c0_i32_2 = arith.constant 0 : i32
    return %c0_i32, %c0_i32_0, %c0_i32_1 : i32, i32, i32
  }
  func.func @transform_18(%arg0: i32) -> (i32, i32) {
    %c0_i32 = arith.constant 0 : i32
    %c0_i32_0 = arith.constant 0 : i32
    %c0_i32_1 = arith.constant 0 : i32
    return %c0_i32, %c0_i32_0 : i32, i32
  }
  func.func @transform_19(%arg0: i32) -> (i32, i32) {
    %c0_i32 = arith.constant 0 : i32
    %c0_i32_0 = arith.constant 0 : i32
    %c0_i32_1 = arith.constant 0 : i32
    return %c0_i32, %c0_i32_0 : i32, i32
  }
  func.func @transform_20(%arg0: i32) -> (i32, i32, i32, i32, i32) {
    %c0_i32 = arith.constant 0 : i32
    %c0_i32_0 = arith.constant 0 : i32
    %c0_i32_1 = arith.constant 0 : i32
    %c0_i32_2 = arith.constant 0 : i32
    %c0_i32_3 = arith.constant 0 : i32
    return %arg0, %c0_i32, %c0_i32_0, %c0_i32_1, %c0_i32_2 : i32, i32, i32, i32, i32
  }
  func.func @transform_21(%arg0: i32) -> (i32, i32, i32, i32, i32) {
    %c0_i32 = arith.constant 0 : i32
    %c0_i32_0 = arith.constant 0 : i32
    %c0_i32_1 = arith.constant 0 : i32
    %c0_i32_2 = arith.constant 0 : i32
    %c0_i32_3 = arith.constant 0 : i32
    return %arg0, %c0_i32, %c0_i32_0, %c0_i32_1, %c0_i32_2 : i32, i32, i32, i32, i32
  }
  func.func @transform_22(%arg0: i32) -> (i32, i32, i32) {
    %c0_i32 = arith.constant 0 : i32
    %c0_i32_0 = arith.constant 0 : i32
    %c0_i32_1 = arith.constant 0 : i32
    return %arg0, %c0_i32, %c0_i32_0 : i32, i32, i32
  }
}

</mosaic_0001>

<bundles_post_ra>
// kernel: closed_call.25
= control target key start
LH: loop header
LB: loop body
LE: loop exit
PB: predicated region body
PF: predicated region fallthrough
CT: control target
= control target key end

     0   :  { %s7640_s0 = inlined_call_operand.<no memory space> [shape: s32[1], index: 0, kind: input, shape index: {}]   ;;  %s7641_s1 = inlined_call_operand.vmem [shape: s32[2], index: 1, kind: input, shape index: {}]   ;;  %s7642_s2 = inlined_call_operand.vmem [shape: bf16[2,2,4,32,32], index: 2, kind: input, shape index: {}, may-alias: {2,22}]   ;;  %s7643_s3 = inlined_call_operand.vmem [shape: bf16[2,2,4,32,32], index: 3, kind: input, shape index: {}, may-alias: {3,23}]   ;;  %s7644_s4 = inlined_call_operand.vmem [shape: f32[128,128], index: 4, kind: input, shape index: {}]   ;;  %s7645_s5 = inlined_call_operand.vmem [shape: f32[32,32], index: 5, kind: input, shape index: {}]   ;;  %s7646_s6 = inlined_call_operand.vmem [shape: f32[32,32], index: 6, kind: input, shape index: {}]   ;;  %s7647_s7 = inlined_call_operand.vmem [shape: f32[2,1,128], index: 7, kind: input, shape index: {}]   ;;  %s7648_s8 = inlined_call_operand.vmem [shape: bf16[2,128,128], index: 8, kind: input, shape index: {}]   ;;  %s7649_s9 = inlined_call_operand.vmem [shape: f32[2,1,128], index: 9, kind: input, shape index: {}]   ;;  %s7650_s10 = inlined_call_operand.vmem [shape: bf16[2,128,128], index: 10, kind: input, shape index: {}]   ;;  %s7651_s11 = inlined_call_operand.vmem [shape: f32[2,1,128], index: 11, kind: input, shape index: {}]   ;;  %s7652_s12 = inlined_call_operand.vmem [shape: bf16[2,128,128], index: 12, kind: input, shape index: {}]   ;;  %s7653_s13 = inlined_call_operand.vmem [shape: f32[2,1,128], index: 13, kind: input, shape index: {}]   ;;  %s7654_s14 = inlined_call_operand.vmem [shape: bf16[2,128,128], index: 14, kind: input, shape index: {}]   ;;  %s7655_s15 = inlined_call_operand.vmem [shape: f32[2,1,128], index: 15, kind: input, shape index: {}]   ;;  %s7656_s16 = inlined_call_operand.vmem [shape: bf16[2,128,256], index: 16, kind: input, shape index: {}]   ;;  %s7657_s17 = inlined_call_operand.vmem [shape: bf16[2,128,256], index: 17, kind: input, shape index: {}]   ;;  %s7658_s18 = inlined_call_operand.vmem [shape: bf16[2,256,128], index: 18, kind: input, shape index: {}]   ;;  %s7659_s19 = inlined_call_operand.vmem [shape: f32[1,128], index: 19, kind: input, shape index: {}]   ;;  %s7660_s20 = inlined_call_operand.vmem [shape: bf16[128,128], index: 20, kind: input, shape index: {}]   ;;  %s7661_s21 = inlined_call_operand.vmem [shape: f32[2,8,128], index: 21, kind: output, shape index: {0}]   ;;  %s7662_s22 = inlined_call_operand.vmem [shape: bf16[2,2,4,32,32], index: 22, kind: output, shape index: {1}, may-alias: {2,22}]   ;;  %s7663_s23 = inlined_call_operand.vmem [shape: bf16[2,2,4,32,32], index: 23, kind: output, shape index: {2}, may-alias: {3,23}]  }
   0x1   :  { %7681 = sst [smem:[#allocation9_spill]] %s7640_s0 }
   0x2   :  { %7682 = sst [smem:[#allocation10_spill]] %s7641_s1  ;;  %s7695_s24 = sld [smem:[#allocation9_spill]] }
   0x3   :  { %7683 = sst [smem:[#allocation11_spill]] %s7642_s2 }
   0x4   :  { %7684 = sst [smem:[#allocation12_spill]] %s7643_s3 }
   0x5   :  { %7685 = sst [smem:[#allocation13_spill]] %s7644_s4 }
   0x6   :  { %7686 = sst [smem:[#allocation14_spill]] %s7645_s5 }
   0x7   :  { %7687 = sst [smem:[#allocation15_spill]] %s7646_s6 }
   0x8   :  { %7688 = sst [smem:[#allocation16_spill]] %s7647_s7 }
   0x9   :  { %7689 = sst [smem:[#allocation17_spill]] %s7654_s14 }
   0xa   :  { %7690 = sst [smem:[#allocation18_spill]] %s7659_s19 }
   0xb   :  { %7691 = sst [smem:[#allocation19_spill]] %s7660_s20 }
   0xc   :  { %7692 = sst [smem:[#allocation20_spill]] %s7661_s21 }
   0xd   :  { %7693 = sst [smem:[#allocation21_spill]] %s7662_s22 }
   0xe   :  { %7694 = sst [smem:[#allocation22_spill]] %s7663_s23 }
   0xf   :  { %29 = sst [smem:[#allocation2]] %s7695_s24 }
  0x10   :  { %30 = vsyncpa [#allocation4], 0  ;;  %s6209_s25 = smov 0  }
  0x11 LB: > { %7696 = sst [smem:[#allocation6_spill]] %s6074_s25  ;;  %s6215_s5 = sadd.s32 4294967295, %s6074_s25   ;;  %s6074_s25 = sphi %s6209_s25, %s36_s25  }
  0x12   : > { %p4748_p0 = scmp.ge.s32.totalorder %s6074_s25, 1  ;;  %p570_p1 = scmp.lt.s32.totalorder %s6074_s25, 3 }
  0x13   : > { %s7697_s2 = sld [smem:[#allocation10_spill]]  ;;  %p5736_p3 = scmp.eq.s32.totalorder %s6215_s5, 0 }
  0x14   : > { %p6222_p2 = pnand %p4748_p0, %p570_p1 }
  0x16   : > { %p5732_p4 = pneg %p6222_p2 }
  0x18   : > { %p5733_p5 = pnand %p5736_p3, %p5732_p4 }
  0x19   : > { %s586_s6 = sshll.u32 %s7697_s2, 4  ;;  %s587_s6 = int_to_ptr.vmem [resolvable:$true] %s586_s6 }
  0x1a   : > { %s6049_s7 = scalar_lea.vmem %s587_s6, 16  ;;  %p6051_p7 = pneg %p5733_p5 }
  0x1b   : > { %p6050_p6 = scmp.ne.s32.totalorder %s587_s6, %s6049_s7  ;;  %p6057_p10 = scmp.lt.s32.totalorder %s587_s6, %s587_s6 }
  0x1c   : > { %p6058_p11 = scmp.lt.s32.totalorder %s6049_s7, %s6049_s7 }
  0x1d   : > { %p6052_p8 = pnand %p6051_p7, %p6050_p6 }
  0x1e   : > { %p6059_p12 = por %p6058_p11, %p6057_p10 }
  0x1f   : > { %p6053_p9 = pneg %p6052_p8 }
  0x21   : > { %p6060_p13 = pnand %p6059_p12, %p6053_p9 }
  0x23   : > { %6063 = shalt.err (!%p6060_p13)
}
  0x24   : > { %s6076_s28 = smov [#allocation3]   ;;  %666 = sbr.rel (%p6222_p2) target bundleno = 5184 (0x1440), region = 104 }
  0x25   : > { %5735 = dma.vmem_to_smem (!%p5733_p5), %s587_s6, 16, %s6076_s28, [#allocation4]  }
  0x2b   : > { %6069 = dma.done.wait (%p5736_p3), [#allocation4], 16  }
  0x2c   : > { %6071 = vsyncadd (%p5736_p3), [#allocation4], 4294967280 }
  0x2d   : > { %672 = sfence }
  0x2e   : > { %s773_s29 = sld [smem:[#allocation3 + %s6215_s5]]  ;;  %v5756_v0 = vld [vmem:[%s7648_s8] sm:$0xff]   ;;  %v6077_v1 = vmov 0.0   ;;  %v5758_v3 = vld [vmem:[%s7648_s8 + $0x8] sm:$0xff]   ;;  %v5760_v5 = vld [vmem:[%s7648_s8 + $0x10] sm:$0xff]   ;;  %vm796_vm0 = vcmask 1040384   ;;  %v780_v48 = vlaneseq }
  0x2f   : > { %5420 = vmatprep.subr.bf16.mxu0 %v6077_v1  ;;  %5440 = vmatprep.subr.bf16.mxu1 %v6077_v1  ;;  %v5757_v2 = vld [vmem:[%s7650_s10] sm:$0xff]   ;;  %v5759_v4 = vld [vmem:[%s7650_s10 + $0x8] sm:$0xff]   ;;  %s7699_s3 = sld [smem:[#allocation13_spill]]  ;;  %v5761_v6 = vld [vmem:[%s7650_s10 + $0x10] sm:$0xff]   ;;  %vm6078_vm1 = vmmov 0   ;;  %s7700_s4 = sld [smem:[#allocation16_spill]] }
  0x30   : > { %5421 = vmatpush3.bf16.msra.mxu0 %v5756_v0  ;;  %5441 = vmatpush3.bf16.msra.mxu1 %v5757_v2  ;;  %v5762_v10 = vld [vmem:[%s7648_s8 + $0x18] sm:$0xff]   ;;  %v5764_v12 = vld [vmem:[%s7648_s8 + $0x20] sm:$0xff]   ;;  %v5766_v14 = vld [vmem:[%s7648_s8 + $0x28] sm:$0xff]   ;;  %p745_p0 = scmp.lt.s32.totalorder %s6215_s5, 1  ;;  %s7702_s7 = sld [smem:[#allocation12_spill]]  ;;  %v786_v49 = vshrl.u32 %v780_v48, 7 }
  0x31   : > { %5422 = vmatprep.subr.bf16.mxu0 %v6077_v1  ;;  %5442 = vmatprep.subr.bf16.mxu1 %v6077_v1  ;;  %v5763_v11 = vld [vmem:[%s7650_s10 + $0x18] sm:$0xff]   ;;  %v5765_v13 = vld [vmem:[%s7650_s10 + $0x20] sm:$0xff]   ;;  %v5767_v15 = vld [vmem:[%s7650_s10 + $0x28] sm:$0xff]   ;;  %s7665_s1 = smov 64   ;;  %s7669_s26 = smov 96   ;;  %v6084_v56 = vmov 0  }
  0x32   : > { %5436 = vmatprep.mubr.msk.bf16.mxu0 %vm6078_vm1, %v6077_v1  ;;  %v5768_v16 = vld [vmem:[%s7648_s8 + $0x30] sm:$0xff]   ;;  %5456 = vmatprep.mubr.msk.bf16.mxu1 %vm6078_vm1, %v6077_v1  ;;  %v5770_v18 = vld [vmem:[%s7648_s8 + $0x38] sm:$0xff]   ;;  %v5772_v27 = vld [vmem:[%s7652_s12] sm:$0xff]   ;;  %s7727_s5 = smov (!%p745_p0, %s6215_s5), 1  ;;  %s7667_s6 = smov 32   ;;  %v787_v52 = vadd.s32 8, %v786_v49 }
  0x33   : > { %v5769_v17 = vld [vmem:[%s7650_s10 + $0x30] sm:$0xff]   ;;  %v5771_v19 = vld [vmem:[%s7650_s10 + $0x38] sm:$0xff]   ;;  %v5773_v29 = vld [vmem:[%s7652_s12 + $0x8] sm:$0xff]   ;;  %7701 = sst [smem:[#allocation7_spill]] %s7727_s5  ;;  %s6361_s2 = sshll.u32 %s7727_s5, 7  ;;  %v788_v53 = vadd.s32 16, %v786_v49 }
  0x34   : > { %5423 = vmatpush3.bf16.msra.mxu0 %v5758_v3  ;;  %5443 = vmatpush3.bf16.msra.mxu1 %v5759_v4  ;;  %v5774_v30 = vld [vmem:[%s7652_s12 + $0x10] sm:$0xff]   ;;  %v5775_v31 = vld [vmem:[%s7652_s12 + $0x18] sm:$0xff]   ;;  %v5776_v32 = vld [vmem:[%s7652_s12 + $0x20] sm:$0xff]   ;;  %s6387_s27 = sld [smem:[#allocation2]]  ;;  %v789_v54 = vadd.s32 24, %v786_v49  ;;  %vm1541_vm12 = vcmask 257024  }
  0x35   : > { %s6260_s0 = scalar_lea.vmem %s7699_s3, %s773_s29  ;;  %5424 = vmatprep.subr.bf16.mxu0 %v6077_v1  ;;  %5444 = vmatprep.subr.bf16.mxu1 %v6077_v1  ;;  %v794_v24 = vld [vmem:[%s7700_s4] sm:$0x1]  ;;  %v5777_v33 = vld [vmem:[%s7652_s12 + $0x28] sm:$0xff]   ;;  %v5778_v34 = vld [vmem:[%s7652_s12 + $0x30] sm:$0xff]   ;;  %s7703_s29 = sld [smem:[#allocation11_spill]]  ;;  %vm1164_vm13 = vcmask 130048  }
  0x36   : > { %v775_v7 = vld [vmem:[%s6260_s0] sm:$0x1]  ;;  %v5779_v35 = vld [vmem:[%s7652_s12 + $0x38] sm:$0xff]   ;;  %s6367_s28 = scalar_lea.vmem %s7702_s7, %s6361_s2  ;;  %s7674_s7 = smov 112   ;;  %vm1634_vm14 = vcmask 261120  }
  0x37   : > { %v795_v8 = vmul.f32 %v775_v7, %v775_v7  ;;  %v928_v36 = vld [vmem:[%s7651_s11] sm:$0x1]  ;;  %s7708_s23 = sld [smem:[#allocation22_spill]]  ;;  %s7710_s21 = sld [smem:[#allocation15_spill]] }
  0x38   : > { %5425 = vmatpush3.bf16.msra.mxu0 %v5760_v5  ;;  %5445 = vmatpush3.bf16.msra.mxu1 %v5761_v6  ;;  %v823_v42 = vld [vmem:[%s7649_s9] sm:$0x1]  ;;  %v6422_v6 = vsub.s32 0, %v786_v49  ;;  %s7711_s22 = sld [smem:[#allocation21_spill]]  ;;  %s7716_s14 = sld [smem:[#allocation17_spill]] }
  0x39   : > { %v797_v9 = vsel %vm796_vm0, %v795_v8, 0.0  ;;  %5426 = vmatprep.subr.bf16.mxu0 %v6077_v1  ;;  %5446 = vmatprep.subr.bf16.mxu1 %v6077_v1  ;;  %v1033_v55 = vld [vmem:[%s7653_s13] sm:$0x1]  ;;  %s7723_s3 = sld [smem:[#allocation18_spill]] }
  0x3a   : > { %798 = vadd.xlane.f32.xlu0 %v797_v9  ;;  %v6395_v51 = vstv %s6387_s27  ;;  %v5780_v8 = vld [vmem:[%s6367_s28] sm:$0xff]   ;;  %v5781_v9 = vld [vmem:[%s6367_s28 + $0x8] sm:$0xff]  }
  0x3b   : > { %s6401_s24 = scalar_lea.vmem %s7703_s29, %s6361_s2  ;;  %vm790_vm2 = vcmp.eq.s32.totalorder %v786_v49, %v6395_v51  ;;  %vm791_vm3 = vcmp.eq.s32.totalorder %v787_v52, %v6395_v51  ;;  %vm792_vm4 = vcmp.eq.s32.totalorder %v788_v53, %v6395_v51  ;;  %vm793_vm6 = vcmp.eq.s32.totalorder %v789_v54, %v6395_v51 }
  0x3c   : > { %5427 = vmatpush3.bf16.msra.mxu0 %v5762_v10  ;;  %5447 = vmatpush3.bf16.msra.mxu1 %v5763_v11  ;;  %vm1313_vm5 = vmpackc.low %vm790_vm2, %vm790_vm2  ;;  %v5783_v52 = vld [vmem:[%s6401_s24 + $0x8] sm:$0xff]   ;;  %v5784_v54 = vld [vmem:[%s6401_s24 + $0x10] sm:$0xff]   ;;  %vm1831_vm2 = vcmask 253952  }
  0x3d   : > { %5428 = vmatprep.subr.bf16.mxu0 %v6077_v1  ;;  %5448 = vmatprep.subr.bf16.mxu1 %v6077_v1  ;;  %vm1314_vm7 = vmpackc.low %vm791_vm3, %vm791_vm3  ;;  %v1317_v57 = vsel %vm1313_vm5, 65537, %v6084_v56  ;;  %s6461_s30 = scalar_lea.vmem %s7708_s23, %s6361_s2  ;;  %s6509_s19 = scalar_lea.vmem %s7710_s21, %s6387_s27  ;;  %vm2065_vm3 = vcmask 523264  }
  0x3e   : > { %vm1315_vm8 = vmpackc.low %vm792_vm4, %vm792_vm4  ;;  %v1318_v58 = vsel %vm1314_vm7, 65537, %v6084_v56  ;;  %s6560_s25 = scalar_lea.vmem %s7711_s22, %s6361_s2  ;;  %s7713_s2 = smov 96   ;;  %vm2067_vm4 = vcmask 785408  }
  0x3f   : > { %vm1316_vm9 = vmpackc.low %vm793_vm6, %vm793_vm6  ;;  %v1319_v59 = vsel %vm1315_vm8, 65537, %v6084_v56  ;;  %v4786_v2 = vcombine.low %v1317_v57, %v1318_v58  ;;  %v6541_v57 = vld [vmem:[%s6401_s24 + $0x20] sm:$0xff]   ;;  %7712 = sst [smem:[#allocation8_spill]] %s6560_s25  ;;  %s7717_s21 = smov 112  }
  0x40   : > { %5429 = vmatpush3.bf16.msra.mxu0 %v5764_v12  ;;  %5449 = vmatpush3.bf16.msra.mxu1 %v5765_v13  ;;  %v1320_v60 = vsel %vm1316_vm9, 65537, %v6084_v56  ;;  %v6436_v13 = vld [vmem:[%s6367_s28 + $0x10] sm:$0xff]   ;;  %s7718_s23 = smov 16  }
  0x41   : > { %5430 = vmatprep.subr.bf16.mxu0 %v6077_v1  ;;  %5450 = vmatprep.subr.bf16.mxu1 %v6077_v1  ;;  %v4787_v3 = vcombine.low %v1319_v59, %v1320_v60  ;;  %vm6426_vm10 = vcmp.ne.s16.totalorder %v4786_v2, 0  ;;  %v6548_v60 = vld [vmem:[%s6401_s24 + $0x28] sm:$0xff]  }
  0x43   : > { %vm6430_vm11 = vcmp.ne.s16.totalorder %v4787_v3, 0 }
  0x44   : > { %5431 = vmatpush3.bf16.msra.mxu0 %v5766_v14  ;;  %5451 = vmatpush3.bf16.msra.mxu1 %v5767_v15  ;;  %v6439_v14 = vld [vmem:[%s6367_s28 + $0x18] sm:$0xff]   ;;  %v6442_v15 = vld [vmem:[%s6367_s28 + $0x30] sm:$0xff]  }
  0x45   : > { %5432 = vmatprep.subr.bf16.mxu0 %v6077_v1  ;;  %5452 = vmatprep.subr.bf16.mxu1 %v6077_v1 }
  0x48   : > { %5433 = vmatpush3.bf16.msra.mxu0 %v5768_v16  ;;  %5453 = vmatpush3.bf16.msra.mxu1 %v5769_v17 }
  0x49   : > { %5434 = vmatprep.subr.bf16.mxu0 %v6077_v1  ;;  %5454 = vmatprep.subr.bf16.mxu1 %v6077_v1 }
  0x4c   : > { %5435 = vmatpush3.bf16.msra.mxu0 %v5770_v18  ;;  %5455 = vmatpush3.bf16.msra.mxu1 %v5771_v19  ;;  %v6449_v18 = vld [vmem:[%s6367_s28 + $0x38] sm:$0xff]   ;;  %v6452_v19 = vld [vmem:[%s6367_s28 + $0x20] sm:$0xff]  }
  0x4d   : > { %5460 = vmatprep.subr.bf16.mxu0 %v6077_v1  ;;  %5480 = vmatprep.subr.bf16.mxu1 %v6077_v1 }
  0xc7   : > { %v799_v20 = vpop.xlane.xlu0 %798 }
  0xc8   : > { %v801_v21 = vmul.f32 0.0078125, %v799_v20  ;;  %v6455_v20 = vld [vmem:[%s6367_s28 + $0x28] sm:$0xff]  }
  0xca   : > { %v802_v22 = vadd.f32 1e-06, %v801_v21 }
  0xcc   : > { %5988 = vrsqrt.f32 %v802_v22 }
  0xd6   : > { %v5989_v23 = vpop.eup %5988 }
  0xd7   : > { %v804_v25 = vmul.f32 %v5989_v23, %v775_v7 }
  0xd9   : > { %v805_v26 = vmul.f32 %v804_v25, %v794_v24 }
  0xdb   : > { %v822_v28 = vpack.c.bf16 %v805_v26, %v805_v26 }
  0xdd   : > { %5437 = vmatmul.mubr.bf16.vlgmr.msra.gmra.mrb[0].mxu0 %v822_v28  ;;  %5457 = vmatmul.mubr.bf16.vlgmr.msra.gmra.mrb[0].mxu1 %v822_v28 }
  0xde   : > { %5461 = vmatpush3.bf16.msra.mxu0 %v5772_v27  ;;  %5476 = vmatprep.mubr.msk.bf16.mxu0 %vm6078_vm1, %v6077_v1 }
  0xdf   : > { %5462 = vmatprep.subr.bf16.mxu0 %v6077_v1  ;;  %5484 = vmatprep.mubr.msk.bf16.mxu1 %vm6078_vm1, %v6077_v1 }
  0xe2   : > { %5463 = vmatpush3.bf16.msra.mxu0 %v5773_v29 }
  0xe3   : > { %5464 = vmatprep.subr.bf16.mxu0 %v6077_v1 }
  0xe6   : > { %5465 = vmatpush3.bf16.msra.mxu0 %v5774_v30 }
  0xe7   : > { %5466 = vmatprep.subr.bf16.mxu0 %v6077_v1 }
  0xea   : > { %5467 = vmatpush3.bf16.msra.mxu0 %v5775_v31 }
  0xeb   : > { %5468 = vmatprep.subr.bf16.mxu0 %v6077_v1 }
  0xee   : > { %5469 = vmatpush3.bf16.msra.mxu0 %v5776_v32 }
  0xef   : > { %5470 = vmatprep.subr.bf16.mxu0 %v6077_v1 }
  0xf2   : > { %5471 = vmatpush3.bf16.msra.mxu0 %v5777_v33 }
  0xf3   : > { %5472 = vmatprep.subr.bf16.mxu0 %v6077_v1 }
  0xf6   : > { %5473 = vmatpush3.bf16.msra.mxu0 %v5778_v34 }
  0xf7   : > { %5474 = vmatprep.subr.bf16.mxu0 %v6077_v1 }
  0xfa   : > { %5475 = vmatpush3.bf16.msra.mxu0 %v5779_v35 }
  0xfb   : > { %5512 = vmatprep.subr.bf16.mxu0 %v6077_v1 }
  0xfd   : > { %5477 = vmatmul.mubr.bf16.vlgmr.msra.gmra.mrb[4].mxu0 %v822_v28 }
  0xfe   : > { %5516 = vmatprep.mubr.msk.bf16.mxu0 %vm6078_vm1, %v6077_v1 }
 0x1b0   : > { %v906_v37 = vpop.f32.mrb[0].mxu0  ;;  %v1011_v38 = vpop.f32.mrb[0].mxu1 }
 0x1b1   : > { %v6372_v39 = vadd.f32 %v1011_v38, %v928_v36  ;;  %v5438_v40 = vpop.f32.mrb[1].mxu0  ;;  %v5458_v41 = vpop.f32.mrb[1].mxu1  ;;  %v6381_v47 = vadd.f32 %v906_v37, %v823_v42  ;;  %v6519_v37 = vld [vmem:[%s6509_s19] sm:$0x1] }
 0x1b2   : > { %v909_v43 = vpop.f32.mrb[2].mxu0  ;;  %v1014_v44 = vpop.f32.mrb[2].mxu1 }
 0x1b3   : > { %1189 = vrot.lane.b32.xlu1 %v6372_v39, %s7665_s1  ;;  %1186 = vrot.lane.b32.xlu0 %v6372_v39, %s7669_s26  ;;  %v5439_v45 = vpop.f32.mrb[3].mxu0  ;;  %v5459_v46 = vpop.f32.mrb[3].mxu1  ;;  %v1195_v50 = vsub.f32 0.0, %v6372_v39  ;;  %v1132_v29 = vsub.f32 0.0, %v6381_v47 }
 0x1b7   : > { %1123 = vrot.lane.b32.xlu1 %v6381_v47, %s7669_s26 }
 0x1bb   : > { %1192 = vrot.lane.b32.xlu1 %v6372_v39, %s7667_s6 }
 0x1bf   : > { %1126 = vrot.lane.b32.xlu1 %v6381_v47, %s7665_s1  ;;  %s7672_s1 = smov 16  }
 0x1c3   : > { %1203 = vrot.lane.b32.xlu1 %v1195_v50, %s7674_s7  ;;  %v5782_v50 = vld [vmem:[%s6401_s24] sm:$0xff]  }
 0x1c7   : > { %1215 = vrot.lane.b32.xlu1 %v6372_v39, %s7672_s1 }
 0x1cb   : > { %1129 = vrot.lane.b32.xlu1 %v6381_v47, %s7667_s6  ;;  %s7709_s6 = sld [smem:[#allocation14_spill]] }
 0x1d0   : > { %v1116_v61 = vpop.f32.mrb[4].mxu0 }
 0x1d1   : > { %v6418_v62 = vadd.f32 %v1116_v61, %v1033_v55  ;;  %v5478_v63 = vpop.f32.mrb[5].mxu0  ;;  %s6503_s26 = scalar_lea.vmem %s7709_s6, %s6387_s27  ;;  %v5785_v55 = vld [vmem:[%s6401_s24 + $0x18] sm:$0xff]   ;;  %v6551_v61 = vld [vmem:[%s6401_s24 + $0x30] sm:$0xff]   ;;  %s7714_s6 = smov 32  }
 0x1d2   : > { %v1119_v0 = vpop.f32.mrb[6].mxu0  ;;  %v6515_v36 = vld [vmem:[%s6503_s26] sm:$0x1]  ;;  %v6554_v63 = vld [vmem:[%s6401_s24 + $0x38] sm:$0xff]   ;;  %s7715_s27 = smov 64  }
 0x1d3   : > { %v1257_v4 = vpack.c.bf16 %v6418_v62, %v6418_v62  ;;  %v5479_v5 = vpop.f32.mrb[7].mxu0  ;;  %v1231_v42 = vmul.f32 %v6372_v39, %v6515_v36 }
 0x1d5   : > { %v1402_v7 = vpack.i.b16 %v1257_v4, %v1257_v4 }
 0x1d7   : > { %v1407_v12 = vrot.slane %v1402_v7, %v6422_v6 }
 0x1d9   : > { %v1477_v16 = vsel %vm6426_vm10, %v1407_v12, %v5780_v8  ;;  %v1478_v17 = vsel %vm6430_vm11, %v1407_v12, %v5781_v9 }
 0x1da   : > { %v4820_v21 = vcombine.low %v1477_v16, %v1477_v16  ;;  %v4821_v22 = vcombine.high %v1477_v16, %v1477_v16  ;;  %5513 = vmatpush3.bf16.msra.mxu0 %v1477_v16  ;;  %v4822_v23 = vcombine.low %v1478_v17, %v1478_v17  ;;  %v4823_v24 = vcombine.high %v1478_v17, %v1478_v17 }
 0x1db   : > { %5514 = vmatprep.subr.bf16.mxu0 %v6077_v1 }
 0x1dc   : > { %1614 = vst.msk [vmem:[%s6461_s30] sm:$0xf] %vm1541_vm12, %v4820_v21  ;;  %1615 = vst.msk [vmem:[%s6461_s30 + $0x4] sm:$0xf] %vm1541_vm12, %v4821_v22 }
 0x1dd   : > { %1616 = vst.msk [vmem:[%s6461_s30 + $0x8] sm:$0xf] %vm1541_vm12, %v4822_v23  ;;  %1617 = vst.msk [vmem:[%s6461_s30 + $0xc] sm:$0xf] %vm1541_vm12, %v4823_v24 }
 0x1de   : > { %5515 = vmatpush3.bf16.msra.mxu0 %v1478_v17 }
 0x1df   : > { %5528 = vmatprep.subr.bf16.mxu0 %v6077_v1 }
 0x225   : > { %v6473_v25 = vpop.permute.xlu1 %1189  ;;  %v6475_v26 = vpop.permute.xlu0 %1186 }
 0x226   : > { %v1196_v27 = vsub.f32 0.0, %v6475_v26  ;;  %1217 = vrot.lane.b32.xlu1 %v6475_v26, %s7672_s1  ;;  %v1197_v31 = vsub.f32 0.0, %v6473_v25  ;;  %v1232_v16 = vmul.f32 %v6475_v26, %v6515_v36  ;;  %v1233_v26 = vmul.f32 %v6473_v25, %v6515_v36 }
 0x228   : > { %1205 = vrot.lane.b32.xlu0 %v1196_v27, %s7674_s7 }
 0x229   : > { %v6481_v28 = vpop.permute.xlu1 %1123 }
 0x22a   : > { %1152 = vrot.lane.b32.xlu1 %v6381_v47, %s7672_s1  ;;  %v1133_v33 = vsub.f32 0.0, %v6481_v28 }
 0x22c   : > { %1140 = vrot.lane.b32.xlu0 %v1132_v29, %s7674_s7  ;;  %v1169_v29 = vmul.f32 %v6381_v47, %v6515_v36 }
 0x22d   : > { %v6487_v30 = vpop.permute.xlu1 %1192 }
 0x22e   : > { %1219 = vrot.lane.b32.xlu1 %v6473_v25, %s7672_s1  ;;  %v1198_v35 = vsub.f32 0.0, %v6487_v30 }
 0x230   : > { %1207 = vrot.lane.b32.xlu0 %v1197_v31, %s7674_s7 }
 0x231   : > { %v6493_v32 = vpop.permute.xlu1 %1126 }
 0x232   : > { %1154 = vrot.lane.b32.xlu1 %v6481_v28, %s7672_s1  ;;  %v1134_v40 = vsub.f32 0.0, %v6493_v32 }
 0x234   : > { %1142 = vrot.lane.b32.xlu0 %v1133_v33, %s7674_s7 }
 0x235   : > { %v1204_v34 = vpop.permute.xlu1 %1203 }
 0x236   : > { %1221 = vrot.lane.b32.xlu1 %v6487_v30, %s7672_s1 }
 0x238   : > { %1209 = vrot.lane.b32.xlu0 %v1198_v35, %s7674_s7 }
 0x239   : > { %v1216_v38 = vpop.permute.xlu1 %1215 }
 0x23a   : > { %v1227_v41 = vsel %vm1164_vm13, %v1204_v34, %v1216_v38  ;;  %1156 = vrot.lane.b32.xlu1 %v6493_v32, %s7672_s1 }
 0x23b   : > { %v1235_v43 = vmul.f32 %v1227_v41, %v6519_v37 }
 0x23c   : > { %1144 = vrot.lane.b32.xlu0 %v1134_v40, %s7674_s7 }
 0x23d   : > { %v1239_v44 = vadd.f32 %v1235_v43, %v1231_v42  ;;  %v6529_v45 = vpop.permute.xlu1 %1129 }
 0x23e   : > { %v1135_v46 = vsub.f32 0.0, %v6529_v45  ;;  %1158 = vrot.lane.b32.xlu1 %v6529_v45, %s7672_s1 }
 0x23f   : > { %v1243_v49 = vpack.c.bf16 %v1239_v44, %v1239_v44 }
 0x240   : > { %1146 = vrot.lane.b32.xlu0 %v1135_v46, %s7674_s7 }
 0x241   : > { %v1286_v39 = vpack.i.b16 %v1243_v49, %v1243_v49 }
 0x243   : > { %v1291_v53 = vrot.slane %v1286_v39, %v6422_v6 }
 0x245   : > { %v1377_v58 = vsel %vm6426_vm10, %v1291_v53, %v5782_v50  ;;  %v1378_v59 = vsel %vm6430_vm11, %v1291_v53, %v5783_v52 }
 0x246   : > { %v4804_v0 = vcombine.low %v1377_v58, %v1377_v58  ;;  %v4805_v2 = vcombine.high %v1377_v58, %v1377_v58  ;;  %v1639_v3 = vsel %vm1634_vm14, %v1377_v58, 0  ;;  %v4806_v4 = vcombine.low %v1378_v59, %v1378_v59 }
 0x247   : > { %5481 = vmatpush3.bf16.xpose.msra.mxu1 %v1639_v3  ;;  %v4807_v5 = vcombine.high %v1378_v59, %v1378_v59  ;;  %v1642_v7 = vsel %vm1634_vm14, %v1378_v59, 0 }
 0x248   : > { %5482 = vmatprep.subr.bf16.mxu1 %v6077_v1  ;;  %1542 = vst.msk [vmem:[%s6560_s25] sm:$0xf] %vm1541_vm12, %v4804_v0  ;;  %1543 = vst.msk [vmem:[%s6560_s25 + $0x4] sm:$0xf] %vm1541_vm12, %v4805_v2 }
 0x249   : > { %1544 = vst.msk [vmem:[%s6560_s25 + $0x8] sm:$0xf] %vm1541_vm12, %v4806_v4  ;;  %1545 = vst.msk [vmem:[%s6560_s25 + $0xc] sm:$0xf] %vm1541_vm12, %v4807_v5 }
 0x24f   : > { %5483 = vmatpush3.bf16.xpose.msra.mxu1 %v1642_v7  ;;  %v1170_v7 = vmul.f32 %v6481_v28, %v6515_v36 }
 0x250   : > { %5488 = vmatprep.subr.bf16.mxu1 %v6077_v1 }
 0x298   : > { %v1218_v8 = vpop.permute.xlu1 %1217 }
 0x29a   : > { %v1206_v9 = vpop.permute.xlu0 %1205 }
 0x29b   : > { %v1228_v12 = vsel %vm1164_vm13, %v1206_v9, %v1218_v8  ;;  %v1234_v8 = vmul.f32 %v6487_v30, %v6515_v36 }
 0x29c   : > { %v1236_v17 = vmul.f32 %v1228_v12, %v6519_v37  ;;  %v1153_v21 = vpop.permute.xlu1 %1152 }
 0x29e   : > { %v1240_v22 = vadd.f32 %v1236_v17, %v1232_v16  ;;  %v1141_v23 = vpop.permute.xlu0 %1140 }
 0x29f   : > { %v1165_v24 = vsel %vm1164_vm13, %v1141_v23, %v1153_v21 }
 0x2a0   : > { %v1244_v27 = vpack.c.bf16 %v1240_v22, %v1240_v22  ;;  %v1173_v31 = vmul.f32 %v1165_v24, %v6519_v37  ;;  %v1220_v33 = vpop.permute.xlu1 %1219 }
 0x2a2   : > { %v1293_v34 = vpack.i.b16 %v1244_v27, %v1244_v27  ;;  %v1177_v35 = vadd.f32 %v1173_v31, %v1169_v29  ;;  %v1208_v38 = vpop.permute.xlu0 %1207 }
 0x2a3   : > { %v1229_v40 = vsel %vm1164_vm13, %v1208_v38, %v1220_v33 }
 0x2a4   : > { %v1298_v41 = vrot.slane %v1293_v34, %v6422_v6  ;;  %v1181_v42 = vmul.f32 0.17677669, %v1177_v35  ;;  %v1237_v43 = vmul.f32 %v1229_v40, %v6519_v37  ;;  %v1155_v44 = vpop.permute.xlu1 %1154 }
 0x2a6   : > { %v1630_v46 = vpack.c.bf16 %v1181_v42, %v1181_v42  ;;  %v1241_v47 = vadd.f32 %v1237_v43, %v1233_v26  ;;  %v1143_v49 = vpop.permute.xlu0 %1142  ;;  %v1379_v39 = vsel %vm6426_vm10, %v1298_v41, %v5784_v54  ;;  %v1380_v50 = vsel %vm6430_vm11, %v1298_v41, %v5785_v55 }
 0x2a7   : > { %v1166_v52 = vsel %vm1164_vm13, %v1143_v49, %v1155_v44  ;;  %v4808_v25 = vcombine.low %v1379_v39, %v1379_v39  ;;  %v4809_v53 = vcombine.high %v1379_v39, %v1379_v39  ;;  %v1688_v58 = vsel %vm1634_vm14, %v1379_v39, 0 }
 0x2a8   : > { %v1245_v59 = vpack.c.bf16 %v1241_v47, %v1241_v47  ;;  %5485 = vmatmul.mubr.msk.bf16.vlgmr.msra.gmra.mrb[4].mxu1 %vm1634_vm14, %v1630_v46  ;;  %v4810_v0 = vcombine.low %v1380_v50, %v1380_v50  ;;  %v4811_v2 = vcombine.high %v1380_v50, %v1380_v50  ;;  %v1174_v55 = vmul.f32 %v1166_v52, %v6519_v37  ;;  %v1222_v3 = vpop.permute.xlu1 %1221 }
 0x2a9   : > { %5489 = vmatpush3.bf16.xpose.msra.mxu1 %v1688_v58  ;;  %5492 = vmatprep.mubr.msk.bf16.mxu1 %vm6078_vm1, %v6077_v1  ;;  %1546 = vst.msk [vmem:[%s6560_s25 + $0x10] sm:$0xf] %vm1541_vm12, %v4808_v25  ;;  %1547 = vst.msk [vmem:[%s6560_s25 + $0x14] sm:$0xf] %vm1541_vm12, %v4809_v53  ;;  %v1691_v30 = vsel %vm1634_vm14, %v1380_v50, 0 }
 0x2aa   : > { %v1300_v54 = vpack.i.b16 %v1245_v59, %v1245_v59  ;;  %v1210_v4 = vpop.permute.xlu0 %1209  ;;  %5490 = vmatprep.subr.bf16.mxu1 %v6077_v1  ;;  %1548 = vst.msk [vmem:[%s6560_s25 + $0x18] sm:$0xf] %vm1541_vm12, %v4810_v0  ;;  %1549 = vst.msk [vmem:[%s6560_s25 + $0x1c] sm:$0xf] %vm1541_vm12, %v4811_v2  ;;  %v1178_v16 = vadd.f32 %v1174_v55, %v1170_v7  ;;  %v1172_v59 = vmul.f32 %v6529_v45, %v6515_v36 }
 0x2ab   : > { %v1230_v5 = vsel %vm1164_vm13, %v1210_v4, %v1222_v3  ;;  %v6085_v3 = vmov -1e+09  }
 0x2ac   : > { %v1305_v9 = vrot.slane %v1300_v54, %v6422_v6  ;;  %v1238_v12 = vmul.f32 %v1230_v5, %v6519_v37  ;;  %v1182_v31 = vmul.f32 0.17677669, %v1178_v16  ;;  %v1157_v35 = vpop.permute.xlu1 %1156 }
 0x2ae   : > { %v1242_v17 = vadd.f32 %v1238_v12, %v1234_v8  ;;  %v1381_v21 = vsel %vm6426_vm10, %v1305_v9, %v6541_v57  ;;  %v1382_v28 = vsel %vm6430_vm11, %v1305_v9, %v6548_v60  ;;  %v1145_v60 = vpop.permute.xlu0 %1144  ;;  %v1631_v34 = vpack.c.bf16 %v1182_v31, %v1182_v31 }
 0x2af   : > { %v4812_v22 = vcombine.low %v1381_v21, %v1381_v21  ;;  %v4813_v23 = vcombine.high %v1381_v21, %v1381_v21  ;;  %v4814_v27 = vcombine.low %v1382_v28, %v1382_v28  ;;  %v4815_v29 = vcombine.high %v1382_v28, %v1382_v28 }
 0x2b0   : > { %v1246_v24 = vpack.c.bf16 %v1242_v17, %v1242_v17  ;;  %v1167_v26 = vsel %vm1164_vm13, %v1145_v60, %v1157_v35  ;;  %v1737_v44 = vsel %vm1634_vm14, %v1381_v21, 0  ;;  %v1740_v49 = vsel %vm1634_vm14, %v1382_v28, 0  ;;  %v1159_v25 = vpop.permute.xlu1 %1158 }
 0x2b1   : > { %5491 = vmatpush3.bf16.xpose.msra.mxu1 %v1691_v30  ;;  %1550 = vst.msk [vmem:[%s6560_s25 + $0x20] sm:$0xf] %vm1541_vm12, %v4812_v22  ;;  %1551 = vst.msk [vmem:[%s6560_s25 + $0x24] sm:$0xf] %vm1541_vm12, %v4813_v23 }
 0x2b2   : > { %v1307_v33 = vpack.i.b16 %v1246_v24, %v1246_v24  ;;  %5496 = vmatprep.subr.bf16.mxu1 %v6077_v1  ;;  %1552 = vst.msk [vmem:[%s6560_s25 + $0x28] sm:$0xf] %vm1541_vm12, %v4814_v27  ;;  %1553 = vst.msk [vmem:[%s6560_s25 + $0x2c] sm:$0xf] %vm1541_vm12, %v4815_v29  ;;  %v1147_v50 = vpop.permute.xlu0 %1146 }
 0x2b3   : > { %v1168_v53 = vsel %vm1164_vm13, %v1147_v50, %v1159_v25 }
 0x2b4   : > { %v1312_v57 = vrot.slane %v1307_v33, %v6422_v6 }
 0x2b6   : > { %v1383_v38 = vsel %vm6426_vm10, %v1312_v57, %v6551_v61  ;;  %v1384_v40 = vsel %vm6430_vm11, %v1312_v57, %v6554_v63  ;;  %v1175_v61 = vmul.f32 %v1167_v26, %v6519_v37  ;;  %v1171_v63 = vmul.f32 %v6493_v32, %v6515_v36 }
 0x2b7   : > { %v4816_v41 = vcombine.low %v1383_v38, %v1383_v38  ;;  %v4817_v42 = vcombine.high %v1383_v38, %v1383_v38  ;;  %v4818_v43 = vcombine.low %v1384_v40, %v1384_v40  ;;  %v4819_v46 = vcombine.high %v1384_v40, %v1384_v40 }
 0x2b8   : > { %5493 = vmatmul.mubr.msk.bf16.vlgmr.msra.gmra.mrb[8].mxu1 %vm1634_vm14, %v1631_v34  ;;  %v1179_v47 = vadd.f32 %v1175_v61, %v1171_v63  ;;  %v1786_v58 = vsel %vm1634_vm14, %v1383_v38, 0  ;;  %v1176_v32 = vmul.f32 %v1168_v53, %v6519_v37  ;;  %v1789_v2 = vsel %vm1634_vm14, %v1384_v40, 0 }
 0x2b9   : > { %5497 = vmatpush3.bf16.xpose.msra.mxu1 %v1737_v44  ;;  %5500 = vmatprep.mubr.msk.bf16.mxu1 %vm6078_vm1, %v6077_v1  ;;  %1554 = vst.msk [vmem:[%s6560_s25 + $0x30] sm:$0xf] %vm1541_vm12, %v4816_v41  ;;  %1555 = vst.msk [vmem:[%s6560_s25 + $0x34] sm:$0xf] %vm1541_vm12, %v4817_v42  ;;  %v781_v37 = vand.u32 127, %v780_v48 }
 0x2ba   : > { %1556 = vst.msk [vmem:[%s6560_s25 + $0x38] sm:$0xf] %vm1541_vm12, %v4818_v43  ;;  %5498 = vmatprep.subr.bf16.mxu1 %v6077_v1  ;;  %1557 = vst.msk [vmem:[%s6560_s25 + $0x3c] sm:$0xf] %vm1541_vm12, %v4819_v46  ;;  %v1183_v39 = vmul.f32 0.17677669, %v1179_v47  ;;  %v1180_v0 = vadd.f32 %v1176_v32, %v1172_v59 }
 0x2bb   : > { %vm783_vm15 = vcmp.le.s32.totalorder %v781_v37, %v6395_v51  ;;  %s7722_s25 = sld [smem:[#allocation7_spill]] }
 0x2bc   : > { %v1632_v52 = vpack.c.bf16 %v1183_v39, %v1183_v39  ;;  %v1184_v54 = vmul.f32 0.17677669, %v1180_v0  ;;  %v6671_v4 = vsel %vm783_vm15, 0.0, %v6085_v3 }
 0x2be   : > { %v1633_v55 = vpack.c.bf16 %v1184_v54, %v1184_v54 }
 0x2c1   : > { %5499 = vmatpush3.bf16.xpose.msra.mxu1 %v1740_v49 }
 0x2c2   : > { %5504 = vmatprep.subr.bf16.mxu1 %v6077_v1 }
 0x2c8   : > { %5501 = vmatmul.mubr.msk.bf16.vlgmr.msra.gmra.mrb[12].mxu1 %vm1634_vm14, %v1632_v52 }
 0x2c9   : > { %5505 = vmatpush3.bf16.xpose.msra.mxu1 %v1786_v58  ;;  %5508 = vmatprep.mubr.msk.bf16.mxu1 %vm6078_vm1, %v6077_v1 }
 0x2ca   : > { %5506 = vmatprep.subr.bf16.mxu1 %v6077_v1 }
 0x2d1   : > { %5507 = vmatpush3.bf16.xpose.msra.mxu1 %v1789_v2 }
 0x2d2   : > { %5520 = vmatprep.subr.bf16.mxu1 %v6077_v1 }
 0x2d8   : > { %5509 = vmatmul.mubr.msk.bf16.vlgmr.msra.gmra.mrb[16].mxu1 %vm1634_vm14, %v1633_v55 }
 0x2d9   : > { %5524 = vmatprep.mubr.msk.bf16.mxu1 %vm6078_vm1, %v6077_v1 }
 0x37b   : > { %v1678_v36 = vpop.f32.mrb[4].mxu1 }
 0x37c   : > { %v1679_v45 = vadd.f32 %v1678_v36, %v6671_v4  ;;  %v5486_v5 = vpop.f32.mrb[5].mxu1 }
 0x37d   : > { %v1681_v7 = vpop.f32.mrb[6].mxu1 }
 0x37e   : > { %v5487_v8 = vpop.f32.mrb[7].mxu1  ;;  %v1832_v9 = vsel %vm1831_vm2, %v1679_v45, -inf }
 0x37f   : > { %1833 = vmax.xlane.f32.xlu0 %v1832_v9 }
 0x38b   : > { %v1727_v12 = vpop.f32.mrb[8].mxu1 }
 0x38c   : > { %v1728_v16 = vadd.f32 %v1727_v12, %v6671_v4  ;;  %v5494_v17 = vpop.f32.mrb[9].mxu1 }
 0x38d   : > { %v1730_v48 = vpop.f32.mrb[10].mxu1 }
 0x38e   : > { %v5495_v21 = vpop.f32.mrb[11].mxu1  ;;  %v1835_v51 = vsel %vm1831_vm2, %v1728_v16, -inf }
 0x38f   : > { %1836 = vmax.xlane.f32.xlu1 %v1835_v51 }
 0x39b   : > { %v1776_v28 = vpop.f32.mrb[12].mxu1 }
 0x39c   : > { %v1777_v22 = vadd.f32 %v1776_v28, %v6671_v4  ;;  %v5502_v23 = vpop.f32.mrb[13].mxu1 }
 0x39d   : > { %v1779_v24 = vpop.f32.mrb[14].mxu1 }
 0x39e   : > { %v5503_v30 = vpop.f32.mrb[15].mxu1  ;;  %v1838_v27 = vsel %vm1831_vm2, %v1777_v22, -inf }
 0x39f   : > { %1839 = vmax.xlane.f32.xlu0 %v1838_v27 }
 0x3a0   : > { %1248 = vrot.lane.b32.xlu1 %v6418_v62, %s7713_s2 }
 0x3ab   : > { %v1825_v29 = vpop.f32.mrb[16].mxu1 }
 0x3ac   : > { %v1826_v31 = vadd.f32 %v1825_v29, %v6671_v4  ;;  %v5510_v33 = vpop.f32.mrb[17].mxu1 }
 0x3ad   : > { %v1828_v57 = vpop.f32.mrb[18].mxu1 }
 0x3ae   : > { %v5511_v60 = vpop.f32.mrb[19].mxu1  ;;  %v1841_v34 = vsel %vm1831_vm2, %v1826_v31, -inf }
 0x3af   : > { %1842 = vmax.xlane.f32.xlu0 %v1841_v34 }
 0x40c   : > { %v1834_v35 = vpop.xlane.xlu0 %1833 }
 0x40d   : > { %v1844_v38 = vsub.f32 %v1679_v45, %v1834_v35 }
 0x40f   : > { %v1848_v40 = vmul.f32 1.442695, %v1844_v38 }
 0x411   : > { %5990 = vpow2.f32 %v1848_v40 }
 0x41b   : > { %v5991_v26 = vpop.eup %5990 }
 0x41c   : > { %v1837_v41 = vpop.xlane.xlu1 %1836  ;;  %v1856_v42 = vsel %vm1831_vm2, %v5991_v26, 0.0 }
 0x41d   : > { %v1845_v43 = vsub.f32 %v1728_v16, %v1837_v41  ;;  %1857 = vadd.xlane.f32.xlu1 %v1856_v42 }
 0x41f   : > { %v1850_v44 = vmul.f32 1.442695, %v1845_v43 }
 0x420   : > { %v1249_v46 = vpop.permute.xlu1 %1248 }
 0x421   : > { %5992 = vpow2.f32 %v1850_v44  ;;  %v1258_v61 = vpack.c.bf16 %v1249_v46, %v1249_v46 }
 0x423   : > { %v1409_v63 = vpack.i.b16 %v1258_v61, %v1258_v61 }
 0x425   : > { %v1414_v47 = vrot.slane %v1409_v63, %v6422_v6 }
 0x427   : > { %v1479_v49 = vsel %vm6426_vm10, %v1414_v47, %v6436_v13  ;;  %v1480_v39 = vsel %vm6430_vm11, %v1414_v47, %v6439_v14 }
 0x428   : > { %v4824_v50 = vcombine.low %v1479_v49, %v1479_v49  ;;  %v4825_v52 = vcombine.high %v1479_v49, %v1479_v49  ;;  %5521 = vmatpush3.bf16.msra.mxu1 %v1479_v49  ;;  %v4826_v25 = vcombine.low %v1480_v39, %v1480_v39  ;;  %v4827_v53 = vcombine.high %v1480_v39, %v1480_v39  ;;  %v5796_v49 = vld [vmem:[%s7716_s14] sm:$0xff]  }
 0x429   : > { %5522 = vmatprep.subr.bf16.mxu1 %v6077_v1 }
 0x42a   : > { %1618 = vst.msk [vmem:[%s6461_s30 + $0x10] sm:$0xf] %vm1541_vm12, %v4824_v50  ;;  %1619 = vst.msk [vmem:[%s6461_s30 + $0x14] sm:$0xf] %vm1541_vm12, %v4825_v52  ;;  %v5798_v50 = vld [vmem:[%s7716_s14 + $0x10] sm:$0xff]   ;;  %v5799_v52 = vld [vmem:[%s7716_s14 + $0x18] sm:$0xff]  }
 0x42b   : > { %1620 = vst.msk [vmem:[%s6461_s30 + $0x18] sm:$0xf] %vm1541_vm12, %v4826_v25  ;;  %1621 = vst.msk [vmem:[%s6461_s30 + $0x1c] sm:$0xf] %vm1541_vm12, %v4827_v53  ;;  %v5993_v13 = vpop.eup %5992 }
 0x42c   : > { %5523 = vmatpush3.bf16.msra.mxu1 %v1480_v39  ;;  %v1840_v58 = vpop.xlane.xlu0 %1839  ;;  %v1859_v14 = vsel %vm1831_vm2, %v5993_v13, 0.0  ;;  %v5797_v39 = vld [vmem:[%s7716_s14 + $0x8] sm:$0xff]  }
 0x42d   : > { %v1846_v32 = vsub.f32 %v1777_v22, %v1840_v58  ;;  %1860 = vadd.xlane.f32.xlu0 %v1859_v14  ;;  %5536 = vmatprep.subr.bf16.mxu1 %v6077_v1  ;;  %v5800_v58 = vld [vmem:[%s7716_s14 + $0x20] sm:$0xff]  }
 0x42f   : > { %v1852_v59 = vmul.f32 1.442695, %v1846_v32  ;;  %v5801_v32 = vld [vmem:[%s7716_s14 + $0x28] sm:$0xff]  }
 0x431   : > { %5994 = vpow2.f32 %v1852_v59  ;;  %v5802_v59 = vld [vmem:[%s7716_s14 + $0x30] sm:$0xff]  }
 0x43b   : > { %v5995_v0 = vpop.eup %5994 }
 0x43c   : > { %v1843_v2 = vpop.xlane.xlu0 %1842  ;;  %v1862_v54 = vsel %vm1831_vm2, %v5995_v0, 0.0 }
 0x43d   : > { %v1847_v55 = vsub.f32 %v1826_v31, %v1843_v2  ;;  %1863 = vadd.xlane.f32.xlu1 %v1862_v54 }
 0x43f   : > { %v1854_v37 = vmul.f32 1.442695, %v1847_v55 }
 0x441   : > { %5996 = vpow2.f32 %v1854_v37 }
 0x44b   : > { %v5997_v3 = vpop.eup %5996 }
 0x44c   : > { %v1865_v36 = vsel %vm1831_vm2, %v5997_v3, 0.0 }
 0x44d   : > { %1866 = vadd.xlane.f32.xlu0 %v1865_v36 }
 0x44e   : > { %1254 = vrot.lane.b32.xlu1 %v6418_v62, %s7714_s6 }
 0x463   : > { %1251 = vrot.lane.b32.xlu0 %v6418_v62, %s7715_s27 }
 0x4aa   : > { %v1858_v45 = vpop.xlane.xlu1 %1857 }
 0x4ab   : > { %5998 = vrcp.f32 %v1858_v45 }
 0x4b5   : > { %v5999_v5 = vpop.eup %5998 }
 0x4b6   : > { %v1872_v7 = vmul.f32 %v5999_v5, %v5991_v26 }
 0x4b8   : > { %v1876_v8 = vpack.c.bf16 %v1872_v7, %v1872_v7 }
 0x4ba   : > { %v1861_v9 = vpop.xlane.xlu0 %1860  ;;  %5517 = vmatmul.mubr.msk.bf16.vlgmr.msra.gmra.mrb[8].mxu0 %vm1634_vm14, %v1876_v8 }
 0x4bb   : > { %6000 = vrcp.f32 %v1861_v9  ;;  %5532 = vmatprep.mubr.msk.bf16.mxu0 %vm6078_vm1, %v6077_v1 }
 0x4c5   : > { %v6001_v12 = vpop.eup %6000 }
 0x4c6   : > { %v1873_v16 = vmul.f32 %v6001_v12, %v5993_v13 }
 0x4c8   : > { %v1877_v17 = vpack.c.bf16 %v1873_v16, %v1873_v16 }
 0x4ca   : > { %v1864_v48 = vpop.xlane.xlu1 %1863  ;;  %5525 = vmatmul.mubr.msk.bf16.vlgmr.msra.gmra.mrb[20].mxu1 %vm1634_vm14, %v1877_v17 }
 0x4cb   : > { %5540 = vmatprep.mubr.msk.bf16.mxu1 %vm6078_vm1, %v6077_v1  ;;  %6002 = vrcp.f32 %v1864_v48 }
 0x4ce   : > { %v1255_v62 = vpop.permute.xlu1 %1254 }
 0x4cf   : > { %v1260_v21 = vpack.c.bf16 %v1255_v62, %v1255_v62  ;;  %v5804_v62 = vld [vmem:[%s7656_s16] ss:$8 sps:$4 sm:$0xff]  }
 0x4d1   : > { %v1423_v51 = vpack.i.b16 %v1260_v21, %v1260_v21  ;;  %v5806_v21 = vld [vmem:[%s7656_s16 + $0x4] ss:$8 sps:$4 sm:$0xff]  }
 0x4d3   : > { %v1428_v28 = vrot.slane %v1423_v51, %v6422_v6  ;;  %v5807_v51 = vld [vmem:[%s7657_s17] ss:$8 sps:$4 sm:$0xff]  }
 0x4d5   : > { %v1483_v22 = vsel %vm6426_vm10, %v1428_v28, %v6442_v15  ;;  %v1484_v23 = vsel %vm6430_vm11, %v1428_v28, %v6449_v18  ;;  %v6003_v60 = vpop.eup %6002  ;;  %v5809_v28 = vld [vmem:[%s7657_s17 + $0x4] ss:$8 sps:$4 sm:$0xff]  }
 0x4d6   : > { %v4832_v24 = vcombine.low %v1483_v22, %v1483_v22  ;;  %v4833_v30 = vcombine.high %v1483_v22, %v1483_v22  ;;  %5537 = vmatpush3.bf16.msra.mxu1 %v1483_v22  ;;  %v4834_v27 = vcombine.low %v1484_v23, %v1484_v23  ;;  %v4835_v29 = vcombine.high %v1484_v23, %v1484_v23  ;;  %v5812_v22 = vld [vmem:[%s7656_s16 + $0x14] ss:$8 sps:$4 sm:$0xff]  }
 0x4d7   : > { %5538 = vmatprep.subr.bf16.mxu1 %v6077_v1  ;;  %v1874_v43 = vmul.f32 %v6003_v60, %v5995_v0  ;;  %v5803_v0 = vld [vmem:[%s7716_s14 + $0x38] sm:$0xff]  }
 0x4d8   : > { %1626 = vst.msk [vmem:[%s6461_s30 + $0x30] sm:$0xf] %vm1541_vm12, %v4832_v24  ;;  %1627 = vst.msk [vmem:[%s6461_s30 + $0x34] sm:$0xf] %vm1541_vm12, %v4833_v30  ;;  %v5810_v24 = vld [vmem:[%s7656_s16 + $0x10] ss:$8 sps:$4 sm:$0xff]  }
 0x4d9   : > { %1628 = vst.msk [vmem:[%s6461_s30 + $0x38] sm:$0xf] %vm1541_vm12, %v4834_v27  ;;  %1629 = vst.msk [vmem:[%s6461_s30 + $0x3c] sm:$0xf] %vm1541_vm12, %v4835_v29  ;;  %v5813_v30 = vld [vmem:[%s7657_s17 + $0x10] ss:$8 sps:$4 sm:$0xff]  }
 0x4da   : > { %5539 = vmatpush3.bf16.msra.mxu1 %v1484_v23  ;;  %v1867_v15 = vpop.xlane.xlu0 %1866  ;;  %v5815_v23 = vld [vmem:[%s7657_s17 + $0x14] ss:$8 sps:$4 sm:$0xff]   ;;  %v5818_v27 = vld [vmem:[%s7656_s16 + $0x24] ss:$8 sps:$4 sm:$0xff]  }
 0x4db   : > { %6004 = vrcp.f32 %v1867_v15  ;;  %2282 = vmatprep.subr.bf16.mxu1 %v5806_v21  ;;  %v5821_v29 = vld [vmem:[%s7657_s17 + $0x24] ss:$8 sps:$4 sm:$0xff]   ;;  %v5816_v15 = vld [vmem:[%s7656_s16 + $0x20] ss:$8 sps:$4 sm:$0xff]  }
 0x4dc   : > { %v5863_v21 = vld [vmem:[%s7658_s18 + $0x28] sm:$0xff]  }
 0x4de   : > { %v1252_v18 = vpop.permute.xlu0 %1251 }
 0x4df   : > { %v1259_v31 = vpack.c.bf16 %v1252_v18, %v1252_v18  ;;  %v5819_v18 = vld [vmem:[%s7657_s17 + $0x20] ss:$8 sps:$4 sm:$0xff]  }
 0x4e1   : > { %v1416_v33 = vpack.i.b16 %v1259_v31, %v1259_v31 }
 0x4e3   : > { %v1421_v57 = vrot.slane %v1416_v33, %v6422_v6  ;;  %v6046_v33 = vld [vmem:[%s6260_s0] sm:$0x1] }
 0x4e5   : > { %v6005_v34 = vpop.eup %6004  ;;  %v1481_v35 = vsel %vm6426_vm10, %v1421_v57, %v6452_v19  ;;  %v1482_v38 = vsel %vm6430_vm11, %v1421_v57, %v6455_v20  ;;  %v1878_v19 = vpack.c.bf16 %v1874_v43, %v1874_v43  ;;  %v5825_v43 = vld [vmem:[%s7657_s17 + $0x30] ss:$8 sps:$4 sm:$0xff]  }
 0x4e6   : > { %v1875_v40 = vmul.f32 %v6005_v34, %v5997_v3  ;;  %v4828_v26 = vcombine.low %v1481_v35, %v1481_v35  ;;  %v4829_v41 = vcombine.high %v1481_v35, %v1481_v35  ;;  %5529 = vmatpush3.bf16.msra.mxu0 %v1481_v35  ;;  %v4830_v42 = vcombine.low %v1482_v38, %v1482_v38 }
 0x4e7   : > { %5530 = vmatprep.subr.bf16.mxu0 %v6077_v1  ;;  %v4831_v44 = vcombine.high %v1482_v38, %v1482_v38 }
 0x4e8   : > { %v1879_v46 = vpack.c.bf16 %v1875_v40, %v1875_v40  ;;  %1622 = vst.msk [vmem:[%s6461_s30 + $0x20] sm:$0xf] %vm1541_vm12, %v4828_v26  ;;  %1623 = vst.msk [vmem:[%s6461_s30 + $0x24] sm:$0xf] %vm1541_vm12, %v4829_v41  ;;  %v5824_v26 = vld [vmem:[%s7656_s16 + $0x34] ss:$8 sps:$4 sm:$0xff]  }
 0x4e9   : > { %1624 = vst.msk [vmem:[%s6461_s30 + $0x28] sm:$0xf] %vm1541_vm12, %v4830_v42  ;;  %1625 = vst.msk [vmem:[%s6461_s30 + $0x2c] sm:$0xf] %vm1541_vm12, %v4831_v44  ;;  %v5827_v41 = vld [vmem:[%s7657_s17 + $0x34] ss:$8 sps:$4 sm:$0xff]  }
 0x4ea   : > { %5531 = vmatpush3.bf16.msra.mxu0 %v1482_v38  ;;  %5541 = vmatmul.mubr.msk.bf16.vlgmr.msra.gmra.mrb[24].mxu1 %vm1634_vm14, %v1879_v46  ;;  %v5822_v42 = vld [vmem:[%s7656_s16 + $0x30] ss:$8 sps:$4 sm:$0xff]   ;;  %v5828_v44 = vld [vmem:[%s7656_s16 + $0x40] ss:$8 sps:$4 sm:$0xff]   ;;  %v5830_v46 = vld [vmem:[%s7656_s16 + $0x44] ss:$8 sps:$4 sm:$0xff]  }
 0x4eb   : > { %5544 = vmatprep.subr.bf16.mxu0 %v6077_v1  ;;  %2314 = vmatprep.mubr.bf16.mxu1 %v6084_v56 }
 0x4ec   : > { %2283 = vmatpush1.bf16.msra.mxu1 %v5804_v62  ;;  %v5862_v62 = vld [vmem:[%s7658_s18 + $0x68] sm:$0xff]  }
 0x4ed   : > { %5533 = vmatmul.mubr.msk.bf16.vlgmr.msra.gmra.mrb[12].mxu0 %vm1634_vm14, %v1878_v19  ;;  %2284 = vmatprep.subr.bf16.mxu1 %v5812_v22  ;;  %v5831_v19 = vld [vmem:[%s7657_s17 + $0x40] ss:$8 sps:$4 sm:$0xff]   ;;  %v5866_v22 = vld [vmem:[%s7658_s18 + $0x78] sm:$0xff]  }
 0x4ee   : > { %5560 = vmatprep.mubr.msk.bf16.mxu0 %vm6078_vm1, %v6077_v1  ;;  %5545 = vmatpush3.bf16.msra.mxu0 %v5796_v49  ;;  %v5837_v49 = vld [vmem:[%s7657_s17 + $0x50] ss:$8 sps:$4 sm:$0xff]  }
 0x4ef   : > { %5546 = vmatprep.subr.bf16.mxu0 %v6077_v1 }
 0x4f0   : > { %2285 = vmatpush1.bf16.msra.mxu1 %v5810_v24 }
 0x4f1   : > { %2286 = vmatprep.subr.bf16.mxu1 %v5818_v27 }
 0x4f2   : > { %5547 = vmatpush3.bf16.msra.mxu0 %v5797_v39  ;;  %v5842_v39 = vld [vmem:[%s7656_s16 + $0x64] ss:$8 sps:$4 sm:$0xff]  }
 0x4f3   : > { %5548 = vmatprep.subr.bf16.mxu0 %v6077_v1 }
 0x4f4   : > { %2287 = vmatpush1.bf16.msra.mxu1 %v5816_v15 }
 0x4f5   : > { %2288 = vmatprep.subr.bf16.mxu1 %v5824_v26 }
 0x4f6   : > { %5549 = vmatpush3.bf16.msra.mxu0 %v5798_v50  ;;  %v5845_v50 = vld [vmem:[%s7657_s17 + $0x64] ss:$8 sps:$4 sm:$0xff]  }
 0x4f7   : > { %5550 = vmatprep.subr.bf16.mxu0 %v6077_v1 }
 0x4f8   : > { %2289 = vmatpush1.bf16.msra.mxu1 %v5822_v42 }
 0x4f9   : > { %2290 = vmatprep.subr.bf16.mxu1 %v5830_v46 }
 0x4fa   : > { %5551 = vmatpush3.bf16.msra.mxu0 %v5799_v52  ;;  %v5840_v52 = vld [vmem:[%s7656_s16 + $0x60] ss:$8 sps:$4 sm:$0xff]  }
 0x4fb   : > { %5552 = vmatprep.subr.bf16.mxu0 %v6077_v1 }
 0x4fc   : > { %2291 = vmatpush1.bf16.msra.mxu1 %v5828_v44 }
 0x4fe   : > { %5553 = vmatpush3.bf16.msra.mxu0 %v5800_v58  ;;  %v5846_v58 = vld [vmem:[%s7656_s16 + $0x70] ss:$8 sps:$4 sm:$0xff]  }
 0x4ff   : > { %5554 = vmatprep.subr.bf16.mxu0 %v6077_v1 }
 0x502   : > { %5555 = vmatpush3.bf16.msra.mxu0 %v5801_v32 }
 0x503   : > { %5556 = vmatprep.subr.bf16.mxu0 %v6077_v1 }
 0x506   : > { %5557 = vmatpush3.bf16.msra.mxu0 %v5802_v59 }
 0x507   : > { %5558 = vmatprep.subr.bf16.mxu0 %v6077_v1 }
 0x50a   : > { %5559 = vmatpush3.bf16.msra.mxu0 %v5803_v0 }
 0x50b   : > { %2419 = vmatprep.subr.bf16.mxu0 %v5809_v28  ;;  %v5865_v28 = vld [vmem:[%s7658_s18 + $0x30] sm:$0xff]  }
 0x58d   : > { %v1917_v20 = vpop.f32.mrb[8].mxu0 }
 0x58e   : > { %v5518_v61 = vpop.f32.mrb[9].mxu0 }
 0x58f   : > { %v1920_v63 = vpop.f32.mrb[10].mxu0  ;;  %v5836_v61 = vld [vmem:[%s7656_s16 + $0x54] ss:$8 sps:$4 sm:$0xff]  }
 0x590   : > { %v5519_v47 = vpop.f32.mrb[11].mxu0  ;;  %v5839_v63 = vld [vmem:[%s7657_s17 + $0x54] ss:$8 sps:$4 sm:$0xff]   ;;  %2292 = vmatprep.subr.bf16.mxu1 %v5836_v61 }
 0x591   : > { %v5834_v47 = vld [vmem:[%s7656_s16 + $0x50] ss:$8 sps:$4 sm:$0xff]  }
 0x592   : > { %2293 = vmatpush1.bf16.msra.mxu1 %v5834_v47 }
 0x593   : > { %2294 = vmatprep.subr.bf16.mxu1 %v5842_v39  ;;  %v5869_v39 = vld [vmem:[%s7650_s10 + $0x40] sm:$0xff]  }
 0x596   : > { %2295 = vmatpush1.bf16.msra.mxu1 %v5840_v52  ;;  %v5871_v52 = vld [vmem:[%s7650_s10 + $0x48] sm:$0xff]  }
 0x59d   : > { %v1960_v25 = vpop.f32.mrb[20].mxu1 }
 0x59e   : > { %2053 = vrot.lane.b32.xlu1 %v1960_v25, %s7714_s6  ;;  %v5526_v53 = vpop.f32.mrb[21].mxu1  ;;  %v5843_v25 = vld [vmem:[%s7657_s17 + $0x60] ss:$8 sps:$4 sm:$0xff]  }
 0x59f   : > { %v1963_v13 = vpop.f32.mrb[22].mxu1  ;;  %v5848_v53 = vld [vmem:[%s7656_s16 + $0x74] ss:$8 sps:$4 sm:$0xff]  }
 0x5a0   : > { %v5527_v14 = vpop.f32.mrb[23].mxu1  ;;  %v5851_v13 = vld [vmem:[%s7657_s17 + $0x74] ss:$8 sps:$4 sm:$0xff]   ;;  %2296 = vmatprep.subr.bf16.mxu1 %v5848_v53 }
 0x5a1   : > { %v5849_v14 = vld [vmem:[%s7657_s17 + $0x70] ss:$8 sps:$4 sm:$0xff]   ;;  %2297 = vmatpush1.bf16.msra.mxu1 %v5846_v58 }
 0x5a2   : > { %v5873_v53 = vld [vmem:[%s7650_s10 + $0x50] sm:$0xff]  }
 0x5bd   : > { %v2046_v2 = vpop.f32.mrb[24].mxu1 }
 0x5be   : > { %2061 = vrot.lane.b32.xlu1 %v2046_v2, %s7713_s2  ;;  %v5542_v54 = vpop.f32.mrb[25].mxu1 }
 0x5bf   : > { %v2049_v55 = vpop.f32.mrb[26].mxu1  ;;  %v2175_v54 = vld [vmem:[%s7655_s15] sm:$0x1] }
 0x5c0   : > { %v2003_v37 = vpop.f32.mrb[12].mxu0  ;;  %v5543_v3 = vpop.f32.mrb[27].mxu1 }
 0x5c1   : > { %2057 = vrot.lane.b32.xlu0 %v2003_v37, %s7715_s27  ;;  %v5534_v36 = vpop.f32.mrb[13].mxu0 }
 0x5c2   : > { %v2006_v45 = vpop.f32.mrb[14].mxu0  ;;  %v5852_v36 = vld [vmem:[%s7658_s18 + $0x40] sm:$0xff]  }
 0x5c3   : > { %v5535_v5 = vpop.f32.mrb[15].mxu0  ;;  %v5853_v45 = vld [vmem:[%s7658_s18] sm:$0xff]   ;;  %5307 = vmatprep.subr.bf16.mxu1 %v5852_v36  ;;  %v5878_v36 = vld [vmem:[%s7648_s8 + $0x68] sm:$0xff]  }
 0x5c4   : > { %v5854_v5 = vld [vmem:[%s7658_s18 + $0x48] sm:$0xff]  }
 0x610   : > { %v2054_v7 = vpop.permute.xlu1 %2053 }
 0x611   : > { %v2064_v8 = vsel %vm1634_vm14, %v1917_v20, %v2054_v7  ;;  %v5833_v20 = vld [vmem:[%s7657_s17 + $0x44] ss:$8 sps:$4 sm:$0xff]  }
 0x612   : > { %v5855_v7 = vld [vmem:[%s7658_s18 + $0x8] sm:$0xff]  }
 0x630   : > { %v2062_v12 = vpop.permute.xlu1 %2061 }
 0x633   : > { %v2058_v9 = vpop.permute.xlu0 %2057 }
 0x634   : > { %v2066_v16 = vsel %vm2065_vm3, %v2064_v8, %v2058_v9  ;;  %v5856_v8 = vld [vmem:[%s7658_s18 + $0x50] sm:$0xff]  }
 0x635   : > { %v2068_v17 = vsel %vm2067_vm4, %v2066_v16, %v2062_v12  ;;  %v5857_v9 = vld [vmem:[%s7658_s18 + $0x10] sm:$0xff]   ;;  %v5858_v12 = vld [vmem:[%s7658_s18 + $0x58] sm:$0xff]  }
 0x636   : > { %v2085_v48 = vpack.c.bf16 %v2068_v17, %v2068_v17  ;;  %v5859_v16 = vld [vmem:[%s7658_s18 + $0x18] sm:$0xff]   ;;  %v5860_v17 = vld [vmem:[%s7658_s18 + $0x60] sm:$0xff]  }
 0x638   : > { %5561 = vmatmul.mubr.bf16.vlgmr.msra.gmra.mrb[16].mxu0 %v2085_v48  ;;  %v5861_v48 = vld [vmem:[%s7658_s18 + $0x20] sm:$0xff]  }
 0x639   : > { %2451 = vmatprep.mubr.bf16.mxu0 %v6084_v56  ;;  %2420 = vmatpush1.bf16.msra.mxu0 %v5807_v51  ;;  %v5864_v51 = vld [vmem:[%s7658_s18 + $0x70] sm:$0xff]  }
 0x63a   : > { %2421 = vmatprep.subr.bf16.mxu0 %v5815_v23  ;;  %v5867_v23 = vld [vmem:[%s7658_s18 + $0x38] sm:$0xff]  }
 0x63d   : > { %2422 = vmatpush1.bf16.msra.mxu0 %v5813_v30 }
 0x63e   : > { %2423 = vmatprep.subr.bf16.mxu0 %v5821_v29 }
 0x641   : > { %2424 = vmatpush1.bf16.msra.mxu0 %v5819_v18 }
 0x642   : > { %2425 = vmatprep.subr.bf16.mxu0 %v5827_v41 }
 0x645   : > { %2426 = vmatpush1.bf16.msra.mxu0 %v5825_v43 }
 0x646   : > { %2427 = vmatprep.subr.bf16.mxu0 %v5833_v20 }
 0x649   : > { %2428 = vmatpush1.bf16.msra.mxu0 %v5831_v19 }
 0x64a   : > { %2429 = vmatprep.subr.bf16.mxu0 %v5839_v63 }
 0x64d   : > { %2430 = vmatpush1.bf16.msra.mxu0 %v5837_v49  ;;  %v5868_v49 = vld [vmem:[%s7648_s8 + $0x40] sm:$0xff]  }
 0x64e   : > { %2431 = vmatprep.subr.bf16.mxu0 %v5845_v50  ;;  %v5870_v50 = vld [vmem:[%s7648_s8 + $0x48] sm:$0xff]  }
 0x651   : > { %2432 = vmatpush1.bf16.msra.mxu0 %v5843_v25  ;;  %v5872_v25 = vld [vmem:[%s7648_s8 + $0x50] sm:$0xff]  }
 0x652   : > { %2433 = vmatprep.subr.bf16.mxu0 %v5851_v13 }
 0x655   : > { %2434 = vmatpush1.bf16.msra.mxu0 %v5849_v14 }
 0x656   : > { %5564 = vmatprep.subr.bf16.mxu0 %v6077_v1 }
 0x70b   : > { %v2168_v31 = vpop.f32.mrb[16].mxu0 }
 0x70c   : > { %v6827_v57 = vadd.f32 %v6046_v33, %v2168_v31  ;;  %v5562_v60 = vpop.f32.mrb[17].mxu0 }
 0x70d   : > { %v2171_v34 = vpop.f32.mrb[18].mxu0 }
 0x70e   : > { %v5563_v35 = vpop.f32.mrb[19].mxu0  ;;  %v2176_v38 = vmul.f32 %v6827_v57, %v6827_v57 }
 0x710   : > { %v2177_v40 = vsel %vm796_vm0, %v2176_v38, 0.0 }
 0x711   : > { %2178 = vadd.xlane.f32.xlu0 %v2177_v40 }
 0x79e   : > { %v2179_v32 = vpop.xlane.xlu0 %2178 }
 0x79f   : > { %v2180_v59 = vmul.f32 0.0078125, %v2179_v32 }
 0x7a1   : > { %v2181_v0 = vadd.f32 1e-06, %v2180_v59 }
 0x7a3   : > { %6006 = vrsqrt.f32 %v2181_v0 }
 0x7ad   : > { %v6007_v2 = vpop.eup %6006 }
 0x7ae   : > { %v2183_v55 = vmul.f32 %v6007_v2, %v6827_v57 }
 0x7b0   : > { %v2184_v37 = vmul.f32 %v2183_v55, %v2175_v54  ;;  %v5874_v55 = vld [vmem:[%s7648_s8 + $0x58] sm:$0xff]  }
 0x7b2   : > { %v2201_v3 = vpack.c.bf16 %v2184_v37, %v2184_v37  ;;  %v5875_v37 = vld [vmem:[%s7650_s10 + $0x58] sm:$0xff]  }
 0x7b4   : > { %2315 = vmatmul.mubr.bf16.vlgmr.msra.gmra.mrb[28].mxu1 %v2201_v3  ;;  %2452 = vmatmul.mubr.bf16.vlgmr.msra.gmra.mrb[20].mxu0 %v2201_v3  ;;  %v5877_v3 = vld [vmem:[%s7650_s10 + $0x60] sm:$0xff]  }
 0x7b5   : > { %5580 = vmatprep.mubr.msk.bf16.mxu0 %vm6078_vm1, %v6077_v1  ;;  %5308 = vmatpush3.bf16.msra.mxu1 %v5853_v45  ;;  %v5879_v45 = vld [vmem:[%s7650_s10 + $0x68] sm:$0xff]  }
 0x7b6   : > { %5309 = vmatprep.subr.bf16.mxu1 %v5854_v5  ;;  %5565 = vmatpush3.bf16.msra.mxu0 %v5868_v49  ;;  %v5880_v5 = vld [vmem:[%s7648_s8 + $0x70] sm:$0xff]  }
 0x7b7   : > { %5566 = vmatprep.subr.bf16.mxu0 %v6077_v1 }
 0x7b9   : > { %5310 = vmatpush3.bf16.msra.mxu1 %v5855_v7  ;;  %v5881_v7 = vld [vmem:[%s7650_s10 + $0x70] sm:$0xff]  }
 0x7ba   : > { %5311 = vmatprep.subr.bf16.mxu1 %v5856_v8  ;;  %5567 = vmatpush3.bf16.msra.mxu0 %v5870_v50  ;;  %v5882_v8 = vld [vmem:[%s7648_s8 + $0x78] sm:$0xff]   ;;  %v5002_v50 = vld [vmem:[%s6367_s28 + $0x48] sm:$0xff]  }
 0x7bb   : > { %5568 = vmatprep.subr.bf16.mxu0 %v6077_v1 }
 0x7bd   : > { %5312 = vmatpush3.bf16.msra.mxu1 %v5857_v9  ;;  %v5883_v9 = vld [vmem:[%s7650_s10 + $0x78] sm:$0xff]  }
 0x7be   : > { %5313 = vmatprep.subr.bf16.mxu1 %v5858_v12  ;;  %5569 = vmatpush3.bf16.msra.mxu0 %v5872_v25 }
 0x7bf   : > { %5570 = vmatprep.subr.bf16.mxu0 %v6077_v1 }
 0x7c1   : > { %5314 = vmatpush3.bf16.msra.mxu1 %v5859_v16 }
 0x7c2   : > { %5315 = vmatprep.subr.bf16.mxu1 %v5860_v17  ;;  %5571 = vmatpush3.bf16.msra.mxu0 %v5874_v55 }
 0x7c3   : > { %5572 = vmatprep.subr.bf16.mxu0 %v6077_v1 }
 0x7c5   : > { %5316 = vmatpush3.bf16.msra.mxu1 %v5861_v48 }
 0x7c6   : > { %5317 = vmatprep.subr.bf16.mxu1 %v5862_v62  ;;  %v4900_v62 = vld [vmem:[%s7700_s4 + $0x1] sm:$0x1] }
 0x7c9   : > { %5318 = vmatpush3.bf16.msra.mxu1 %v5863_v21 }
 0x7ca   : > { %5319 = vmatprep.subr.bf16.mxu1 %v5864_v51 }
 0x7cd   : > { %5320 = vmatpush3.bf16.msra.mxu1 %v5865_v28  ;;  %v5884_v28 = vld [vmem:[%s7652_s12 + $0x40] sm:$0xff]  }
 0x7ce   : > { %5321 = vmatprep.subr.bf16.mxu1 %v5866_v22 }
 0x7d1   : > { %5322 = vmatpush3.bf16.msra.mxu1 %v5867_v23  ;;  %v5885_v23 = vld [vmem:[%s7652_s12 + $0x48] sm:$0xff]  }
 0x7d2   : > { %5584 = vmatprep.subr.bf16.mxu1 %v6077_v1 }
 0x887   : > { %v2316_v24 = vpop.f32.mrb[28].mxu1  ;;  %v2453_v30 = vpop.f32.mrb[20].mxu0 }
 0x888   : > { %v2460_v27 = vsub.f32 0.0, %v2316_v24  ;;  %v2318_v29 = vpop.f32.mrb[29].mxu1  ;;  %v2455_v15 = vpop.f32.mrb[21].mxu0 }
 0x889   : > { %v2461_v18 = vsub.f32 0.0, %v2318_v29  ;;  %v2320_v31 = vpop.f32.mrb[30].mxu1  ;;  %v2457_v33 = vpop.f32.mrb[22].mxu0 }
 0x88a   : > { %v2462_v60 = vmul.f32 1.442695, %v2460_v27  ;;  %v2321_v34 = vpop.f32.mrb[31].mxu1  ;;  %v2458_v35 = vpop.f32.mrb[23].mxu0  ;;  %v5888_v27 = vld [vmem:[%s7652_s12 + $0x60] sm:$0xff]  }
 0x88b   : > { %v2464_v38 = vmul.f32 1.442695, %v2461_v18  ;;  %v5891_v18 = vld [vmem:[%s7652_s12 + $0x78] sm:$0xff]   ;;  %v4942_v31 = vld [vmem:[%s7651_s11 + $0x1] sm:$0x1] }
 0x88c   : > { %6008 = vpow2.f32 %v2462_v60 }
 0x88d   : > { %6010 = vpow2.f32 %v2464_v38 }
 0x896   : > { %v6009_v40 = vpop.eup %6008 }
 0x897   : > { %v6011_v26 = vpop.eup %6010  ;;  %v2466_v41 = vadd.f32 1.0, %v6009_v40  ;;  %v4917_v40 = vld [vmem:[%s7649_s9 + $0x1] sm:$0x1] }
 0x898   : > { %v2467_v42 = vadd.f32 1.0, %v6011_v26 }
 0x899   : > { %6012 = vrcp.f32 %v2466_v41 }
 0x89a   : > { %6014 = vrcp.f32 %v2467_v42 }
 0x8a3   : > { %v6013_v43 = vpop.eup %6012 }
 0x8a4   : > { %v6015_v44 = vpop.eup %6014  ;;  %v2470_v46 = vmul.f32 %v6013_v43, %v2316_v24  ;;  %v5886_v24 = vld [vmem:[%s7652_s12 + $0x50] sm:$0xff]  }
 0x8a5   : > { %v2471_v19 = vmul.f32 %v6015_v44, %v2318_v29  ;;  %v5889_v29 = vld [vmem:[%s7652_s12 + $0x68] sm:$0xff]  }
 0x8a6   : > { %v2472_v20 = vmul.f32 %v2470_v46, %v2453_v30  ;;  %v5887_v30 = vld [vmem:[%s7652_s12 + $0x58] sm:$0xff]  }
 0x8a7   : > { %v2473_v61 = vmul.f32 %v2471_v19, %v2455_v15  ;;  %v5890_v15 = vld [vmem:[%s7652_s12 + $0x70] sm:$0xff]   ;;  %v4967_v19 = vld [vmem:[%s7653_s13 + $0x1] sm:$0x1] }
 0x8a8   : > { %v2506_v47 = vpack.c.bf16 %v2472_v20, %v2472_v20 }
 0x8a9   : > { %v2507_v63 = vpack.c.bf16 %v2473_v61, %v2473_v61 }
 0x8ab   : > { %2636 = vmatprep.mubr.bf16.mxu1 %v2507_v63 }
 0x8ac   : > { %2637 = vmatmul.mubr.bf16.vlgmr.msra.gmra.mrb[32].mxu1 %v2506_v47 }
 0x8ad   : > { %5600 = vmatprep.mubr.msk.bf16.mxu1 %vm6078_vm1, %v6077_v1  ;;  %5585 = vmatpush3.bf16.msra.mxu1 %v5869_v39 }
 0x8ae   : > { %5586 = vmatprep.subr.bf16.mxu1 %v6077_v1 }
 0x8b1   : > { %5587 = vmatpush3.bf16.msra.mxu1 %v5871_v52 }
 0x8b2   : > { %5588 = vmatprep.subr.bf16.mxu1 %v6077_v1 }
 0x8b5   : > { %5589 = vmatpush3.bf16.msra.mxu1 %v5873_v53  ;;  %v5893_v53 = vld [vmem:[%s6367_s28 + $0x40] sm:$0xff]  }
 0x8b6   : > { %5590 = vmatprep.subr.bf16.mxu1 %v6077_v1 }
 0x8b9   : > { %5591 = vmatpush3.bf16.msra.mxu1 %v5875_v37 }
 0x8ba   : > { %5592 = vmatprep.subr.bf16.mxu1 %v6077_v1 }
 0x8bd   : > { %5593 = vmatpush3.bf16.msra.mxu1 %v5877_v3  ;;  %v7127_v3 = vld [vmem:[%s6367_s28 + $0x70] sm:$0xff]  }
 0x8be   : > { %5594 = vmatprep.subr.bf16.mxu1 %v6077_v1 }
 0x8c1   : > { %5595 = vmatpush3.bf16.msra.mxu1 %v5879_v45 }
 0x8c2   : > { %5596 = vmatprep.subr.bf16.mxu1 %v6077_v1 }
 0x8c5   : > { %5597 = vmatpush3.bf16.msra.mxu1 %v5881_v7 }
 0x8c6   : > { %5598 = vmatprep.subr.bf16.mxu1 %v6077_v1 }
 0x8c9   : > { %5599 = vmatpush3.bf16.msra.mxu1 %v5883_v9 }
 0x8ca   : > { %5624 = vmatprep.subr.bf16.mxu1 %v6077_v1 }
 0x97f   : > { %v5323_v13 = vpop.f32.mrb[32].mxu1 }
 0x980   : > { %v5324_v58 = vpop.f32.mrb[33].mxu1 }
 0x981   : > { %v5325_v14 = vadd.f32 %v5324_v58, %v5323_v13  ;;  %v5326_v32 = vpop.f32.mrb[34].mxu1 }
 0x982   : > { %v5327_v59 = vpop.f32.mrb[35].mxu1  ;;  %v7110_v32 = vld [vmem:[%s6367_s28 + $0x58] sm:$0xff]  }
 0x983   : > { %v6975_v0 = vadd.f32 %v5325_v14, %v6827_v57  ;;  %v5876_v57 = vld [vmem:[%s7648_s8 + $0x60] sm:$0xff]   ;;  %v7107_v14 = vld [vmem:[%s6367_s28 + $0x50] sm:$0xff]  }
 0x984   : > { %5573 = vmatpush3.bf16.msra.mxu0 %v5876_v57  ;;  %v7113_v59 = vld [vmem:[%s6367_s28 + $0x60] sm:$0xff]   ;;  %v7124_v57 = vld [vmem:[%s6367_s28 + $0x68] sm:$0xff]  }
 0x985   : > { %v2647_v2 = vmul.f32 %v6975_v0, %v6975_v0  ;;  %5574 = vmatprep.subr.bf16.mxu0 %v6077_v1 }
 0x987   : > { %v2648_v54 = vsel %vm796_vm0, %v2647_v2, 0.0 }
 0x988   : > { %2649 = vadd.xlane.f32.xlu1 %v2648_v54  ;;  %5575 = vmatpush3.bf16.msra.mxu0 %v5878_v36  ;;  %v7130_v36 = vld [vmem:[%s6367_s28 + $0x78] sm:$0xff]   ;;  %s7724_s28 = sld [smem:[#allocation20_spill]] }
 0x989   : > { %5576 = vmatprep.subr.bf16.mxu0 %v6077_v1 }
 0x98c   : > { %5577 = vmatpush3.bf16.msra.mxu0 %v5880_v5 }
 0x98d   : > { %5578 = vmatprep.subr.bf16.mxu0 %v6077_v1 }
 0x990   : > { %5579 = vmatpush3.bf16.msra.mxu0 %v5882_v8 }
 0x991   : > { %5604 = vmatprep.subr.bf16.mxu0 %v6077_v1 }
 0xa15   : > { %v2650_v12 = vpop.xlane.xlu1 %2649 }
 0xa16   : > { %v2651_v16 = vmul.f32 0.0078125, %v2650_v12 }
 0xa18   : > { %v2652_v17 = vadd.f32 1e-06, %v2651_v16 }
 0xa1a   : > { %6016 = vrsqrt.f32 %v2652_v17 }
 0xa24   : > { %v6017_v48 = vpop.eup %6016 }
 0xa25   : > { %v2654_v21 = vmul.f32 %v6017_v48, %v6975_v0 }
 0xa27   : > { %v2655_v51 = vmul.f32 %v4900_v62, %v2654_v21 }
 0xa29   : > { %v2673_v22 = vpack.c.bf16 %v2655_v51, %v2655_v51 }
 0xa2b   : > { %5581 = vmatmul.mubr.bf16.vlgmr.msra.gmra.mrb[24].mxu0 %v2673_v22  ;;  %5601 = vmatmul.mubr.bf16.vlgmr.msra.gmra.mrb[36].mxu1 %v2673_v22 }
 0xa2c   : > { %5605 = vmatpush3.bf16.msra.mxu0 %v5884_v28  ;;  %5620 = vmatprep.mubr.msk.bf16.mxu0 %vm6078_vm1, %v6077_v1 }
 0xa2d   : > { %5606 = vmatprep.subr.bf16.mxu0 %v6077_v1  ;;  %5628 = vmatprep.mubr.msk.bf16.mxu1 %vm6078_vm1, %v6077_v1 }
 0xa30   : > { %5607 = vmatpush3.bf16.msra.mxu0 %v5885_v23 }
 0xa31   : > { %5608 = vmatprep.subr.bf16.mxu0 %v6077_v1 }
 0xa34   : > { %5609 = vmatpush3.bf16.msra.mxu0 %v5886_v24  ;;  %v7174_v24 = vld [vmem:[%s6509_s19] sm:$0x1]  ;;  %s7719_s19 = sld [smem:[#allocation8_spill]] }
 0xa35   : > { %5610 = vmatprep.subr.bf16.mxu0 %v6077_v1 }
 0xa38   : > { %5611 = vmatpush3.bf16.msra.mxu0 %v5887_v30 }
 0xa39   : > { %5612 = vmatprep.subr.bf16.mxu0 %v6077_v1 }
 0xa3c   : > { %5613 = vmatpush3.bf16.msra.mxu0 %v5888_v27 }
 0xa3d   : > { %5614 = vmatprep.subr.bf16.mxu0 %v6077_v1 }
 0xa40   : > { %5615 = vmatpush3.bf16.msra.mxu0 %v5889_v29 }
 0xa41   : > { %5616 = vmatprep.subr.bf16.mxu0 %v6077_v1 }
 0xa44   : > { %5617 = vmatpush3.bf16.msra.mxu0 %v5890_v15 }
 0xa45   : > { %5618 = vmatprep.subr.bf16.mxu0 %v6077_v1 }
 0xa48   : > { %5619 = vmatpush3.bf16.msra.mxu0 %v5891_v18  ;;  %v4978_v18 = vld [vmem:[%s6401_s24 + $0x48] sm:$0xff]  }
 0xa49   : > { %5640 = vmatprep.subr.bf16.mxu0 %v6077_v1 }
 0xa4b   : > { %5621 = vmatmul.mubr.bf16.vlgmr.msra.gmra.mrb[28].mxu0 %v2673_v22  ;;  %v7169_v22 = vld [vmem:[%s6503_s26] sm:$0x1] }
 0xa4c   : > { %5644 = vmatprep.mubr.msk.bf16.mxu0 %vm6078_vm1, %v6077_v1 }
 0xafe   : > { %v2758_v33 = vpop.f32.mrb[24].mxu0  ;;  %v2865_v60 = vpop.f32.mrb[36].mxu1 }
 0xaff   : > { %v7065_v34 = vadd.f32 %v4942_v31, %v2865_v60  ;;  %v5582_v35 = vpop.f32.mrb[25].mxu0  ;;  %v5602_v38 = vpop.f32.mrb[37].mxu1  ;;  %v7074_v44 = vadd.f32 %v4917_v40, %v2758_v33 }
 0xb00   : > { %v2761_v26 = vpop.f32.mrb[26].mxu0  ;;  %v2868_v41 = vpop.f32.mrb[38].mxu1 }
 0xb01   : > { %3044 = vrot.lane.b32.xlu1 %v7065_v34, %s7715_s27  ;;  %3041 = vrot.lane.b32.xlu0 %v7065_v34, %s7713_s2  ;;  %v5583_v42 = vpop.f32.mrb[27].mxu0  ;;  %v5603_v43 = vpop.f32.mrb[39].mxu1  ;;  %v3050_v46 = vsub.f32 0.0, %v7065_v34  ;;  %v2988_v12 = vsub.f32 0.0, %v7074_v44  ;;  %v3086_v23 = vmul.f32 %v7169_v22, %v7065_v34  ;;  %v4980_v26 = vld [vmem:[%s6401_s24 + $0x50] sm:$0xff]   ;;  %v4982_v41 = vld [vmem:[%s6401_s24 + $0x58] sm:$0xff]  }
 0xb02   : > { %v7199_v42 = vld [vmem:[%s6401_s24 + $0x60] sm:$0xff]  }
 0xb05   : > { %3047 = vrot.lane.b32.xlu0 %v7065_v34, %s7714_s6  ;;  %2979 = vrot.lane.b32.xlu1 %v7074_v44, %s7713_s2 }
 0xb09   : > { %2982 = vrot.lane.b32.xlu0 %v7074_v44, %s7715_s27  ;;  %2985 = vrot.lane.b32.xlu1 %v7074_v44, %s7714_s6 }
 0xb0d   : > { %3058 = vrot.lane.b32.xlu0 %v3050_v46, %s7717_s21  ;;  %3070 = vrot.lane.b32.xlu1 %v7065_v34, %s7718_s23  ;;  %v5892_v34 = vld [vmem:[%s6401_s24 + $0x40] sm:$0xff]  }
 0xb1e   : > { %v2972_v20 = vpop.f32.mrb[28].mxu0 }
 0xb1f   : > { %v7091_v61 = vadd.f32 %v4967_v19, %v2972_v20  ;;  %v5622_v63 = vpop.f32.mrb[29].mxu0 }
 0xb20   : > { %v2975_v47 = vpop.f32.mrb[30].mxu0  ;;  %v7203_v63 = vld [vmem:[%s6401_s24 + $0x68] sm:$0xff]  }
 0xb21   : > { %v3112_v49 = vpack.c.bf16 %v7091_v61, %v7091_v61  ;;  %v5623_v39 = vpop.f32.mrb[31].mxu0  ;;  %v7206_v47 = vld [vmem:[%s6401_s24 + $0x70] sm:$0xff]  }
 0xb23   : > { %v3235_v52 = vpack.i.b16 %v3112_v49, %v3112_v49  ;;  %v7209_v49 = vld [vmem:[%s6401_s24 + $0x78] sm:$0xff]   ;;  %s7720_s24 = sld [smem:[#allocation17_spill]] }
 0xb25   : > { %v3240_v25 = vrot.slane %v3235_v52, %v6422_v6 }
 0xb27   : > { %v7100_v13 = vsel %vm6426_vm10, %v3240_v25, %v5893_v53  ;;  %v7104_v58 = vsel %vm6430_vm11, %v3240_v25, %v5002_v50 }
 0xb28   : > { %v5056_v2 = vcombine.low %v7100_v13, %v7100_v13  ;;  %v5057_v54 = vcombine.high %v7100_v13, %v7100_v13  ;;  %v5058_v55 = vcombine.low %v7104_v58, %v7104_v58  ;;  %v5059_v37 = vcombine.high %v7104_v58, %v7104_v58 }
 0xb2a   : > { %5072 = vst.msk [vmem:[%s6461_s30 + $0x40] sm:$0xf] %vm1541_vm12, %v5056_v2  ;;  %5073 = vst.msk [vmem:[%s6461_s30 + $0x44] sm:$0xf] %vm1541_vm12, %v5057_v54 }
 0xb2b   : > { %5074 = vst.msk [vmem:[%s6461_s30 + $0x48] sm:$0xf] %vm1541_vm12, %v5058_v55  ;;  %5075 = vst.msk [vmem:[%s6461_s30 + $0x4c] sm:$0xf] %vm1541_vm12, %v5059_v37 }
 0xb73   : > { %v7140_v45 = vpop.permute.xlu1 %3044  ;;  %v7142_v5 = vpop.permute.xlu0 %3041 }
 0xb74   : > { %v3051_v7 = vsub.f32 0.0, %v7142_v5  ;;  %3072 = vrot.lane.b32.xlu1 %v7142_v5, %s7718_s23  ;;  %v3052_v48 = vsub.f32 0.0, %v7140_v45  ;;  %v3087_v2 = vmul.f32 %v7169_v22, %v7142_v5  ;;  %v3088_v5 = vmul.f32 %v7169_v22, %v7140_v45 }
 0xb76   : > { %3060 = vrot.lane.b32.xlu0 %v3051_v7, %s7717_s21 }
 0xb77   : > { %v7148_v8 = vpop.permute.xlu0 %3047  ;;  %v7150_v9 = vpop.permute.xlu1 %2979 }
 0xb78   : > { %3008 = vrot.lane.b32.xlu1 %v7074_v44, %s7718_s23  ;;  %v3053_v51 = vsub.f32 0.0, %v7148_v8  ;;  %v2989_v29 = vsub.f32 0.0, %v7150_v9 }
 0xb7a   : > { %2996 = vrot.lane.b32.xlu0 %v2988_v12, %s7717_s21 }
 0xb7b   : > { %v7156_v16 = vpop.permute.xlu0 %2982  ;;  %v7158_v17 = vpop.permute.xlu1 %2985 }
 0xb7c   : > { %3074 = vrot.lane.b32.xlu1 %v7140_v45, %s7718_s23  ;;  %v2990_v33 = vsub.f32 0.0, %v7156_v16  ;;  %v2991_v35 = vsub.f32 0.0, %v7158_v17 }
 0xb7e   : > { %3062 = vrot.lane.b32.xlu0 %v3052_v48, %s7717_s21 }
 0xb7f   : > { %v3059_v62 = vpop.permute.xlu0 %3058  ;;  %v3071_v21 = vpop.permute.xlu1 %3070 }
 0xb80   : > { %v3082_v28 = vsel %vm1164_vm13, %v3059_v62, %v3071_v21  ;;  %3076 = vrot.lane.b32.xlu1 %v7148_v8, %s7718_s23  ;;  %v3024_v62 = vmul.f32 %v7169_v22, %v7074_v44  ;;  %v3089_v44 = vmul.f32 %v7169_v22, %v7148_v8 }
 0xb81   : > { %v3090_v30 = vmul.f32 %v7174_v24, %v3082_v28 }
 0xb82   : > { %3064 = vrot.lane.b32.xlu0 %v3053_v51, %s7717_s21 }
 0xb83   : > { %v3094_v27 = vadd.f32 %v3090_v30, %v3086_v23 }
 0xb84   : > { %3010 = vrot.lane.b32.xlu1 %v7150_v9, %s7718_s23 }
 0xb85   : > { %v3098_v15 = vpack.c.bf16 %v3094_v27, %v3094_v27 }
 0xb86   : > { %2998 = vrot.lane.b32.xlu0 %v2989_v29, %s7717_s21 }
 0xb87   : > { %v3134_v31 = vpack.i.b16 %v3098_v15, %v3098_v15 }
 0xb88   : > { %3012 = vrot.lane.b32.xlu1 %v7156_v16, %s7718_s23 }
 0xb89   : > { %v3139_v60 = vrot.slane %v3134_v31, %v6422_v6 }
 0xb8a   : > { %3000 = vrot.lane.b32.xlu0 %v2990_v33, %s7717_s21 }
 0xb8b   : > { %v3209_v38 = vsel %vm6426_vm10, %v3139_v60, %v5892_v34  ;;  %v3210_v40 = vsel %vm6430_vm11, %v3139_v60, %v4978_v18 }
 0xb8c   : > { %3014 = vrot.lane.b32.xlu1 %v7158_v17, %s7718_s23  ;;  %v5024_v43 = vcombine.low %v3209_v38, %v3209_v38  ;;  %v5025_v46 = vcombine.high %v3209_v38, %v3209_v38  ;;  %v3472_v19 = vsel %vm1634_vm14, %v3209_v38, 0  ;;  %v5026_v20 = vcombine.low %v3210_v40, %v3210_v40 }
 0xb8d   : > { %5625 = vmatpush3.bf16.xpose.msra.mxu1 %v3472_v19  ;;  %v5027_v39 = vcombine.high %v3210_v40, %v3210_v40  ;;  %v3475_v50 = vsel %vm1634_vm14, %v3210_v40, 0 }
 0xb8e   : > { %5040 = vst.msk [vmem:[%s7719_s19 + $0x40] sm:$0xf] %vm1541_vm12, %v5024_v43  ;;  %5041 = vst.msk [vmem:[%s7719_s19 + $0x44] sm:$0xf] %vm1541_vm12, %v5025_v46  ;;  %3002 = vrot.lane.b32.xlu0 %v2991_v35, %s7717_s21  ;;  %5626 = vmatprep.subr.bf16.mxu1 %v6077_v1 }
 0xb8f   : > { %5042 = vst.msk [vmem:[%s7719_s19 + $0x48] sm:$0xf] %vm1541_vm12, %v5026_v20  ;;  %5043 = vst.msk [vmem:[%s7719_s19 + $0x4c] sm:$0xf] %vm1541_vm12, %v5027_v39 }
 0xb95   : > { %5627 = vmatpush3.bf16.xpose.msra.mxu1 %v3475_v50 }
 0xb96   : > { %5632 = vmatprep.subr.bf16.mxu1 %v6077_v1 }
 0xbe6   : > { %v3073_v52 = vpop.permute.xlu1 %3072 }
 0xbe8   : > { %v3061_v25 = vpop.permute.xlu0 %3060 }
 0xbe9   : > { %v3083_v53 = vsel %vm1164_vm13, %v3061_v25, %v3073_v52 }
 0xbea   : > { %v3091_v54 = vmul.f32 %v7174_v24, %v3083_v53  ;;  %v3009_v55 = vpop.permute.xlu1 %3008  ;;  %v3025_v53 = vmul.f32 %v7169_v22, %v7150_v9 }
 0xbec   : > { %v3095_v37 = vadd.f32 %v3091_v54, %v3087_v2  ;;  %v2997_v7 = vpop.permute.xlu0 %2996 }
 0xbed   : > { %v3020_v12 = vsel %vm1164_vm13, %v2997_v7, %v3009_v55 }
 0xbee   : > { %v3099_v48 = vpack.c.bf16 %v3095_v37, %v3095_v37  ;;  %v3028_v21 = vmul.f32 %v7174_v24, %v3020_v12  ;;  %v3075_v51 = vpop.permute.xlu1 %3074 }
 0xbf0   : > { %v3141_v28 = vpack.i.b16 %v3099_v48, %v3099_v48  ;;  %v3032_v23 = vadd.f32 %v3028_v21, %v3024_v62  ;;  %v3063_v30 = vpop.permute.xlu0 %3062 }
 0xbf1   : > { %v3084_v27 = vsel %vm1164_vm13, %v3063_v30, %v3075_v51 }
 0xbf2   : > { %v3146_v29 = vrot.slane %v3141_v28, %v6422_v6  ;;  %v3036_v15 = vmul.f32 0.17677669, %v3032_v23  ;;  %v3092_v18 = vmul.f32 %v7174_v24, %v3084_v27  ;;  %v3077_v31 = vpop.permute.xlu1 %3076 }
 0xbf4   : > { %v3464_v33 = vpack.c.bf16 %v3036_v15, %v3036_v15  ;;  %v3096_v60 = vadd.f32 %v3092_v18, %v3088_v5  ;;  %v3065_v34 = vpop.permute.xlu0 %3064  ;;  %v3211_v35 = vsel %vm6426_vm10, %v3146_v29, %v4980_v26  ;;  %v3212_v45 = vsel %vm6430_vm11, %v3146_v29, %v4982_v41 }
 0xbf5   : > { %v3085_v38 = vsel %vm1164_vm13, %v3065_v34, %v3077_v31  ;;  %v5028_v40 = vcombine.low %v3211_v35, %v3211_v35  ;;  %v5029_v43 = vcombine.high %v3211_v35, %v3211_v35  ;;  %v3521_v46 = vsel %vm1634_vm14, %v3211_v35, 0 }
 0xbf6   : > { %v3100_v8 = vpack.c.bf16 %v3096_v60, %v3096_v60  ;;  %v3093_v19 = vmul.f32 %v7174_v24, %v3085_v38  ;;  %v3011_v20 = vpop.permute.xlu1 %3010  ;;  %5629 = vmatmul.mubr.msk.bf16.vlgmr.msra.gmra.mrb[40].mxu1 %vm1634_vm14, %v3464_v33  ;;  %v5030_v39 = vcombine.low %v3212_v45, %v3212_v45  ;;  %v5031_v50 = vcombine.high %v3212_v45, %v3212_v45 }
 0xbf7   : > { %5044 = vst.msk [vmem:[%s7719_s19 + $0x50] sm:$0xf] %vm1541_vm12, %v5028_v40  ;;  %5045 = vst.msk [vmem:[%s7719_s19 + $0x54] sm:$0xf] %vm1541_vm12, %v5029_v43  ;;  %5633 = vmatpush3.bf16.xpose.msra.mxu1 %v3521_v46  ;;  %5636 = vmatprep.mubr.msk.bf16.mxu1 %vm6078_vm1, %v6077_v1  ;;  %v3524_v27 = vsel %vm1634_vm14, %v3212_v45, 0  ;;  %v3026_v31 = vmul.f32 %v7169_v22, %v7156_v16 }
 0xbf8   : > { %v3148_v26 = vpack.i.b16 %v3100_v8, %v3100_v8  ;;  %v3097_v41 = vadd.f32 %v3093_v19, %v3089_v44  ;;  %v2999_v52 = vpop.permute.xlu0 %2998  ;;  %5634 = vmatprep.subr.bf16.mxu1 %v6077_v1  ;;  %5046 = vst.msk [vmem:[%s7719_s19 + $0x58] sm:$0xf] %vm1541_vm12, %v5030_v39  ;;  %5047 = vst.msk [vmem:[%s7719_s19 + $0x5c] sm:$0xf] %vm1541_vm12, %v5031_v50  ;;  %v3027_v8 = vmul.f32 %v7169_v22, %v7158_v17 }
 0xbf9   : > { %v3021_v25 = vsel %vm1164_vm13, %v2999_v52, %v3011_v20 }
 0xbfa   : > { %v3153_v2 = vrot.slane %v3148_v26, %v6422_v6  ;;  %v3101_v54 = vpack.c.bf16 %v3097_v41, %v3097_v41  ;;  %v3029_v55 = vmul.f32 %v7174_v24, %v3021_v25  ;;  %v3013_v12 = vpop.permute.xlu1 %3012 }
 0xbfc   : > { %v3155_v37 = vpack.i.b16 %v3101_v54, %v3101_v54  ;;  %v3033_v7 = vadd.f32 %v3029_v55, %v3025_v53  ;;  %v3001_v48 = vpop.permute.xlu0 %3000  ;;  %v3213_v62 = vsel %vm6426_vm10, %v3153_v2, %v7199_v42  ;;  %v3214_v21 = vsel %vm6430_vm11, %v3153_v2, %v7203_v63 }
 0xbfd   : > { %v3022_v9 = vsel %vm1164_vm13, %v3001_v48, %v3013_v12  ;;  %v5032_v51 = vcombine.low %v3213_v62, %v3213_v62  ;;  %v5033_v28 = vcombine.high %v3213_v62, %v3213_v62  ;;  %v3570_v23 = vsel %vm1634_vm14, %v3213_v62, 0 }
 0xbfe   : > { %v3160_v30 = vrot.slane %v3155_v37, %v6422_v6  ;;  %5641 = vmatpush3.bf16.xpose.msra.mxu0 %v3570_v23  ;;  %v5034_v5 = vcombine.low %v3214_v21, %v3214_v21  ;;  %v3030_v42 = vmul.f32 %v7174_v24, %v3022_v9  ;;  %v5035_v63 = vcombine.high %v3214_v21, %v3214_v21  ;;  %v3015_v38 = vpop.permute.xlu1 %3014 }
 0xbff   : > { %5635 = vmatpush3.bf16.xpose.msra.mxu1 %v3524_v27  ;;  %5048 = vst.msk [vmem:[%s7719_s19 + $0x60] sm:$0xf] %vm1541_vm12, %v5032_v51  ;;  %5049 = vst.msk [vmem:[%s7719_s19 + $0x64] sm:$0xf] %vm1541_vm12, %v5033_v28  ;;  %5642 = vmatprep.subr.bf16.mxu0 %v6077_v1  ;;  %v3037_v29 = vmul.f32 0.17677669, %v3033_v7 }
 0xc00   : > { %5648 = vmatprep.subr.bf16.mxu1 %v6077_v1  ;;  %5050 = vst.msk [vmem:[%s7719_s19 + $0x68] sm:$0xf] %vm1541_vm12, %v5034_v5  ;;  %v3215_v15 = vsel %vm6426_vm10, %v3160_v30, %v7206_v47  ;;  %v3216_v18 = vsel %vm6430_vm11, %v3160_v30, %v7209_v49  ;;  %5051 = vst.msk [vmem:[%s7719_s19 + $0x6c] sm:$0xf] %vm1541_vm12, %v5035_v63  ;;  %v3003_v60 = vpop.permute.xlu0 %3002  ;;  %v3034_v45 = vadd.f32 %v3030_v42, %v3026_v31 }
 0xc01   : > { %v5036_v44 = vcombine.low %v3215_v15, %v3215_v15  ;;  %v5037_v33 = vcombine.high %v3215_v15, %v3215_v15  ;;  %v5038_v34 = vcombine.low %v3216_v18, %v3216_v18  ;;  %v5039_v35 = vcombine.high %v3216_v18, %v3216_v18 }
 0xc02   : > { %v3465_v47 = vpack.c.bf16 %v3037_v29, %v3037_v29  ;;  %v3023_v16 = vsel %vm1164_vm13, %v3003_v60, %v3015_v38  ;;  %v3573_v49 = vsel %vm1634_vm14, %v3214_v21, 0  ;;  %v3619_v40 = vsel %vm1634_vm14, %v3215_v15, 0 }
 0xc03   : > { %5052 = vst.msk [vmem:[%s7719_s19 + $0x70] sm:$0xf] %vm1541_vm12, %v5036_v44  ;;  %5053 = vst.msk [vmem:[%s7719_s19 + $0x74] sm:$0xf] %vm1541_vm12, %v5037_v33  ;;  %v3038_v43 = vmul.f32 0.17677669, %v3034_v45  ;;  %v3031_v46 = vmul.f32 %v7174_v24, %v3023_v16 }
 0xc04   : > { %5054 = vst.msk [vmem:[%s7719_s19 + $0x78] sm:$0xf] %vm1541_vm12, %v5038_v34  ;;  %5055 = vst.msk [vmem:[%s7719_s19 + $0x7c] sm:$0xf] %vm1541_vm12, %v5039_v35  ;;  %v3622_v39 = vsel %vm1634_vm14, %v3216_v18, 0  ;;  %s4757_s19 = sshll.u32 %s7722_s25, 3 }
 0xc05   : > { %v3466_v19 = vpack.c.bf16 %v3038_v43, %v3038_v43  ;;  %v3035_v20 = vadd.f32 %v3031_v46, %v3027_v8  ;;  %s758_s26 = scalar_lea.vmem %s7724_s28, %s4757_s19 }
 0xc06   : > { %5637 = vmatmul.mubr.msk.bf16.vlgmr.msra.gmra.mrb[44].mxu1 %vm1634_vm14, %v3465_v47  ;;  %5643 = vmatpush3.bf16.xpose.msra.mxu0 %v3573_v49 }
 0xc07   : > { %5649 = vmatpush3.bf16.xpose.msra.mxu1 %v3619_v40  ;;  %5656 = vmatprep.subr.bf16.mxu0 %v6077_v1  ;;  %v3039_v24 = vmul.f32 0.17677669, %v3035_v20 }
 0xc08   : > { %5650 = vmatprep.subr.bf16.mxu1 %v6077_v1  ;;  %5652 = vmatprep.mubr.msk.bf16.mxu1 %vm6078_vm1, %v6077_v1 }
 0xc09   : > { %v3467_v17 = vpack.c.bf16 %v3039_v24, %v3039_v24 }
 0xc0d   : > { %5645 = vmatmul.mubr.msk.bf16.vlgmr.msra.gmra.mrb[32].mxu0 %vm1634_vm14, %v3466_v19 }
 0xc0e   : > { %5657 = vmatpush3.bf16.msra.mxu0 %v7100_v13  ;;  %5660 = vmatprep.mubr.msk.bf16.mxu0 %vm6078_vm1, %v6077_v1 }
 0xc0f   : > { %5651 = vmatpush3.bf16.xpose.msra.mxu1 %v3622_v39  ;;  %5658 = vmatprep.subr.bf16.mxu0 %v6077_v1 }
 0xc10   : > { %5664 = vmatprep.subr.bf16.mxu1 %v6077_v1 }
 0xc12   : > { %5659 = vmatpush3.bf16.msra.mxu0 %v7104_v58 }
 0xc13   : > { %5672 = vmatprep.subr.bf16.mxu0 %v6077_v1 }
 0xc16   : > { %5653 = vmatmul.mubr.msk.bf16.vlgmr.msra.gmra.mrb[48].mxu1 %vm1634_vm14, %v3467_v17 }
 0xc17   : > { %5668 = vmatprep.mubr.msk.bf16.mxu1 %vm6078_vm1, %v6077_v1 }
 0xcc9   : > { %v3511_v13 = vpop.f32.mrb[40].mxu1 }
 0xcca   : > { %v3512_v22 = vadd.f32 %v3511_v13, %v6671_v4  ;;  %v5630_v50 = vpop.f32.mrb[41].mxu1 }
 0xccb   : > { %v3514_v26 = vpop.f32.mrb[42].mxu1 }
 0xccc   : > { %v5631_v41 = vpop.f32.mrb[43].mxu1  ;;  %v3664_v52 = vsel %vm1831_vm2, %v3512_v22, -inf }
 0xccd   : > { %3665 = vmax.xlane.f32.xlu0 %v3664_v52 }
 0xcd9   : > { %v3560_v25 = vpop.f32.mrb[44].mxu1 }
 0xcda   : > { %v3561_v58 = vadd.f32 %v3560_v25, %v6671_v4  ;;  %v5638_v53 = vpop.f32.mrb[45].mxu1 }
 0xcdb   : > { %v3563_v2 = vpop.f32.mrb[46].mxu1 }
 0xcdc   : > { %v5639_v54 = vpop.f32.mrb[47].mxu1  ;;  %v3667_v55 = vsel %vm1831_vm2, %v3561_v58, -inf }
 0xcdd   : > { %3668 = vmax.xlane.f32.xlu1 %v3667_v55 }
 0xce0   : > { %v3609_v37 = vpop.f32.mrb[32].mxu0 }
 0xce1   : > { %v3610_v7 = vadd.f32 %v3609_v37, %v6671_v4  ;;  %v5646_v12 = vpop.f32.mrb[33].mxu0 }
 0xce2   : > { %v3612_v48 = vpop.f32.mrb[34].mxu0 }
 0xce3   : > { %v5647_v62 = vpop.f32.mrb[35].mxu0  ;;  %v3670_v21 = vsel %vm1831_vm2, %v3610_v7, -inf }
 0xce4   : > { %3671 = vmax.xlane.f32.xlu0 %v3670_v21 }
 0xce9   : > { %v3658_v9 = vpop.f32.mrb[48].mxu1 }
 0xcea   : > { %v3659_v51 = vadd.f32 %v3658_v9, %v6671_v4  ;;  %v5654_v28 = vpop.f32.mrb[49].mxu1 }
 0xceb   : > { %v3661_v23 = vpop.f32.mrb[50].mxu1 }
 0xcec   : > { %v5655_v30 = vpop.f32.mrb[51].mxu1  ;;  %v3673_v27 = vsel %vm1831_vm2, %v3659_v51, -inf }
 0xced   : > { %3674 = vmax.xlane.f32.xlu0 %v3673_v27 }
 0xcee   : > { %3103 = vrot.lane.b32.xlu1 %v7091_v61, %s7713_s2 }
 0xd5a   : > { %v3666_v5 = vpop.xlane.xlu0 %3665 }
 0xd5b   : > { %v3676_v42 = vsub.f32 %v3512_v22, %v3666_v5 }
 0xd5d   : > { %v3680_v63 = vmul.f32 1.442695, %v3676_v42 }
 0xd5f   : > { %6018 = vpow2.f32 %v3680_v63 }
 0xd69   : > { %v6019_v29 = vpop.eup %6018 }
 0xd6a   : > { %v3669_v15 = vpop.xlane.xlu1 %3668  ;;  %v3688_v18 = vsel %vm1831_vm2, %v6019_v29, 0.0 }
 0xd6b   : > { %v3677_v31 = vsub.f32 %v3561_v58, %v3669_v15  ;;  %3689 = vadd.xlane.f32.xlu1 %v3688_v18 }
 0xd6d   : > { %v3682_v4 = vmul.f32 1.442695, %v3677_v31 }
 0xd6e   : > { %v3104_v44 = vpop.permute.xlu1 %3103 }
 0xd6f   : > { %6020 = vpow2.f32 %v3682_v4  ;;  %v3113_v33 = vpack.c.bf16 %v3104_v44, %v3104_v44 }
 0xd71   : > { %v3242_v60 = vpack.i.b16 %v3113_v33, %v3113_v33  ;;  %v3672_v34 = vpop.xlane.xlu0 %3671 }
 0xd72   : > { %v3678_v35 = vsub.f32 %v3610_v7, %v3672_v34 }
 0xd73   : > { %v3247_v45 = vrot.slane %v3242_v60, %v6422_v6 }
 0xd74   : > { %v3684_v47 = vmul.f32 1.442695, %v3678_v35  ;;  %v5896_v35 = vld [vmem:[%s7720_s24 + $0x50] sm:$0xff]  }
 0xd75   : > { %v3312_v38 = vsel %vm6426_vm10, %v3247_v45, %v7107_v14  ;;  %v3313_v16 = vsel %vm6430_vm11, %v3247_v45, %v7110_v32  ;;  %v5897_v45 = vld [vmem:[%s7720_s24 + $0x58] sm:$0xff]  }
 0xd76   : > { %6022 = vpow2.f32 %v3684_v47  ;;  %v5060_v49 = vcombine.low %v3312_v38, %v3312_v38  ;;  %v5061_v40 = vcombine.high %v3312_v38, %v3312_v38  ;;  %5665 = vmatpush3.bf16.msra.mxu1 %v3312_v38  ;;  %v5062_v43 = vcombine.low %v3313_v16, %v3313_v16  ;;  %v5898_v47 = vld [vmem:[%s7720_s24 + $0x60] sm:$0xff]   ;;  %v5899_v38 = vld [vmem:[%s7720_s24 + $0x68] sm:$0xff]  }
 0xd77   : > { %5666 = vmatprep.subr.bf16.mxu1 %v6077_v1  ;;  %v5063_v46 = vcombine.high %v3313_v16, %v3313_v16 }
 0xd78   : > { %5076 = vst.msk [vmem:[%s6461_s30 + $0x50] sm:$0xf] %vm1541_vm12, %v5060_v49  ;;  %5077 = vst.msk [vmem:[%s6461_s30 + $0x54] sm:$0xf] %vm1541_vm12, %v5061_v40 }
 0xd79   : > { %5078 = vst.msk [vmem:[%s6461_s30 + $0x58] sm:$0xf] %vm1541_vm12, %v5062_v43  ;;  %v6021_v8 = vpop.eup %6020  ;;  %5079 = vst.msk [vmem:[%s6461_s30 + $0x5c] sm:$0xf] %vm1541_vm12, %v5063_v46  ;;  %v5900_v46 = vld [vmem:[%s7720_s24 + $0x70] sm:$0xff]  }
 0xd7a   : > { %5667 = vmatpush3.bf16.msra.mxu1 %v3313_v16  ;;  %v3675_v14 = vpop.xlane.xlu0 %3674  ;;  %v3691_v32 = vsel %vm1831_vm2, %v6021_v8, 0.0 }
 0xd7b   : > { %v3679_v19 = vsub.f32 %v3659_v51, %v3675_v14  ;;  %3692 = vadd.xlane.f32.xlu0 %v3691_v32  ;;  %5680 = vmatprep.subr.bf16.mxu1 %v6077_v1 }
 0xd7d   : > { %v3686_v20 = vmul.f32 1.442695, %v3679_v19 }
 0xd7f   : > { %6024 = vpow2.f32 %v3686_v20 }
 0xd80   : > { %v6023_v39 = vpop.eup %6022 }
 0xd81   : > { %v3694_v24 = vsel %vm1831_vm2, %v6023_v39, 0.0 }
 0xd82   : > { %3695 = vadd.xlane.f32.xlu1 %v3694_v24 }
 0xd89   : > { %v6025_v17 = vpop.eup %6024 }
 0xd8a   : > { %v3697_v13 = vsel %vm1831_vm2, %v6025_v17, 0.0 }
 0xd8b   : > { %3698 = vadd.xlane.f32.xlu0 %v3697_v13 }
 0xd93   : > { %3109 = vrot.lane.b32.xlu1 %v7091_v61, %s7714_s6 }
 0xda1   : > { %3106 = vrot.lane.b32.xlu0 %v7091_v61, %s7715_s27 }
 0xdf8   : > { %v3690_v22 = vpop.xlane.xlu1 %3689 }
 0xdf9   : > { %6026 = vrcp.f32 %v3690_v22 }
 0xe03   : > { %v6027_v50 = vpop.eup %6026 }
 0xe04   : > { %v3704_v26 = vmul.f32 %v6027_v50, %v6019_v29 }
 0xe06   : > { %v3708_v41 = vpack.c.bf16 %v3704_v26, %v3704_v26 }
 0xe08   : > { %v3693_v52 = vpop.xlane.xlu0 %3692  ;;  %5661 = vmatmul.mubr.msk.bf16.vlgmr.msra.gmra.mrb[36].mxu0 %vm1634_vm14, %v3708_v41 }
 0xe09   : > { %6028 = vrcp.f32 %v3693_v52  ;;  %5676 = vmatprep.mubr.msk.bf16.mxu0 %vm6078_vm1, %v6077_v1 }
 0xe0f   : > { %v3696_v25 = vpop.xlane.xlu1 %3695 }
 0xe10   : > { %6030 = vrcp.f32 %v3696_v25 }
 0xe13   : > { %v6029_v58 = vpop.eup %6028  ;;  %v3110_v53 = vpop.permute.xlu1 %3109 }
 0xe14   : > { %v3705_v2 = vmul.f32 %v6029_v58, %v6021_v8  ;;  %v3115_v54 = vpack.c.bf16 %v3110_v53, %v3110_v53  ;;  %v5901_v8 = vld [vmem:[%s7720_s24 + $0x78] sm:$0xff]   ;;  %v5902_v53 = vld [vmem:[%s7656_s16 + $0x80] ss:$8 sps:$4 sm:$0xff]  }
 0xe16   : > { %v3256_v55 = vpack.i.b16 %v3115_v54, %v3115_v54  ;;  %v3709_v37 = vpack.c.bf16 %v3705_v2, %v3705_v2  ;;  %v5904_v2 = vld [vmem:[%s7656_s16 + $0x84] ss:$8 sps:$4 sm:$0xff]   ;;  %v5905_v54 = vld [vmem:[%s7657_s17 + $0x80] ss:$8 sps:$4 sm:$0xff]  }
 0xe18   : > { %v3261_v61 = vrot.slane %v3256_v55, %v6422_v6  ;;  %5669 = vmatmul.mubr.msk.bf16.vlgmr.msra.gmra.mrb[52].mxu1 %vm1634_vm14, %v3709_v37  ;;  %v3699_v7 = vpop.xlane.xlu0 %3698  ;;  %v5907_v55 = vld [vmem:[%s7657_s17 + $0x84] ss:$8 sps:$4 sm:$0xff]   ;;  %v5913_v37 = vld [vmem:[%s7657_s17 + $0x94] ss:$8 sps:$4 sm:$0xff]  }
 0xe19   : > { %6032 = vrcp.f32 %v3699_v7  ;;  %5684 = vmatprep.mubr.msk.bf16.mxu1 %vm6078_vm1, %v6077_v1  ;;  %v5911_v7 = vld [vmem:[%s7657_s17 + $0x90] ss:$8 sps:$4 sm:$0xff]  }
 0xe1a   : > { %v3316_v12 = vsel %vm6426_vm10, %v3261_v61, %v7127_v3  ;;  %v3317_v48 = vsel %vm6430_vm11, %v3261_v61, %v7130_v36  ;;  %v6031_v30 = vpop.eup %6030  ;;  %v5908_v61 = vld [vmem:[%s7656_s16 + $0x90] ss:$8 sps:$4 sm:$0xff]  }
 0xe1b   : > { %v5068_v62 = vcombine.low %v3316_v12, %v3316_v12  ;;  %v5069_v21 = vcombine.high %v3316_v12, %v3316_v12  ;;  %5681 = vmatpush3.bf16.msra.mxu1 %v3316_v12  ;;  %v5070_v9 = vcombine.low %v3317_v48, %v3317_v48  ;;  %v5071_v28 = vcombine.high %v3317_v48, %v3317_v48  ;;  %v5916_v12 = vld [vmem:[%s7656_s16 + $0xa4] ss:$8 sps:$4 sm:$0xff]  }
 0xe1c   : > { %v3107_v51 = vpop.permute.xlu0 %3106  ;;  %5682 = vmatprep.subr.bf16.mxu1 %v6077_v1  ;;  %v3706_v31 = vmul.f32 %v6031_v30, %v6023_v39 }
 0xe1d   : > { %5084 = vst.msk [vmem:[%s6461_s30 + $0x70] sm:$0xf] %vm1541_vm12, %v5068_v62  ;;  %5085 = vst.msk [vmem:[%s6461_s30 + $0x74] sm:$0xf] %vm1541_vm12, %v5069_v21  ;;  %v3114_v23 = vpack.c.bf16 %v3107_v51, %v3107_v51  ;;  %v5914_v62 = vld [vmem:[%s7656_s16 + $0xa0] ss:$8 sps:$4 sm:$0xff]  }
 0xe1e   : > { %5086 = vst.msk [vmem:[%s6461_s30 + $0x78] sm:$0xf] %vm1541_vm12, %v5070_v9  ;;  %5087 = vst.msk [vmem:[%s6461_s30 + $0x7c] sm:$0xf] %vm1541_vm12, %v5071_v28  ;;  %v3710_v11 = vpack.c.bf16 %v3706_v31, %v3706_v31  ;;  %v5917_v21 = vld [vmem:[%s7657_s17 + $0xa0] ss:$8 sps:$4 sm:$0xff]  }
 0xe1f   : > { %v3249_v3 = vpack.i.b16 %v3114_v23, %v3114_v23  ;;  %5683 = vmatpush3.bf16.msra.mxu1 %v3317_v48  ;;  %v5919_v48 = vld [vmem:[%s7657_s17 + $0xa4] ss:$8 sps:$4 sm:$0xff]   ;;  %v5934_v31 = vld [vmem:[%s7656_s16 + $0xd4] ss:$8 sps:$4 sm:$0xff]  }
 0xe20   : > { %4115 = vmatprep.subr.bf16.mxu1 %v5904_v2 }
 0xe21   : > { %v3254_v36 = vrot.slane %v3249_v3, %v6422_v6 }
 0xe23   : > { %v6033_v27 = vpop.eup %6032  ;;  %v3314_v5 = vsel %vm6426_vm10, %v3254_v36, %v7113_v59  ;;  %v3315_v42 = vsel %vm6430_vm11, %v3254_v36, %v7124_v57  ;;  %v5894_v59 = vld [vmem:[%s7720_s24 + $0x40] sm:$0xff]   ;;  %v5895_v57 = vld [vmem:[%s7720_s24 + $0x48] sm:$0xff]  }
 0xe24   : > { %v3707_v63 = vmul.f32 %v6033_v27, %v6025_v17  ;;  %v5064_v29 = vcombine.low %v3314_v5, %v3314_v5  ;;  %v5065_v15 = vcombine.high %v3314_v5, %v3314_v5  ;;  %5673 = vmatpush3.bf16.msra.mxu0 %v3314_v5  ;;  %v5066_v18 = vcombine.low %v3315_v42, %v3315_v42  ;;  %v5922_v27 = vld [vmem:[%s7656_s16 + $0xb4] ss:$8 sps:$4 sm:$0xff]  }
 0xe25   : > { %5674 = vmatprep.subr.bf16.mxu0 %v6077_v1  ;;  %v5067_v4 = vcombine.high %v3315_v42, %v3315_v42  ;;  %v5925_v5 = vld [vmem:[%s7657_s17 + $0xb4] ss:$8 sps:$4 sm:$0xff]  }
 0xe26   : > { %5080 = vst.msk [vmem:[%s6461_s30 + $0x60] sm:$0xf] %vm1541_vm12, %v5064_v29  ;;  %5081 = vst.msk [vmem:[%s6461_s30 + $0x64] sm:$0xf] %vm1541_vm12, %v5065_v15  ;;  %v3711_v10 = vpack.c.bf16 %v3707_v63, %v3707_v63  ;;  %v5928_v63 = vld [vmem:[%s7656_s16 + $0xc4] ss:$8 sps:$4 sm:$0xff]  }
 0xe27   : > { %5082 = vst.msk [vmem:[%s6461_s30 + $0x68] sm:$0xf] %vm1541_vm12, %v5066_v18  ;;  %5083 = vst.msk [vmem:[%s6461_s30 + $0x6c] sm:$0xf] %vm1541_vm12, %v5067_v4  ;;  %v5926_v29 = vld [vmem:[%s7656_s16 + $0xc0] ss:$8 sps:$4 sm:$0xff]  }
 0xe28   : > { %5675 = vmatpush3.bf16.msra.mxu0 %v3315_v42  ;;  %5685 = vmatmul.mubr.msk.bf16.vlgmr.msra.gmra.mrb[56].mxu1 %vm1634_vm14, %v3711_v10  ;;  %v5923_v42 = vld [vmem:[%s7657_s17 + $0xb0] ss:$8 sps:$4 sm:$0xff]   ;;  %v5929_v15 = vld [vmem:[%s7657_s17 + $0xc0] ss:$8 sps:$4 sm:$0xff]   ;;  %v5931_v18 = vld [vmem:[%s7657_s17 + $0xc4] ss:$8 sps:$4 sm:$0xff]  }
 0xe29   : > { %5688 = vmatprep.subr.bf16.mxu0 %v6077_v1  ;;  %4147 = vmatprep.mubr.bf16.mxu1 %v6084_v56  ;;  %v5937_v4 = vld [vmem:[%s7657_s17 + $0xd4] ss:$8 sps:$4 sm:$0xff]   ;;  %v5932_v10 = vld [vmem:[%s7656_s16 + $0xd0] ss:$8 sps:$4 sm:$0xff]  }
 0xe2a   : > { %4116 = vmatpush1.bf16.msra.mxu1 %v5902_v53  ;;  %v5965_v53 = vld [vmem:[%s7658_s18 + $0xb8] sm:$0xff]  }
 0xe2b   : > { %5677 = vmatmul.mubr.msk.bf16.vlgmr.msra.gmra.mrb[40].mxu0 %vm1634_vm14, %v3710_v11  ;;  %v5935_v11 = vld [vmem:[%s7657_s17 + $0xd0] ss:$8 sps:$4 sm:$0xff]  }
 0xe2c   : > { %5704 = vmatprep.mubr.msk.bf16.mxu0 %vm6078_vm1, %v6077_v1  ;;  %5689 = vmatpush3.bf16.msra.mxu0 %v5894_v59  ;;  %v5940_v59 = vld [vmem:[%s7656_s16 + $0xe4] ss:$8 sps:$4 sm:$0xff]  }
 0xe2d   : > { %5690 = vmatprep.subr.bf16.mxu0 %v6077_v1 }
 0xe30   : > { %5691 = vmatpush3.bf16.msra.mxu0 %v5895_v57  ;;  %v5943_v57 = vld [vmem:[%s7657_s17 + $0xe4] ss:$8 sps:$4 sm:$0xff]  }
 0xe31   : > { %5692 = vmatprep.subr.bf16.mxu0 %v6077_v1 }
 0xe34   : > { %5693 = vmatpush3.bf16.msra.mxu0 %v5896_v35  ;;  %v5944_v35 = vld [vmem:[%s7656_s16 + $0xf0] ss:$8 sps:$4 sm:$0xff]  }
 0xe35   : > { %5694 = vmatprep.subr.bf16.mxu0 %v6077_v1 }
 0xe38   : > { %5695 = vmatpush3.bf16.msra.mxu0 %v5897_v45  ;;  %v5947_v45 = vld [vmem:[%s7657_s17 + $0xf0] ss:$8 sps:$4 sm:$0xff]  }
 0xe39   : > { %5696 = vmatprep.subr.bf16.mxu0 %v6077_v1 }
 0xe3c   : > { %5697 = vmatpush3.bf16.msra.mxu0 %v5898_v47 }
 0xe3d   : > { %5698 = vmatprep.subr.bf16.mxu0 %v6077_v1 }
 0xe40   : > { %5699 = vmatpush3.bf16.msra.mxu0 %v5899_v38 }
 0xe41   : > { %5700 = vmatprep.subr.bf16.mxu0 %v6077_v1 }
 0xe44   : > { %5701 = vmatpush3.bf16.msra.mxu0 %v5900_v46 }
 0xe45   : > { %5702 = vmatprep.subr.bf16.mxu0 %v6077_v1 }
 0xe48   : > { %5703 = vmatpush3.bf16.msra.mxu0 %v5901_v8 }
 0xe49   : > { %4253 = vmatprep.subr.bf16.mxu0 %v5907_v55 }
 0xedb   : > { %v3749_v44 = vpop.f32.mrb[36].mxu0 }
 0xedc   : > { %v5662_v33 = vpop.f32.mrb[37].mxu0 }
 0xedd   : > { %v3752_v60 = vpop.f32.mrb[38].mxu0  ;;  %v5941_v33 = vld [vmem:[%s7657_s17 + $0xe0] ss:$8 sps:$4 sm:$0xff]  }
 0xede   : > { %v5663_v34 = vpop.f32.mrb[39].mxu0  ;;  %v5946_v60 = vld [vmem:[%s7656_s16 + $0xf4] ss:$8 sps:$4 sm:$0xff]  }
 0xedf   : > { %v5949_v34 = vld [vmem:[%s7657_s17 + $0xf4] ss:$8 sps:$4 sm:$0xff]  }
 0xeeb   : > { %v3792_v16 = vpop.f32.mrb[52].mxu1 }
 0xeec   : > { %3885 = vrot.lane.b32.xlu1 %v3792_v16, %s7714_s6  ;;  %v5670_v49 = vpop.f32.mrb[53].mxu1 }
 0xeed   : > { %v3795_v40 = vpop.f32.mrb[54].mxu1 }
 0xeee   : > { %v5671_v43 = vpop.f32.mrb[55].mxu1  ;;  %v5120_v40 = vld [vmem:[%s7655_s15 + $0x1] sm:$0x1] }
 0xefb   : > { %v3878_v14 = vpop.f32.mrb[56].mxu1 }
 0xefc   : > { %3893 = vrot.lane.b32.xlu1 %v3878_v14, %s7713_s2  ;;  %v5686_v32 = vpop.f32.mrb[57].mxu1  ;;  %v5950_v14 = vld [vmem:[%s7658_s18 + $0xc0] sm:$0xff]   ;;  %s7721_s2 = sld [smem:[#allocation19_spill]] }
 0xefd   : > { %v3881_v19 = vpop.f32.mrb[58].mxu1  ;;  %v5951_v32 = vld [vmem:[%s7658_s18 + $0x80] sm:$0xff]  }
 0xefe   : > { %v3835_v20 = vpop.f32.mrb[40].mxu0  ;;  %v5687_v39 = vpop.f32.mrb[59].mxu1  ;;  %v5952_v19 = vld [vmem:[%s7658_s18 + $0xc8] sm:$0xff]  }
 0xeff   : > { %3889 = vrot.lane.b32.xlu0 %v3835_v20, %s7715_s27  ;;  %v5678_v24 = vpop.f32.mrb[41].mxu0  ;;  %v5953_v20 = vld [vmem:[%s7658_s18 + $0x88] sm:$0xff]   ;;  %v5954_v39 = vld [vmem:[%s7658_s18 + $0xd0] sm:$0xff]  }
 0xf00   : > { %v3838_v17 = vpop.f32.mrb[42].mxu0  ;;  %v5955_v24 = vld [vmem:[%s7658_s18 + $0x90] sm:$0xff]  }
 0xf01   : > { %v5679_v13 = vpop.f32.mrb[43].mxu0  ;;  %v5956_v17 = vld [vmem:[%s7658_s18 + $0xd8] sm:$0xff]  }
 0xf02   : > { %v5957_v13 = vld [vmem:[%s7658_s18 + $0x98] sm:$0xff]  }
 0xf5e   : > { %v3886_v22 = vpop.permute.xlu1 %3885 }
 0xf5f   : > { %v3896_v50 = vsel %vm1634_vm14, %v3749_v44, %v3886_v22  ;;  %v5938_v44 = vld [vmem:[%s7656_s16 + $0xe0] ss:$8 sps:$4 sm:$0xff]  }
 0xf60   : > { %v5958_v22 = vld [vmem:[%s7658_s18 + $0xe0] sm:$0xff]  }
 0xf6e   : > { %v3894_v41 = vpop.permute.xlu1 %3893 }
 0xf71   : > { %v3890_v26 = vpop.permute.xlu0 %3889 }
 0xf72   : > { %v3897_v52 = vsel %vm2065_vm3, %v3896_v50, %v3890_v26  ;;  %v5959_v50 = vld [vmem:[%s7658_s18 + $0xa0] sm:$0xff]   ;;  %v5960_v26 = vld [vmem:[%s7658_s18 + $0xe8] sm:$0xff]  }
 0xf73   : > { %v3898_v25 = vsel %vm2067_vm4, %v3897_v52, %v3894_v41  ;;  %v5961_v41 = vld [vmem:[%s7658_s18 + $0xa8] sm:$0xff]   ;;  %v5962_v52 = vld [vmem:[%s7658_s18 + $0xf0] sm:$0xff]  }
 0xf74   : > { %v3916_v58 = vpack.c.bf16 %v3898_v25, %v3898_v25  ;;  %v5963_v25 = vld [vmem:[%s7658_s18 + $0xb0] sm:$0xff]  }
 0xf76   : > { %5705 = vmatmul.mubr.bf16.vlgmr.msra.gmra.mrb[44].mxu0 %v3916_v58  ;;  %v5964_v58 = vld [vmem:[%s7658_s18 + $0xf8] sm:$0xff]  }
 0xf77   : > { %4285 = vmatprep.mubr.bf16.mxu0 %v6084_v56  ;;  %v5910_v56 = vld [vmem:[%s7656_s16 + $0x94] ss:$8 sps:$4 sm:$0xff]   ;;  %4254 = vmatpush1.bf16.msra.mxu0 %v5905_v54 }
 0xf78   : > { %4117 = vmatprep.subr.bf16.mxu1 %v5910_v56  ;;  %4255 = vmatprep.subr.bf16.mxu0 %v5913_v37 }
 0xf79   : > { %4118 = vmatpush1.bf16.msra.mxu1 %v5908_v61 }
 0xf7a   : > { %4119 = vmatprep.subr.bf16.mxu1 %v5916_v12 }
 0xf7b   : > { %4256 = vmatpush1.bf16.msra.mxu0 %v5911_v7 }
 0xf7c   : > { %4257 = vmatprep.subr.bf16.mxu0 %v5919_v48 }
 0xf7d   : > { %4120 = vmatpush1.bf16.msra.mxu1 %v5914_v62 }
 0xf7e   : > { %4121 = vmatprep.subr.bf16.mxu1 %v5922_v27 }
 0xf7f   : > { %4258 = vmatpush1.bf16.msra.mxu0 %v5917_v21 }
 0xf80   : > { %4259 = vmatprep.subr.bf16.mxu0 %v5925_v5 }
 0xf83   : > { %4260 = vmatpush1.bf16.msra.mxu0 %v5923_v42 }
 0xf84   : > { %4261 = vmatprep.subr.bf16.mxu0 %v5931_v18  ;;  %v5966_v18 = vld [vmem:[%s7721_s2] sm:$0xff]  }
 0xf87   : > { %4262 = vmatpush1.bf16.msra.mxu0 %v5929_v15 }
 0xf88   : > { %4263 = vmatprep.subr.bf16.mxu0 %v5937_v4  ;;  %v5968_v4 = vld [vmem:[%s7721_s2 + $0x10] sm:$0xff]  }
 0xf8b   : > { %4264 = vmatpush1.bf16.msra.mxu0 %v5935_v11 }
 0xf8c   : > { %4265 = vmatprep.subr.bf16.mxu0 %v5943_v57 }
 0xf8f   : > { %4266 = vmatpush1.bf16.msra.mxu0 %v5941_v33 }
 0xf90   : > { %4267 = vmatprep.subr.bf16.mxu0 %v5949_v34 }
 0xf93   : > { %4268 = vmatpush1.bf16.msra.mxu0 %v5947_v45  ;;  %v5970_v45 = vld [vmem:[%s7721_s2 + $0x20] sm:$0xff]  }
 0xf94   : > { %5708 = vmatprep.subr.bf16.mxu0 %v6077_v1 }
0x1049   : > { %v3999_v9 = vpop.f32.mrb[44].mxu0 }
0x104a   : > { %v7476_v51 = vadd.f32 %v3999_v9, %v6975_v0  ;;  %v5706_v28 = vpop.f32.mrb[45].mxu0  ;;  %v5920_v0 = vld [vmem:[%s7656_s16 + $0xb0] ss:$8 sps:$4 sm:$0xff]  }
0x104b   : > { %v4002_v23 = vpop.f32.mrb[46].mxu0  ;;  %4122 = vmatpush1.bf16.msra.mxu1 %v5920_v0 }
0x104c   : > { %v5707_v3 = vpop.f32.mrb[47].mxu0  ;;  %v4008_v36 = vmul.f32 %v7476_v51, %v7476_v51  ;;  %4123 = vmatprep.subr.bf16.mxu1 %v5928_v63 }
0x104e   : > { %v4009_v30 = vsel %vm796_vm0, %v4008_v36, 0.0 }
0x104f   : > { %4010 = vadd.xlane.f32.xlu0 %v4009_v30  ;;  %4124 = vmatpush1.bf16.msra.mxu1 %v5926_v29 }
0x1050   : > { %4125 = vmatprep.subr.bf16.mxu1 %v5934_v31  ;;  %v5967_v31 = vld [vmem:[%s7721_s2 + $0x8] sm:$0xff]  }
0x1053   : > { %4126 = vmatpush1.bf16.msra.mxu1 %v5932_v10 }
0x1054   : > { %4127 = vmatprep.subr.bf16.mxu1 %v5940_v59 }
0x1057   : > { %4128 = vmatpush1.bf16.msra.mxu1 %v5938_v44 }
0x1058   : > { %4129 = vmatprep.subr.bf16.mxu1 %v5946_v60 }
0x105b   : > { %4130 = vmatpush1.bf16.msra.mxu1 %v5944_v35  ;;  %v5969_v35 = vld [vmem:[%s7721_s2 + $0x18] sm:$0xff]  }
0x105c   : > { %5389 = vmatprep.subr.bf16.mxu1 %v5950_v14 }
0x10dc   : > { %v4011_v47 = vpop.xlane.xlu0 %4010 }
0x10dd   : > { %v4012_v38 = vmul.f32 0.0078125, %v4011_v47  ;;  %v5972_v47 = vld [vmem:[%s7721_s2 + $0x30] sm:$0xff]  }
0x10df   : > { %v4013_v16 = vadd.f32 1e-06, %v4012_v38  ;;  %v5973_v38 = vld [vmem:[%s7721_s2 + $0x38] sm:$0xff]  }
0x10e1   : > { %6034 = vrsqrt.f32 %v4013_v16 }
0x10eb   : > { %v6035_v49 = vpop.eup %6034 }
0x10ec   : > { %v4015_v43 = vmul.f32 %v6035_v49, %v7476_v51 }
0x10ee   : > { %v4016_v46 = vmul.f32 %v5120_v40, %v4015_v43 }
0x10f0   : > { %v4034_v8 = vpack.c.bf16 %v4016_v46, %v4016_v46  ;;  %v4480_v46 = vld [vmem:[%s7723_s3] sm:$0x1] }
0x10f2   : > { %4148 = vmatmul.mubr.bf16.vlgmr.msra.gmra.mrb[60].mxu1 %v4034_v8  ;;  %4286 = vmatmul.mubr.bf16.vlgmr.msra.gmra.mrb[48].mxu0 %v4034_v8 }
0x10f3   : > { %5724 = vmatprep.mubr.msk.bf16.mxu0 %vm6078_vm1, %v6077_v1  ;;  %5390 = vmatpush3.bf16.msra.mxu1 %v5951_v32 }
0x10f4   : > { %5391 = vmatprep.subr.bf16.mxu1 %v5952_v19  ;;  %5709 = vmatpush3.bf16.msra.mxu0 %v5966_v18 }
0x10f5   : > { %5710 = vmatprep.subr.bf16.mxu0 %v6077_v1 }
0x10f7   : > { %5392 = vmatpush3.bf16.msra.mxu1 %v5953_v20 }
0x10f8   : > { %5393 = vmatprep.subr.bf16.mxu1 %v5954_v39  ;;  %5711 = vmatpush3.bf16.msra.mxu0 %v5967_v31 }
0x10f9   : > { %5712 = vmatprep.subr.bf16.mxu0 %v6077_v1 }
0x10fb   : > { %5394 = vmatpush3.bf16.msra.mxu1 %v5955_v24 }
0x10fc   : > { %5395 = vmatprep.subr.bf16.mxu1 %v5956_v17  ;;  %5713 = vmatpush3.bf16.msra.mxu0 %v5968_v4 }
0x10fd   : > { %5714 = vmatprep.subr.bf16.mxu0 %v6077_v1 }
0x10ff   : > { %5396 = vmatpush3.bf16.msra.mxu1 %v5957_v13 }
0x1100   : > { %5397 = vmatprep.subr.bf16.mxu1 %v5958_v22  ;;  %5715 = vmatpush3.bf16.msra.mxu0 %v5969_v35 }
0x1101   : > { %5716 = vmatprep.subr.bf16.mxu0 %v6077_v1 }
0x1103   : > { %5398 = vmatpush3.bf16.msra.mxu1 %v5959_v50 }
0x1104   : > { %5399 = vmatprep.subr.bf16.mxu1 %v5960_v26  ;;  %5717 = vmatpush3.bf16.msra.mxu0 %v5970_v45 }
0x1105   : > { %5718 = vmatprep.subr.bf16.mxu0 %v6077_v1 }
0x1107   : > { %5400 = vmatpush3.bf16.msra.mxu1 %v5961_v41 }
0x1108   : > { %5401 = vmatprep.subr.bf16.mxu1 %v5962_v52 }
0x110b   : > { %5402 = vmatpush3.bf16.msra.mxu1 %v5963_v25 }
0x110c   : > { %5403 = vmatprep.subr.bf16.mxu1 %v5964_v58 }
0x110f   : > { %5404 = vmatpush3.bf16.msra.mxu1 %v5965_v53 }
0x11c5   : > { %v4149_v2 = vpop.f32.mrb[60].mxu1  ;;  %v4287_v54 = vpop.f32.mrb[48].mxu0 }
0x11c6   : > { %v4294_v55 = vsub.f32 0.0, %v4149_v2  ;;  %v4151_v56 = vpop.f32.mrb[61].mxu1  ;;  %v4289_v37 = vpop.f32.mrb[49].mxu0 }
0x11c7   : > { %v4295_v61 = vsub.f32 0.0, %v4151_v56  ;;  %v4153_v7 = vpop.f32.mrb[62].mxu1  ;;  %v4291_v12 = vpop.f32.mrb[50].mxu0 }
0x11c8   : > { %v4296_v48 = vmul.f32 1.442695, %v4294_v55  ;;  %v4154_v62 = vpop.f32.mrb[63].mxu1  ;;  %v4292_v21 = vpop.f32.mrb[51].mxu0 }
0x11c9   : > { %v4298_v9 = vmul.f32 1.442695, %v4295_v61 }
0x11ca   : > { %6036 = vpow2.f32 %v4296_v48 }
0x11cb   : > { %6038 = vpow2.f32 %v4298_v9 }
0x11d4   : > { %v6037_v28 = vpop.eup %6036 }
0x11d5   : > { %v6039_v23 = vpop.eup %6038  ;;  %v4300_v3 = vadd.f32 1.0, %v6037_v28 }
0x11d6   : > { %v4301_v36 = vadd.f32 1.0, %v6039_v23 }
0x11d7   : > { %6040 = vrcp.f32 %v4300_v3 }
0x11d8   : > { %6042 = vrcp.f32 %v4301_v36 }
0x11e1   : > { %v6041_v30 = vpop.eup %6040 }
0x11e2   : > { %v6043_v27 = vpop.eup %6042  ;;  %v4304_v5 = vmul.f32 %v6041_v30, %v4149_v2 }
0x11e3   : > { %v4305_v0 = vmul.f32 %v6043_v27, %v4151_v56 }
0x11e4   : > { %v4306_v42 = vmul.f32 %v4304_v5, %v4287_v54 }
0x11e5   : > { %v4307_v63 = vmul.f32 %v4305_v0, %v4289_v37 }
0x11e6   : > { %v4341_v15 = vpack.c.bf16 %v4306_v42, %v4306_v42 }
0x11e7   : > { %v4342_v29 = vpack.c.bf16 %v4307_v63, %v4307_v63 }
0x11e9   : > { %4471 = vmatprep.mubr.bf16.mxu1 %v4342_v29 }
0x11ea   : > { %4472 = vmatmul.mubr.bf16.vlgmr.msra.gmra.mrb[64].mxu1 %v4341_v15 }
0x12bd   : > { %v5405_v10 = vpop.f32.mrb[64].mxu1 }
0x12be   : > { %v5406_v11 = vpop.f32.mrb[65].mxu1 }
0x12bf   : > { %v5407_v59 = vadd.f32 %v5406_v11, %v5405_v10  ;;  %v5408_v57 = vpop.f32.mrb[66].mxu1 }
0x12c0   : > { %v5409_v44 = vpop.f32.mrb[67].mxu1 }
0x12c1   : > { %v4479_v33 = vadd.f32 %v5407_v59, %v7476_v51  ;;  %v5971_v51 = vld [vmem:[%s7721_s2 + $0x28] sm:$0xff]  }
0x12c2   : > { %5719 = vmatpush3.bf16.msra.mxu0 %v5971_v51 }
0x12c3   : > { %v4481_v60 = vmul.f32 %v4479_v33, %v4479_v33  ;;  %5720 = vmatprep.subr.bf16.mxu0 %v6077_v1 }
0x12c5   : > { %v4482_v34 = vsel %vm796_vm0, %v4481_v60, 0.0 }
0x12c6   : > { %4483 = vadd.xlane.f32.xlu1 %v4482_v34  ;;  %5721 = vmatpush3.bf16.msra.mxu0 %v5972_v47 }
0x12c7   : > { %5722 = vmatprep.subr.bf16.mxu0 %v6077_v1 }
0x12ca   : > { %5723 = vmatpush3.bf16.msra.mxu0 %v5973_v38 }
0x1353   : > { %v4484_v16 = vpop.xlane.xlu1 %4483 }
0x1354   : > { %v4485_v49 = vmul.f32 0.0078125, %v4484_v16 }
0x1356   : > { %v4486_v40 = vadd.f32 1e-06, %v4485_v49 }
0x1358   : > { %6044 = vrsqrt.f32 %v4486_v40 }
0x1362   : > { %v6045_v43 = vpop.eup %6044 }
0x1363   : > { %v4488_v8 = vmul.f32 %v6045_v43, %v4479_v33 }
0x1365   : > { %v4489_v14 = vmul.f32 %v4488_v8, %v4480_v46 }
0x1367   : > { %v4506_v32 = vpack.c.bf16 %v4489_v14, %v4489_v14 }
0x1369   : > { %5725 = vmatmul.mubr.bf16.vlgmr.msra.gmra.mrb[52].mxu0 %v4506_v32 }
0x143c   : > { %v4589_v1 = vpop.f32.mrb[52].mxu0 }
0x143d   : > { %v4598_v19 = vrot.slane %v4589_v1, %v6422_v6  ;;  %v5726_v20 = vpop.f32.mrb[53].mxu0 }
0x143e   : > { %v4592_v39 = vpop.f32.mrb[54].mxu0 }
0x143f   : > { %4599 = vst [vmem:[%s758_s26] sm:$0xff] %v4598_v19  ;;  %v5727_v24 = vpop.f32.mrb[55].mxu0 }
0x1440 PF: > { %s7725_s24 = sld [smem:[#allocation6_spill]] }
0x1446   : > { %s36_s25 = sadd.s32 1, %s7725_s24  }
0x1447   : > { %p33_p1 = scmp.ge.s32.totalorder %s36_s25, 4  }
0x1449   :  { %35 = sbr.rel (!%p33_p1) target bundleno = 17 (0x11), region = 185 }
0x1450   :  { %4651 = vsyncpa [#allocation4], 1 }
0x1451   :  { %4653 = vsyncpa [#allocation4 + $0x1], 1 }

// kernel: vlm_generate.1
= control target key start
LH: loop header
LB: loop body
LE: loop exit
PB: predicated region body
PF: predicated region fallthrough
CT: control target
= control target key end

     0   :  { %s10426_s0 = inlined_call_operand.vmem [shape: f32[2,16,128], index: 0, kind: input, shape index: {}]   ;;  %s10427_s1 = inlined_call_operand.vmem [shape: f32[2,8,128], index: 1, kind: input, shape index: {}]   ;;  %s10428_s2 = inlined_call_operand.vmem [shape: bf16[128,128], index: 2, kind: input, shape index: {}]   ;;  %s10429_s3 = inlined_call_operand.vmem [shape: f32[1,128], index: 3, kind: input, shape index: {}]   ;;  %s10430_s4 = inlined_call_operand.vmem [shape: f32[32,32], index: 4, kind: input, shape index: {}]   ;;  %s10431_s5 = inlined_call_operand.vmem [shape: f32[32,32], index: 5, kind: input, shape index: {}]   ;;  %s10432_s6 = inlined_call_operand.vmem [shape: f32[2,1,128], index: 6, kind: input, shape index: {}]   ;;  %s10433_s7 = inlined_call_operand.vmem [shape: bf16[2,128,128], index: 7, kind: input, shape index: {}]   ;;  %s10434_s8 = inlined_call_operand.vmem [shape: f32[2,1,128], index: 8, kind: input, shape index: {}]   ;;  %s10435_s9 = inlined_call_operand.vmem [shape: bf16[2,128,128], index: 9, kind: input, shape index: {}]   ;;  %s10436_s10 = inlined_call_operand.vmem [shape: f32[2,1,128], index: 10, kind: input, shape index: {}]   ;;  %s10437_s11 = inlined_call_operand.vmem [shape: bf16[2,128,128], index: 11, kind: input, shape index: {}]   ;;  %s10438_s12 = inlined_call_operand.vmem [shape: f32[2,1,128], index: 12, kind: input, shape index: {}]   ;;  %s10439_s13 = inlined_call_operand.vmem [shape: bf16[2,128,128], index: 13, kind: input, shape index: {}]   ;;  %s10440_s14 = inlined_call_operand.vmem [shape: f32[2,1,128], index: 14, kind: input, shape index: {}]   ;;  %s10441_s15 = inlined_call_operand.vmem [shape: bf16[2,128,256], index: 15, kind: input, shape index: {}]   ;;  %s10442_s16 = inlined_call_operand.vmem [shape: bf16[2,128,256], index: 16, kind: input, shape index: {}]   ;;  %s10443_s17 = inlined_call_operand.vmem [shape: bf16[2,256,128], index: 17, kind: input, shape index: {}]   ;;  %s10444_s18 = inlined_call_operand.vmem [shape: f32[1,128], index: 18, kind: input, shape index: {}]   ;;  %s10445_s19 = inlined_call_operand.vmem [shape: bf16[128,128], index: 19, kind: input, shape index: {}]   ;;  %s10446_s20 = inlined_call_operand.vmem [shape: bf16[2,2,4,32,32], index: 20, kind: output, shape index: {0}]   ;;  %s10447_s21 = inlined_call_operand.vmem [shape: bf16[2,2,4,32,32], index: 21, kind: output, shape index: {1}]   ;;  %s10448_s22 = inlined_call_operand.vmem [shape: f32[2,8,128], index: 22, kind: output, shape index: {2}]  }
   0x1   :  { %10495 = sst [smem:[#allocation15_spill]] %s10426_s0 }
   0x2   :  { %10496 = sst [smem:[#allocation16_spill]] %s10427_s1 }
   0x3   :  { %10497 = sst [smem:[#allocation17_spill]] %s10428_s2 }
   0x4   :  { %10498 = sst [smem:[#allocation18_spill]] %s10429_s3  ;;  %s7937_s3 = smov 0  }
   0x5   :  { %10499 = sst [smem:[#allocation19_spill]] %s10430_s4 }
   0x6   :  { %10500 = sst [smem:[#allocation20_spill]] %s10431_s5 }
   0x7   :  { %10501 = sst [smem:[#allocation21_spill]] %s10432_s6 }
   0x8   :  { %10502 = sst [smem:[#allocation22_spill]] %s10439_s13 }
   0x9   :  { %10503 = sst [smem:[#allocation23_spill]] %s10444_s18 }
   0xa   :  { %10504 = sst [smem:[#allocation24_spill]] %s10445_s19 }
   0xb   :  { %10505 = sst [smem:[#allocation25_spill]] %s10446_s20 }
   0xc   :  { %10506 = sst [smem:[#allocation26_spill]] %s10447_s21 }
   0xd   :  { %10507 = sst [smem:[#allocation27_spill]] %s10448_s22 }
   0xe LB: > { %10508 = sst [smem:[#allocation2_spill]] %s7811_s3  ;;  %s6132_s28 = sadd.s32 4294967295, %s7811_s3   ;;  %s7811_s3 = sphi %s7937_s3, %s33_s3  }
   0xf   : > { %p6136_p0 = scmp.ge.s32.totalorder %s7811_s3, 1  ;;  %p626_p1 = scmp.lt.s32.totalorder %s7811_s3, 3 }
  0x11   : > { %p627_p2 = pnand %p6136_p0, %p626_p1 }
  0x13   : > { %630 = sbr.rel (%p627_p2) target bundleno = 5704 (0x1648), region = 100 }
  0x1a   : > { %s10509_s4 = sld [smem:[#allocation17_spill]]  ;;  %v10465_v1 = vmov 0.0   ;;  %vm7814_vm0 = vmmov 0   ;;  %p701_p3 = scmp.lt.s32.totalorder %s6132_s28, 1  ;;  %v7370_v14 = vld [vmem:[%s10433_s7] sm:$0xff]   ;;  %v7372_v16 = vld [vmem:[%s10433_s7 + $0x8] sm:$0xff]  }
  0x1b   : > { %6881 = vmatprep.subr.bf16.mxu0 %v10465_v1  ;;  %6897 = vmatprep.mubr.msk.bf16.mxu0 %vm7814_vm0, %v10465_v1  ;;  %s10511_s5 = sld [smem:[#allocation15_spill]]  ;;  %v7371_v15 = vld [vmem:[%s10435_s9] sm:$0xff]   ;;  %v7373_v17 = vld [vmem:[%s10435_s9 + $0x8] sm:$0xff]   ;;  %s10513_s0 = sld [smem:[#allocation18_spill]]  ;;  %v7374_v27 = vld [vmem:[%s10433_s7 + $0x10] sm:$0xff]   ;;  %vm1858_vm1 = vcmask 257024  }
  0x1c   : > { %s10571_s28 = smov (!%p701_p3, %s6132_s28), 1  ;;  %6901 = vmatprep.subr.bf16.mxu1 %v7370_v14  ;;  %v7375_v28 = vld [vmem:[%s10435_s9 + $0x10] sm:$0xff]   ;;  %v7376_v29 = vld [vmem:[%s10433_s7 + $0x18] sm:$0xff]   ;;  %v7378_v31 = vld [vmem:[%s10433_s7 + $0x20] sm:$0xff]   ;;  %s10456_s23 = smov 64   ;;  %vm1433_vm2 = vcmask 130048  }
  0x1d   : > { %10510 = sst [smem:[#allocation3_spill]] %s10571_s28  ;;  %s6596_s25 = sshll.u32 %s10571_s28, 4  ;;  %6902 = vmatpush3.bf16.msra.mxu1 %v7370_v14  ;;  %v7377_v30 = vld [vmem:[%s10435_s9 + $0x18] sm:$0xff]   ;;  %v7379_v32 = vld [vmem:[%s10435_s9 + $0x20] sm:$0xff]   ;;  %v7380_v33 = vld [vmem:[%s10433_s7 + $0x28] sm:$0xff]   ;;  %vm1955_vm3 = vcmask 261120  }
  0x1e   : > { %s10453_s2 = sshll.u32 %s10571_s28, 3  ;;  %6903 = vmatprep.subr.bf16.mxu1 %v7372_v16  ;;  %v7381_v34 = vld [vmem:[%s10435_s9 + $0x28] sm:$0xff]   ;;  %v7382_v35 = vld [vmem:[%s10433_s7 + $0x30] sm:$0xff]   ;;  %v7384_v37 = vld [vmem:[%s10433_s7 + $0x38] sm:$0xff]   ;;  %s10454_s1 = smov 32   ;;  %vm2656_vm8 = vcmask 523264  }
  0x1f   : > { %v7383_v36 = vld [vmem:[%s10435_s9 + $0x30] sm:$0xff]   ;;  %v7385_v38 = vld [vmem:[%s10435_s9 + $0x38] sm:$0xff]   ;;  %v7386_v39 = vld [vmem:[%s10437_s11] sm:$0xff]   ;;  %s6597_s26 = sshll.u32 %s10571_s28, 7  ;;  %s10517_s21 = sld [smem:[#allocation26_spill]]  ;;  %vm2661_vm9 = vcmask 785408  }
  0x20   : > { %v7362_v0 = vld [vmem:[%s10509_s4] sm:$0xff]   ;;  %v7363_v2 = vld [vmem:[%s10509_s4 + $0x8] sm:$0xff]   ;;  %v7364_v3 = vld [vmem:[%s10509_s4 + $0x10] sm:$0xff]   ;;  %s10522_s29 = sld [smem:[#allocation19_spill]]  ;;  %s10524_s20 = sld [smem:[#allocation25_spill]]  ;;  %vm5871_vm10 = vcmask 1047559  }
  0x21   : > { %6882 = vmatpush3.bf16.msra.mxu0 %v7362_v0  ;;  %v7365_v4 = vld [vmem:[%s10509_s4 + $0x18] sm:$0xff]   ;;  %v7366_v5 = vld [vmem:[%s10509_s4 + $0x20] sm:$0xff]   ;;  %v7367_v6 = vld [vmem:[%s10509_s4 + $0x28] sm:$0xff]   ;;  %s705_s24 = scalar_lea.vmem %s10511_s5, %s6596_s25  ;;  %s10512_s25 = sld [smem:[#allocation16_spill]]  ;;  %6904 = vmatpush3.bf16.msra.mxu1 %v7372_v16 }
  0x22   : > { %6883 = vmatprep.subr.bf16.mxu0 %v10465_v1  ;;  %v7368_v7 = vld [vmem:[%s10509_s4 + $0x30] sm:$0xff]   ;;  %v7369_v8 = vld [vmem:[%s10509_s4 + $0x38] sm:$0xff]   ;;  %v733_v9 = vld [vmem:[%s705_s24] sm:$0xff]  ;;  %6905 = vmatprep.subr.bf16.mxu1 %v7374_v27  ;;  %s10460_s5 = smov 16   ;;  %s10526_s4 = smov 16  }
  0x23   : > { %v734_v10 = vld [vmem:[%s705_s24 + $0x8] sm:$0xff]  ;;  %v6145_v18 = vld [vmem:[%s10513_s0] ss:$0 sm:$0xff]  ;;  %s10458_s0 = smov 96   ;;  %s10463_s24 = smov 112  }
  0x24   : > { %v751_v11 = vpack.c.bf16 %v734_v10, %v733_v9  ;;  %v7392_v9 = vld [vmem:[%s10437_s11 + $0x30] sm:$0xff]   ;;  %v7393_v10 = vld [vmem:[%s10437_s11 + $0x38] sm:$0xff]   ;;  %s10539_s13 = sld [smem:[#allocation22_spill]]  ;;  %s10548_s3 = sld [smem:[#allocation20_spill]] }
  0x25   : > { %6884 = vmatpush3.bf16.msra.mxu0 %v7363_v2  ;;  %6906 = vmatpush3.bf16.msra.mxu1 %v7374_v27  ;;  %s10565_s18 = sld [smem:[#allocation23_spill]] }
  0x26   : > { %6885 = vmatprep.subr.bf16.mxu0 %v10465_v1  ;;  %6907 = vmatprep.subr.bf16.mxu1 %v7376_v29  ;;  %s8350_s6 = scalar_lea.vmem %s10524_s20, %s6597_s26 }
  0x27   : > { %s7991_s30 = scalar_lea.vmem %s10512_s25, %s10453_s2  ;;  %s10516_s25 = sld [smem:[#allocation21_spill]] }
  0x28   : > { %v7994_v12 = vld [vmem:[%s7991_s30] sm:$0xff]  ;;  %s8152_s2 = scalar_lea.vmem %s10517_s21, %s6597_s26  ;;  %s10525_s21 = smov 112  }
  0x29   : > { %6886 = vmatpush3.bf16.msra.mxu0 %v7364_v3  ;;  %v867_v13 = vmul.f32 %v7994_v12, %v7994_v12  ;;  %6908 = vmatpush3.bf16.msra.mxu1 %v7376_v29 }
  0x2a   : > { %6887 = vmatprep.subr.bf16.mxu0 %v10465_v1  ;;  %6909 = vmatprep.subr.bf16.mxu1 %v7378_v31  ;;  %s10549_s27 = smov %s10548_s3 }
  0x2b   : > { %872 = vadd.xlane.f32.xlu1 %v867_v13 }
  0x2d   : > { %6888 = vmatpush3.bf16.msra.mxu0 %v7365_v4  ;;  %6910 = vmatpush3.bf16.msra.mxu1 %v7378_v31  ;;  %v6154_v57 = vld [vmem:[%s10516_s25] ss:$0 sm:$0xff]  ;;  %v7387_v4 = vld [vmem:[%s10437_s11 + $0x8] sm:$0xff]  }
  0x2e   : > { %6889 = vmatprep.subr.bf16.mxu0 %v10465_v1  ;;  %6911 = vmatprep.subr.bf16.mxu1 %v7380_v33 }
  0x2f   : > { %874 = vadd.xlane.f32.xlu1 %v10465_v1 }
  0x31   : > { %6890 = vmatpush3.bf16.msra.mxu0 %v7366_v5  ;;  %6912 = vmatpush3.bf16.msra.mxu1 %v7380_v33  ;;  %v7388_v5 = vld [vmem:[%s10437_s11 + $0x10] sm:$0xff]  }
  0x32   : > { %6891 = vmatprep.subr.bf16.mxu0 %v10465_v1  ;;  %6913 = vmatprep.subr.bf16.mxu1 %v7382_v35 }
  0x35   : > { %6892 = vmatpush3.bf16.msra.mxu0 %v7367_v6  ;;  %6914 = vmatpush3.bf16.msra.mxu1 %v7382_v35  ;;  %v7389_v6 = vld [vmem:[%s10437_s11 + $0x18] sm:$0xff]  }
  0x36   : > { %6893 = vmatprep.subr.bf16.mxu0 %v10465_v1  ;;  %6915 = vmatprep.subr.bf16.mxu1 %v7384_v37 }
  0x39   : > { %6894 = vmatpush3.bf16.msra.mxu0 %v7368_v7  ;;  %6916 = vmatpush3.bf16.msra.mxu1 %v7384_v37  ;;  %v7390_v7 = vld [vmem:[%s10437_s11 + $0x20] sm:$0xff]  }
  0x3a   : > { %6895 = vmatprep.subr.bf16.mxu0 %v10465_v1  ;;  %6941 = vmatprep.subr.bf16.mxu1 %v7386_v39 }
  0x3d   : > { %6896 = vmatpush3.bf16.msra.mxu0 %v7369_v8  ;;  %v7391_v8 = vld [vmem:[%s10437_s11 + $0x28] sm:$0xff]  }
  0x3e   : > { %6921 = vmatprep.subr.bf16.mxu0 %v7371_v15 }
  0x40   : > { %6898 = vmatmul.mubr.bf16.vlgmr.msra.gmra.mrb[0].mxu0 %v751_v11  ;;  %v8091_v11 = vld [vmem:[%s10434_s8] ss:$0 sm:$0xff] }
  0x41   : > { %6922 = vmatpush3.bf16.msra.mxu0 %v7371_v15 }
  0x42   : > { %6923 = vmatprep.subr.bf16.mxu0 %v7373_v17 }
  0x45   : > { %6924 = vmatpush3.bf16.msra.mxu0 %v7373_v17 }
  0x46   : > { %6925 = vmatprep.subr.bf16.mxu0 %v7375_v28 }
  0x49   : > { %6926 = vmatpush3.bf16.msra.mxu0 %v7375_v28  ;;  %v6173_v28 = vld [vmem:[%s10438_s12] ss:$0 sm:$0xff] }
  0x4a   : > { %6927 = vmatprep.subr.bf16.mxu0 %v7377_v30 }
  0x4d   : > { %6928 = vmatpush3.bf16.msra.mxu0 %v7377_v30 }
  0x4e   : > { %6929 = vmatprep.subr.bf16.mxu0 %v7379_v32 }
  0x51   : > { %6930 = vmatpush3.bf16.msra.mxu0 %v7379_v32 }
  0x52   : > { %6931 = vmatprep.subr.bf16.mxu0 %v7381_v34 }
  0x55   : > { %6932 = vmatpush3.bf16.msra.mxu0 %v7381_v34 }
  0x56   : > { %6933 = vmatprep.subr.bf16.mxu0 %v7383_v36 }
  0x59   : > { %6934 = vmatpush3.bf16.msra.mxu0 %v7383_v36 }
  0x5a   : > { %6935 = vmatprep.subr.bf16.mxu0 %v7385_v38 }
  0x5d   : > { %6936 = vmatpush3.bf16.msra.mxu0 %v7385_v38 }
  0xb8   : > { %v873_v40 = vpop.xlane.xlu1 %872 }
  0xb9   : > { %v879_v42 = vmul.f32 0.0078125, %v873_v40 }
  0xbb   : > { %v883_v44 = vadd.f32 1e-06, %v879_v42 }
  0xbc   : > { %v875_v41 = vpop.xlane.xlu1 %874 }
  0xbd   : > { %v880_v43 = vmul.f32 0.0078125, %v875_v41  ;;  %7570 = vrsqrt.f32 %v883_v44 }
  0xbf   : > { %v884_v46 = vadd.f32 1e-06, %v880_v43 }
  0xc1   : > { %7572 = vrsqrt.f32 %v884_v46 }
  0xc7   : > { %v7571_v52 = vpop.eup %7570 }
  0xc8   : > { %v891_v56 = vmul.f32 %v7571_v52, %v7994_v12  ;;  %v6164_v12 = vld [vmem:[%s10436_s10] ss:$0 sm:$0xff] }
  0xca   : > { %v901_v61 = vmul.f32 %v6154_v57, %v891_v56 }
  0xcb   : > { %v7573_v53 = vpop.eup %7572 }
  0xcc   : > { %v892_v55 = vmul.f32 0.0, %v7573_v53 }
  0xce   : > { %v902_v62 = vmul.f32 %v6154_v57, %v892_v55 }
  0xd0   : > { %v920_v3 = vpack.c.bf16 %v902_v62, %v901_v61 }
 0x113   : > { %v841_v19 = vpop.f32.mrb[0].mxu0 }
 0x114   : > { %v8014_v20 = vadd.f32 %v6145_v18, %v841_v19  ;;  %v6899_v21 = vpop.f32.mrb[1].mxu0 }
 0x115   : > { %v844_v22 = vpop.f32.mrb[2].mxu0 }
 0x116   : > { %10514 = vst [vmem:[#allocation4_spill] sm:$0xff] %v8014_v20  ;;  %v8016_v23 = vadd.f32 %v6145_v18, %v844_v22  ;;  %v6900_v24 = vpop.f32.mrb[3].mxu0  ;;  %v865_v25 = vmul.f32 %v8014_v20, %v8014_v20 }
 0x118   : > { %10515 = vst [vmem:[#allocation5_spill] sm:$0xff] %v8016_v23  ;;  %868 = vadd.xlane.f32.xlu0 %v865_v25  ;;  %v866_v26 = vmul.f32 %v8016_v23, %v8016_v23 }
 0x11c   : > { %870 = vadd.xlane.f32.xlu0 %v866_v26 }
 0x1a5   : > { %v869_v45 = vpop.xlane.xlu0 %868 }
 0x1a6   : > { %v877_v47 = vmul.f32 0.0078125, %v869_v45 }
 0x1a8   : > { %v881_v48 = vadd.f32 1e-06, %v877_v47 }
 0x1a9   : > { %v871_v49 = vpop.xlane.xlu0 %870 }
 0x1aa   : > { %7574 = vrsqrt.f32 %v881_v48  ;;  %v878_v50 = vmul.f32 0.0078125, %v871_v49 }
 0x1ac   : > { %v882_v51 = vadd.f32 1e-06, %v878_v50 }
 0x1ae   : > { %7576 = vrsqrt.f32 %v882_v51 }
 0x1b4   : > { %v7575_v54 = vpop.eup %7574 }
 0x1b5   : > { %v889_v58 = vmul.f32 %v7575_v54, %v8014_v20 }
 0x1b7   : > { %v899_v63 = vmul.f32 %v6154_v57, %v889_v58 }
 0x1b8   : > { %v7577_v59 = vpop.eup %7576 }
 0x1b9   : > { %v890_v60 = vmul.f32 %v7577_v59, %v8016_v23 }
 0x1bb   : > { %v900_v0 = vmul.f32 %v6154_v57, %v890_v60 }
 0x1bd   : > { %v919_v2 = vpack.c.bf16 %v900_v0, %v899_v63 }
 0x1bf   : > { %6917 = vmatprep.mubr.bf16.mxu1 %v919_v2  ;;  %6937 = vmatprep.mubr.bf16.mxu0 %v919_v2 }
 0x1c0   : > { %6918 = vmatmul.mubr.bf16.vlgmr.msra.gmra.mrb[0].mxu1 %v920_v3  ;;  %6938 = vmatmul.mubr.bf16.vlgmr.msra.gmra.mrb[4].mxu0 %v920_v3 }
 0x1c1   : > { %6942 = vmatpush3.bf16.msra.mxu1 %v7386_v39  ;;  %6957 = vmatprep.mubr.bf16.mxu1 %v919_v2 }
 0x1c2   : > { %6943 = vmatprep.subr.bf16.mxu1 %v7387_v4 }
 0x1c5   : > { %6944 = vmatpush3.bf16.msra.mxu1 %v7387_v4 }
 0x1c6   : > { %6945 = vmatprep.subr.bf16.mxu1 %v7388_v5 }
 0x1c9   : > { %6946 = vmatpush3.bf16.msra.mxu1 %v7388_v5 }
 0x1ca   : > { %6947 = vmatprep.subr.bf16.mxu1 %v7389_v6 }
 0x1cd   : > { %6948 = vmatpush3.bf16.msra.mxu1 %v7389_v6 }
 0x1ce   : > { %6949 = vmatprep.subr.bf16.mxu1 %v7390_v7 }
 0x1d1   : > { %6950 = vmatpush3.bf16.msra.mxu1 %v7390_v7 }
 0x1d2   : > { %6951 = vmatprep.subr.bf16.mxu1 %v7391_v8 }
 0x1d5   : > { %6952 = vmatpush3.bf16.msra.mxu1 %v7391_v8 }
 0x1d6   : > { %6953 = vmatprep.subr.bf16.mxu1 %v7392_v9 }
 0x1d9   : > { %6954 = vmatpush3.bf16.msra.mxu1 %v7392_v9 }
 0x1da   : > { %6955 = vmatprep.subr.bf16.mxu1 %v7393_v10 }
 0x1dd   : > { %6956 = vmatpush3.bf16.msra.mxu1 %v7393_v10 }
 0x1e0   : > { %6958 = vmatmul.mubr.bf16.vlgmr.msra.gmra.mrb[4].mxu1 %v920_v3 }
 0x293   : > { %v6919_v13 = vpop.f32.mrb[0].mxu1  ;;  %v6939_v14 = vpop.f32.mrb[4].mxu0 }
 0x294   : > { %v8097_v15 = vadd.f32 %v6919_v13, %v8091_v11  ;;  %v8099_v16 = vadd.f32 %v6939_v14, %v6164_v12  ;;  %v1010_v17 = vpop.f32.mrb[1].mxu1  ;;  %v1130_v18 = vpop.f32.mrb[5].mxu0 }
 0x295   : > { %v6920_v19 = vpop.f32.mrb[2].mxu1  ;;  %v6940_v21 = vpop.f32.mrb[6].mxu0  ;;  %v8134_v27 = vadd.f32 %v6164_v12, %v1130_v18  ;;  %v8145_v30 = vadd.f32 %v8091_v11, %v1010_v17 }
 0x296   : > { %1273 = vrot.lane.b32.xlu0 %v8097_v15, %s10458_s0  ;;  %v1013_v22 = vpop.f32.mrb[3].mxu1  ;;  %1522 = vrot.lane.b32.xlu1 %v8099_v16, %s10458_s0  ;;  %v1133_v24 = vpop.f32.mrb[7].mxu0  ;;  %v8105_v25 = vadd.f32 %v6940_v21, %v6164_v12  ;;  %v8112_v26 = vadd.f32 %v6920_v19, %v8091_v11  ;;  %v1556_v48 = vsub.f32 0.0, %v8099_v16  ;;  %v1307_v49 = vsub.f32 0.0, %v8097_v15 }
 0x297   : > { %v8158_v38 = vadd.f32 %v6164_v12, %v1133_v24  ;;  %v8181_v47 = vadd.f32 %v8091_v11, %v1013_v22  ;;  %v1554_v51 = vsub.f32 0.0, %v8134_v27  ;;  %v1305_v53 = vsub.f32 0.0, %v8145_v30 }
 0x298   : > { %v1557_v50 = vsub.f32 0.0, %v8105_v25  ;;  %v1308_v52 = vsub.f32 0.0, %v8112_v26 }
 0x299   : > { %v1555_v54 = vsub.f32 0.0, %v8158_v38  ;;  %v1306_v55 = vsub.f32 0.0, %v8181_v47 }
 0x29a   : > { %1534 = vrot.lane.b32.xlu0 %v8099_v16, %s10456_s23  ;;  %1524 = vrot.lane.b32.xlu1 %v8105_v25, %s10458_s0 }
 0x29e   : > { %1546 = vrot.lane.b32.xlu0 %v8099_v16, %s10454_s1  ;;  %1275 = vrot.lane.b32.xlu1 %v8112_v26, %s10458_s0 }
 0x2a2   : > { %1285 = vrot.lane.b32.xlu0 %v8097_v15, %s10456_s23  ;;  %1536 = vrot.lane.b32.xlu1 %v8105_v25, %s10456_s23 }
 0x2a6   : > { %1297 = vrot.lane.b32.xlu0 %v8097_v15, %s10454_s1  ;;  %1548 = vrot.lane.b32.xlu1 %v8105_v25, %s10454_s1 }
 0x2aa   : > { %1638 = vrot.lane.b32.xlu0 %v8099_v16, %s10460_s5  ;;  %1287 = vrot.lane.b32.xlu1 %v8112_v26, %s10456_s23 }
 0x2ae   : > { %1389 = vrot.lane.b32.xlu0 %v8097_v15, %s10460_s5  ;;  %1299 = vrot.lane.b32.xlu1 %v8112_v26, %s10454_s1 }
 0x2b2   : > { %1640 = vrot.lane.b32.xlu1 %v8105_v25, %s10460_s5  ;;  %1518 = vrot.lane.b32.xlu0 %v8134_v27, %s10458_s0 }
 0x2b3   : > { %v6959_v29 = vpop.f32.mrb[4].mxu1 }
 0x2b4   : > { %v1259_v31 = vadd.f32 %v6959_v29, %v6173_v28  ;;  %v1250_v32 = vpop.f32.mrb[5].mxu1 }
 0x2b5   : > { %v1251_v33 = vadd.f32 %v6173_v28, %v1250_v32  ;;  %v6960_v34 = vpop.f32.mrb[6].mxu1 }
 0x2b6   : > { %v6617_v35 = vpack.c.bf16 %v1259_v31, %v1259_v31  ;;  %v1262_v36 = vadd.f32 %v6960_v34, %v6173_v28  ;;  %v1253_v37 = vpop.f32.mrb[7].mxu1  ;;  %1391 = vrot.lane.b32.xlu1 %v8112_v26, %s10460_s5  ;;  %1269 = vrot.lane.b32.xlu0 %v8145_v30, %s10458_s0 }
 0x2b7   : > { %v6615_v39 = vpack.c.bf16 %v1251_v33, %v1251_v33  ;;  %v1254_v40 = vadd.f32 %v6173_v28, %v1253_v37 }
 0x2b8   : > { %1933 = vst.msk [vmem:[%s8152_s2 + $0x8] sm:$0xf] %vm1858_vm1, %v6617_v35  ;;  %v6618_v41 = vpack.c.bf16 %v1262_v36, %v1262_v36  ;;  %v8162_v42 = vpack.c.bf16 %v1262_v36, %v1259_v31  ;;  %v8164_v43 = vpack.i.bf16 %v1262_v36, %v1259_v31  ;;  %v8326_v35 = vld [vmem:[%s10522_s29 + $0x10] sm:$0xff] }
 0x2b9   : > { %1931 = vst.msk [vmem:[%s8152_s2] sm:$0xf] %vm1858_vm1, %v6615_v39  ;;  %v6616_v44 = vpack.c.bf16 %v1254_v40, %v1254_v40  ;;  %v8168_v45 = vpack.c.bf16 %v1254_v40, %v1251_v33  ;;  %v8170_v46 = vpack.i.bf16 %v1254_v40, %v1251_v33 }
 0x2ba   : > { %10518 = vst [vmem:[#allocation6_spill] sm:$0xff] %v8162_v42  ;;  %10519 = vst [vmem:[#allocation7_spill] sm:$0xff] %v8164_v43  ;;  %1520 = vrot.lane.b32.xlu1 %v8158_v38, %s10458_s0  ;;  %1530 = vrot.lane.b32.xlu0 %v8134_v27, %s10456_s23 }
 0x2bb   : > { %10520 = vst [vmem:[#allocation8_spill] sm:$0xff] %v8170_v46  ;;  %1934 = vst.msk [vmem:[%s8152_s2 + $0xc] sm:$0xf] %vm1858_vm1, %v6618_v41 }
 0x2bc   : > { %1932 = vst.msk [vmem:[%s8152_s2 + $0x4] sm:$0xf] %vm1858_vm1, %v6616_v44 }
 0x2be   : > { %1271 = vrot.lane.b32.xlu1 %v8181_v47, %s10458_s0  ;;  %1542 = vrot.lane.b32.xlu0 %v8134_v27, %s10454_s1  ;;  %s10523_s0 = sld [smem:[#allocation20_spill]] }
 0x2c2   : > { %1532 = vrot.lane.b32.xlu1 %v8158_v38, %s10456_s23  ;;  %1281 = vrot.lane.b32.xlu0 %v8145_v30, %s10456_s23 }
 0x2c4   : > { %v8331_v36 = vld [vmem:[%s10523_s0 + $0x10] sm:$0xff] }
 0x2c6   : > { %1544 = vrot.lane.b32.xlu1 %v8158_v38, %s10454_s1  ;;  %1293 = vrot.lane.b32.xlu0 %v8145_v30, %s10454_s1 }
 0x2ca   : > { %1283 = vrot.lane.b32.xlu1 %v8181_v47, %s10456_s23  ;;  %1634 = vrot.lane.b32.xlu0 %v8134_v27, %s10460_s5  ;;  %s10534_s23 = smov 96  }
 0x2ce   : > { %1295 = vrot.lane.b32.xlu1 %v8181_v47, %s10454_s1  ;;  %1385 = vrot.lane.b32.xlu0 %v8145_v30, %s10460_s5  ;;  %s10536_s1 = smov 64  }
 0x2d2   : > { %1636 = vrot.lane.b32.xlu1 %v8158_v38, %s10460_s5  ;;  %1590 = vrot.lane.b32.xlu0 %v1556_v48, %s10463_s24  ;;  %v1700_v48 = vmul.f32 %v8099_v16, %v8326_v35  ;;  %v8357_v16 = vld [vmem:[%s10522_s29] sm:$0xff] }
 0x2d6   : > { %1387 = vrot.lane.b32.xlu1 %v8181_v47, %s10460_s5  ;;  %1341 = vrot.lane.b32.xlu0 %v1307_v49, %s10463_s24 }
 0x2da   : > { %1592 = vrot.lane.b32.xlu1 %v1557_v50, %s10463_s24  ;;  %1586 = vrot.lane.b32.xlu0 %v1554_v51, %s10463_s24 }
 0x2de   : > { %1343 = vrot.lane.b32.xlu1 %v1308_v52, %s10463_s24  ;;  %1337 = vrot.lane.b32.xlu0 %v1305_v53, %s10463_s24 }
 0x2e2   : > { %1588 = vrot.lane.b32.xlu1 %v1555_v54, %s10463_s24 }
 0x2e6   : > { %1339 = vrot.lane.b32.xlu1 %v1306_v55, %s10463_s24 }
 0x308   : > { %v8223_v56 = vpop.permute.xlu0 %1273  ;;  %v8225_v57 = vpop.permute.xlu1 %1522 }
 0x309   : > { %1646 = vrot.lane.b32.xlu0 %v8225_v57, %s10460_s5  ;;  %v1560_v19 = vsub.f32 0.0, %v8225_v57  ;;  %v1311_v24 = vsub.f32 0.0, %v8223_v56 }
 0x30c   : > { %v8229_v58 = vpop.permute.xlu0 %1534  ;;  %v8231_v59 = vpop.permute.xlu1 %1524 }
 0x30d   : > { %1648 = vrot.lane.b32.xlu1 %v8231_v59, %s10460_s5  ;;  %1397 = vrot.lane.b32.xlu0 %v8223_v56, %s10460_s5  ;;  %v1561_v31 = vsub.f32 0.0, %v8231_v59  ;;  %v1564_v32 = vsub.f32 0.0, %v8229_v58 }
 0x310   : > { %v8237_v60 = vpop.permute.xlu0 %1546  ;;  %v8239_v61 = vpop.permute.xlu1 %1275 }
 0x311   : > { %1399 = vrot.lane.b32.xlu1 %v8239_v61, %s10460_s5  ;;  %1654 = vrot.lane.b32.xlu0 %v8229_v58, %s10460_s5  ;;  %v1312_v37 = vsub.f32 0.0, %v8239_v61  ;;  %v1568_v39 = vsub.f32 0.0, %v8237_v60 }
 0x314   : > { %v8245_v62 = vpop.permute.xlu0 %1285  ;;  %v8247_v63 = vpop.permute.xlu1 %1536 }
 0x315   : > { %1656 = vrot.lane.b32.xlu1 %v8247_v63, %s10460_s5  ;;  %1662 = vrot.lane.b32.xlu0 %v8237_v60, %s10460_s5  ;;  %v1565_v50 = vsub.f32 0.0, %v8247_v63  ;;  %v1315_v51 = vsub.f32 0.0, %v8245_v62 }
 0x318   : > { %v8253_v0 = vpop.permute.xlu0 %1297  ;;  %v8255_v2 = vpop.permute.xlu1 %1548 }
 0x319   : > { %1664 = vrot.lane.b32.xlu1 %v8255_v2, %s10460_s5  ;;  %1405 = vrot.lane.b32.xlu0 %v8245_v62, %s10460_s5 }
 0x31c   : > { %v1639_v3 = vpop.permute.xlu0 %1638  ;;  %v8261_v4 = vpop.permute.xlu1 %1287 }
 0x31d   : > { %1407 = vrot.lane.b32.xlu1 %v8261_v4, %s10460_s5 }
 0x320   : > { %v1390_v5 = vpop.permute.xlu0 %1389  ;;  %v8265_v6 = vpop.permute.xlu1 %1299 }
 0x321   : > { %10521 = vst [vmem:[#allocation9_spill] sm:$0xff] %v8265_v6 }
 0x324   : > { %v8267_v7 = vpop.permute.xlu1 %1640  ;;  %v8269_v8 = vpop.permute.xlu0 %1518 }
 0x325   : > { %1642 = vrot.lane.b32.xlu0 %v8269_v8, %s10460_s5 }
 0x328   : > { %v8273_v9 = vpop.permute.xlu1 %1391  ;;  %v8275_v10 = vpop.permute.xlu0 %1269 }
 0x329   : > { %1393 = vrot.lane.b32.xlu0 %v8275_v10, %s10460_s5 }
 0x32c   : > { %v8279_v11 = vpop.permute.xlu1 %1520  ;;  %v8281_v12 = vpop.permute.xlu0 %1530 }
 0x32d   : > { %1644 = vrot.lane.b32.xlu1 %v8279_v11, %s10460_s5  ;;  %1650 = vrot.lane.b32.xlu0 %v8281_v12, %s10460_s5 }
 0x330   : > { %v8287_v13 = vpop.permute.xlu1 %1271  ;;  %v8289_v14 = vpop.permute.xlu0 %1542 }
 0x331   : > { %1395 = vrot.lane.b32.xlu1 %v8287_v13, %s10460_s5  ;;  %1658 = vrot.lane.b32.xlu0 %v8289_v14, %s10460_s5 }
 0x334   : > { %v8295_v17 = vpop.permute.xlu1 %1532  ;;  %v8297_v18 = vpop.permute.xlu0 %1281 }
 0x335   : > { %1652 = vrot.lane.b32.xlu1 %v8295_v17, %s10460_s5  ;;  %1401 = vrot.lane.b32.xlu0 %v8297_v18, %s10460_s5 }
 0x338   : > { %v8304_v21 = vpop.permute.xlu1 %1544  ;;  %v8306_v22 = vpop.permute.xlu0 %1293 }
 0x339   : > { %1660 = vrot.lane.b32.xlu1 %v8304_v21, %s10460_s5  ;;  %1598 = vrot.lane.b32.xlu0 %v1560_v19, %s10463_s24  ;;  %v8363_v19 = vld [vmem:[%s10522_s29 + $0x18] sm:$0xff] }
 0x33c   : > { %v8312_v28 = vpop.permute.xlu1 %1283  ;;  %v1635_v29 = vpop.permute.xlu0 %1634 }
 0x33d   : > { %1403 = vrot.lane.b32.xlu1 %v8312_v28, %s10460_s5  ;;  %1349 = vrot.lane.b32.xlu0 %v1311_v24, %s10463_s24  ;;  %v8368_v24 = vld [vmem:[%s10523_s0 + $0x18] sm:$0xff]  ;;  %s10538_s5 = smov 32  }
 0x340   : > { %v8319_v33 = vpop.permute.xlu1 %1295  ;;  %v1386_v34 = vpop.permute.xlu0 %1385 }
 0x341   : > { %1600 = vrot.lane.b32.xlu1 %v1561_v31, %s10463_s24  ;;  %1606 = vrot.lane.b32.xlu0 %v1564_v32, %s10463_s24  ;;  %v8373_v31 = vld [vmem:[%s10523_s0] sm:$0xff]  ;;  %v1569_v32 = vsub.f32 0.0, %v8255_v2 }
 0x344   : > { %v1637_v40 = vpop.permute.xlu1 %1636  ;;  %v1591_v41 = vpop.permute.xlu0 %1590 }
 0x345   : > { %v1684_v44 = vsel %vm1433_vm2, %v1591_v41, %v1639_v3  ;;  %1351 = vrot.lane.b32.xlu1 %v1312_v37, %s10463_s24  ;;  %1614 = vrot.lane.b32.xlu0 %v1568_v39, %s10463_s24  ;;  %v1558_v37 = vsub.f32 0.0, %v8269_v8 }
 0x346   : > { %v1716_v49 = vmul.f32 %v1684_v44, %v8331_v36 }
 0x348   : > { %v1732_v52 = vadd.f32 %v1716_v49, %v1700_v48  ;;  %v8343_v53 = vpop.permute.xlu1 %1387  ;;  %v1342_v54 = vpop.permute.xlu0 %1341  ;;  %v1701_v49 = vmul.f32 %v8105_v25, %v8363_v19  ;;  %v1453_v25 = vmul.f32 %v8112_v26, %v8363_v19 }
 0x349   : > { %1608 = vrot.lane.b32.xlu1 %v1565_v50, %s10463_s24  ;;  %1357 = vrot.lane.b32.xlu0 %v1315_v51, %s10463_s24  ;;  %v1436_v3 = vsel %vm1433_vm2, %v1342_v54, %v1390_v5  ;;  %v1698_v51 = vmul.f32 %v8134_v27, %v8357_v16 }
 0x34a   : > { %v6601_v55 = vpack.c.bf16 %v1732_v52, %v1732_v52  ;;  %v1468_v41 = vmul.f32 %v1436_v3, %v8331_v36 }
 0x34c   : > { %1861 = vst.msk [vmem:[%s8350_s6 + $0x8] sm:$0xf] %vm1858_vm1, %v6601_v55  ;;  %v1593_v5 = vpop.permute.xlu1 %1592  ;;  %v1587_v39 = vpop.permute.xlu0 %1586  ;;  %v1452_v55 = vmul.f32 %v8097_v15, %v8326_v35  ;;  %v8404_v15 = vld [vmem:[%s10522_s29 + $0x8] sm:$0xff] }
 0x34d   : > { %v1685_v44 = vsel %vm1433_vm2, %v1593_v5, %v8267_v7  ;;  %v1682_v48 = vsel %vm1433_vm2, %v1587_v39, %v1635_v29  ;;  %1616 = vrot.lane.b32.xlu1 %v1569_v32, %s10525_s21  ;;  %1594 = vrot.lane.b32.xlu0 %v1558_v37, %s10525_s21  ;;  %v1316_v7 = vsub.f32 0.0, %v8261_v4 }
 0x34e   : > { %v1717_v50 = vmul.f32 %v1685_v44, %v8368_v24  ;;  %v1714_v54 = vmul.f32 %v1682_v48, %v8373_v31  ;;  %v1484_v5 = vadd.f32 %v1468_v41, %v1452_v55 }
 0x350   : > { %v1733_v29 = vadd.f32 %v1717_v50, %v1701_v49  ;;  %v1730_v3 = vadd.f32 %v1714_v54, %v1698_v51  ;;  %v1344_v32 = vpop.permute.xlu1 %1343  ;;  %v1338_v37 = vpop.permute.xlu0 %1337  ;;  %v1559_v49 = vsub.f32 0.0, %v8279_v11  ;;  %v1309_v50 = vsub.f32 0.0, %v8275_v10 }
 0x351   : > { %v1437_v27 = vsel %vm1433_vm2, %v1344_v32, %v8273_v9  ;;  %1359 = vrot.lane.b32.xlu1 %v1316_v7, %s10525_s21  ;;  %1409 = vrot.lane.b32.xlu0 %v8306_v22, %s10526_s4  ;;  %v1434_v26 = vsel %vm1433_vm2, %v1338_v37, %v1386_v34  ;;  %v8411_v9 = vld [vmem:[%s10523_s0 + $0x8] sm:$0xff]  ;;  %v1699_v54 = vmul.f32 %v8158_v38, %v8404_v15  ;;  %v1500_v55 = vmul.f32 0.17677669, %v1484_v5  ;;  %s10564_s0 = sld [smem:[#allocation3_spill]] }
 0x352   : > { %v1747_v39 = vpack.c.bf16 %v1733_v29, %v1732_v52  ;;  %v6602_v44 = vpack.c.bf16 %v1733_v29, %v1733_v29  ;;  %v6599_v48 = vpack.c.bf16 %v1730_v3, %v1730_v3  ;;  %v1469_v41 = vmul.f32 %v1437_v27, %v8368_v24 }
 0x353   : > { %v1466_v29 = vmul.f32 %v1434_v26, %v8373_v31  ;;  %v1562_v37 = vsub.f32 0.0, %v8281_v12  ;;  %v1450_v27 = vmul.f32 %v8145_v30, %v8357_v16  ;;  %v1310_v30 = vsub.f32 0.0, %v8287_v13 }
 0x354   : > { %1862 = vst.msk [vmem:[%s8350_s6 + $0xc] sm:$0xf] %vm1858_vm1, %v6602_v44  ;;  %1859 = vst.msk [vmem:[%s8350_s6] sm:$0xf] %vm1858_vm1, %v6599_v48  ;;  %v1485_v52 = vadd.f32 %v1469_v41, %v1453_v25  ;;  %v1589_v51 = vpop.permute.xlu1 %1588 }
 0x355   : > { %v1683_v34 = vsel %vm1433_vm2, %v1589_v51, %v1637_v40  ;;  %1596 = vrot.lane.b32.xlu1 %v1559_v49, %s10525_s21  ;;  %1345 = vrot.lane.b32.xlu0 %v1309_v50, %s10525_s21  ;;  %v1451_v40 = vmul.f32 %v8181_v47, %v8404_v15  ;;  %v1482_v48 = vadd.f32 %v1466_v29, %v1450_v27  ;;  %v1566_v50 = vsub.f32 0.0, %v8289_v14 }
 0x356   : > { %v1501_v7 = vmul.f32 0.17677669, %v1485_v52  ;;  %v1715_v32 = vmul.f32 %v1683_v34, %v8411_v9  ;;  %v1563_v51 = vsub.f32 0.0, %v8295_v17  ;;  %v1966_v29 = vsel %vm1955_vm3, %v1747_v39, 0 }
 0x357   : > { %v1314_v27 = vsub.f32 0.0, %v8312_v28  ;;  %s10567_s28 = sshll.u32 %s10564_s0, 3 }
 0x358   : > { %v1948_v25 = vpack.c.bf16 %v1501_v7, %v1500_v55  ;;  %v1731_v38 = vadd.f32 %v1715_v32, %v1699_v54  ;;  %v1340_v44 = vpop.permute.xlu1 %1339  ;;  %v1313_v54 = vsub.f32 0.0, %v8297_v18  ;;  %v1567_v55 = vsub.f32 0.0, %v8304_v21 }
 0x359   : > { %v1435_v5 = vsel %vm1433_vm2, %v1340_v44, %v8343_v53  ;;  %1411 = vrot.lane.b32.xlu1 %v8319_v33, %s10526_s4  ;;  %1602 = vrot.lane.b32.xlu0 %v1562_v37, %s10525_s21  ;;  %v1317_v7 = vsub.f32 0.0, %v8306_v22  ;;  %v1320_v32 = vsub.f32 0.0, %v8265_v6  ;;  %v1319_v37 = vsub.f32 0.0, %v8253_v0 }
 0x35a   : > { %v1746_v41 = vpack.c.bf16 %v1731_v38, %v1730_v3  ;;  %v6600_v26 = vpack.c.bf16 %v1731_v38, %v1731_v38  ;;  %v1467_v49 = vmul.f32 %v1435_v5, %v8411_v9  ;;  %v1498_v3 = vmul.f32 0.17677669, %v1482_v48 }
 0x35c   : > { %1860 = vst.msk [vmem:[%s8350_s6 + $0x4] sm:$0xf] %vm1858_vm1, %v6600_v26  ;;  %v1483_v47 = vadd.f32 %v1467_v49, %v1451_v40  ;;  %7209 = vmatprep.subr.msk.bf16.mxu1 %vm1955_vm3, %v1746_v41  ;;  %v1963_v53 = vsel %vm1955_vm3, %v1746_v41, 0 }
 0x35d   : > { %1347 = vrot.lane.b32.xlu1 %v1310_v30, %s10525_s21  ;;  %1610 = vrot.lane.b32.xlu0 %v1566_v50, %s10525_s21 }
 0x35e   : > { %v1499_v52 = vmul.f32 0.17677669, %v1483_v47  ;;  %6962 = vmatpush3.bf16.xpose.msra.mxu1 %v1963_v53 }
 0x35f   : > { %7210 = vmatprep.subr.msk.bf16.mxu1 %vm1955_vm3, %v1747_v39  ;;  %v1318_v39 = vsub.f32 0.0, %v8319_v33 }
 0x360   : > { %v1947_v34 = vpack.c.bf16 %v1499_v52, %v1498_v3 }
 0x361   : > { %1604 = vrot.lane.b32.xlu1 %v1563_v51, %s10525_s21  ;;  %1353 = vrot.lane.b32.xlu0 %v1313_v54, %s10525_s21 }
 0x362   : > { %6965 = vmatprep.mubr.msk.bf16.mxu1 %vm1955_vm3, %v1947_v34 }
 0x365   : > { %1612 = vrot.lane.b32.xlu1 %v1567_v55, %s10525_s21  ;;  %1361 = vrot.lane.b32.xlu0 %v1317_v7, %s10525_s21 }
 0x366   : > { %6964 = vmatpush3.bf16.xpose.msra.mxu1 %v1966_v29 }
 0x369   : > { %1367 = vrot.lane.b32.xlu1 %v1320_v32, %s10525_s21  ;;  %1365 = vrot.lane.b32.xlu0 %v1319_v37, %s10525_s21  ;;  %v1704_v32 = vmul.f32 %v8225_v57, %v8326_v35 }
 0x36d   : > { %6966 = vmatmul.mubr.msk.bf16.vlgmr.msra.gmra.mrb[8].mxu1 %vm1955_vm3, %v1948_v25  ;;  %1355 = vrot.lane.b32.xlu1 %v1314_v27, %s10525_s21 }
 0x36e   : > { %1413 = vrot.lane.b32.xlu0 %v8253_v0, %s10526_s4 }
 0x371   : > { %1363 = vrot.lane.b32.xlu1 %v1318_v39, %s10525_s21 }
 0x375   : > { %1415 = vrot.lane.b32.xlu1 %v8265_v6, %s10526_s4 }
 0x37b   : > { %v1647_v38 = vpop.permute.xlu0 %1646 }
 0x37f   : > { %v8469_v44 = vpop.permute.xlu0 %1397  ;;  %v1649_v40 = vpop.permute.xlu1 %1648 }
 0x383   : > { %v1655_v5 = vpop.permute.xlu0 %1654  ;;  %v8471_v48 = vpop.permute.xlu1 %1399 }
 0x387   : > { %v1663_v25 = vpop.permute.xlu0 %1662  ;;  %v1657_v41 = vpop.permute.xlu1 %1656 }
 0x38b   : > { %v8473_v26 = vpop.permute.xlu0 %1405  ;;  %v1665_v49 = vpop.permute.xlu1 %1664 }
 0x38f   : > { %v8475_v50 = vpop.permute.xlu1 %1407 }
 0x397   : > { %v1643_v30 = vpop.permute.xlu0 %1642 }
 0x39b   : > { %v8477_v47 = vpop.permute.xlu0 %1393 }
 0x39f   : > { %v8479_v53 = vpop.permute.xlu1 %1644  ;;  %v8481_v3 = vpop.permute.xlu0 %1650 }
 0x3a3   : > { %v8483_v52 = vpop.permute.xlu1 %1395  ;;  %v8485_v51 = vpop.permute.xlu0 %1658 }
 0x3a7   : > { %v8487_v54 = vpop.permute.xlu1 %1652  ;;  %v8489_v34 = vpop.permute.xlu0 %1401 }
 0x3ab   : > { %v8491_v55 = vpop.permute.xlu1 %1660  ;;  %v1599_v7 = vpop.permute.xlu0 %1598 }
 0x3ac   : > { %v1688_v29 = vsel %vm1433_vm2, %v1599_v7, %v1647_v38  ;;  %v1708_v7 = vmul.f32 %v8229_v58, %v8326_v35  ;;  %v1712_v58 = vmul.f32 %v8237_v60, %v8326_v35 }
 0x3ad   : > { %v1720_v37 = vmul.f32 %v1688_v29, %v8331_v36  ;;  %v1705_v29 = vmul.f32 %v8231_v59, %v8363_v19 }
 0x3af   : > { %v8497_v27 = vadd.f32 %v1720_v37, %v1704_v32  ;;  %v8499_v39 = vpop.permute.xlu1 %1403  ;;  %v8501_v1 = vpop.permute.xlu0 %1349 }
 0x3b1   : > { %v6605_v23 = vpack.c.bf16 %v8497_v27, %v8497_v27 }
 0x3b3   : > { %1865 = vst.msk [vmem:[%s8350_s6 + $0x18] sm:$0xf] %vm1858_vm1, %v6605_v23  ;;  %v1601_v20 = vpop.permute.xlu1 %1600  ;;  %v1607_v46 = vpop.permute.xlu0 %1606 }
 0x3b4   : > { %v1689_v38 = vsel %vm1433_vm2, %v1601_v20, %v1649_v40  ;;  %v1692_v57 = vsel %vm1433_vm2, %v1607_v46, %v1655_v5 }
 0x3b5   : > { %v1721_v32 = vmul.f32 %v1689_v38, %v8368_v24  ;;  %v1724_v37 = vmul.f32 %v1692_v57, %v8331_v36 }
 0x3b7   : > { %v1737_v43 = vadd.f32 %v1721_v32, %v1705_v29  ;;  %v8515_v23 = vadd.f32 %v1724_v37, %v1708_v7  ;;  %v1352_v42 = vpop.permute.xlu1 %1351  ;;  %v1615_v6 = vpop.permute.xlu0 %1614 }
 0x3b8   : > { %v1696_v20 = vsel %vm1433_vm2, %v1615_v6, %v1663_v25  ;;  %v1709_v25 = vmul.f32 %v8247_v63, %v8363_v19  ;;  %v1713_v63 = vmul.f32 %v8255_v2, %v8363_v19 }
 0x3b9   : > { %v6606_v40 = vpack.c.bf16 %v1737_v43, %v1737_v43  ;;  %v6609_v46 = vpack.c.bf16 %v8515_v23, %v8515_v23  ;;  %v1728_v59 = vmul.f32 %v1696_v20, %v8331_v36 }
 0x3bb   : > { %1866 = vst.msk [vmem:[%s8350_s6 + $0x1c] sm:$0xf] %vm1858_vm1, %v6606_v40  ;;  %1869 = vst.msk [vmem:[%s8350_s6 + $0x28] sm:$0xf] %vm1858_vm1, %v6609_v46  ;;  %v1609_v5 = vpop.permute.xlu1 %1608  ;;  %v8527_v38 = vpop.permute.xlu0 %1357  ;;  %v8529_v57 = vadd.f32 %v1728_v59, %v1712_v58  ;;  %v1702_v58 = vmul.f32 %v8269_v8, %v8357_v16 }
 0x3bc   : > { %v1693_v6 = vsel %vm1433_vm2, %v1609_v5, %v1657_v41 }
 0x3bd   : > { %v1725_v7 = vmul.f32 %v1693_v6, %v8368_v24  ;;  %v6613_v60 = vpack.c.bf16 %v8529_v57, %v8529_v57 }
 0x3bf   : > { %v8537_v29 = vadd.f32 %v1725_v7, %v1709_v25  ;;  %v1617_v32 = vpop.permute.xlu1 %1616  ;;  %v1595_v37 = vpop.permute.xlu0 %1594  ;;  %1873 = vst.msk [vmem:[%s8350_s6 + $0x38] sm:$0xf] %vm1858_vm1, %v6613_v60 }
 0x3c0   : > { %v1697_v20 = vsel %vm1433_vm2, %v1617_v32, %v1665_v49  ;;  %v1686_v40 = vsel %vm1433_vm2, %v1595_v37, %v1643_v30  ;;  %v1703_v32 = vmul.f32 %v8279_v11, %v8404_v15 }
 0x3c1   : > { %v6610_v41 = vpack.c.bf16 %v8537_v29, %v8537_v29  ;;  %v1729_v46 = vmul.f32 %v1697_v20, %v8368_v24  ;;  %v1718_v59 = vmul.f32 %v1686_v40, %v8373_v31 }
 0x3c3   : > { %1870 = vst.msk [vmem:[%s8350_s6 + $0x2c] sm:$0xf] %vm1858_vm1, %v6610_v41  ;;  %v8553_v5 = vadd.f32 %v1729_v46, %v1713_v63  ;;  %v8555_v49 = vpop.permute.xlu1 %1359  ;;  %v8557_v30 = vpop.permute.xlu0 %1409  ;;  %v1734_v6 = vadd.f32 %v1718_v59, %v1702_v58  ;;  %v1706_v46 = vmul.f32 %v8281_v12, %v8357_v16  ;;  %v1441_v58 = vsel %vm1433_vm2, %v1352_v42, %v8471_v48 }
 0x3c4   : > { %v1440_v12 = vsel %vm1433_vm2, %v8501_v1, %v8469_v44  ;;  %v1749_v42 = vpack.c.bf16 %v1737_v43, %v8497_v27 }
 0x3c5   : > { %v6614_v2 = vpack.c.bf16 %v8553_v5, %v8553_v5  ;;  %v6603_v25 = vpack.c.bf16 %v1734_v6, %v1734_v6 }
 0x3c7   : > { %1874 = vst.msk [vmem:[%s8350_s6 + $0x3c] sm:$0xf] %vm1858_vm1, %v6614_v2  ;;  %v1597_v7 = vpop.permute.xlu1 %1596  ;;  %v1346_v60 = vpop.permute.xlu0 %1345  ;;  %1863 = vst.msk [vmem:[%s8350_s6 + $0x10] sm:$0xf] %vm1858_vm1, %v6603_v25 }
 0x3c8   : > { %v1687_v8 = vsel %vm1433_vm2, %v1597_v7, %v8479_v53  ;;  %v1438_v20 = vsel %vm1433_vm2, %v1346_v60, %v8477_v47  ;;  %v1454_v47 = vmul.f32 %v8275_v10, %v8357_v16  ;;  %v1455_v7 = vmul.f32 %v8287_v13, %v8404_v15 }
 0x3c9   : > { %v1719_v37 = vmul.f32 %v1687_v8, %v8411_v9  ;;  %v1470_v2 = vmul.f32 %v1438_v20, %v8373_v31  ;;  %v1710_v10 = vmul.f32 %v8289_v14, %v8357_v16  ;;  %v1473_v13 = vmul.f32 %v1441_v58, %v8368_v24 }
 0x3ca   : > { %v1457_v14 = vmul.f32 %v8239_v61, %v8363_v19 }
 0x3cb   : > { %v1735_v40 = vadd.f32 %v1719_v37, %v1703_v32  ;;  %v8572_v63 = vpop.permute.xlu1 %1411  ;;  %v1603_v41 = vpop.permute.xlu0 %1602  ;;  %v1486_v44 = vadd.f32 %v1470_v2, %v1454_v47  ;;  %v1472_v37 = vmul.f32 %v1440_v12, %v8331_v36 }
 0x3cc   : > { %v1690_v53 = vsel %vm1433_vm2, %v1603_v41, %v8481_v3  ;;  %v1456_v41 = vmul.f32 %v8223_v56, %v8326_v35  ;;  %v1489_v58 = vadd.f32 %v1473_v13, %v1457_v14 }
 0x3cd   : > { %v1748_v11 = vpack.c.bf16 %v1735_v40, %v1734_v6  ;;  %v6604_v59 = vpack.c.bf16 %v1735_v40, %v1735_v40  ;;  %v1722_v25 = vmul.f32 %v1690_v53, %v8373_v31  ;;  %v1502_v61 = vmul.f32 0.17677669, %v1486_v44 }
 0x3cf   : > { %1864 = vst.msk [vmem:[%s8350_s6 + $0x14] sm:$0xf] %vm1858_vm1, %v6604_v59  ;;  %v1738_v48 = vadd.f32 %v1722_v25, %v1706_v46  ;;  %v1348_v3 = vpop.permute.xlu1 %1347  ;;  %7211 = vmatprep.subr.msk.bf16.mxu1 %vm1955_vm3, %v1748_v11  ;;  %v1611_v6 = vpop.permute.xlu0 %1610  ;;  %v2024_v60 = vsel %vm1955_vm3, %v1748_v11, 0  ;;  %v1707_v46 = vmul.f32 %v8295_v17, %v8404_v15  ;;  %v1488_v25 = vadd.f32 %v1472_v37, %v1456_v41 }
 0x3d0   : > { %v1439_v1 = vsel %vm1433_vm2, %v1348_v3, %v8483_v52  ;;  %v1694_v43 = vsel %vm1433_vm2, %v1611_v6, %v8485_v51  ;;  %6970 = vmatpush3.bf16.xpose.msra.mxu1 %v2024_v60  ;;  %v2027_v3 = vsel %vm1955_vm3, %v1749_v42, 0  ;;  %v1711_v17 = vmul.f32 %v8304_v21, %v8404_v15 }
 0x3d1   : > { %v6607_v27 = vpack.c.bf16 %v1738_v48, %v1738_v48  ;;  %v1471_v8 = vmul.f32 %v1439_v1, %v8411_v9  ;;  %v1726_v32 = vmul.f32 %v1694_v43, %v8373_v31  ;;  %7212 = vmatprep.subr.msk.bf16.mxu1 %vm1955_vm3, %v1749_v42  ;;  %v1505_v6 = vmul.f32 0.17677669, %v1489_v58 }
 0x3d2   : > { %v1504_v42 = vmul.f32 0.17677669, %v1488_v25  ;;  %v1751_v21 = vpack.c.bf16 %v8537_v29, %v8515_v23  ;;  %v1753_v37 = vpack.c.bf16 %v8553_v5, %v8529_v57  ;;  %v1459_v57 = vmul.f32 %v8312_v28, %v8404_v15 }
 0x3d3   : > { %1867 = vst.msk [vmem:[%s8350_s6 + $0x20] sm:$0xf] %vm1858_vm1, %v6607_v27  ;;  %v1487_v52 = vadd.f32 %v1471_v8, %v1455_v7  ;;  %v1742_v20 = vadd.f32 %v1726_v32, %v1710_v10  ;;  %v1605_v51 = vpop.permute.xlu1 %1604  ;;  %v1354_v40 = vpop.permute.xlu0 %1353 }
 0x3d4   : > { %v1691_v53 = vsel %vm1433_vm2, %v1605_v51, %v8487_v54  ;;  %v1445_v54 = vsel %vm1433_vm2, %v8555_v49, %v8475_v50  ;;  %v1442_v1 = vsel %vm1433_vm2, %v1354_v40, %v8489_v34  ;;  %v1444_v50 = vsel %vm1433_vm2, %v8527_v38, %v8473_v26 }
 0x3d5   : > { %v1503_v11 = vmul.f32 0.17677669, %v1487_v52  ;;  %v6611_v59 = vpack.c.bf16 %v1742_v20, %v1742_v20  ;;  %v1723_v2 = vmul.f32 %v1691_v53, %v8411_v9  ;;  %v1477_v44 = vmul.f32 %v1445_v54, %v8368_v24 }
 0x3d6   : > { %v1474_v27 = vmul.f32 %v1442_v1, %v8373_v31  ;;  %v1950_v23 = vpack.c.bf16 %v1505_v6, %v1504_v42  ;;  %v1461_v26 = vmul.f32 %v8261_v4, %v8363_v19  ;;  %v1458_v38 = vmul.f32 %v8297_v18, %v8357_v16 }
 0x3d7   : > { %v1949_v47 = vpack.c.bf16 %v1503_v11, %v1502_v61  ;;  %1871 = vst.msk [vmem:[%s8350_s6 + $0x30] sm:$0xf] %vm1858_vm1, %v6611_v59  ;;  %v1739_v7 = vadd.f32 %v1723_v2, %v1707_v46  ;;  %v1613_v12 = vpop.permute.xlu1 %1612  ;;  %v1362_v56 = vpop.permute.xlu0 %1361  ;;  %v1476_v32 = vmul.f32 %v1444_v50, %v8331_v36  ;;  %v1460_v18 = vmul.f32 %v8245_v62, %v8326_v35 }
 0x3d8   : > { %v1695_v60 = vsel %vm1433_vm2, %v1613_v12, %v8491_v55  ;;  %6972 = vmatpush3.bf16.xpose.msra.mxu1 %v2027_v3  ;;  %v1446_v14 = vsel %vm1433_vm2, %v1362_v56, %v8557_v30  ;;  %v1490_v51 = vadd.f32 %v1474_v27, %v1458_v38  ;;  %v1462_v62 = vmul.f32 %v8306_v22, %v8357_v16 }
 0x3d9   : > { %v1750_v10 = vpack.c.bf16 %v1739_v7, %v1738_v48  ;;  %v6608_v13 = vpack.c.bf16 %v1739_v7, %v1739_v7  ;;  %v1727_v43 = vmul.f32 %v1695_v60, %v8411_v9  ;;  %6973 = vmatprep.mubr.msk.bf16.mxu1 %vm1955_vm3, %v1949_v47  ;;  %v1478_v5 = vmul.f32 %v1446_v14, %v8373_v31 }
 0x3da   : > { %v1492_v46 = vadd.f32 %v1476_v32, %v1460_v18  ;;  %v1463_v11 = vmul.f32 %v8319_v33, %v8404_v15  ;;  %v1506_v59 = vmul.f32 0.17677669, %v1490_v51  ;;  %v1464_v16 = vmul.f32 %v8253_v0, %v8326_v35 }
 0x3db   : > { %1868 = vst.msk [vmem:[%s8350_s6 + $0x24] sm:$0xf] %vm1858_vm1, %v6608_v13  ;;  %v1743_v55 = vadd.f32 %v1727_v43, %v1711_v17  ;;  %v1368_v49 = vpop.permute.xlu1 %1367  ;;  %7213 = vmatprep.subr.msk.bf16.mxu0 %vm1955_vm3, %v1750_v10  ;;  %v1366_v34 = vpop.permute.xlu0 %1365  ;;  %v2085_v48 = vsel %vm1955_vm3, %v1750_v10, 0  ;;  %v1494_v2 = vadd.f32 %v1478_v5, %v1462_v62  ;;  %v2149_v56 = vsel %vm1955_vm3, %v1753_v37, 0 }
 0x3dc   : > { %6978 = vmatpush3.bf16.xpose.msra.mxu0 %v2085_v48  ;;  %v1508_v22 = vmul.f32 0.17677669, %v1492_v46 }
 0x3dd   : > { %v1752_v29 = vpack.c.bf16 %v1743_v55, %v1742_v20  ;;  %v6612_v8 = vpack.c.bf16 %v1743_v55, %v1743_v55  ;;  %7214 = vmatprep.subr.msk.bf16.mxu0 %vm1955_vm3, %v1751_v21  ;;  %v1493_v20 = vadd.f32 %v1477_v44, %v1461_v26  ;;  %v7820_v55 = vmov -1e+09  }
 0x3df   : > { %1872 = vst.msk [vmem:[%s8350_s6 + $0x34] sm:$0xf] %vm1858_vm1, %v6612_v8  ;;  %v1356_v52 = vpop.permute.xlu1 %1355  ;;  %6974 = vmatmul.mubr.msk.bf16.vlgmr.msra.gmra.mrb[12].mxu1 %vm1955_vm3, %v1950_v23  ;;  %7215 = vmatprep.subr.msk.bf16.mxu1 %vm1955_vm3, %v1752_v29  ;;  %v2146_v4 = vsel %vm1955_vm3, %v1752_v29, 0  ;;  %v1509_v28 = vmul.f32 0.17677669, %v1493_v20 }
 0x3e0   : > { %v1443_v30 = vsel %vm1433_vm2, %v1356_v52, %v8499_v39  ;;  %v1414_v40 = vpop.permute.xlu0 %1413  ;;  %6986 = vmatpush3.bf16.xpose.msra.mxu1 %v2146_v4  ;;  %v2088_v39 = vsel %vm1955_vm3, %v1751_v21, 0 }
 0x3e1   : > { %v1475_v41 = vmul.f32 %v1443_v30, %v8411_v9  ;;  %7216 = vmatprep.subr.msk.bf16.mxu1 %vm1955_vm3, %v1753_v37  ;;  %v1448_v58 = vsel %vm1433_vm2, %v1366_v34, %v1414_v40  ;;  %v1952_v17 = vpack.c.bf16 %v1509_v28, %v1508_v22 }
 0x3e2   : > { %v1480_v47 = vmul.f32 %v1448_v58, %v8331_v36  ;;  %v1510_v36 = vmul.f32 0.17677669, %v1494_v2 }
 0x3e3   : > { %v1491_v53 = vadd.f32 %v1475_v41, %v1459_v57  ;;  %v1364_v61 = vpop.permute.xlu1 %1363 }
 0x3e4   : > { %v1447_v31 = vsel %vm1433_vm2, %v1364_v61, %v8572_v63  ;;  %6980 = vmatpush3.bf16.xpose.msra.mxu0 %v2088_v39  ;;  %v10527_v63 = vld [vmem:[#allocation9_spill] sm:$0xff] }
 0x3e5   : > { %v1507_v25 = vmul.f32 0.17677669, %v1491_v53  ;;  %v1479_v7 = vmul.f32 %v1447_v31, %v8411_v9  ;;  %6993 = vmatprep.subr.bf16.mxu0 %v8168_v45  ;;  %v1465_v3 = vmul.f32 %v10527_v63, %v8363_v19  ;;  %v1496_v9 = vadd.f32 %v1480_v47, %v1464_v16  ;;  %v10528_v19 = vld [vmem:[#allocation6_spill] sm:$0xff] }
 0x3e7   : > { %v1951_v12 = vpack.c.bf16 %v1507_v25, %v1506_v59  ;;  %v1495_v33 = vadd.f32 %v1479_v7, %v1463_v11  ;;  %v1416_v15 = vpop.permute.xlu1 %1415  ;;  %v1512_v10 = vmul.f32 0.17677669, %v1496_v9  ;;  %v10535_v9 = vld [vmem:[#allocation7_spill] sm:$0xff] }
 0x3e8   : > { %v1449_v6 = vsel %vm1433_vm2, %v1368_v49, %v1416_v15  ;;  %6988 = vmatpush3.bf16.xpose.msra.mxu1 %v2149_v56 }
 0x3e9   : > { %v1511_v54 = vmul.f32 0.17677669, %v1495_v33  ;;  %v1481_v60 = vmul.f32 %v1449_v6, %v8368_v24  ;;  %6981 = vmatprep.mubr.msk.bf16.mxu0 %vm1955_vm3, %v1951_v12  ;;  %v849_v24 = vlaneseq }
 0x3eb   : > { %v1953_v0 = vpack.c.bf16 %v1511_v54, %v1510_v36  ;;  %v1497_v35 = vadd.f32 %v1481_v60, %v1465_v3  ;;  %6982 = vmatmul.mubr.msk.bf16.vlgmr.msra.gmra.mrb[8].mxu0 %vm1955_vm3, %v1952_v17  ;;  %v8690_v43 = vshrl.u32 %v849_v24, 7  ;;  %v855_v21 = vand.u32 127, %v849_v24  ;;  %v10537_v54 = vld [vmem:[#allocation8_spill] sm:$0xff] }
 0x3ec   : > { %6994 = vmatpush3.bf16.msra.mxu0 %v8168_v45 }
 0x3ed   : > { %v1513_v13 = vmul.f32 0.17677669, %v1497_v35  ;;  %6989 = vmatprep.mubr.msk.bf16.mxu1 %vm1955_vm3, %v1953_v0  ;;  %6995 = vmatprep.subr.bf16.mxu0 %v10528_v19  ;;  %10529 = vst [vmem:[#allocation9_spill] sm:$0xff] %v8690_v43  ;;  %v852_v42 = vadd.s32 16, %v8690_v43  ;;  %v851_v50 = vadd.s32 8, %v8690_v43  ;;  %vm856_vm5 = vcmp.le.s32.totalorder %v855_v21, %v8690_v43 }
 0x3ee   : > { %v853_v45 = vadd.s32 24, %v8690_v43  ;;  %v8698_v48 = vsel %vm856_vm5, 0.0, %v7820_v55 }
 0x3ef   : > { %v1954_v1 = vpack.c.bf16 %v1513_v13, %v1512_v10  ;;  %vm858_vm4 = vcmp.le.s32.totalorder %v855_v21, %v852_v42  ;;  %vm857_vm6 = vcmp.le.s32.totalorder %v855_v21, %v851_v50  ;;  %10531 = vst [vmem:[#allocation10_spill] sm:$0xff] %v8698_v48 }
 0x3f0   : > { %6996 = vmatpush3.bf16.msra.mxu0 %v10528_v19  ;;  %v8696_v49 = vsel %vm858_vm4, 0.0, %v7820_v55  ;;  %vm859_vm7 = vcmp.le.s32.totalorder %v855_v21, %v853_v45  ;;  %v8703_v23 = vsel %vm857_vm6, 0.0, %v7820_v55 }
 0x3f1   : > { %6990 = vmatmul.mubr.msk.bf16.vlgmr.msra.gmra.mrb[16].mxu1 %vm1955_vm3, %v1954_v1  ;;  %10530 = vst [vmem:[#allocation6_spill] sm:$0xff] %v8696_v49  ;;  %10532 = vst [vmem:[#allocation11_spill] sm:$0xff] %v8703_v23  ;;  %v8710_v32 = vsel %vm859_vm7, 0.0, %v7820_v55 }
 0x3f2   : > { %10533 = vst [vmem:[#allocation12_spill] sm:$0xff] %v8710_v32 }
 0x440   : > { %v6967_v34 = vpop.f32.mrb[8].mxu1 }
 0x441   : > { %v8701_v44 = vadd.f32 %v6967_v34, %v8696_v49  ;;  %v2002_v27 = vpop.f32.mrb[9].mxu1 }
 0x442   : > { %v6968_v29 = vpop.f32.mrb[10].mxu1  ;;  %v8706_v8 = vadd.f32 %v2002_v27, %v8698_v48 }
 0x443   : > { %v2005_v26 = vpop.f32.mrb[11].mxu1  ;;  %v2206_v38 = vsel %vm1955_vm3, %v8701_v44, -inf  ;;  %v8718_v52 = vadd.f32 %v6968_v29, %v8710_v32 }
 0x444   : > { %v8713_v14 = vadd.f32 %v2005_v26, %v8703_v23  ;;  %2207 = vmax.xlane.f32.xlu0 %v2206_v38  ;;  %v2200_v4 = vsel %vm1955_vm3, %v8706_v8, -inf }
 0x445   : > { %v2209_v18 = vsel %vm1955_vm3, %v8718_v52, -inf }
 0x446   : > { %v2203_v37 = vsel %vm1955_vm3, %v8713_v14, -inf }
 0x447   : > { %2204 = vmax.xlane.f32.xlu1 %v2203_v37 }
 0x448   : > { %2201 = vmax.xlane.f32.xlu0 %v2200_v4 }
 0x44c   : > { %2210 = vmax.xlane.f32.xlu0 %v2209_v18 }
 0x4b2   : > { %v6975_v20 = vpop.f32.mrb[12].mxu1 }
 0x4b3   : > { %v8725_v51 = vadd.f32 %v6975_v20, %v8696_v49  ;;  %v2063_v30 = vpop.f32.mrb[13].mxu1 }
 0x4b4   : > { %v6976_v40 = vpop.f32.mrb[14].mxu1  ;;  %v8738_v39 = vadd.f32 %v2063_v30, %v8698_v48 }
 0x4b5   : > { %v8728_v57 = vadd.f32 %v6976_v40, %v8710_v32  ;;  %v2066_v5 = vpop.f32.mrb[15].mxu1  ;;  %v2218_v41 = vsel %vm1955_vm3, %v8725_v51, -inf }
 0x4b6   : > { %2219 = vmax.xlane.f32.xlu0 %v2218_v41  ;;  %v8746_v31 = vadd.f32 %v2066_v5, %v8703_v23  ;;  %v2212_v22 = vsel %vm1955_vm3, %v8738_v39, -inf }
 0x4b7   : > { %v2221_v46 = vsel %vm1955_vm3, %v8728_v57, -inf }
 0x4b8   : > { %2222 = vmax.xlane.f32.xlu1 %v2221_v46  ;;  %v2215_v15 = vsel %vm1955_vm3, %v8746_v31, -inf }
 0x4be   : > { %v6983_v58 = vpop.f32.mrb[8].mxu0 }
 0x4bf   : > { %v8735_v62 = vadd.f32 %v6983_v58, %v8696_v49  ;;  %v2124_v53 = vpop.f32.mrb[9].mxu0 }
 0x4c0   : > { %v6984_v61 = vpop.f32.mrb[10].mxu0  ;;  %v8751_v47 = vadd.f32 %v2124_v53, %v8698_v48 }
 0x4c1   : > { %v8741_v11 = vadd.f32 %v6984_v61, %v8710_v32  ;;  %v2127_v28 = vpop.f32.mrb[11].mxu0  ;;  %v2230_v59 = vsel %vm1955_vm3, %v8735_v62, -inf }
 0x4c2   : > { %2231 = vmax.xlane.f32.xlu0 %v2230_v59  ;;  %v8756_v12 = vadd.f32 %v2127_v28, %v8703_v23  ;;  %v2224_v63 = vsel %vm1955_vm3, %v8751_v47, -inf }
 0x4c3   : > { %v2233_v2 = vsel %vm1955_vm3, %v8741_v11, -inf }
 0x4c4   : > { %2234 = vmax.xlane.f32.xlu1 %v2233_v2  ;;  %v6991_v25 = vpop.f32.mrb[16].mxu1  ;;  %v2227_v3 = vsel %vm1955_vm3, %v8756_v12, -inf }
 0x4c5   : > { %v2185_v7 = vpop.f32.mrb[17].mxu1  ;;  %v8761_v56 = vadd.f32 %v6991_v25, %v8696_v49 }
 0x4c6   : > { %2213 = vmax.xlane.f32.xlu0 %v2212_v22  ;;  %v6992_v16 = vpop.f32.mrb[18].mxu1  ;;  %v8768_v17 = vadd.f32 %v2185_v7, %v8698_v48 }
 0x4c7   : > { %v2188_v33 = vpop.f32.mrb[19].mxu1  ;;  %v2242_v6 = vsel %vm1955_vm3, %v8761_v56, -inf  ;;  %v8783_v1 = vadd.f32 %v6992_v16, %v8710_v32 }
 0x4c8   : > { %2216 = vmax.xlane.f32.xlu1 %v2215_v15  ;;  %v2236_v36 = vsel %vm1955_vm3, %v8768_v17, -inf  ;;  %v8788_v42 = vadd.f32 %v2188_v33, %v8703_v23 }
 0x4c9   : > { %v2245_v21 = vsel %vm1955_vm3, %v8783_v1, -inf }
 0x4ca   : > { %2225 = vmax.xlane.f32.xlu0 %v2224_v63  ;;  %v2239_v55 = vsel %vm1955_vm3, %v8788_v42, -inf }
 0x4cc   : > { %2228 = vmax.xlane.f32.xlu1 %v2227_v3 }
 0x4ce   : > { %2243 = vmax.xlane.f32.xlu0 %v2242_v6 }
 0x4d1   : > { %v2208_v60 = vpop.xlane.xlu0 %2207 }
 0x4d2   : > { %2237 = vmax.xlane.f32.xlu0 %v2236_v36  ;;  %v2250_v0 = vsub.f32 %v8701_v44, %v2208_v60 }
 0x4d4   : > { %v2268_v10 = vmul.f32 1.442695, %v2250_v0  ;;  %v2205_v29 = vpop.xlane.xlu1 %2204 }
 0x4d5   : > { %v2202_v35 = vpop.xlane.xlu0 %2201 }
 0x4d6   : > { %v2248_v13 = vsub.f32 %v8706_v8, %v2202_v35  ;;  %7578 = vpow2.f32 %v2268_v10  ;;  %v2249_v8 = vsub.f32 %v8713_v14, %v2205_v29 }
 0x4d8   : > { %v2264_v19 = vmul.f32 1.442695, %v2248_v13  ;;  %v2266_v38 = vmul.f32 1.442695, %v2249_v8 }
 0x4d9   : > { %v2211_v44 = vpop.xlane.xlu0 %2210 }
 0x4da   : > { %7580 = vpow2.f32 %v2264_v19  ;;  %v2251_v27 = vsub.f32 %v8718_v52, %v2211_v44 }
 0x4dc   : > { %v2270_v26 = vmul.f32 1.442695, %v2251_v27 }
 0x4dd   : > { %7248 = vrot.lane.b32.xlu1 %v10535_v9, %s10534_s23 }
 0x4de   : > { %7582 = vpow2.f32 %v2270_v26 }
 0x4df   : > { %7584 = vpow2.f32 %v2266_v38 }
 0x4e0   : > { %v8785_v24 = vpop.eup %7578 }
 0x4e1   : > { %7253 = vrot.lane.b32.xlu1 %v10537_v54, %s10536_s1  ;;  %v2302_v50 = vsel %vm1955_vm3, %v8785_v24, 0.0 }
 0x4e4   : > { %v8794_v45 = vpop.eup %7580 }
 0x4e5   : > { %v2296_v34 = vsel %vm1955_vm3, %v8794_v45, 0.0 }
 0x4e8   : > { %7243 = vrot.lane.b32.xlu0 %v10537_v54, %s10534_s23  ;;  %v8804_v37 = vpop.eup %7582 }
 0x4e9   : > { %v2305_v4 = vsel %vm1955_vm3, %v8804_v37, 0.0  ;;  %v8808_v18 = vpop.eup %7584 }
 0x4ea   : > { %v2299_v20 = vsel %vm1955_vm3, %v8808_v18, 0.0 }
 0x505   : > { %2246 = vmax.xlane.f32.xlu1 %v2245_v21 }
 0x507   : > { %2303 = vadd.xlane.f32.xlu0 %v2302_v50 }
 0x509   : > { %2240 = vmax.xlane.f32.xlu1 %v2239_v55 }
 0x50b   : > { %2297 = vadd.xlane.f32.xlu0 %v2296_v34 }
 0x51a   : > { %7258 = vrot.lane.b32.xlu1 %v10537_v54, %s10538_s5 }
 0x53e   : > { %2306 = vadd.xlane.f32.xlu1 %v2305_v4 }
 0x542   : > { %2300 = vadd.xlane.f32.xlu1 %v2299_v20 }
 0x543   : > { %v2220_v52 = vpop.xlane.xlu0 %2219 }
 0x544   : > { %v2254_v30 = vsub.f32 %v8725_v51, %v2220_v52 }
 0x545   : > { %v2223_v14 = vpop.xlane.xlu1 %2222 }
 0x546   : > { %v2276_v40 = vmul.f32 1.442695, %v2254_v30  ;;  %v2255_v5 = vsub.f32 %v8728_v57, %v2223_v14 }
 0x548   : > { %7586 = vpow2.f32 %v2276_v40  ;;  %v2278_v41 = vmul.f32 1.442695, %v2255_v5 }
 0x54a   : > { %7588 = vpow2.f32 %v2278_v41 }
 0x54f   : > { %v2232_v46 = vpop.xlane.xlu0 %2231 }
 0x550   : > { %v2258_v58 = vsub.f32 %v8735_v62, %v2232_v46 }
 0x551   : > { %v2235_v53 = vpop.xlane.xlu1 %2234 }
 0x552   : > { %v8815_v61 = vpop.eup %7586  ;;  %v2284_v28 = vmul.f32 1.442695, %v2258_v58  ;;  %v2259_v59 = vsub.f32 %v8741_v11, %v2235_v53 }
 0x553   : > { %v2214_v2 = vpop.xlane.xlu0 %2213  ;;  %v2314_v51 = vsel %vm1955_vm3, %v8815_v61, 0.0 }
 0x554   : > { %v8820_v25 = vpop.eup %7588  ;;  %7590 = vpow2.f32 %v2284_v28  ;;  %v2286_v57 = vmul.f32 1.442695, %v2259_v59  ;;  %v2252_v7 = vsub.f32 %v8738_v39, %v2214_v2  ;;  %2315 = vadd.xlane.f32.xlu0 %v2314_v51 }
 0x555   : > { %v2217_v22 = vpop.xlane.xlu1 %2216  ;;  %v2317_v62 = vsel %vm1955_vm3, %v8820_v25, 0.0 }
 0x556   : > { %7592 = vpow2.f32 %v2286_v57  ;;  %v2272_v16 = vmul.f32 1.442695, %v2252_v7  ;;  %v2253_v33 = vsub.f32 %v8746_v31, %v2217_v22  ;;  %2318 = vadd.xlane.f32.xlu1 %v2317_v62 }
 0x557   : > { %v2226_v11 = vpop.xlane.xlu0 %2225 }
 0x558   : > { %7594 = vpow2.f32 %v2272_v16  ;;  %v2274_v15 = vmul.f32 1.442695, %v2253_v33  ;;  %v2256_v63 = vsub.f32 %v8751_v47, %v2226_v11 }
 0x559   : > { %v2229_v3 = vpop.xlane.xlu1 %2228 }
 0x55a   : > { %7596 = vpow2.f32 %v2274_v15  ;;  %v2280_v6 = vmul.f32 1.442695, %v2256_v63  ;;  %v2257_v39 = vsub.f32 %v8756_v12, %v2229_v3 }
 0x55b   : > { %v2244_v36 = vpop.xlane.xlu0 %2243 }
 0x55c   : > { %7598 = vpow2.f32 %v2280_v6  ;;  %v2282_v54 = vmul.f32 1.442695, %v2257_v39  ;;  %v2262_v60 = vsub.f32 %v8761_v56, %v2244_v36 }
 0x55d   : > { %v7249_v0 = vpop.permute.xlu1 %7248 }
 0x55e   : > { %v8829_v35 = vpop.eup %7590  ;;  %7600 = vpow2.f32 %v2282_v54  ;;  %v2292_v31 = vmul.f32 1.442695, %v2262_v60  ;;  %v7251_v10 = vunpack.i.h.bf16 %v7249_v0  ;;  %v7250_v13 = vunpack.i.l.bf16 %v7249_v0 }
 0x55f   : > { %v2238_v47 = vpop.xlane.xlu0 %2237  ;;  %v2326_v19 = vsel %vm1955_vm3, %v8829_v35, 0.0 }
 0x560   : > { %v8833_v21 = vpop.eup %7592  ;;  %7602 = vpow2.f32 %v2292_v31  ;;  %v6622_v12 = vpack.c.bf16 %v7251_v10, %v7251_v10  ;;  %v6621_v50 = vpack.c.bf16 %v7250_v13, %v7250_v13  ;;  %v2260_v56 = vsub.f32 %v8768_v17, %v2238_v47  ;;  %2327 = vadd.xlane.f32.xlu0 %v2326_v19 }
 0x561   : > { %v7254_v55 = vpop.permute.xlu1 %7253  ;;  %v2329_v34 = vsel %vm1955_vm3, %v8833_v21, 0.0  ;;  %v1797_v2 = vpack.c.bf16 %v7251_v10, %v7250_v13 }
 0x562   : > { %v8838_v44 = vpop.eup %7594  ;;  %1938 = vst.msk [vmem:[%s8152_s2 + $0x1c] sm:$0xf] %vm1858_vm1, %v6622_v12  ;;  %1937 = vst.msk [vmem:[%s8152_s2 + $0x18] sm:$0xf] %vm1858_vm1, %v6621_v50  ;;  %v2288_v27 = vmul.f32 1.442695, %v2260_v56  ;;  %v7256_v29 = vunpack.i.h.bf16 %v7254_v55  ;;  %v7255_v8 = vunpack.i.l.bf16 %v7254_v55  ;;  %2330 = vadd.xlane.f32.xlu1 %v2329_v34 }
 0x563   : > { %v7244_v26 = vpop.permute.xlu0 %7243  ;;  %v2308_v17 = vsel %vm1955_vm3, %v8838_v44, 0.0 }
 0x564   : > { %v8846_v38 = vpop.eup %7596  ;;  %7604 = vpow2.f32 %v2288_v27  ;;  %v6624_v4 = vpack.c.bf16 %v7256_v29, %v7256_v29  ;;  %v6623_v20 = vpack.c.bf16 %v7255_v8, %v7255_v8  ;;  %v7246_v52 = vunpack.i.h.bf16 %v7244_v26  ;;  %2309 = vadd.xlane.f32.xlu0 %v2308_v17 }
 0x565   : > { %v7245_v30 = vunpack.i.l.bf16 %v7244_v26  ;;  %v8848_v14 = vpack.c.bf16 %v7256_v29, %v7255_v8  ;;  %v2311_v40 = vsel %vm1955_vm3, %v8846_v38, 0.0 }
 0x566   : > { %v8852_v5 = vpop.eup %7598  ;;  %1940 = vst.msk [vmem:[%s8152_s2 + $0x24] sm:$0xf] %vm1858_vm1, %v6624_v4  ;;  %1939 = vst.msk [vmem:[%s8152_s2 + $0x20] sm:$0xf] %vm1858_vm1, %v6623_v20  ;;  %v6620_v41 = vpack.c.bf16 %v7246_v52, %v7246_v52  ;;  %2312 = vadd.xlane.f32.xlu1 %v2311_v40 }
 0x567   : > { %v6619_v46 = vpack.c.bf16 %v7245_v30, %v7245_v30  ;;  %7009 = vmatprep.subr.bf16.mxu0 %v8848_v14  ;;  %v2320_v58 = vsel %vm1955_vm3, %v8852_v5, 0.0  ;;  %v1796_v53 = vpack.c.bf16 %v7246_v52, %v7245_v30 }
 0x568   : > { %v8861_v28 = vpop.eup %7600  ;;  %1936 = vst.msk [vmem:[%s8152_s2 + $0x14] sm:$0xf] %vm1858_vm1, %v6620_v41  ;;  %2321 = vadd.xlane.f32.xlu0 %v2320_v58 }
 0x569   : > { %1935 = vst.msk [vmem:[%s8152_s2 + $0x10] sm:$0xf] %vm1858_vm1, %v6619_v46  ;;  %7001 = vmatprep.subr.bf16.mxu1 %v1796_v53  ;;  %v2323_v59 = vsel %vm1955_vm3, %v8861_v28, 0.0 }
 0x56a   : > { %v8869_v51 = vpop.eup %7602  ;;  %7002 = vmatpush3.bf16.msra.mxu1 %v1796_v53  ;;  %2324 = vadd.xlane.f32.xlu1 %v2323_v59 }
 0x56b   : > { %7003 = vmatprep.subr.bf16.mxu1 %v1797_v2  ;;  %v2338_v57 = vsel %vm1955_vm3, %v8869_v51, 0.0 }
 0x56c   : > { %2339 = vadd.xlane.f32.xlu0 %v2338_v57 }
 0x56e   : > { %v8873_v7 = vpop.eup %7604  ;;  %7004 = vmatpush3.bf16.msra.mxu1 %v1797_v2 }
 0x56f   : > { %v2332_v22 = vsel %vm1955_vm3, %v8873_v7, 0.0 }
 0x570   : > { %2333 = vadd.xlane.f32.xlu0 %v2332_v22 }
 0x586   : > { %7263 = vrot.lane.b32.xlu0 %v10535_v9, %s10536_s1 }
 0x592   : > { %v2247_v62 = vpop.xlane.xlu1 %2246 }
 0x593   : > { %v2263_v16 = vsub.f32 %v8783_v1, %v2247_v62 }
 0x594   : > { %v2304_v10 = vpop.xlane.xlu0 %2303 }
 0x595   : > { %v2294_v33 = vmul.f32 1.442695, %v2263_v16 }
 0x596   : > { %v2241_v11 = vpop.xlane.xlu1 %2240 }
 0x597   : > { %7606 = vpow2.f32 %v2294_v33  ;;  %v2261_v15 = vsub.f32 %v8788_v42, %v2241_v11 }
 0x598   : > { %v2298_v13 = vpop.xlane.xlu0 %2297 }
 0x599   : > { %v2290_v63 = vmul.f32 1.442695, %v2261_v15 }
 0x59a   : > { %v7259_v3 = vpop.permute.xlu1 %7258 }
 0x59b   : > { %7608 = vpow2.f32 %v2290_v63  ;;  %v7261_v6 = vunpack.i.h.bf16 %v7259_v3  ;;  %v7260_v39 = vunpack.i.l.bf16 %v7259_v3 }
 0x59d   : > { %v6628_v36 = vpack.c.bf16 %v7261_v6, %v7261_v6  ;;  %v6627_v54 = vpack.c.bf16 %v7260_v39, %v7260_v39  ;;  %v8881_v60 = vpack.c.bf16 %v7261_v6, %v7260_v39 }
 0x59f   : > { %1944 = vst.msk [vmem:[%s8152_s2 + $0x34] sm:$0xf] %vm1858_vm1, %v6628_v36  ;;  %1943 = vst.msk [vmem:[%s8152_s2 + $0x30] sm:$0xf] %vm1858_vm1, %v6627_v54  ;;  %7017 = vmatprep.subr.bf16.mxu1 %v8881_v60 }
 0x5a1   : > { %v8888_v1 = vpop.eup %7606 }
 0x5a2   : > { %v2341_v42 = vsel %vm1955_vm3, %v8888_v1, 0.0 }
 0x5a3   : > { %2342 = vadd.xlane.f32.xlu1 %v2341_v42 }
 0x5a5   : > { %v8892_v0 = vpop.eup %7608 }
 0x5a6   : > { %v2335_v31 = vsel %vm1955_vm3, %v8892_v0, 0.0 }
 0x5a7   : > { %2336 = vadd.xlane.f32.xlu1 %v2335_v31 }
 0x5b8   : > { %7268 = vrot.lane.b32.xlu1 %v10535_v9, %s10538_s5 }
 0x5cb   : > { %v2307_v47 = vpop.xlane.xlu1 %2306 }
 0x5cc   : > { %7610 = vrcp.f32 %v2307_v47 }
 0x5cd   : > { %7612 = vrcp.f32 %v2298_v13 }
 0x5ce   : > { %7614 = vrcp.f32 %v2304_v10 }
 0x5cf   : > { %v2301_v19 = vpop.xlane.xlu1 %2300 }
 0x5d0   : > { %7616 = vrcp.f32 %v2301_v19 }
 0x5d6   : > { %v7611_v12 = vpop.eup %7610 }
 0x5d7   : > { %v7613_v50 = vpop.eup %7612  ;;  %v2363_v34 = vmul.f32 %v7611_v12, %v8804_v37 }
 0x5d8   : > { %v7615_v56 = vpop.eup %7614  ;;  %v2360_v27 = vmul.f32 %v7613_v50, %v8794_v45 }
 0x5d9   : > { %v2362_v9 = vmul.f32 %v7615_v56, %v8785_v24 }
 0x5da   : > { %v7617_v55 = vpop.eup %7616 }
 0x5db   : > { %v2361_v29 = vmul.f32 %v7617_v55, %v8808_v18  ;;  %v2377_v26 = vpack.c.bf16 %v2363_v34, %v2362_v9 }
 0x5dd   : > { %v2376_v8 = vpack.c.bf16 %v2361_v29, %v2360_v27 }
 0x5df   : > { %6997 = vmatprep.mubr.msk.bf16.mxu0 %vm1955_vm3, %v2376_v8 }
 0x5e0   : > { %6998 = vmatmul.mubr.msk.bf16.vlgmr.msra.gmra.mrb[12].mxu0 %vm1955_vm3, %v2377_v26 }
 0x5e1   : > { %7010 = vmatpush3.bf16.msra.mxu0 %v8848_v14  ;;  %v2316_v17 = vpop.xlane.xlu0 %2315 }
 0x5e3   : > { %v2319_v4 = vpop.xlane.xlu1 %2318 }
 0x5e4   : > { %7618 = vrcp.f32 %v2319_v4 }
 0x5ed   : > { %v2328_v20 = vpop.xlane.xlu0 %2327 }
 0x5ee   : > { %v7619_v40 = vpop.eup %7618 }
 0x5ef   : > { %v2331_v52 = vpop.xlane.xlu1 %2330  ;;  %v2367_v53 = vmul.f32 %v7619_v40, %v8820_v25 }
 0x5f1   : > { %v2310_v37 = vpop.xlane.xlu0 %2309 }
 0x5f2   : > { %7620 = vrcp.f32 %v2310_v37 }
 0x5f3   : > { %7622 = vrcp.f32 %v2316_v17  ;;  %v2313_v45 = vpop.xlane.xlu1 %2312 }
 0x5f4   : > { %7624 = vrcp.f32 %v2313_v45 }
 0x5f5   : > { %v2322_v18 = vpop.xlane.xlu0 %2321 }
 0x5f6   : > { %7626 = vrcp.f32 %v2322_v18 }
 0x5f7   : > { %7628 = vrcp.f32 %v2331_v52  ;;  %v2325_v24 = vpop.xlane.xlu1 %2324 }
 0x5f8   : > { %7630 = vrcp.f32 %v2325_v24  ;;  %v7396_v24 = vld [vmem:[%s10539_s13 + $0x10] sm:$0xff]  }
 0x5f9   : > { %7632 = vrcp.f32 %v2328_v20  ;;  %v2340_v30 = vpop.xlane.xlu0 %2339 }
 0x5fc   : > { %v7621_v41 = vpop.eup %7620 }
 0x5fd   : > { %v7623_v14 = vpop.eup %7622  ;;  %v2334_v46 = vpop.xlane.xlu0 %2333  ;;  %v2364_v59 = vmul.f32 %v7621_v41, %v8838_v44 }
 0x5fe   : > { %v7625_v58 = vpop.eup %7624  ;;  %v2366_v22 = vmul.f32 %v7623_v14, %v8815_v61  ;;  %v7397_v14 = vld [vmem:[%s10539_s13 + $0x18] sm:$0xff]  }
 0x5ff   : > { %v2365_v2 = vmul.f32 %v7625_v58, %v8846_v38 }
 0x600   : > { %v7627_v57 = vpop.eup %7626  ;;  %v2379_v3 = vpack.c.bf16 %v2367_v53, %v2366_v22  ;;  %v7401_v22 = vld [vmem:[%s10539_s13 + $0x38] sm:$0xff]  }
 0x601   : > { %v7629_v62 = vpop.eup %7628  ;;  %v7264_v16 = vpop.permute.xlu0 %7263  ;;  %v2378_v33 = vpack.c.bf16 %v2365_v2, %v2364_v59  ;;  %v2368_v25 = vmul.f32 %v7627_v57, %v8852_v5  ;;  %v7398_v59 = vld [vmem:[%s10539_s13 + $0x20] sm:$0xff]   ;;  %v7399_v2 = vld [vmem:[%s10539_s13 + $0x28] sm:$0xff]   ;;  %v7400_v57 = vld [vmem:[%s10539_s13 + $0x30] sm:$0xff]  }
 0x602   : > { %v7631_v11 = vpop.eup %7630  ;;  %v7266_v15 = vunpack.i.h.bf16 %v7264_v16  ;;  %v7265_v63 = vunpack.i.l.bf16 %v7264_v16  ;;  %v2371_v38 = vmul.f32 %v7629_v62, %v8833_v21 }
 0x603   : > { %v7633_v6 = vpop.eup %7632  ;;  %7005 = vmatprep.mubr.msk.bf16.mxu1 %vm1955_vm3, %v2378_v33  ;;  %v2369_v44 = vmul.f32 %v7631_v11, %v8861_v28 }
 0x604   : > { %v6626_v39 = vpack.c.bf16 %v7266_v15, %v7266_v15  ;;  %v6625_v61 = vpack.c.bf16 %v7265_v63, %v7265_v63  ;;  %7006 = vmatmul.mubr.msk.bf16.vlgmr.msra.gmra.mrb[20].mxu1 %vm1955_vm3, %v2379_v3  ;;  %v1799_v36 = vpack.c.bf16 %v7266_v15, %v7265_v63  ;;  %v2370_v42 = vmul.f32 %v7633_v6, %v8829_v35 }
 0x605   : > { %7018 = vmatpush3.bf16.msra.mxu1 %v8881_v60  ;;  %v2380_v54 = vpack.c.bf16 %v2369_v44, %v2368_v25 }
 0x606   : > { %1942 = vst.msk [vmem:[%s8152_s2 + $0x2c] sm:$0xf] %vm1858_vm1, %v6626_v39  ;;  %1941 = vst.msk [vmem:[%s8152_s2 + $0x28] sm:$0xf] %vm1858_vm1, %v6625_v61  ;;  %7011 = vmatprep.subr.bf16.mxu0 %v1799_v36  ;;  %v2381_v5 = vpack.c.bf16 %v2371_v38, %v2370_v42 }
 0x607   : > { %7012 = vmatpush3.bf16.msra.mxu0 %v1799_v36  ;;  %7013 = vmatprep.mubr.msk.bf16.mxu0 %vm1955_vm3, %v2380_v54 }
 0x60a   : > { %7014 = vmatmul.mubr.msk.bf16.vlgmr.msra.gmra.mrb[16].mxu0 %vm1955_vm3, %v2381_v5 }
 0x630   : > { %v2343_v21 = vpop.xlane.xlu1 %2342 }
 0x631   : > { %7634 = vrcp.f32 %v2343_v21 }
 0x632   : > { %7636 = vrcp.f32 %v2334_v46 }
 0x633   : > { %7638 = vrcp.f32 %v2340_v30 }
 0x634   : > { %v2337_v28 = vpop.xlane.xlu1 %2336 }
 0x635   : > { %7640 = vrcp.f32 %v2337_v28 }
 0x638   : > { %v7269_v35 = vpop.permute.xlu1 %7268 }
 0x639   : > { %v7271_v60 = vunpack.i.h.bf16 %v7269_v35  ;;  %v7270_v31 = vunpack.i.l.bf16 %v7269_v35 }
 0x63b   : > { %v6630_v10 = vpack.c.bf16 %v7271_v60, %v7271_v60  ;;  %v6629_v13 = vpack.c.bf16 %v7270_v31, %v7270_v31  ;;  %v1801_v47 = vpack.c.bf16 %v7271_v60, %v7270_v31  ;;  %v7635_v19 = vpop.eup %7634 }
 0x63c   : > { %v7637_v12 = vpop.eup %7636  ;;  %v2375_v55 = vmul.f32 %v7635_v19, %v8888_v1 }
 0x63d   : > { %1946 = vst.msk [vmem:[%s8152_s2 + $0x3c] sm:$0xf] %vm1858_vm1, %v6630_v10  ;;  %1945 = vst.msk [vmem:[%s8152_s2 + $0x38] sm:$0xf] %vm1858_vm1, %v6629_v13  ;;  %7019 = vmatprep.subr.bf16.mxu1 %v1801_v47  ;;  %v7639_v50 = vpop.eup %7638  ;;  %v2372_v34 = vmul.f32 %v7637_v12, %v8873_v7  ;;  %v7394_v7 = vld [vmem:[%s10539_s13] sm:$0xff]  }
 0x63e   : > { %7020 = vmatpush3.bf16.msra.mxu1 %v1801_v47  ;;  %v2374_v29 = vmul.f32 %v7639_v50, %v8869_v51  ;;  %v7395_v51 = vld [vmem:[%s10539_s13 + $0x8] sm:$0xff]   ;;  %7025 = vmatprep.subr.bf16.mxu0 %v7394_v7 }
 0x63f   : > { %v7641_v56 = vpop.eup %7640  ;;  %7026 = vmatpush3.bf16.msra.mxu0 %v7394_v7  ;;  %v7405_v7 = vld [vmem:[%s10442_s16] ss:$8 sps:$4 sm:$0xff]  }
 0x640   : > { %v2373_v27 = vmul.f32 %v7641_v56, %v8892_v0  ;;  %v2383_v8 = vpack.c.bf16 %v2375_v55, %v2374_v29  ;;  %7027 = vmatprep.subr.bf16.mxu0 %v7395_v51 }
 0x642   : > { %v2382_v9 = vpack.c.bf16 %v2373_v27, %v2372_v34 }
 0x643   : > { %7028 = vmatpush3.bf16.msra.mxu0 %v7395_v51  ;;  %v7407_v51 = vld [vmem:[%s10442_s16 + $0x4] ss:$8 sps:$4 sm:$0xff]  }
 0x644   : > { %7021 = vmatprep.mubr.msk.bf16.mxu1 %vm1955_vm3, %v2382_v9  ;;  %7029 = vmatprep.subr.bf16.mxu0 %v7396_v24 }
 0x645   : > { %7022 = vmatmul.mubr.msk.bf16.vlgmr.msra.gmra.mrb[24].mxu1 %vm1955_vm3, %v2383_v8 }
 0x647   : > { %7030 = vmatpush3.bf16.msra.mxu0 %v7396_v24  ;;  %v7419_v24 = vld [vmem:[%s10442_s16 + $0x24] ss:$8 sps:$4 sm:$0xff]  }
 0x648   : > { %7031 = vmatprep.subr.bf16.mxu0 %v7397_v14 }
 0x64b   : > { %7032 = vmatpush3.bf16.msra.mxu0 %v7397_v14 }
 0x64c   : > { %7033 = vmatprep.subr.bf16.mxu0 %v7398_v59 }
 0x64f   : > { %7034 = vmatpush3.bf16.msra.mxu0 %v7398_v59 }
 0x650   : > { %7035 = vmatprep.subr.bf16.mxu0 %v7399_v2 }
 0x653   : > { %7036 = vmatpush3.bf16.msra.mxu0 %v7399_v2  ;;  %v7796_v2 = vld [vmem:[%s7991_s30] sm:$0xff] }
 0x654   : > { %7037 = vmatprep.subr.bf16.mxu0 %v7400_v57 }
 0x657   : > { %7038 = vmatpush3.bf16.msra.mxu0 %v7400_v57 }
 0x658   : > { %7039 = vmatprep.subr.bf16.mxu0 %v7401_v22 }
 0x65b   : > { %7040 = vmatpush3.bf16.msra.mxu0 %v7401_v22  ;;  %v10541_v22 = vld [vmem:[#allocation5_spill] sm:$0xff] }
 0x65c   : > { %3071 = vmatprep.subr.bf16.mxu0 %v7407_v51  ;;  %v6238_v51 = vld [vmem:[%s10440_s14] ss:$0 sm:$0xff] }
 0x6b3   : > { %v8932_v26 = vpop.f32.mrb[12].mxu0 }
 0x6b4   : > { %v8934_v17 = vpop.f32.mrb[13].mxu0 }
 0x6b5   : > { %v8936_v4 = vpop.f32.mrb[14].mxu0 }
 0x6b6   : > { %v8938_v20 = vpop.f32.mrb[15].mxu0 }
 0x6d7   : > { %v7007_v1 = vpop.f32.mrb[20].mxu1 }
 0x6d8   : > { %v2479_v0 = vpop.f32.mrb[21].mxu1 }
 0x6d9   : > { %v7008_v52 = vpop.f32.mrb[22].mxu1 }
 0x6da   : > { %v7272_v37 = vpack.i.bf16 %v7008_v52, %v7007_v1  ;;  %v2482_v45 = vpop.f32.mrb[23].mxu1  ;;  %v7404_v1 = vld [vmem:[%s10441_s15 + $0x4] ss:$8 sps:$4 sm:$0xff]   ;;  %v7413_v52 = vld [vmem:[%s10442_s16 + $0x14] ss:$8 sps:$4 sm:$0xff]  }
 0x6db   : > { %v7282_v18 = vpack.i.bf16 %v2482_v45, %v2479_v0  ;;  %v7410_v0 = vld [vmem:[%s10441_s15 + $0x14] ss:$8 sps:$4 sm:$0xff]   ;;  %2922 = vmatprep.subr.bf16.mxu1 %v7404_v1  ;;  %v7411_v45 = vld [vmem:[%s10442_s16 + $0x10] ss:$8 sps:$4 sm:$0xff]  }
 0x6dc   : > { %7273 = vrot.lane.b32.xlu1 %v7272_v37, %s10538_s5  ;;  %v7408_v37 = vld [vmem:[%s10441_s15 + $0x10] ss:$8 sps:$4 sm:$0xff]  }
 0x6dd   : > { %v7015_v30 = vpop.f32.mrb[16].mxu0  ;;  %7283 = vrot.lane.b32.xlu0 %v7282_v18, %s10538_s5  ;;  %v7416_v18 = vld [vmem:[%s10441_s15 + $0x24] ss:$8 sps:$4 sm:$0xff]  }
 0x6de   : > { %v2534_v40 = vpop.f32.mrb[17].mxu0 }
 0x6df   : > { %v7016_v41 = vpop.f32.mrb[18].mxu0 }
 0x6e0   : > { %v7277_v46 = vpack.i.bf16 %v7016_v41, %v7015_v30  ;;  %v2537_v58 = vpop.f32.mrb[19].mxu0  ;;  %v7414_v30 = vld [vmem:[%s10441_s15 + $0x20] ss:$8 sps:$4 sm:$0xff]  }
 0x6e1   : > { %v7287_v53 = vpack.i.bf16 %v2537_v58, %v2534_v40  ;;  %v7417_v40 = vld [vmem:[%s10442_s16 + $0x20] ss:$8 sps:$4 sm:$0xff]  }
 0x6e2   : > { %7278 = vrot.lane.b32.xlu1 %v7277_v46, %s10536_s1  ;;  %v10540_v46 = vld [vmem:[#allocation4_spill] sm:$0xff] }
 0x6e3   : > { %7288 = vrot.lane.b32.xlu0 %v7287_v53, %s10536_s1 }
 0x718   : > { %v7023_v62 = vpop.f32.mrb[24].mxu1 }
 0x719   : > { %v2589_v16 = vpop.f32.mrb[25].mxu1 }
 0x71a   : > { %v7024_v33 = vpop.f32.mrb[26].mxu1 }
 0x71b   : > { %v7297_v11 = vpack.i.bf16 %v7024_v33, %v7023_v62  ;;  %v2592_v15 = vpop.f32.mrb[27].mxu1 }
 0x71c   : > { %v7292_v63 = vpack.i.bf16 %v2592_v15, %v2589_v16 }
 0x71d   : > { %7298 = vrot.lane.b32.xlu1 %v7297_v11, %s10534_s23 }
 0x71e   : > { %7293 = vrot.lane.b32.xlu0 %v7292_v63, %s10534_s23  ;;  %v7422_v63 = vld [vmem:[%s10441_s15 + $0x34] ss:$8 sps:$4 sm:$0xff]  }
 0x74e   : > { %v7274_v3 = vpop.permute.xlu1 %7273 }
 0x74f   : > { %v7284_v6 = vpop.permute.xlu0 %7283  ;;  %v7276_v44 = vunpack.i.h.bf16 %v7274_v3  ;;  %v7275_v38 = vunpack.i.l.bf16 %v7274_v3  ;;  %v7425_v3 = vld [vmem:[%s10442_s16 + $0x34] ss:$8 sps:$4 sm:$0xff]  }
 0x750   : > { %v7286_v61 = vunpack.i.h.bf16 %v7284_v6  ;;  %v7285_v36 = vunpack.i.l.bf16 %v7284_v6  ;;  %v7420_v6 = vld [vmem:[%s10441_s15 + $0x30] ss:$8 sps:$4 sm:$0xff]  }
 0x751   : > { %v2655_v28 = vsel %vm1955_vm3, %v8936_v4, %v7276_v44  ;;  %v2654_v35 = vsel %vm1955_vm3, %v8932_v26, %v7275_v38  ;;  %v7426_v44 = vld [vmem:[%s10441_s15 + $0x40] ss:$8 sps:$4 sm:$0xff]   ;;  %v7428_v38 = vld [vmem:[%s10441_s15 + $0x44] ss:$8 sps:$4 sm:$0xff]  }
 0x752   : > { %v2653_v31 = vsel %vm1955_vm3, %v8938_v20, %v7286_v61  ;;  %v2652_v10 = vsel %vm1955_vm3, %v8934_v17, %v7285_v36  ;;  %v7402_v20 = vld [vmem:[%s10441_s15] ss:$8 sps:$4 sm:$0xff]   ;;  %v7431_v61 = vld [vmem:[%s10442_s16 + $0x44] ss:$8 sps:$4 sm:$0xff]   ;;  %v7432_v36 = vld [vmem:[%s10441_s15 + $0x50] ss:$8 sps:$4 sm:$0xff]  }
 0x753   : > { %2923 = vmatpush1.bf16.msra.mxu1 %v7402_v20 }
 0x754   : > { %v7279_v25 = vpop.permute.xlu1 %7278  ;;  %2924 = vmatprep.subr.bf16.mxu1 %v7410_v0 }
 0x755   : > { %v7289_v39 = vpop.permute.xlu0 %7288  ;;  %v7281_v54 = vunpack.i.h.bf16 %v7279_v25  ;;  %v7280_v42 = vunpack.i.l.bf16 %v7279_v25  ;;  %v7423_v25 = vld [vmem:[%s10442_s16 + $0x30] ss:$8 sps:$4 sm:$0xff]  }
 0x756   : > { %v7291_v5 = vunpack.i.h.bf16 %v7289_v39  ;;  %v7290_v21 = vunpack.i.l.bf16 %v7289_v39  ;;  %v7429_v39 = vld [vmem:[%s10442_s16 + $0x40] ss:$8 sps:$4 sm:$0xff]  }
 0x757   : > { %v2659_v12 = vsel %vm2656_vm8, %v2654_v35, %v7280_v42  ;;  %v2660_v50 = vsel %vm2656_vm8, %v2655_v28, %v7281_v54  ;;  %2925 = vmatpush1.bf16.msra.mxu1 %v7408_v37  ;;  %v7434_v54 = vld [vmem:[%s10441_s15 + $0x54] ss:$8 sps:$4 sm:$0xff]   ;;  %v7435_v42 = vld [vmem:[%s10442_s16 + $0x50] ss:$8 sps:$4 sm:$0xff]   ;;  %v7443_v28 = vld [vmem:[%s10442_s16 + $0x64] ss:$8 sps:$4 sm:$0xff]  }
 0x758   : > { %v2657_v29 = vsel %vm2656_vm8, %v2652_v10, %v7290_v21  ;;  %v2658_v9 = vsel %vm2656_vm8, %v2653_v31, %v7291_v5  ;;  %2926 = vmatprep.subr.bf16.mxu1 %v7416_v18  ;;  %v7437_v5 = vld [vmem:[%s10442_s16 + $0x54] ss:$8 sps:$4 sm:$0xff]   ;;  %v7440_v21 = vld [vmem:[%s10441_s15 + $0x64] ss:$8 sps:$4 sm:$0xff]   ;;  %v7438_v35 = vld [vmem:[%s10441_s15 + $0x60] ss:$8 sps:$4 sm:$0xff]  }
 0x759   : > { %v7446_v31 = vld [vmem:[%s10441_s15 + $0x74] ss:$8 sps:$4 sm:$0xff]  }
 0x75a   : > { %v7449_v10 = vld [vmem:[%s10442_s16 + $0x74] ss:$8 sps:$4 sm:$0xff]  }
 0x75b   : > { %2927 = vmatpush1.bf16.msra.mxu1 %v7414_v30 }
 0x75c   : > { %2928 = vmatprep.subr.bf16.mxu1 %v7422_v63  ;;  %v7457_v63 = vld [vmem:[%s10443_s17 + $0x18] sm:$0xff]  }
 0x75f   : > { %2929 = vmatpush1.bf16.msra.mxu1 %v7420_v6  ;;  %v7459_v6 = vld [vmem:[%s10443_s17 + $0x20] sm:$0xff]  }
 0x760   : > { %2930 = vmatprep.subr.bf16.mxu1 %v7428_v38  ;;  %v7462_v38 = vld [vmem:[%s10443_s17 + $0x70] sm:$0xff]  }
 0x763   : > { %2931 = vmatpush1.bf16.msra.mxu1 %v7426_v44  ;;  %v7461_v44 = vld [vmem:[%s10443_s17 + $0x28] sm:$0xff]  }
 0x764   : > { %2932 = vmatprep.subr.bf16.mxu1 %v7434_v54 }
 0x767   : > { %2933 = vmatpush1.bf16.msra.mxu1 %v7432_v36  ;;  %v7465_v36 = vld [vmem:[%s10443_s17 + $0x38] sm:$0xff]  }
 0x768   : > { %2934 = vmatprep.subr.bf16.mxu1 %v7440_v21 }
 0x76b   : > { %2935 = vmatpush1.bf16.msra.mxu1 %v7438_v35 }
 0x76c   : > { %2936 = vmatprep.subr.bf16.mxu1 %v7446_v31 }
 0x78f   : > { %v7299_v60 = vpop.permute.xlu1 %7298 }
 0x790   : > { %v7301_v13 = vunpack.i.h.bf16 %v7299_v60  ;;  %v7300_v47 = vunpack.i.l.bf16 %v7299_v60  ;;  %v7294_v19 = vpop.permute.xlu0 %7293  ;;  %v7441_v60 = vld [vmem:[%s10442_s16 + $0x60] ss:$8 sps:$4 sm:$0xff]  }
 0x791   : > { %v7296_v56 = vunpack.i.h.bf16 %v7294_v19  ;;  %v7295_v55 = vunpack.i.l.bf16 %v7294_v19  ;;  %v7447_v19 = vld [vmem:[%s10442_s16 + $0x70] ss:$8 sps:$4 sm:$0xff]  }
 0x792   : > { %v2665_v34 = vsel %vm2661_vm9, %v2660_v50, %v7301_v13  ;;  %v2664_v27 = vsel %vm2661_vm9, %v2659_v12, %v7300_v47  ;;  %v10478_v13 = vmov 0   ;;  %v7444_v47 = vld [vmem:[%s10441_s15 + $0x70] ss:$8 sps:$4 sm:$0xff]  }
 0x793   : > { %v2662_v8 = vsel %vm2661_vm9, %v2657_v29, %v7295_v55  ;;  %v2663_v26 = vsel %vm2661_vm9, %v2658_v9, %v7296_v56  ;;  %v2683_v17 = vpack.c.bf16 %v2665_v34, %v2664_v27  ;;  %2954 = vmatprep.mubr.bf16.mxu1 %v10478_v13  ;;  %2937 = vmatpush1.bf16.msra.mxu1 %v7444_v47 }
 0x794   : > { %v2682_v4 = vpack.c.bf16 %v2663_v26, %v2662_v8 }
 0x796   : > { %7041 = vmatprep.mubr.bf16.mxu0 %v2682_v4 }
 0x797   : > { %7042 = vmatmul.mubr.bf16.vlgmr.msra.gmra.mrb[20].mxu0 %v2683_v17 }
 0x798   : > { %3072 = vmatpush1.bf16.msra.mxu0 %v7405_v7  ;;  %3103 = vmatprep.mubr.bf16.mxu0 %v10478_v13 }
 0x799   : > { %3073 = vmatprep.subr.bf16.mxu0 %v7413_v52 }
 0x79c   : > { %3074 = vmatpush1.bf16.msra.mxu0 %v7411_v45 }
 0x79d   : > { %3075 = vmatprep.subr.bf16.mxu0 %v7419_v24 }
 0x7a0   : > { %3076 = vmatpush1.bf16.msra.mxu0 %v7417_v40 }
 0x7a1   : > { %3077 = vmatprep.subr.bf16.mxu0 %v7425_v3  ;;  %v7458_v3 = vld [vmem:[%s10443_s17 + $0x60] sm:$0xff]  }
 0x7a4   : > { %3078 = vmatpush1.bf16.msra.mxu0 %v7423_v25  ;;  %v7460_v25 = vld [vmem:[%s10443_s17 + $0x68] sm:$0xff]  }
 0x7a5   : > { %3079 = vmatprep.subr.bf16.mxu0 %v7431_v61  ;;  %v7464_v61 = vld [vmem:[%s10443_s17 + $0x78] sm:$0xff]  }
 0x7a8   : > { %3080 = vmatpush1.bf16.msra.mxu0 %v7429_v39  ;;  %v7463_v39 = vld [vmem:[%s10443_s17 + $0x30] sm:$0xff]  }
 0x7a9   : > { %3081 = vmatprep.subr.bf16.mxu0 %v7437_v5 }
 0x7ac   : > { %3082 = vmatpush1.bf16.msra.mxu0 %v7435_v42 }
 0x7ad   : > { %3083 = vmatprep.subr.bf16.mxu0 %v7443_v28 }
 0x7b0   : > { %3084 = vmatpush1.bf16.msra.mxu0 %v7441_v60 }
 0x7b1   : > { %3085 = vmatprep.subr.bf16.mxu0 %v7449_v10 }
 0x7b4   : > { %3086 = vmatpush1.bf16.msra.mxu0 %v7447_v19 }
 0x86a   : > { %v7043_v41 = vpop.f32.mrb[20].mxu0 }
 0x86b   : > { %v2766_v14 = vpop.f32.mrb[21].mxu0  ;;  %v9028_v57 = vadd.f32 %v7796_v2, %v7043_v41  ;;  %v7451_v2 = vld [vmem:[%s10443_s17] sm:$0xff]  }
 0x86c   : > { %v9023_v58 = vadd.f32 %v2766_v14, %v10540_v46  ;;  %v9025_v53 = vpop.f32.mrb[22].mxu0 }
 0x86d   : > { %v2769_v59 = vpop.f32.mrb[23].mxu0  ;;  %v2788_v11 = vmul.f32 %v9028_v57, %v9028_v57  ;;  %v2789_v15 = vmul.f32 %v9025_v53, %v9025_v53 }
 0x86e   : > { %v9031_v62 = vadd.f32 %v2769_v59, %v10541_v22  ;;  %v2786_v16 = vmul.f32 %v9023_v58, %v9023_v58  ;;  %v7450_v59 = vld [vmem:[%s10443_s17 + $0x40] sm:$0xff]   ;;  %v7452_v22 = vld [vmem:[%s10443_s17 + $0x48] sm:$0xff]  }
 0x86f   : > { %6744 = vmatprep.subr.bf16.mxu1 %v7450_v59 }
 0x870   : > { %2790 = vadd.xlane.f32.xlu0 %v2786_v16  ;;  %v2787_v33 = vmul.f32 %v9031_v62, %v9031_v62  ;;  %v7453_v16 = vld [vmem:[%s10443_s17 + $0x8] sm:$0xff]  }
 0x872   : > { %2792 = vadd.xlane.f32.xlu1 %v2787_v33  ;;  %v7454_v33 = vld [vmem:[%s10443_s17 + $0x50] sm:$0xff]  }
 0x874   : > { %2794 = vadd.xlane.f32.xlu0 %v2788_v11  ;;  %v7455_v11 = vld [vmem:[%s10443_s17 + $0x10] sm:$0xff]  }
 0x878   : > { %2796 = vadd.xlane.f32.xlu0 %v2789_v15  ;;  %v7456_v15 = vld [vmem:[%s10443_s17 + $0x58] sm:$0xff]  }
 0x8fd   : > { %v2791_v12 = vpop.xlane.xlu0 %2790 }
 0x8fe   : > { %v2798_v50 = vmul.f32 0.0078125, %v2791_v12 }
 0x8ff   : > { %v2793_v56 = vpop.xlane.xlu1 %2792 }
 0x900   : > { %v2802_v55 = vadd.f32 1e-06, %v2798_v50  ;;  %v2799_v34 = vmul.f32 0.0078125, %v2793_v56 }
 0x901   : > { %v2795_v27 = vpop.xlane.xlu0 %2794 }
 0x902   : > { %7642 = vrsqrt.f32 %v2802_v55  ;;  %v2803_v29 = vadd.f32 1e-06, %v2799_v34  ;;  %v2800_v9 = vmul.f32 0.0078125, %v2795_v27 }
 0x904   : > { %7644 = vrsqrt.f32 %v2803_v29  ;;  %v2804_v8 = vadd.f32 1e-06, %v2800_v9 }
 0x905   : > { %v2797_v26 = vpop.xlane.xlu0 %2796 }
 0x906   : > { %v2801_v17 = vmul.f32 0.0078125, %v2797_v26  ;;  %7646 = vrsqrt.f32 %v2804_v8 }
 0x908   : > { %v2805_v4 = vadd.f32 1e-06, %v2801_v17 }
 0x90a   : > { %7648 = vrsqrt.f32 %v2805_v4 }
 0x90c   : > { %v7643_v20 = vpop.eup %7642 }
 0x90d   : > { %v2810_v1 = vmul.f32 %v7643_v20, %v9023_v58 }
 0x90e   : > { %v7645_v7 = vpop.eup %7644 }
 0x90f   : > { %v2811_v0 = vmul.f32 %v7645_v7, %v9031_v62  ;;  %v2820_v52 = vmul.f32 %v6238_v51, %v2810_v1 }
 0x910   : > { %v7647_v45 = vpop.eup %7646 }
 0x911   : > { %v2821_v37 = vmul.f32 %v6238_v51, %v2811_v0  ;;  %v2812_v30 = vmul.f32 %v7647_v45, %v9028_v57 }
 0x913   : > { %v2840_v18 = vpack.c.bf16 %v2821_v37, %v2820_v52  ;;  %v2822_v14 = vmul.f32 %v6238_v51, %v2812_v30 }
 0x914   : > { %v7649_v24 = vpop.eup %7648 }
 0x915   : > { %2955 = vmatmul.mubr.bf16.vlgmr.msra.gmra.mrb[28].mxu1 %v2840_v18  ;;  %3104 = vmatmul.mubr.bf16.vlgmr.msra.gmra.mrb[24].mxu0 %v2840_v18  ;;  %v2813_v40 = vmul.f32 %v7649_v24, %v9025_v53 }
 0x916   : > { %2964 = vmatprep.mubr.bf16.mxu1 %v10478_v13  ;;  %3113 = vmatprep.mubr.bf16.mxu0 %v10478_v13 }
 0x917   : > { %v2823_v41 = vmul.f32 %v6238_v51, %v2813_v40  ;;  %6745 = vmatpush3.bf16.msra.mxu1 %v7451_v2 }
 0x918   : > { %6746 = vmatprep.subr.bf16.mxu1 %v7452_v22 }
 0x919   : > { %v2841_v46 = vpack.c.bf16 %v2823_v41, %v2822_v14 }
 0x91b   : > { %6747 = vmatpush3.bf16.msra.mxu1 %v7453_v16 }
 0x91c   : > { %6748 = vmatprep.subr.bf16.mxu1 %v7454_v33 }
 0x91d   : > { %2965 = vmatmul.mubr.bf16.gmra.mrb[32].mxu1 %v2841_v46  ;;  %3114 = vmatmul.mubr.bf16.gmra.mrb[28].mxu0 %v2841_v46 }
 0x91f   : > { %6749 = vmatpush3.bf16.msra.mxu1 %v7455_v11 }
 0x920   : > { %6750 = vmatprep.subr.bf16.mxu1 %v7456_v15 }
 0x923   : > { %6751 = vmatpush3.bf16.msra.mxu1 %v7457_v63 }
 0x924   : > { %6752 = vmatprep.subr.bf16.mxu1 %v7458_v3 }
 0x927   : > { %6753 = vmatpush3.bf16.msra.mxu1 %v7459_v6 }
 0x928   : > { %6754 = vmatprep.subr.bf16.mxu1 %v7460_v25 }
 0x92b   : > { %6755 = vmatpush3.bf16.msra.mxu1 %v7461_v44 }
 0x92c   : > { %6756 = vmatprep.subr.bf16.mxu1 %v7462_v38 }
 0x92f   : > { %6757 = vmatpush3.bf16.msra.mxu1 %v7463_v39 }
 0x930   : > { %6758 = vmatprep.subr.bf16.mxu1 %v7464_v61 }
 0x933   : > { %6759 = vmatpush3.bf16.msra.mxu1 %v7465_v36 }
 0x9e8   : > { %v9160_v54 = vpop.f32.mrb[28].mxu1  ;;  %v9162_v42 = vpop.f32.mrb[24].mxu0 }
 0x9e9   : > { %v3124_v5 = vsub.f32 0.0, %v9160_v54  ;;  %v9165_v21 = vpop.f32.mrb[29].mxu1  ;;  %v9167_v28 = vpop.f32.mrb[25].mxu0 }
 0x9ea   : > { %v3125_v35 = vsub.f32 0.0, %v9165_v21  ;;  %v9170_v60 = vpop.f32.mrb[30].mxu1  ;;  %v9172_v31 = vpop.f32.mrb[26].mxu0 }
 0x9eb   : > { %v3132_v10 = vmul.f32 1.442695, %v3124_v5  ;;  %v3126_v47 = vsub.f32 0.0, %v9170_v60  ;;  %v9175_v19 = vpop.f32.mrb[31].mxu1  ;;  %v9177_v12 = vpop.f32.mrb[27].mxu0 }
 0x9ec   : > { %v3134_v50 = vmul.f32 1.442695, %v3125_v35  ;;  %v3127_v56 = vsub.f32 0.0, %v9175_v19 }
 0x9ed   : > { %7650 = vpow2.f32 %v3132_v10  ;;  %v3136_v55 = vmul.f32 1.442695, %v3126_v47 }
 0x9ee   : > { %7652 = vpow2.f32 %v3134_v50  ;;  %v3138_v34 = vmul.f32 1.442695, %v3127_v56 }
 0x9ef   : > { %7654 = vpow2.f32 %v3136_v55 }
 0x9f0   : > { %7656 = vpow2.f32 %v3138_v34  ;;  %v2966_v27 = vpop.f32.mrb[32].mxu1  ;;  %v9180_v29 = vpop.f32.mrb[28].mxu0 }
 0x9f1   : > { %v3128_v9 = vsub.f32 0.0, %v2966_v27  ;;  %v2968_v8 = vpop.f32.mrb[33].mxu1  ;;  %v9182_v26 = vpop.f32.mrb[29].mxu0 }
 0x9f2   : > { %v3129_v17 = vsub.f32 0.0, %v2968_v8  ;;  %v2970_v4 = vpop.f32.mrb[34].mxu1  ;;  %v9184_v20 = vpop.f32.mrb[30].mxu0 }
 0x9f3   : > { %v3140_v1 = vmul.f32 1.442695, %v3128_v9  ;;  %v3130_v7 = vsub.f32 0.0, %v2970_v4  ;;  %v2972_v51 = vpop.f32.mrb[35].mxu1  ;;  %v3121_v0 = vpop.f32.mrb[31].mxu0 }
 0x9f4   : > { %v3142_v52 = vmul.f32 1.442695, %v3129_v17  ;;  %v3131_v37 = vsub.f32 0.0, %v2972_v51 }
 0x9f5   : > { %7658 = vpow2.f32 %v3140_v1  ;;  %v3144_v45 = vmul.f32 1.442695, %v3130_v7 }
 0x9f6   : > { %7660 = vpow2.f32 %v3142_v52  ;;  %v3146_v18 = vmul.f32 1.442695, %v3131_v37 }
 0x9f7   : > { %v7651_v24 = vpop.eup %7650  ;;  %7662 = vpow2.f32 %v3144_v45 }
 0x9f8   : > { %v7653_v30 = vpop.eup %7652  ;;  %v3148_v40 = vadd.f32 1.0, %v7651_v24  ;;  %7664 = vpow2.f32 %v3146_v18 }
 0x9f9   : > { %v7655_v41 = vpop.eup %7654  ;;  %v3149_v14 = vadd.f32 1.0, %v7653_v30 }
 0x9fa   : > { %v7657_v46 = vpop.eup %7656  ;;  %7666 = vrcp.f32 %v3148_v40  ;;  %v3150_v59 = vadd.f32 1.0, %v7655_v41 }
 0x9fb   : > { %7668 = vrcp.f32 %v3149_v14  ;;  %v3151_v2 = vadd.f32 1.0, %v7657_v46 }
 0x9fc   : > { %7670 = vrcp.f32 %v3150_v59 }
 0x9fd   : > { %7672 = vrcp.f32 %v3151_v2 }
 0x9ff   : > { %v7659_v22 = vpop.eup %7658 }
 0xa00   : > { %v7661_v16 = vpop.eup %7660  ;;  %v3152_v33 = vadd.f32 1.0, %v7659_v22 }
 0xa01   : > { %v7663_v11 = vpop.eup %7662  ;;  %v3153_v15 = vadd.f32 1.0, %v7661_v16 }
 0xa02   : > { %v7665_v63 = vpop.eup %7664  ;;  %7674 = vrcp.f32 %v3152_v33  ;;  %v3154_v3 = vadd.f32 1.0, %v7663_v11  ;;  %v7468_v33 = vld [vmem:[%s10433_s7 + $0x48] sm:$0xff]   ;;  %v7471_v11 = vld [vmem:[%s10435_s9 + $0x50] sm:$0xff]  }
 0xa03   : > { %7676 = vrcp.f32 %v3153_v15  ;;  %v3155_v6 = vadd.f32 1.0, %v7665_v63  ;;  %v7472_v15 = vld [vmem:[%s10433_s7 + $0x58] sm:$0xff]  }
 0xa04   : > { %v7667_v25 = vpop.eup %7666  ;;  %7678 = vrcp.f32 %v3154_v3  ;;  %v7473_v63 = vld [vmem:[%s10435_s9 + $0x58] sm:$0xff]   ;;  %v7474_v3 = vld [vmem:[%s10433_s7 + $0x60] sm:$0xff]  }
 0xa05   : > { %v7669_v44 = vpop.eup %7668  ;;  %v3164_v38 = vmul.f32 %v7667_v25, %v9160_v54  ;;  %7680 = vrcp.f32 %v3155_v6  ;;  %v7475_v6 = vld [vmem:[%s10435_s9 + $0x60] sm:$0xff]   ;;  %v7476_v25 = vld [vmem:[%s10433_s7 + $0x68] sm:$0xff]  }
 0xa06   : > { %v7671_v39 = vpop.eup %7670  ;;  %v3165_v61 = vmul.f32 %v7669_v44, %v9165_v21  ;;  %v7477_v44 = vld [vmem:[%s10435_s9 + $0x68] sm:$0xff]  }
 0xa07   : > { %v7673_v36 = vpop.eup %7672  ;;  %v3172_v5 = vmul.f32 %v3164_v38, %v9162_v42  ;;  %v3166_v35 = vmul.f32 %v7671_v39, %v9170_v60  ;;  %v7478_v38 = vld [vmem:[%s10433_s7 + $0x70] sm:$0xff]  }
 0xa08   : > { %v3173_v10 = vmul.f32 %v3165_v61, %v9167_v28  ;;  %v3167_v47 = vmul.f32 %v7673_v36, %v9175_v19  ;;  %v7479_v39 = vld [vmem:[%s10435_s9 + $0x70] sm:$0xff]   ;;  %v7480_v61 = vld [vmem:[%s10433_s7 + $0x78] sm:$0xff]  }
 0xa09   : > { %v3174_v50 = vmul.f32 %v3166_v35, %v9172_v31  ;;  %v7481_v36 = vld [vmem:[%s10435_s9 + $0x78] sm:$0xff]  }
 0xa0a   : > { %v3175_v56 = vmul.f32 %v3167_v47, %v9177_v12 }
 0xa0b   : > { %v3212_v55 = vpack.c.bf16 %v3174_v50, %v3172_v5  ;;  %v7482_v5 = vld [vmem:[%s10437_s11 + $0x40] sm:$0xff]  }
 0xa0c   : > { %v7675_v34 = vpop.eup %7674  ;;  %v3213_v54 = vpack.c.bf16 %v3175_v56, %v3173_v10 }
 0xa0d   : > { %v7677_v9 = vpop.eup %7676  ;;  %v3168_v17 = vmul.f32 %v7675_v34, %v2966_v27  ;;  %v7466_v27 = vld [vmem:[%s10433_s7 + $0x40] sm:$0xff]  }
 0xa0e   : > { %v7679_v1 = vpop.eup %7678  ;;  %v3169_v21 = vmul.f32 %v7677_v9, %v2968_v8  ;;  %3344 = vmatprep.mubr.bf16.mxu1 %v3213_v54  ;;  %7045 = vmatprep.subr.bf16.mxu0 %v7466_v27 }
 0xa0f   : > { %v7681_v7 = vpop.eup %7680  ;;  %v3176_v42 = vmul.f32 %v3168_v17, %v9180_v29  ;;  %v3170_v60 = vmul.f32 %v7679_v1, %v2970_v4  ;;  %3345 = vmatmul.mubr.bf16.vlgmr.msra.gmra.mrb[36].mxu1 %v3212_v55  ;;  %v7467_v29 = vld [vmem:[%s10435_s9 + $0x40] sm:$0xff]   ;;  %7046 = vmatpush3.bf16.msra.mxu0 %v7466_v27 }
 0xa10   : > { %v3177_v28 = vmul.f32 %v3169_v21, %v9182_v26  ;;  %v3171_v19 = vmul.f32 %v7681_v7, %v2972_v51  ;;  %7065 = vmatprep.subr.bf16.mxu1 %v7467_v29  ;;  %7047 = vmatprep.subr.bf16.mxu0 %v7468_v33 }
 0xa11   : > { %v3178_v31 = vmul.f32 %v3170_v60, %v9184_v20  ;;  %7066 = vmatpush3.bf16.msra.mxu1 %v7467_v29 }
 0xa12   : > { %v3179_v52 = vmul.f32 %v3171_v19, %v3121_v0 }
 0xa13   : > { %v3214_v12 = vpack.c.bf16 %v3178_v31, %v3176_v42  ;;  %7048 = vmatpush3.bf16.msra.mxu0 %v7468_v33 }
 0xa14   : > { %v3215_v37 = vpack.c.bf16 %v3179_v52, %v3177_v28  ;;  %v6288_v28 = vld [vmem:[%s10516_s25 + $0x1] ss:$0 sm:$0xff] }
 0xa16   : > { %3352 = vmatprep.mubr.bf16.mxu1 %v3215_v37 }
 0xa17   : > { %3353 = vmatmul.mubr.bf16.gmra.mrb[40].mxu1 %v3214_v12 }
 0xae2   : > { %v6760_v8 = vpop.f32.mrb[36].mxu1 }
 0xae3   : > { %v6761_v26 = vpop.f32.mrb[37].mxu1 }
 0xae4   : > { %v6762_v4 = vadd.f32 %v6761_v26, %v6760_v8  ;;  %v6763_v20 = vpop.f32.mrb[38].mxu1 }
 0xae5   : > { %v6764_v51 = vpop.f32.mrb[39].mxu1 }
 0xae6   : > { %v9204_v0 = vadd.f32 %v6762_v4, %v9023_v58  ;;  %v6765_v45 = vadd.f32 %v6764_v51, %v6763_v20  ;;  %v7483_v51 = vld [vmem:[%s10437_s11 + $0x48] sm:$0xff]  }
 0xae8   : > { %10542 = vst [vmem:[#allocation7_spill] sm:$0xff] %v9204_v0  ;;  %v9207_v18 = vadd.f32 %v6765_v45, %v9031_v62  ;;  %v3367_v24 = vmul.f32 %v9204_v0, %v9204_v0  ;;  %v7484_v45 = vld [vmem:[%s10437_s11 + $0x50] sm:$0xff]  }
 0xaea   : > { %10543 = vst [vmem:[#allocation8_spill] sm:$0xff] %v9207_v18  ;;  %3371 = vadd.xlane.f32.xlu0 %v3367_v24  ;;  %v6766_v30 = vpop.f32.mrb[40].mxu1  ;;  %v3368_v40 = vmul.f32 %v9207_v18, %v9207_v18  ;;  %v7485_v24 = vld [vmem:[%s10437_s11 + $0x58] sm:$0xff]  }
 0xaeb   : > { %v6767_v41 = vpop.f32.mrb[41].mxu1 }
 0xaec   : > { %v6768_v14 = vadd.f32 %v6767_v41, %v6766_v30  ;;  %3373 = vadd.xlane.f32.xlu1 %v3368_v40  ;;  %v6769_v46 = vpop.f32.mrb[42].mxu1  ;;  %v7486_v30 = vld [vmem:[%s10437_s11 + $0x60] sm:$0xff]   ;;  %v7487_v40 = vld [vmem:[%s10437_s11 + $0x68] sm:$0xff]   ;;  %v7488_v41 = vld [vmem:[%s10437_s11 + $0x70] sm:$0xff]  }
 0xaed   : > { %v6770_v59 = vpop.f32.mrb[43].mxu1 }
 0xaee   : > { %v9214_v58 = vadd.f32 %v6768_v14, %v9028_v57  ;;  %v6771_v2 = vadd.f32 %v6770_v59, %v6769_v46  ;;  %v7469_v57 = vld [vmem:[%s10435_s9 + $0x48] sm:$0xff]   ;;  %v7489_v14 = vld [vmem:[%s10437_s11 + $0x78] sm:$0xff]   ;;  %v6306_v46 = vld [vmem:[%s10434_s8 + $0x1] ss:$0 sm:$0xff] }
 0xaef   : > { %7067 = vmatprep.subr.bf16.mxu1 %v7469_v57  ;;  %v6332_v59 = vld [vmem:[%s10436_s10 + $0x1] ss:$0 sm:$0xff] }
 0xaf0   : > { %10544 = vst [vmem:[#allocation4_spill] sm:$0xff] %v9214_v58  ;;  %v9217_v62 = vadd.f32 %v9025_v53, %v6771_v2  ;;  %v3369_v22 = vmul.f32 %v9214_v58, %v9214_v58  ;;  %v7470_v53 = vld [vmem:[%s10433_s7 + $0x50] sm:$0xff]   ;;  %7068 = vmatpush3.bf16.msra.mxu1 %v7469_v57 }
 0xaf1   : > { %7049 = vmatprep.subr.bf16.mxu0 %v7470_v53  ;;  %7069 = vmatprep.subr.bf16.mxu1 %v7471_v11 }
 0xaf2   : > { %10545 = vst [vmem:[#allocation5_spill] sm:$0xff] %v9217_v62  ;;  %3375 = vadd.xlane.f32.xlu0 %v3369_v22  ;;  %v3370_v16 = vmul.f32 %v9217_v62, %v9217_v62  ;;  %7050 = vmatpush3.bf16.msra.mxu0 %v7470_v53 }
 0xaf3   : > { %7051 = vmatprep.subr.bf16.mxu0 %v7472_v15 }
 0xaf4   : > { %3377 = vadd.xlane.f32.xlu1 %v3370_v16  ;;  %7070 = vmatpush3.bf16.msra.mxu1 %v7471_v11 }
 0xaf5   : > { %7071 = vmatprep.subr.bf16.mxu1 %v7473_v63 }
 0xaf6   : > { %7052 = vmatpush3.bf16.msra.mxu0 %v7472_v15 }
 0xaf7   : > { %7053 = vmatprep.subr.bf16.mxu0 %v7474_v3 }
 0xaf8   : > { %7072 = vmatpush3.bf16.msra.mxu1 %v7473_v63 }
 0xaf9   : > { %7073 = vmatprep.subr.bf16.mxu1 %v7475_v6 }
 0xafa   : > { %7054 = vmatpush3.bf16.msra.mxu0 %v7474_v3 }
 0xafb   : > { %7055 = vmatprep.subr.bf16.mxu0 %v7476_v25 }
 0xafc   : > { %7074 = vmatpush3.bf16.msra.mxu1 %v7475_v6 }
 0xafd   : > { %7075 = vmatprep.subr.bf16.mxu1 %v7477_v44 }
 0xafe   : > { %7056 = vmatpush3.bf16.msra.mxu0 %v7476_v25 }
 0xaff   : > { %7057 = vmatprep.subr.bf16.mxu0 %v7478_v38 }
 0xb00   : > { %7076 = vmatpush3.bf16.msra.mxu1 %v7477_v44 }
 0xb01   : > { %7077 = vmatprep.subr.bf16.mxu1 %v7479_v39 }
 0xb02   : > { %7058 = vmatpush3.bf16.msra.mxu0 %v7478_v38  ;;  %v6358_v38 = vld [vmem:[%s10438_s12 + $0x1] ss:$0 sm:$0xff] }
 0xb03   : > { %7059 = vmatprep.subr.bf16.mxu0 %v7480_v61 }
 0xb04   : > { %7078 = vmatpush3.bf16.msra.mxu1 %v7479_v39 }
 0xb05   : > { %7079 = vmatprep.subr.bf16.mxu1 %v7481_v36 }
 0xb06   : > { %7060 = vmatpush3.bf16.msra.mxu0 %v7480_v61 }
 0xb07   : > { %7085 = vmatprep.subr.bf16.mxu0 %v7482_v5 }
 0xb08   : > { %7080 = vmatpush3.bf16.msra.mxu1 %v7481_v36 }
 0xb77   : > { %v3372_v35 = vpop.xlane.xlu0 %3371 }
 0xb78   : > { %v3379_v10 = vmul.f32 0.0078125, %v3372_v35 }
 0xb79   : > { %v3374_v47 = vpop.xlane.xlu1 %3373 }
 0xb7a   : > { %v3383_v50 = vadd.f32 1e-06, %v3379_v10  ;;  %v3380_v56 = vmul.f32 0.0078125, %v3374_v47 }
 0xb7c   : > { %7682 = vrsqrt.f32 %v3383_v50  ;;  %v3384_v55 = vadd.f32 1e-06, %v3380_v56 }
 0xb7e   : > { %7684 = vrsqrt.f32 %v3384_v55 }
 0xb7f   : > { %v3376_v34 = vpop.xlane.xlu0 %3375 }
 0xb80   : > { %v3381_v54 = vmul.f32 0.0078125, %v3376_v34 }
 0xb81   : > { %v3378_v9 = vpop.xlane.xlu1 %3377 }
 0xb82   : > { %v3385_v17 = vadd.f32 1e-06, %v3381_v54  ;;  %v3382_v1 = vmul.f32 0.0078125, %v3378_v9 }
 0xb84   : > { %7686 = vrsqrt.f32 %v3385_v17  ;;  %v3386_v21 = vadd.f32 1e-06, %v3382_v1 }
 0xb86   : > { %v7683_v7 = vpop.eup %7682  ;;  %7688 = vrsqrt.f32 %v3386_v21 }
 0xb87   : > { %v3391_v42 = vmul.f32 %v7683_v7, %v9204_v0 }
 0xb88   : > { %v7685_v60 = vpop.eup %7684 }
 0xb89   : > { %v3392_v19 = vmul.f32 %v7685_v60, %v9207_v18  ;;  %v3401_v31 = vmul.f32 %v6288_v28, %v3391_v42 }
 0xb8b   : > { %v3402_v52 = vmul.f32 %v6288_v28, %v3392_v19 }
 0xb8d   : > { %v3422_v12 = vpack.c.bf16 %v3402_v52, %v3401_v31 }
 0xb8e   : > { %v7687_v37 = vpop.eup %7686 }
 0xb8f   : > { %v3393_v27 = vmul.f32 %v7687_v37, %v9214_v58  ;;  %7061 = vmatprep.mubr.bf16.mxu0 %v3422_v12  ;;  %7081 = vmatprep.mubr.bf16.mxu1 %v3422_v12 }
 0xb90   : > { %v7689_v29 = vpop.eup %7688 }
 0xb91   : > { %v3394_v8 = vmul.f32 %v7689_v29, %v9217_v62  ;;  %v3403_v26 = vmul.f32 %v6288_v28, %v3393_v27 }
 0xb93   : > { %v3404_v4 = vmul.f32 %v6288_v28, %v3394_v8 }
 0xb95   : > { %v3423_v20 = vpack.c.bf16 %v3404_v4, %v3403_v26 }
 0xb97   : > { %7062 = vmatmul.mubr.bf16.vlgmr.msra.gmra.mrb[32].mxu0 %v3423_v20  ;;  %7082 = vmatmul.mubr.bf16.vlgmr.msra.gmra.mrb[44].mxu1 %v3423_v20 }
 0xb98   : > { %7086 = vmatpush3.bf16.msra.mxu0 %v7482_v5  ;;  %7101 = vmatprep.mubr.bf16.mxu0 %v3422_v12 }
 0xb99   : > { %7087 = vmatprep.subr.bf16.mxu0 %v7483_v51 }
 0xb9c   : > { %7088 = vmatpush3.bf16.msra.mxu0 %v7483_v51 }
 0xb9d   : > { %7089 = vmatprep.subr.bf16.mxu0 %v7484_v45 }
 0xba0   : > { %7090 = vmatpush3.bf16.msra.mxu0 %v7484_v45 }
 0xba1   : > { %7091 = vmatprep.subr.bf16.mxu0 %v7485_v24 }
 0xba4   : > { %7092 = vmatpush3.bf16.msra.mxu0 %v7485_v24 }
 0xba5   : > { %7093 = vmatprep.subr.bf16.mxu0 %v7486_v30 }
 0xba8   : > { %7094 = vmatpush3.bf16.msra.mxu0 %v7486_v30 }
 0xba9   : > { %7095 = vmatprep.subr.bf16.mxu0 %v7487_v40 }
 0xbac   : > { %7096 = vmatpush3.bf16.msra.mxu0 %v7487_v40 }
 0xbad   : > { %7097 = vmatprep.subr.bf16.mxu0 %v7488_v41 }
 0xbb0   : > { %7098 = vmatpush3.bf16.msra.mxu0 %v7488_v41 }
 0xbb1   : > { %7099 = vmatprep.subr.bf16.mxu0 %v7489_v14 }
 0xbb4   : > { %7100 = vmatpush3.bf16.msra.mxu0 %v7489_v14 }
 0xbb7   : > { %7102 = vmatmul.mubr.bf16.vlgmr.msra.gmra.mrb[36].mxu0 %v3423_v20 }
 0xc6a   : > { %v7063_v2 = vpop.f32.mrb[32].mxu0  ;;  %v7083_v22 = vpop.f32.mrb[44].mxu1 }
 0xc6b   : > { %v9302_v16 = vadd.f32 %v7063_v2, %v6306_v46  ;;  %v9304_v33 = vadd.f32 %v7083_v22, %v6332_v59  ;;  %v3514_v57 = vpop.f32.mrb[33].mxu0  ;;  %v3636_v53 = vpop.f32.mrb[45].mxu1 }
 0xc6c   : > { %v7064_v11 = vpop.f32.mrb[34].mxu0  ;;  %v7084_v15 = vpop.f32.mrb[46].mxu1  ;;  %v9338_v44 = vadd.f32 %v6332_v59, %v3636_v53  ;;  %v9347_v61 = vadd.f32 %v6306_v46, %v3514_v57 }
 0xc6d   : > { %4029 = vrot.lane.b32.xlu1 %v9304_v33, %s10534_s23  ;;  %v3639_v63 = vpop.f32.mrb[47].mxu1  ;;  %3781 = vrot.lane.b32.xlu0 %v9302_v16, %s10534_s23  ;;  %v3517_v3 = vpop.f32.mrb[35].mxu0  ;;  %v9310_v6 = vadd.f32 %v7084_v15, %v6332_v59  ;;  %v9316_v25 = vadd.f32 %v7064_v11, %v6306_v46  ;;  %v4063_v28 = vsub.f32 0.0, %v9304_v33  ;;  %v3815_v19 = vsub.f32 0.0, %v9302_v16 }
 0xc6e   : > { %v9353_v55 = vadd.f32 %v6332_v59, %v3639_v63  ;;  %v9375_v60 = vadd.f32 %v6306_v46, %v3517_v3  ;;  %v4061_v52 = vsub.f32 0.0, %v9338_v44  ;;  %v3813_v37 = vsub.f32 0.0, %v9347_v61 }
 0xc6f   : > { %v4064_v31 = vsub.f32 0.0, %v9310_v6  ;;  %v3816_v12 = vsub.f32 0.0, %v9316_v25 }
 0xc70   : > { %v4062_v27 = vsub.f32 0.0, %v9353_v55  ;;  %v3814_v29 = vsub.f32 0.0, %v9375_v60 }
 0xc71   : > { %4031 = vrot.lane.b32.xlu1 %v9310_v6, %s10534_s23  ;;  %4041 = vrot.lane.b32.xlu0 %v9304_v33, %s10536_s1 }
 0xc75   : > { %4053 = vrot.lane.b32.xlu0 %v9304_v33, %s10538_s5  ;;  %3783 = vrot.lane.b32.xlu1 %v9316_v25, %s10534_s23 }
 0xc79   : > { %3793 = vrot.lane.b32.xlu0 %v9302_v16, %s10536_s1  ;;  %4043 = vrot.lane.b32.xlu1 %v9310_v6, %s10536_s1 }
 0xc7d   : > { %3805 = vrot.lane.b32.xlu0 %v9302_v16, %s10538_s5  ;;  %4055 = vrot.lane.b32.xlu1 %v9310_v6, %s10538_s5 }
 0xc81   : > { %4145 = vrot.lane.b32.xlu0 %v9304_v33, %s10526_s4  ;;  %3795 = vrot.lane.b32.xlu1 %v9316_v25, %s10536_s1 }
 0xc85   : > { %3897 = vrot.lane.b32.xlu0 %v9302_v16, %s10526_s4  ;;  %3807 = vrot.lane.b32.xlu1 %v9316_v25, %s10538_s5 }
 0xc89   : > { %4025 = vrot.lane.b32.xlu0 %v9338_v44, %s10534_s23  ;;  %4147 = vrot.lane.b32.xlu1 %v9310_v6, %s10526_s4 }
 0xc8a   : > { %v7103_v39 = vpop.f32.mrb[36].mxu0 }
 0xc8b   : > { %v3767_v36 = vadd.f32 %v7103_v39, %v6358_v38  ;;  %v3758_v5 = vpop.f32.mrb[37].mxu0 }
 0xc8c   : > { %v3759_v35 = vadd.f32 %v6358_v38, %v3758_v5  ;;  %v7104_v10 = vpop.f32.mrb[38].mxu0 }
 0xc8d   : > { %v6649_v47 = vpack.c.bf16 %v3767_v36, %v3767_v36  ;;  %v3770_v50 = vadd.f32 %v7104_v10, %v6358_v38  ;;  %v3761_v56 = vpop.f32.mrb[39].mxu0  ;;  %3899 = vrot.lane.b32.xlu1 %v9316_v25, %s10526_s4  ;;  %3777 = vrot.lane.b32.xlu0 %v9347_v61, %s10534_s23 }
 0xc8e   : > { %v6647_v34 = vpack.c.bf16 %v3759_v35, %v3759_v35  ;;  %v3762_v54 = vadd.f32 %v6358_v38, %v3761_v56 }
 0xc8f   : > { %6417 = vst.msk [vmem:[%s8152_s2 + $0x48] sm:$0xf] %vm1858_vm1, %v6649_v47  ;;  %v6650_v9 = vpack.c.bf16 %v3770_v50, %v3770_v50  ;;  %v9357_v17 = vpack.c.bf16 %v3770_v50, %v3767_v36  ;;  %v9359_v1 = vpack.i.bf16 %v3770_v50, %v3767_v36 }
 0xc90   : > { %6415 = vst.msk [vmem:[%s8152_s2 + $0x40] sm:$0xf] %vm1858_vm1, %v6647_v34  ;;  %v6648_v21 = vpack.c.bf16 %v3762_v54, %v3762_v54  ;;  %v9363_v7 = vpack.c.bf16 %v3762_v54, %v3759_v35  ;;  %v9365_v42 = vpack.i.bf16 %v3762_v54, %v3759_v35 }
 0xc91   : > { %10546 = vst [vmem:[#allocation13_spill] sm:$0xff] %v9359_v1  ;;  %6418 = vst.msk [vmem:[%s8152_s2 + $0x4c] sm:$0xf] %vm1858_vm1, %v6650_v9  ;;  %4027 = vrot.lane.b32.xlu1 %v9353_v55, %s10534_s23  ;;  %4037 = vrot.lane.b32.xlu0 %v9338_v44, %s10536_s1 }
 0xc92   : > { %10547 = vst [vmem:[#allocation14_spill] sm:$0xff] %v9365_v42  ;;  %6416 = vst.msk [vmem:[%s8152_s2 + $0x44] sm:$0xf] %vm1858_vm1, %v6648_v21 }
 0xc95   : > { %3779 = vrot.lane.b32.xlu1 %v9375_v60, %s10534_s23  ;;  %4049 = vrot.lane.b32.xlu0 %v9338_v44, %s10538_s5 }
 0xc99   : > { %4039 = vrot.lane.b32.xlu1 %v9353_v55, %s10536_s1  ;;  %3789 = vrot.lane.b32.xlu0 %v9347_v61, %s10536_s1 }
 0xc9d   : > { %4051 = vrot.lane.b32.xlu1 %v9353_v55, %s10538_s5  ;;  %3801 = vrot.lane.b32.xlu0 %v9347_v61, %s10538_s5 }
 0xca1   : > { %3791 = vrot.lane.b32.xlu1 %v9375_v60, %s10536_s1  ;;  %4141 = vrot.lane.b32.xlu0 %v9338_v44, %s10526_s4 }
 0xca5   : > { %3803 = vrot.lane.b32.xlu1 %v9375_v60, %s10538_s5  ;;  %3893 = vrot.lane.b32.xlu0 %v9347_v61, %s10526_s4 }
 0xca9   : > { %4143 = vrot.lane.b32.xlu1 %v9353_v55, %s10526_s4  ;;  %4097 = vrot.lane.b32.xlu0 %v4063_v28, %s10525_s21 }
 0xcad   : > { %3895 = vrot.lane.b32.xlu1 %v9375_v60, %s10526_s4  ;;  %3849 = vrot.lane.b32.xlu0 %v3815_v19, %s10525_s21 }
 0xcb1   : > { %4099 = vrot.lane.b32.xlu1 %v4064_v31, %s10525_s21  ;;  %4093 = vrot.lane.b32.xlu0 %v4061_v52, %s10525_s21 }
 0xcb5   : > { %3851 = vrot.lane.b32.xlu1 %v3816_v12, %s10525_s21  ;;  %3845 = vrot.lane.b32.xlu0 %v3813_v37, %s10525_s21  ;;  %v9523_v37 = vld [vmem:[%s10522_s29 + $0x10] sm:$0xff] }
 0xcb9   : > { %4095 = vrot.lane.b32.xlu1 %v4062_v27, %s10525_s21  ;;  %v4207_v27 = vmul.f32 %v9523_v37, %v9304_v33 }
 0xcbd   : > { %3847 = vrot.lane.b32.xlu1 %v3814_v29, %s10525_s21  ;;  %v9530_v29 = vld [vmem:[%s10548_s3 + $0x10] sm:$0xff]  ;;  %s10568_s3 = sld [smem:[#allocation27_spill]] }
 0xcdf   : > { %v9417_v8 = vpop.permute.xlu1 %4029  ;;  %v9419_v26 = vpop.permute.xlu0 %3781 }
 0xce0   : > { %4153 = vrot.lane.b32.xlu0 %v9417_v8, %s10526_s4  ;;  %v4067_v5 = vsub.f32 0.0, %v9417_v8  ;;  %v3819_v47 = vsub.f32 0.0, %v9419_v26 }
 0xce3   : > { %v9423_v4 = vpop.permute.xlu1 %4031  ;;  %v9425_v20 = vpop.permute.xlu0 %4041 }
 0xce4   : > { %4155 = vrot.lane.b32.xlu1 %v9423_v4, %s10526_s4  ;;  %3905 = vrot.lane.b32.xlu0 %v9419_v26, %s10526_s4  ;;  %v4068_v34 = vsub.f32 0.0, %v9423_v4  ;;  %v4071_v54 = vsub.f32 0.0, %v9425_v20 }
 0xce7   : > { %v9431_v51 = vpop.permute.xlu0 %4053  ;;  %v9433_v45 = vpop.permute.xlu1 %3783 }
 0xce8   : > { %3907 = vrot.lane.b32.xlu1 %v9433_v45, %s10526_s4  ;;  %4161 = vrot.lane.b32.xlu0 %v9425_v20, %s10526_s4  ;;  %v4075_v28 = vsub.f32 0.0, %v9431_v51  ;;  %v3820_v19 = vsub.f32 0.0, %v9433_v45 }
 0xceb   : > { %v9439_v24 = vpop.permute.xlu0 %3793  ;;  %v9441_v30 = vpop.permute.xlu1 %4043 }
 0xcec   : > { %4163 = vrot.lane.b32.xlu1 %v9441_v30, %s10526_s4  ;;  %4169 = vrot.lane.b32.xlu0 %v9431_v51, %s10526_s4 }
 0xcef   : > { %v9447_v40 = vpop.permute.xlu0 %3805  ;;  %v9449_v41 = vpop.permute.xlu1 %4055 }
 0xcf0   : > { %4171 = vrot.lane.b32.xlu1 %v9449_v41, %s10526_s4  ;;  %3913 = vrot.lane.b32.xlu0 %v9439_v24, %s10526_s4 }
 0xcf3   : > { %v4146_v14 = vpop.permute.xlu0 %4145  ;;  %v9455_v46 = vpop.permute.xlu1 %3795 }
 0xcf4   : > { %3915 = vrot.lane.b32.xlu1 %v9455_v46, %s10526_s4 }
 0xcf7   : > { %v3898_v59 = vpop.permute.xlu0 %3897  ;;  %v9459_v2 = vpop.permute.xlu1 %3807 }
 0xcfb   : > { %v9461_v22 = vpop.permute.xlu0 %4025  ;;  %v4148_v57 = vpop.permute.xlu1 %4147 }
 0xcfc   : > { %4149 = vrot.lane.b32.xlu0 %v9461_v22, %s10526_s4  ;;  %v4065_v13 = vsub.f32 0.0, %v9461_v22 }
 0xcff   : > { %v9465_v53 = vpop.permute.xlu1 %3899  ;;  %v9467_v11 = vpop.permute.xlu0 %3777 }
 0xd00   : > { %3901 = vrot.lane.b32.xlu0 %v9467_v11, %s10526_s4 }
 0xd03   : > { %v9471_v15 = vpop.permute.xlu1 %4027  ;;  %v9473_v63 = vpop.permute.xlu0 %4037 }
 0xd04   : > { %4151 = vrot.lane.b32.xlu1 %v9471_v15, %s10526_s4  ;;  %4157 = vrot.lane.b32.xlu0 %v9473_v63, %s10526_s4 }
 0xd07   : > { %v9479_v3 = vpop.permute.xlu1 %3779  ;;  %v9481_v38 = vpop.permute.xlu0 %4049 }
 0xd08   : > { %3903 = vrot.lane.b32.xlu1 %v9479_v3, %s10526_s4  ;;  %4165 = vrot.lane.b32.xlu0 %v9481_v38, %s10526_s4 }
 0xd0b   : > { %v9487_v39 = vpop.permute.xlu1 %4039  ;;  %v9489_v36 = vpop.permute.xlu0 %3789 }
 0xd0c   : > { %4159 = vrot.lane.b32.xlu1 %v9487_v39, %s10526_s4  ;;  %3909 = vrot.lane.b32.xlu0 %v9489_v36, %s10526_s4 }
 0xd0f   : > { %v9496_v35 = vpop.permute.xlu1 %4051  ;;  %v9498_v10 = vpop.permute.xlu0 %3801 }
 0xd10   : > { %4167 = vrot.lane.b32.xlu1 %v9496_v35, %s10526_s4  ;;  %4105 = vrot.lane.b32.xlu0 %v4067_v5, %s10525_s21  ;;  %v3823_v5 = vsub.f32 0.0, %v9439_v24 }
 0xd13   : > { %v9504_v50 = vpop.permute.xlu1 %3791  ;;  %v4142_v56 = vpop.permute.xlu0 %4141 }
 0xd14   : > { %3911 = vrot.lane.b32.xlu1 %v9504_v50, %s10526_s4  ;;  %3857 = vrot.lane.b32.xlu0 %v3819_v47, %s10525_s21  ;;  %v4072_v47 = vsub.f32 0.0, %v9441_v30 }
 0xd17   : > { %v9511_v9 = vpop.permute.xlu1 %3803  ;;  %v3894_v21 = vpop.permute.xlu0 %3893 }
 0xd18   : > { %4107 = vrot.lane.b32.xlu1 %v4068_v34, %s10525_s21  ;;  %4113 = vrot.lane.b32.xlu0 %v4071_v54, %s10525_s21 }
 0xd1b   : > { %v4144_v31 = vpop.permute.xlu1 %4143  ;;  %v4098_v52 = vpop.permute.xlu0 %4097 }
 0xd1c   : > { %v4191_v12 = vsel %vm1433_vm2, %v4098_v52, %v4146_v14  ;;  %3859 = vrot.lane.b32.xlu1 %v3820_v19, %s10525_s21  ;;  %4121 = vrot.lane.b32.xlu0 %v4075_v28, %s10525_s21  ;;  %v4076_v52 = vsub.f32 0.0, %v9449_v41 }
 0xd1d   : > { %v4223_v14 = vmul.f32 %v9530_v29, %v4191_v12 }
 0xd1f   : > { %v4239_v34 = vadd.f32 %v4223_v14, %v4207_v27  ;;  %v9535_v54 = vpop.permute.xlu1 %3895  ;;  %v3850_v28 = vpop.permute.xlu0 %3849 }
 0xd20   : > { %4115 = vrot.lane.b32.xlu1 %v4072_v47, %s10525_s21  ;;  %3865 = vrot.lane.b32.xlu0 %v3823_v5, %s10525_s21  ;;  %v3943_v19 = vsel %vm1433_vm2, %v3850_v28, %v3898_v59  ;;  %v9552_v59 = vld [vmem:[%s10522_s29 + $0x18] sm:$0xff]  ;;  %v3824_v28 = vsub.f32 0.0, %v9455_v46 }
 0xd21   : > { %v6633_v33 = vpack.c.bf16 %v4239_v34, %v4239_v34  ;;  %v3975_v27 = vmul.f32 %v9530_v29, %v3943_v19  ;;  %v4208_v5 = vmul.f32 %v9552_v59, %v9310_v6  ;;  %v9559_v47 = vld [vmem:[%s10549_s27 + $0x18] sm:$0xff] }
 0xd23   : > { %6385 = vst.msk [vmem:[%s8350_s6 + $0x48] sm:$0xf] %vm1858_vm1, %v6633_v33  ;;  %v4100_v12 = vpop.permute.xlu1 %4099  ;;  %v4094_v43 = vpop.permute.xlu0 %4093  ;;  %v3959_v33 = vmul.f32 %v9523_v37, %v9302_v16 }
 0xd24   : > { %v4192_v14 = vsel %vm1433_vm2, %v4100_v12, %v4148_v57  ;;  %v4189_v62 = vsel %vm1433_vm2, %v4094_v43, %v4142_v56  ;;  %4123 = vrot.lane.b32.xlu1 %v4076_v52, %s10525_s21  ;;  %4101 = vrot.lane.b32.xlu0 %v4065_v13, %s10525_s21  ;;  %v9565_v43 = vld [vmem:[%s10522_s29] sm:$0xff] }
 0xd25   : > { %v4224_v57 = vmul.f32 %v9559_v47, %v4192_v14  ;;  %v4205_v13 = vmul.f32 %v9565_v43, %v9338_v44  ;;  %v9572_v56 = vld [vmem:[%s10549_s27] sm:$0xff]  ;;  %v3991_v18 = vadd.f32 %v3975_v27, %v3959_v33  ;;  %v3960_v44 = vmul.f32 %v9552_v59, %v9316_v25 }
 0xd26   : > { %v4221_v6 = vmul.f32 %v9572_v56, %v4189_v62  ;;  %v4066_v27 = vsub.f32 0.0, %v9471_v15 }
 0xd27   : > { %v4240_v19 = vadd.f32 %v4224_v57, %v4208_v5  ;;  %v3852_v12 = vpop.permute.xlu1 %3851  ;;  %v3846_v14 = vpop.permute.xlu0 %3845 }
 0xd28   : > { %v4237_v52 = vadd.f32 %v4221_v6, %v4205_v13  ;;  %v3944_v58 = vsel %vm1433_vm2, %v3852_v12, %v9465_v53  ;;  %3867 = vrot.lane.b32.xlu1 %v3824_v28, %s10525_s21  ;;  %3917 = vrot.lane.b32.xlu0 %v9498_v10, %s10526_s4  ;;  %v3817_v13 = vsub.f32 0.0, %v9467_v11  ;;  %v3941_v6 = vsel %vm1433_vm2, %v3846_v14, %v3894_v21  ;;  %v9607_v12 = vld [vmem:[%s10549_s27 + $0x8] sm:$0xff] }
 0xd29   : > { %v4254_v62 = vpack.c.bf16 %v4240_v19, %v4239_v34  ;;  %v6634_v16 = vpack.c.bf16 %v4240_v19, %v4240_v19  ;;  %v3976_v57 = vmul.f32 %v9559_v47, %v3944_v58  ;;  %v9596_v34 = vld [vmem:[%s10522_s29 + $0x8] sm:$0xff]  ;;  %v4007_v21 = vmul.f32 0.17677669, %v3991_v18 }
 0xd2a   : > { %v6631_v5 = vpack.c.bf16 %v4237_v52, %v4237_v52  ;;  %v4206_v58 = vmul.f32 %v9596_v34, %v9353_v55  ;;  %v3973_v19 = vmul.f32 %v9572_v56, %v3941_v6  ;;  %v4069_v55 = vsub.f32 0.0, %v9473_v63 }
 0xd2b   : > { %6386 = vst.msk [vmem:[%s8350_s6 + $0x4c] sm:$0xf] %vm1858_vm1, %v6634_v16  ;;  %v3992_v25 = vadd.f32 %v3976_v57, %v3960_v44  ;;  %v4096_v53 = vpop.permute.xlu1 %4095  ;;  %v3958_v18 = vmul.f32 %v9596_v34, %v9375_v60 }
 0xd2c   : > { %6383 = vst.msk [vmem:[%s8350_s6 + $0x40] sm:$0xf] %vm1858_vm1, %v6631_v5  ;;  %v4190_v28 = vsel %vm1433_vm2, %v4096_v53, %v4144_v31  ;;  %4103 = vrot.lane.b32.xlu1 %v4066_v27, %s10525_s21  ;;  %3853 = vrot.lane.b32.xlu0 %v3817_v13, %s10525_s21  ;;  %v3957_v31 = vmul.f32 %v9565_v43, %v9347_v61  ;;  %v3818_v61 = vsub.f32 0.0, %v9479_v3  ;;  %v4073_v53 = vsub.f32 0.0, %v9481_v38 }
 0xd2d   : > { %v4008_v33 = vmul.f32 0.17677669, %v3992_v25  ;;  %v4222_v14 = vmul.f32 %v9607_v12, %v4190_v28 }
 0xd2e   : > { %v3989_v13 = vadd.f32 %v3973_v19, %v3957_v31  ;;  %v4074_v19 = vsub.f32 0.0, %v9496_v35  ;;  %v3828_v31 = vsub.f32 0.0, %v9459_v2 }
 0xd2f   : > { %v4456_v44 = vpack.c.bf16 %v4008_v33, %v4007_v21  ;;  %v4238_v16 = vadd.f32 %v4222_v14, %v4206_v58  ;;  %v3848_v5 = vpop.permute.xlu1 %3847  ;;  %v3821_v21 = vsub.f32 0.0, %v9489_v36  ;;  %v3825_v14 = vsub.f32 0.0, %v9498_v10 }
 0xd30   : > { %v3942_v57 = vsel %vm1433_vm2, %v3848_v5, %v9535_v54  ;;  %3919 = vrot.lane.b32.xlu1 %v9511_v9, %s10526_s4  ;;  %4109 = vrot.lane.b32.xlu0 %v4069_v55, %s10525_s21  ;;  %v4005_v58 = vmul.f32 0.17677669, %v3989_v13  ;;  %v4473_v55 = vsel %vm1955_vm3, %v4254_v62, 0  ;;  %v3822_v5 = vsub.f32 0.0, %v9504_v50 }
 0xd31   : > { %v4253_v27 = vpack.c.bf16 %v4238_v16, %v4237_v52  ;;  %v6632_v6 = vpack.c.bf16 %v4238_v16, %v4238_v16  ;;  %v3974_v25 = vmul.f32 %v9607_v12, %v3942_v57  ;;  %v4070_v52 = vsub.f32 0.0, %v9487_v39 }
 0xd32   : > { %v3827_v16 = vsub.f32 0.0, %v9447_v40 }
 0xd33   : > { %6384 = vst.msk [vmem:[%s8350_s6 + $0x44] sm:$0xf] %vm1858_vm1, %v6632_v6  ;;  %v3990_v60 = vadd.f32 %v3974_v25, %v3958_v18  ;;  %7217 = vmatprep.subr.msk.bf16.mxu1 %vm1955_vm3, %v4253_v27  ;;  %v4470_v54 = vsel %vm1955_vm3, %v4253_v27, 0 }
 0xd34   : > { %3855 = vrot.lane.b32.xlu1 %v3818_v61, %s10525_s21  ;;  %7106 = vmatpush3.bf16.xpose.msra.mxu1 %v4470_v54 }
 0xd35   : > { %v4006_v28 = vmul.f32 0.17677669, %v3990_v60  ;;  %4117 = vrot.lane.b32.xlu0 %v4073_v53, %s10525_s21  ;;  %7218 = vmatprep.subr.msk.bf16.mxu1 %vm1955_vm3, %v4254_v62  ;;  %v3826_v62 = vsub.f32 0.0, %v9511_v9 }
 0xd37   : > { %v4455_v33 = vpack.c.bf16 %v4006_v28, %v4005_v58 }
 0xd38   : > { %4111 = vrot.lane.b32.xlu1 %v4070_v52, %s10525_s21 }
 0xd39   : > { %3861 = vrot.lane.b32.xlu0 %v3821_v21, %s10525_s21  ;;  %7109 = vmatprep.mubr.msk.bf16.mxu1 %vm1955_vm3, %v4455_v33 }
 0xd3c   : > { %4119 = vrot.lane.b32.xlu1 %v4074_v19, %s10525_s21  ;;  %7108 = vmatpush3.bf16.xpose.msra.mxu1 %v4473_v55 }
 0xd3d   : > { %3869 = vrot.lane.b32.xlu0 %v3825_v14, %s10525_s21 }
 0xd40   : > { %3875 = vrot.lane.b32.xlu1 %v3828_v31, %s10525_s21 }
 0xd41   : > { %3873 = vrot.lane.b32.xlu0 %v3827_v16, %s10525_s21 }
 0xd43   : > { %7110 = vmatmul.mubr.msk.bf16.vlgmr.msra.gmra.mrb[48].mxu1 %vm1955_vm3, %v4456_v44 }
 0xd44   : > { %3863 = vrot.lane.b32.xlu1 %v3822_v5, %s10525_s21  ;;  %v4211_v5 = vmul.f32 %v9523_v37, %v9417_v8 }
 0xd45   : > { %3921 = vrot.lane.b32.xlu0 %v9447_v40, %s10526_s4 }
 0xd48   : > { %3871 = vrot.lane.b32.xlu1 %v3826_v62, %s10525_s21  ;;  %s10557_s21 = sld [smem:[#allocation22_spill]] }
 0xd4c   : > { %3923 = vrot.lane.b32.xlu1 %v9459_v2, %s10526_s4 }
 0xd52   : > { %v4154_v18 = vpop.permute.xlu0 %4153 }
 0xd56   : > { %v3906_v57 = vpop.permute.xlu0 %3905  ;;  %v4156_v13 = vpop.permute.xlu1 %4155 }
 0xd5a   : > { %v4162_v27 = vpop.permute.xlu0 %4161  ;;  %v3908_v6 = vpop.permute.xlu1 %3907 }
 0xd5e   : > { %v4170_v25 = vpop.permute.xlu0 %4169  ;;  %v4164_v61 = vpop.permute.xlu1 %4163 }
 0xd62   : > { %v3914_v44 = vpop.permute.xlu0 %3913  ;;  %v9653_v53 = vpop.permute.xlu1 %4171 }
 0xd66   : > { %v9657_v54 = vpop.permute.xlu1 %3915 }
 0xd6e   : > { %v9655_v60 = vpop.permute.xlu0 %4149 }
 0xd72   : > { %v9659_v58 = vpop.permute.xlu0 %3901 }
 0xd76   : > { %v9661_v28 = vpop.permute.xlu1 %4151  ;;  %v9663_v52 = vpop.permute.xlu0 %4157 }
 0xd7a   : > { %v9665_v21 = vpop.permute.xlu1 %3903  ;;  %v9667_v33 = vpop.permute.xlu0 %4165 }
 0xd7e   : > { %v9669_v19 = vpop.permute.xlu1 %4159  ;;  %v9671_v14 = vpop.permute.xlu0 %3909 }
 0xd82   : > { %v9673_v55 = vpop.permute.xlu1 %4167  ;;  %v4106_v31 = vpop.permute.xlu0 %4105 }
 0xd83   : > { %v4195_v16 = vsel %vm1433_vm2, %v4106_v31, %v4154_v18  ;;  %v4212_v18 = vmul.f32 %v9552_v59, %v9423_v4 }
 0xd84   : > { %v4227_v62 = vmul.f32 %v9530_v29, %v4195_v16  ;;  %v4215_v16 = vmul.f32 %v9523_v37, %v9425_v20  ;;  %v3964_v20 = vmul.f32 %v9552_v59, %v9433_v45 }
 0xd86   : > { %v9679_v0 = vadd.f32 %v4227_v62, %v4211_v5  ;;  %v9681_v42 = vpop.permute.xlu1 %3911  ;;  %v3858_v1 = vpop.permute.xlu0 %3857 }
 0xd87   : > { %v3947_v23 = vsel %vm1433_vm2, %v3858_v1, %v3906_v57 }
 0xd88   : > { %v6637_v32 = vpack.c.bf16 %v9679_v0, %v9679_v0  ;;  %v3979_v5 = vmul.f32 %v9530_v29, %v3947_v23 }
 0xd8a   : > { %6389 = vst.msk [vmem:[%s8350_s6 + $0x58] sm:$0xf] %vm1858_vm1, %v6637_v32  ;;  %v4108_v48 = vpop.permute.xlu1 %4107  ;;  %v4114_v49 = vpop.permute.xlu0 %4113  ;;  %v3963_v32 = vmul.f32 %v9523_v37, %v9419_v26 }
 0xd8b   : > { %v4196_v8 = vsel %vm1433_vm2, %v4108_v48, %v4156_v13  ;;  %v4199_v31 = vsel %vm1433_vm2, %v4114_v49, %v4162_v27 }
 0xd8c   : > { %v4228_v62 = vmul.f32 %v9559_v47, %v4196_v8  ;;  %v4231_v1 = vmul.f32 %v9530_v29, %v4199_v31  ;;  %v3995_v27 = vadd.f32 %v3979_v5, %v3963_v32  ;;  %v4219_v31 = vmul.f32 %v9523_v37, %v9431_v51 }
 0xd8e   : > { %v9699_v57 = vadd.f32 %v4228_v62, %v4212_v18  ;;  %v9701_v4 = vadd.f32 %v4231_v1, %v4215_v16  ;;  %v3860_v48 = vpop.permute.xlu1 %3859  ;;  %v4122_v49 = vpop.permute.xlu0 %4121  ;;  %v4216_v1 = vmul.f32 %v9552_v59, %v9441_v30  ;;  %v9724_v32 = vmul.f32 0.17677669, %v3995_v27 }
 0xd8f   : > { %v3948_v23 = vsel %vm1433_vm2, %v3860_v48, %v3908_v6  ;;  %v4203_v13 = vsel %vm1433_vm2, %v4122_v49, %v4170_v25 }
 0xd90   : > { %v6638_v8 = vpack.c.bf16 %v9699_v57, %v9699_v57  ;;  %v6641_v26 = vpack.c.bf16 %v9701_v4, %v9701_v4  ;;  %v3980_v18 = vmul.f32 %v9559_v47, %v3948_v23  ;;  %v4235_v16 = vmul.f32 %v9530_v29, %v4203_v13 }
 0xd92   : > { %6390 = vst.msk [vmem:[%s8350_s6 + $0x5c] sm:$0xf] %vm1858_vm1, %v6638_v8  ;;  %6393 = vst.msk [vmem:[%s8350_s6 + $0x68] sm:$0xf] %vm1858_vm1, %v6641_v26  ;;  %v3996_v45 = vadd.f32 %v3980_v18, %v3964_v20  ;;  %v4116_v6 = vpop.permute.xlu1 %4115  ;;  %v3866_v25 = vpop.permute.xlu0 %3865  ;;  %v9719_v5 = vadd.f32 %v4235_v16, %v4219_v31  ;;  %v4220_v26 = vmul.f32 %v9552_v59, %v9449_v41 }
 0xd93   : > { %v4200_v62 = vsel %vm1433_vm2, %v4116_v6, %v4164_v61  ;;  %v3951_v20 = vsel %vm1433_vm2, %v3866_v25, %v3914_v44  ;;  %v4209_v16 = vmul.f32 %v9565_v43, %v9461_v22  ;;  %v3968_v22 = vmul.f32 %v9552_v59, %v9455_v46 }
 0xd94   : > { %v9726_v51 = vmul.f32 0.17677669, %v3996_v45  ;;  %v4232_v48 = vmul.f32 %v9559_v47, %v4200_v62  ;;  %v6645_v49 = vpack.c.bf16 %v9719_v5, %v9719_v5  ;;  %v3983_v18 = vmul.f32 %v9530_v29, %v3951_v20 }
 0xd95   : > { %v4210_v46 = vmul.f32 %v9596_v34, %v9471_v15  ;;  %v4213_v15 = vmul.f32 %v9565_v43, %v9473_v63 }
 0xd96   : > { %v4458_v23 = vpack.c.bf16 %v9726_v51, %v9724_v32  ;;  %v9734_v13 = vadd.f32 %v4232_v48, %v4216_v1  ;;  %v4124_v61 = vpop.permute.xlu1 %4123  ;;  %v4102_v8 = vpop.permute.xlu0 %4101  ;;  %6397 = vst.msk [vmem:[%s8350_s6 + $0x78] sm:$0xf] %vm1858_vm1, %v6645_v49  ;;  %v3969_v51 = vmul.f32 %v9565_v43, %v9498_v10  ;;  %v3971_v10 = vmul.f32 %v9523_v37, %v9447_v40 }
 0xd97   : > { %v4204_v30 = vsel %vm1433_vm2, %v4124_v61, %v9653_v53  ;;  %v4193_v27 = vsel %vm1433_vm2, %v4102_v8, %v9655_v60  ;;  %v3967_v53 = vmul.f32 %v9523_v37, %v9439_v24 }
 0xd98   : > { %v6642_v44 = vpack.c.bf16 %v9734_v13, %v9734_v13  ;;  %v4236_v31 = vmul.f32 %v9559_v47, %v4204_v30  ;;  %v4225_v45 = vmul.f32 %v9572_v56, %v4193_v27 }
 0xd99   : > { %v3999_v1 = vadd.f32 %v3983_v18, %v3967_v53 }
 0xd9a   : > { %6394 = vst.msk [vmem:[%s8350_s6 + $0x6c] sm:$0xf] %vm1858_vm1, %v6642_v44  ;;  %v9755_v41 = vadd.f32 %v4236_v31, %v4220_v26  ;;  %v3868_v60 = vpop.permute.xlu1 %3867  ;;  %v9757_v6 = vpop.permute.xlu0 %3917  ;;  %v4241_v25 = vadd.f32 %v4225_v45, %v4209_v16 }
 0xd9b   : > { %v3952_v62 = vsel %vm1433_vm2, %v3868_v60, %v9657_v54  ;;  %v9774_v30 = vmul.f32 0.17677669, %v3999_v1  ;;  %v4256_v1 = vpack.c.bf16 %v9699_v57, %v9679_v0 }
 0xd9c   : > { %v6646_v48 = vpack.c.bf16 %v9755_v41, %v9755_v41  ;;  %v3984_v24 = vmul.f32 %v9559_v47, %v3952_v62  ;;  %v6635_v49 = vpack.c.bf16 %v4241_v25, %v4241_v25 }
 0xd9e   : > { %6398 = vst.msk [vmem:[%s8350_s6 + $0x7c] sm:$0xf] %vm1858_vm1, %v6646_v48  ;;  %v4000_v20 = vadd.f32 %v3984_v24, %v3968_v22  ;;  %v4104_v61 = vpop.permute.xlu1 %4103  ;;  %v3854_v8 = vpop.permute.xlu0 %3853  ;;  %6387 = vst.msk [vmem:[%s8350_s6 + $0x50] sm:$0xf] %vm1858_vm1, %v6635_v49 }
 0xd9f   : > { %v4194_v54 = vsel %vm1433_vm2, %v4104_v61, %v9661_v28  ;;  %v3945_v44 = vsel %vm1433_vm2, %v3854_v8, %v9659_v58  ;;  %v3961_v58 = vmul.f32 %v9565_v43, %v9467_v11  ;;  %v4217_v61 = vmul.f32 %v9565_v43, %v9481_v38 }
 0xda0   : > { %v9776_v27 = vmul.f32 0.17677669, %v4000_v20  ;;  %v4226_v26 = vmul.f32 %v9607_v12, %v4194_v54  ;;  %v3977_v62 = vmul.f32 %v9572_v56, %v3945_v44 }
 0xda2   : > { %v4460_v18 = vpack.c.bf16 %v9776_v27, %v9774_v30  ;;  %v4242_v31 = vadd.f32 %v4226_v26, %v4210_v46  ;;  %v9783_v16 = vpop.permute.xlu1 %3919  ;;  %v4110_v28 = vpop.permute.xlu0 %4109  ;;  %v3993_v11 = vadd.f32 %v3977_v62, %v3961_v58  ;;  %v4218_v62 = vmul.f32 %v9596_v34, %v9496_v35 }
 0xda3   : > { %v4197_v45 = vsel %vm1433_vm2, %v4110_v28, %v9663_v52  ;;  %v4258_v35 = vpack.c.bf16 %v9734_v13, %v9701_v4  ;;  %v4260_v13 = vpack.c.bf16 %v9755_v41, %v9719_v5  ;;  %v3966_v5 = vmul.f32 %v9596_v34, %v9504_v50 }
 0xda4   : > { %v4255_v53 = vpack.c.bf16 %v4242_v31, %v4241_v25  ;;  %v6636_v60 = vpack.c.bf16 %v4242_v31, %v4242_v31  ;;  %v4229_v22 = vmul.f32 %v9572_v56, %v4197_v45  ;;  %v3962_v25 = vmul.f32 %v9596_v34, %v9479_v3 }
 0xda5   : > { %v4009_v44 = vmul.f32 0.17677669, %v3993_v11  ;;  %v3965_v11 = vmul.f32 %v9565_v43, %v9489_v36 }
 0xda6   : > { %6388 = vst.msk [vmem:[%s8350_s6 + $0x54] sm:$0xf] %vm1858_vm1, %v6636_v60  ;;  %v4245_v48 = vadd.f32 %v4229_v22, %v4213_v15  ;;  %v3856_v63 = vpop.permute.xlu1 %3855  ;;  %7219 = vmatprep.subr.msk.bf16.mxu1 %vm1955_vm3, %v4255_v53  ;;  %v4531_v52 = vsel %vm1955_vm3, %v4255_v53, 0  ;;  %v4534_v60 = vsel %vm1955_vm3, %v4256_v1, 0 }
 0xda7   : > { %v3946_v24 = vsel %vm1433_vm2, %v3856_v63, %v9665_v21  ;;  %v4118_v49 = vpop.permute.xlu0 %4117  ;;  %7114 = vmatpush3.bf16.xpose.msra.mxu1 %v4531_v52 }
 0xda8   : > { %v6639_v20 = vpack.c.bf16 %v4245_v48, %v4245_v48  ;;  %v3978_v0 = vmul.f32 %v9607_v12, %v3946_v24  ;;  %v4201_v57 = vsel %vm1433_vm2, %v4118_v49, %v9667_v33  ;;  %7220 = vmatprep.subr.msk.bf16.mxu1 %vm1955_vm3, %v4256_v1  ;;  %v4214_v33 = vmul.f32 %v9596_v34, %v9487_v39 }
 0xda9   : > { %v4233_v8 = vmul.f32 %v9572_v56, %v4201_v57 }
 0xdaa   : > { %6391 = vst.msk [vmem:[%s8350_s6 + $0x60] sm:$0xf] %vm1858_vm1, %v6639_v20  ;;  %v3994_v3 = vadd.f32 %v3978_v0, %v3962_v25  ;;  %v4112_v21 = vpop.permute.xlu1 %4111 }
 0xdab   : > { %v4249_v54 = vadd.f32 %v4233_v8, %v4217_v61  ;;  %v4198_v46 = vsel %vm1433_vm2, %v4112_v21, %v9669_v19  ;;  %v3862_v26 = vpop.permute.xlu0 %3861 }
 0xdac   : > { %v4010_v31 = vmul.f32 0.17677669, %v3994_v3  ;;  %v4230_v28 = vmul.f32 %v9607_v12, %v4198_v46  ;;  %v3949_v63 = vsel %vm1433_vm2, %v3862_v26, %v9671_v14  ;;  %v3970_v3 = vmul.f32 %v9596_v34, %v9511_v9 }
 0xdad   : > { %v6643_v38 = vpack.c.bf16 %v4249_v54, %v4249_v54  ;;  %v4656_v9 = vsel %vm1955_vm3, %v4260_v13, 0  ;;  %v3972_v34 = vmul.f32 %v9552_v59, %v9459_v2 }
 0xdae   : > { %v4457_v15 = vpack.c.bf16 %v4010_v31, %v4009_v44  ;;  %v4246_v45 = vadd.f32 %v4230_v28, %v4214_v33  ;;  %v4120_v53 = vpop.permute.xlu1 %4119 }
 0xdaf   : > { %6395 = vst.msk [vmem:[%s8350_s6 + $0x70] sm:$0xf] %vm1858_vm1, %v6643_v38  ;;  %v4202_v19 = vsel %vm1433_vm2, %v4120_v53, %v9673_v55  ;;  %v3870_v39 = vpop.permute.xlu0 %3869  ;;  %7116 = vmatpush3.bf16.xpose.msra.mxu1 %v4534_v60 }
 0xdb0   : > { %v4257_v22 = vpack.c.bf16 %v4246_v45, %v4245_v48  ;;  %v6640_v58 = vpack.c.bf16 %v4246_v45, %v4246_v45  ;;  %v4234_v52 = vmul.f32 %v9607_v12, %v4202_v19  ;;  %7117 = vmatprep.mubr.msk.bf16.mxu1 %vm1955_vm3, %v4457_v15  ;;  %v3981_v48 = vmul.f32 %v9572_v56, %v3949_v63  ;;  %v10550_v15 = vld [vmem:[#allocation6_spill] sm:$0xff] }
 0xdb1   : > { %v3953_v4 = vsel %vm1433_vm2, %v3870_v39, %v9757_v6  ;;  %v10553_v39 = vld [vmem:[#allocation12_spill] sm:$0xff] }
 0xdb2   : > { %6392 = vst.msk [vmem:[%s8350_s6 + $0x64] sm:$0xf] %vm1858_vm1, %v6640_v58  ;;  %v4250_v1 = vadd.f32 %v4234_v52, %v4218_v62  ;;  %v3876_v25 = vpop.permute.xlu1 %3875  ;;  %7221 = vmatprep.subr.msk.bf16.mxu0 %vm1955_vm3, %v4257_v22  ;;  %v4592_v55 = vsel %vm1955_vm3, %v4257_v22, 0  ;;  %v3997_v57 = vadd.f32 %v3981_v48, %v3965_v11  ;;  %v3985_v41 = vmul.f32 %v9572_v56, %v3953_v4  ;;  %v10552_v62 = vld [vmem:[#allocation11_spill] sm:$0xff] }
 0xdb3   : > { %v3874_v24 = vpop.permute.xlu0 %3873  ;;  %7122 = vmatpush3.bf16.xpose.msra.mxu0 %v4592_v55 }
 0xdb4   : > { %v4259_v14 = vpack.c.bf16 %v4250_v1, %v4249_v54  ;;  %v6644_v49 = vpack.c.bf16 %v4250_v1, %v4250_v1  ;;  %7222 = vmatprep.subr.msk.bf16.mxu0 %vm1955_vm3, %v4258_v35  ;;  %v4013_v21 = vmul.f32 0.17677669, %v3997_v57  ;;  %v4001_v56 = vadd.f32 %v3985_v41, %v3969_v51 }
 0xdb6   : > { %6396 = vst.msk [vmem:[%s8350_s6 + $0x74] sm:$0xf] %vm1858_vm1, %v6644_v49  ;;  %v3864_v20 = vpop.permute.xlu1 %3863  ;;  %7118 = vmatmul.mubr.msk.bf16.vlgmr.msra.gmra.mrb[52].mxu1 %vm1955_vm3, %v4458_v23  ;;  %7223 = vmatprep.subr.msk.bf16.mxu1 %vm1955_vm3, %v4259_v14  ;;  %v4653_v0 = vsel %vm1955_vm3, %v4259_v14, 0  ;;  %v4017_v31 = vmul.f32 0.17677669, %v4001_v56 }
 0xdb7   : > { %v3950_v36 = vsel %vm1433_vm2, %v3864_v20, %v9681_v42  ;;  %v3922_v6 = vpop.permute.xlu0 %3921  ;;  %7130 = vmatpush3.bf16.xpose.msra.mxu1 %v4653_v0  ;;  %v4595_v42 = vsel %vm1955_vm3, %v4258_v35, 0 }
 0xdb8   : > { %v3982_v61 = vmul.f32 %v9607_v12, %v3950_v36  ;;  %7224 = vmatprep.subr.msk.bf16.mxu1 %vm1955_vm3, %v4260_v13  ;;  %v3955_v32 = vsel %vm1433_vm2, %v3874_v24, %v3922_v6 }
 0xdb9   : > { %v3987_v46 = vmul.f32 %v9530_v29, %v3955_v32 }
 0xdba   : > { %v3998_v23 = vadd.f32 %v3982_v61, %v3966_v5  ;;  %v3872_v8 = vpop.permute.xlu1 %3871 }
 0xdbb   : > { %v3954_v50 = vsel %vm1433_vm2, %v3872_v8, %v9783_v16  ;;  %7124 = vmatpush3.bf16.xpose.msra.mxu0 %v4595_v42  ;;  %v4003_v29 = vadd.f32 %v3987_v46, %v3971_v10  ;;  %v10554_v10 = vld [vmem:[#allocation13_spill] sm:$0xff] }
 0xdbc   : > { %v4014_v54 = vmul.f32 0.17677669, %v3998_v23  ;;  %v3986_v26 = vmul.f32 %v9607_v12, %v3954_v50  ;;  %7137 = vmatprep.subr.bf16.mxu0 %v9363_v7 }
 0xdbd   : > { %v4019_v2 = vmul.f32 0.17677669, %v4003_v29 }
 0xdbe   : > { %v4459_v43 = vpack.c.bf16 %v4014_v54, %v4013_v21  ;;  %v4002_v33 = vadd.f32 %v3986_v26, %v3970_v3  ;;  %v3924_v44 = vpop.permute.xlu1 %3923 }
 0xdbf   : > { %v3956_v16 = vsel %vm1433_vm2, %v3876_v25, %v3924_v44  ;;  %7132 = vmatpush3.bf16.xpose.msra.mxu1 %v4656_v9 }
 0xdc0   : > { %v4018_v28 = vmul.f32 0.17677669, %v4002_v33  ;;  %v3988_v12 = vmul.f32 %v9559_v47, %v3956_v16  ;;  %7125 = vmatprep.mubr.msk.bf16.mxu0 %vm1955_vm3, %v4459_v43  ;;  %v10555_v43 = vld [vmem:[#allocation14_spill] sm:$0xff] }
 0xdc2   : > { %v4461_v38 = vpack.c.bf16 %v4018_v28, %v4017_v31  ;;  %v4004_v40 = vadd.f32 %v3988_v12, %v3972_v34  ;;  %7126 = vmatmul.mubr.msk.bf16.vlgmr.msra.gmra.mrb[40].mxu0 %vm1955_vm3, %v4460_v18  ;;  %v10551_v18 = vld [vmem:[#allocation10_spill] sm:$0xff] }
 0xdc3   : > { %7138 = vmatpush3.bf16.msra.mxu0 %v9363_v7 }
 0xdc4   : > { %v4020_v37 = vmul.f32 0.17677669, %v4004_v40  ;;  %7133 = vmatprep.mubr.msk.bf16.mxu1 %vm1955_vm3, %v4461_v38  ;;  %7139 = vmatprep.subr.bf16.mxu0 %v9357_v17 }
 0xdc6   : > { %v4462_v59 = vpack.c.bf16 %v4020_v37, %v4019_v2 }
 0xdc7   : > { %7140 = vmatpush3.bf16.msra.mxu0 %v9357_v17 }
 0xdc8   : > { %7134 = vmatmul.mubr.msk.bf16.vlgmr.msra.gmra.mrb[56].mxu1 %vm1955_vm3, %v4462_v59 }
 0xe16   : > { %v7111_v47 = vpop.f32.mrb[48].mxu1 }
 0xe17   : > { %v9886_v45 = vadd.f32 %v7111_v47, %v10550_v15  ;;  %v4509_v30 = vpop.f32.mrb[49].mxu1 }
 0xe18   : > { %v7112_v27 = vpop.f32.mrb[50].mxu1  ;;  %v9889_v53 = vadd.f32 %v4509_v30, %v10551_v18 }
 0xe19   : > { %v4512_v7 = vpop.f32.mrb[51].mxu1  ;;  %v4713_v60 = vsel %vm1955_vm3, %v9886_v45, -inf  ;;  %v9899_v22 = vadd.f32 %v7112_v27, %v10553_v39 }
 0xe1a   : > { %v9894_v19 = vadd.f32 %v4512_v7, %v10552_v62  ;;  %4714 = vmax.xlane.f32.xlu0 %v4713_v60  ;;  %v4707_v58 = vsel %vm1955_vm3, %v9889_v53, -inf }
 0xe1b   : > { %v4716_v63 = vsel %vm1955_vm3, %v9899_v22, -inf }
 0xe1c   : > { %v4710_v17 = vsel %vm1955_vm3, %v9894_v19, -inf }
 0xe1d   : > { %4711 = vmax.xlane.f32.xlu1 %v4710_v17 }
 0xe1e   : > { %4708 = vmax.xlane.f32.xlu0 %v4707_v58 }
 0xe22   : > { %4717 = vmax.xlane.f32.xlu0 %v4716_v63 }
 0xe89   : > { %v7119_v52 = vpop.f32.mrb[52].mxu1 }
 0xe8a   : > { %v9906_v35 = vadd.f32 %v7119_v52, %v10550_v15  ;;  %v4570_v1 = vpop.f32.mrb[53].mxu1 }
 0xe8b   : > { %v7120_v25 = vpop.f32.mrb[54].mxu1  ;;  %v9919_v20 = vadd.f32 %v4570_v1, %v10551_v18 }
 0xe8c   : > { %v9909_v55 = vadd.f32 %v7120_v25, %v10553_v39  ;;  %v4573_v48 = vpop.f32.mrb[55].mxu1  ;;  %v4725_v24 = vsel %vm1955_vm3, %v9906_v35, -inf }
 0xe8d   : > { %4726 = vmax.xlane.f32.xlu0 %v4725_v24  ;;  %v9927_v6 = vadd.f32 %v4573_v48, %v10552_v62  ;;  %v4719_v51 = vsel %vm1955_vm3, %v9919_v20, -inf }
 0xe8e   : > { %v4728_v14 = vsel %vm1955_vm3, %v9909_v55, -inf }
 0xe8f   : > { %4729 = vmax.xlane.f32.xlu1 %v4728_v14  ;;  %v4722_v3 = vsel %vm1955_vm3, %v9927_v6, -inf }
 0xe95   : > { %v7127_v49 = vpop.f32.mrb[40].mxu0 }
 0xe96   : > { %v9916_v11 = vadd.f32 %v7127_v49, %v10550_v15  ;;  %v4631_v4 = vpop.f32.mrb[41].mxu0 }
 0xe97   : > { %v7128_v13 = vpop.f32.mrb[42].mxu0  ;;  %v9932_v61 = vadd.f32 %v4631_v4, %v10551_v18 }
 0xe98   : > { %v9922_v0 = vadd.f32 %v7128_v13, %v10553_v39  ;;  %v4634_v57 = vpop.f32.mrb[43].mxu0  ;;  %v4737_v36 = vsel %vm1955_vm3, %v9916_v11, -inf }
 0xe99   : > { %4738 = vmax.xlane.f32.xlu0 %v4737_v36  ;;  %v9937_v8 = vadd.f32 %v4634_v57, %v10552_v62  ;;  %v4731_v50 = vsel %vm1955_vm3, %v9932_v61, -inf }
 0xe9a   : > { %v4740_v5 = vsel %vm1955_vm3, %v9922_v0, -inf }
 0xe9b   : > { %4741 = vmax.xlane.f32.xlu1 %v4740_v5  ;;  %v7135_v41 = vpop.f32.mrb[56].mxu1  ;;  %v4734_v56 = vsel %vm1955_vm3, %v9937_v8, -inf }
 0xe9c   : > { %v4692_v32 = vpop.f32.mrb[57].mxu1  ;;  %v9942_v21 = vadd.f32 %v7135_v41, %v10550_v15 }
 0xe9d   : > { %4720 = vmax.xlane.f32.xlu0 %v4719_v51  ;;  %v7136_v23 = vpop.f32.mrb[58].mxu1  ;;  %v9949_v54 = vadd.f32 %v4692_v32, %v10551_v18 }
 0xe9e   : > { %v4695_v42 = vpop.f32.mrb[59].mxu1  ;;  %v4749_v46 = vsel %vm1955_vm3, %v9942_v21, -inf  ;;  %v9964_v29 = vadd.f32 %v7136_v23, %v10553_v39 }
 0xe9f   : > { %4723 = vmax.xlane.f32.xlu1 %v4722_v3  ;;  %v4743_v26 = vsel %vm1955_vm3, %v9949_v54, -inf  ;;  %v9969_v12 = vadd.f32 %v4695_v42, %v10552_v62 }
 0xea0   : > { %v4752_v38 = vsel %vm1955_vm3, %v9964_v29, -inf }
 0xea1   : > { %4732 = vmax.xlane.f32.xlu0 %v4731_v50  ;;  %v4746_v37 = vsel %vm1955_vm3, %v9969_v12, -inf }
 0xea3   : > { %4735 = vmax.xlane.f32.xlu1 %v4734_v56 }
 0xea5   : > { %4750 = vmax.xlane.f32.xlu0 %v4749_v46 }
 0xea7   : > { %v4715_v33 = vpop.xlane.xlu0 %4714 }
 0xea8   : > { %v4757_v44 = vsub.f32 %v9886_v45, %v4715_v33 }
 0xea9   : > { %4744 = vmax.xlane.f32.xlu0 %v4743_v26 }
 0xeaa   : > { %v4775_v34 = vmul.f32 1.442695, %v4757_v44  ;;  %v4712_v45 = vpop.xlane.xlu1 %4711 }
 0xeab   : > { %v4709_v9 = vpop.xlane.xlu0 %4708  ;;  %v4756_v30 = vsub.f32 %v9894_v19, %v4712_v45 }
 0xeac   : > { %v4755_v16 = vsub.f32 %v9889_v53, %v4709_v9  ;;  %7690 = vpow2.f32 %v4775_v34 }
 0xead   : > { %v4773_v18 = vmul.f32 1.442695, %v4756_v30 }
 0xeae   : > { %v4771_v31 = vmul.f32 1.442695, %v4755_v16 }
 0xeaf   : > { %v4718_v47 = vpop.xlane.xlu0 %4717 }
 0xeb0   : > { %7692 = vpow2.f32 %v4771_v31  ;;  %v4758_v15 = vsub.f32 %v9899_v22, %v4718_v47 }
 0xeb2   : > { %v4777_v27 = vmul.f32 1.442695, %v4758_v15 }
 0xeb4   : > { %7308 = vrot.lane.b32.xlu1 %v10554_v10, %s10534_s23  ;;  %7694 = vpow2.f32 %v4777_v27 }
 0xeb5   : > { %7696 = vpow2.f32 %v4773_v18 }
 0xeb6   : > { %v9966_v28 = vpop.eup %7690 }
 0xeb7   : > { %v4809_v40 = vsel %vm1955_vm3, %v9966_v28, 0.0 }
 0xeb8   : > { %7313 = vrot.lane.b32.xlu1 %v10555_v43, %s10536_s1 }
 0xeba   : > { %v9975_v2 = vpop.eup %7692 }
 0xebb   : > { %v4803_v59 = vsel %vm1955_vm3, %v9975_v2, 0.0 }
 0xebe   : > { %v9985_v53 = vpop.eup %7694 }
 0xebf   : > { %7303 = vrot.lane.b32.xlu0 %v10555_v43, %s10534_s23  ;;  %v4812_v7 = vsel %vm1955_vm3, %v9985_v53, 0.0  ;;  %v9989_v60 = vpop.eup %7696 }
 0xec0   : > { %v4806_v62 = vsel %vm1955_vm3, %v9989_v60, 0.0 }
 0xedc   : > { %4753 = vmax.xlane.f32.xlu1 %v4752_v38 }
 0xede   : > { %4810 = vadd.xlane.f32.xlu0 %v4809_v40 }
 0xee0   : > { %4747 = vmax.xlane.f32.xlu1 %v4746_v37 }
 0xee2   : > { %4804 = vadd.xlane.f32.xlu0 %v4803_v59 }
 0xef1   : > { %7318 = vrot.lane.b32.xlu1 %v10555_v43, %s10538_s5 }
 0xf15   : > { %4813 = vadd.xlane.f32.xlu1 %v4812_v7 }
 0xf19   : > { %4807 = vadd.xlane.f32.xlu1 %v4806_v62 }
 0xf1a   : > { %v4727_v17 = vpop.xlane.xlu0 %4726 }
 0xf1b   : > { %v4761_v39 = vsub.f32 %v9906_v35, %v4727_v17 }
 0xf1c   : > { %v4730_v19 = vpop.xlane.xlu1 %4729 }
 0xf1d   : > { %v4783_v22 = vmul.f32 1.442695, %v4761_v39  ;;  %v4762_v58 = vsub.f32 %v9909_v55, %v4730_v19 }
 0xf1f   : > { %7698 = vpow2.f32 %v4783_v22  ;;  %v4785_v63 = vmul.f32 1.442695, %v4762_v58 }
 0xf21   : > { %7700 = vpow2.f32 %v4785_v63 }
 0xf26   : > { %v4739_v52 = vpop.xlane.xlu0 %4738 }
 0xf27   : > { %v4765_v1 = vsub.f32 %v9916_v11, %v4739_v52 }
 0xf28   : > { %v4742_v25 = vpop.xlane.xlu1 %4741 }
 0xf29   : > { %v9996_v48 = vpop.eup %7698  ;;  %v4791_v24 = vmul.f32 1.442695, %v4765_v1  ;;  %v4766_v14 = vsub.f32 %v9922_v0, %v4742_v25 }
 0xf2a   : > { %v4721_v49 = vpop.xlane.xlu0 %4720  ;;  %v4821_v35 = vsel %vm1955_vm3, %v9996_v48, 0.0 }
 0xf2b   : > { %v10001_v4 = vpop.eup %7700  ;;  %7702 = vpow2.f32 %v4791_v24  ;;  %v4793_v55 = vmul.f32 1.442695, %v4766_v14  ;;  %v4759_v13 = vsub.f32 %v9919_v20, %v4721_v49  ;;  %4822 = vadd.xlane.f32.xlu0 %v4821_v35 }
 0xf2c   : > { %v4724_v57 = vpop.xlane.xlu1 %4723  ;;  %v4824_v11 = vsel %vm1955_vm3, %v10001_v4, 0.0 }
 0xf2d   : > { %7704 = vpow2.f32 %v4793_v55  ;;  %v4779_v36 = vmul.f32 1.442695, %v4759_v13  ;;  %v4760_v5 = vsub.f32 %v9927_v6, %v4724_v57  ;;  %4825 = vadd.xlane.f32.xlu1 %v4824_v11 }
 0xf2e   : > { %v4733_v0 = vpop.xlane.xlu0 %4732 }
 0xf2f   : > { %7706 = vpow2.f32 %v4779_v36  ;;  %v4781_v41 = vmul.f32 1.442695, %v4760_v5  ;;  %v4763_v32 = vsub.f32 %v9932_v61, %v4733_v0 }
 0xf30   : > { %v4736_v51 = vpop.xlane.xlu1 %4735 }
 0xf31   : > { %7708 = vpow2.f32 %v4781_v41  ;;  %v4787_v23 = vmul.f32 1.442695, %v4763_v32  ;;  %v4764_v20 = vsub.f32 %v9937_v8, %v4736_v51 }
 0xf32   : > { %v4751_v42 = vpop.xlane.xlu0 %4750 }
 0xf33   : > { %7710 = vpow2.f32 %v4787_v23  ;;  %v4789_v3 = vmul.f32 1.442695, %v4764_v20  ;;  %v4769_v50 = vsub.f32 %v9942_v21, %v4751_v42 }
 0xf34   : > { %v7309_v56 = vpop.permute.xlu1 %7308 }
 0xf35   : > { %v10010_v46 = vpop.eup %7702  ;;  %7712 = vpow2.f32 %v4789_v3  ;;  %v4799_v6 = vmul.f32 1.442695, %v4769_v50  ;;  %v7311_v26 = vunpack.i.h.bf16 %v7309_v56  ;;  %v7310_v43 = vunpack.i.l.bf16 %v7309_v56 }
 0xf36   : > { %v4745_v61 = vpop.xlane.xlu0 %4744  ;;  %v4833_v33 = vsel %vm1955_vm3, %v10010_v46, 0.0 }
 0xf37   : > { %v10014_v44 = vpop.eup %7704  ;;  %7714 = vpow2.f32 %v4799_v6  ;;  %v6654_v8 = vpack.c.bf16 %v7311_v26, %v7311_v26  ;;  %v6653_v9 = vpack.c.bf16 %v7310_v43, %v7310_v43  ;;  %4834 = vadd.xlane.f32.xlu0 %v4833_v33  ;;  %v4767_v21 = vsub.f32 %v9949_v54, %v4745_v61 }
 0xf38   : > { %v7314_v34 = vpop.permute.xlu1 %7313  ;;  %v4836_v16 = vsel %vm1955_vm3, %v10014_v44, 0.0  ;;  %v4304_v63 = vpack.c.bf16 %v7311_v26, %v7310_v43 }
 0xf39   : > { %v10019_v31 = vpop.eup %7706  ;;  %6422 = vst.msk [vmem:[%s8152_s2 + $0x5c] sm:$0xf] %vm1858_vm1, %v6654_v8  ;;  %6421 = vst.msk [vmem:[%s8152_s2 + $0x58] sm:$0xf] %vm1858_vm1, %v6653_v9  ;;  %v7316_v38 = vunpack.i.h.bf16 %v7314_v34  ;;  %v7315_v40 = vunpack.i.l.bf16 %v7314_v34  ;;  %4837 = vadd.xlane.f32.xlu1 %v4836_v16  ;;  %v4795_v37 = vmul.f32 1.442695, %v4767_v21 }
 0xf3a   : > { %v7304_v59 = vpop.permute.xlu0 %7303  ;;  %v4815_v54 = vsel %vm1955_vm3, %v10019_v31, 0.0 }
 0xf3b   : > { %v10027_v47 = vpop.eup %7708  ;;  %v6656_v15 = vpack.c.bf16 %v7316_v38, %v7316_v38  ;;  %v10029_v45 = vpack.c.bf16 %v7316_v38, %v7315_v40  ;;  %v6655_v30 = vpack.c.bf16 %v7315_v40, %v7315_v40  ;;  %v7306_v27 = vunpack.i.h.bf16 %v7304_v59  ;;  %4816 = vadd.xlane.f32.xlu0 %v4815_v54 }
 0xf3c   : > { %7716 = vpow2.f32 %v4795_v37  ;;  %v7305_v18 = vunpack.i.l.bf16 %v7304_v59  ;;  %v4818_v7 = vsel %vm1955_vm3, %v10027_v47, 0.0 }
 0xf3d   : > { %v10033_v62 = vpop.eup %7710  ;;  %6424 = vst.msk [vmem:[%s8152_s2 + $0x64] sm:$0xf] %vm1858_vm1, %v6656_v15  ;;  %6423 = vst.msk [vmem:[%s8152_s2 + $0x60] sm:$0xf] %vm1858_vm1, %v6655_v30  ;;  %v6652_v17 = vpack.c.bf16 %v7306_v27, %v7306_v27  ;;  %7153 = vmatprep.subr.bf16.mxu0 %v10029_v45  ;;  %4819 = vadd.xlane.f32.xlu1 %v4818_v7 }
 0xf3e   : > { %v4303_v39 = vpack.c.bf16 %v7306_v27, %v7305_v18  ;;  %v6651_v19 = vpack.c.bf16 %v7305_v18, %v7305_v18  ;;  %v4827_v22 = vsel %vm1955_vm3, %v10033_v62, 0.0 }
 0xf3f   : > { %v10042_v58 = vpop.eup %7712  ;;  %6420 = vst.msk [vmem:[%s8152_s2 + $0x54] sm:$0xf] %vm1858_vm1, %v6652_v17  ;;  %4828 = vadd.xlane.f32.xlu0 %v4827_v22 }
 0xf40   : > { %6419 = vst.msk [vmem:[%s8152_s2 + $0x50] sm:$0xf] %vm1858_vm1, %v6651_v19  ;;  %7145 = vmatprep.subr.bf16.mxu1 %v4303_v39  ;;  %v4830_v52 = vsel %vm1955_vm3, %v10042_v58, 0.0 }
 0xf41   : > { %v10050_v1 = vpop.eup %7714  ;;  %7146 = vmatpush3.bf16.msra.mxu1 %v4303_v39  ;;  %4831 = vadd.xlane.f32.xlu1 %v4830_v52 }
 0xf42   : > { %7147 = vmatprep.subr.bf16.mxu1 %v4304_v63  ;;  %v4845_v25 = vsel %vm1955_vm3, %v10050_v1, 0.0 }
 0xf43   : > { %4846 = vadd.xlane.f32.xlu0 %v4845_v25 }
 0xf45   : > { %7148 = vmatpush3.bf16.msra.mxu1 %v4304_v63 }
 0xf46   : > { %v10054_v24 = vpop.eup %7716 }
 0xf47   : > { %v4839_v14 = vsel %vm1955_vm3, %v10054_v24, 0.0 }
 0xf48   : > { %4840 = vadd.xlane.f32.xlu0 %v4839_v14 }
 0xf5e   : > { %7323 = vrot.lane.b32.xlu0 %v10554_v10, %s10536_s1 }
 0xf69   : > { %v4754_v49 = vpop.xlane.xlu1 %4753 }
 0xf6a   : > { %v4770_v35 = vsub.f32 %v9964_v29, %v4754_v49 }
 0xf6b   : > { %v4811_v42 = vpop.xlane.xlu0 %4810 }
 0xf6c   : > { %v4801_v55 = vmul.f32 1.442695, %v4770_v35 }
 0xf6d   : > { %v4748_v13 = vpop.xlane.xlu1 %4747 }
 0xf6e   : > { %7718 = vpow2.f32 %v4801_v55  ;;  %v4768_v57 = vsub.f32 %v9969_v12, %v4748_v13 }
 0xf6f   : > { %v4805_v3 = vpop.xlane.xlu0 %4804 }
 0xf70   : > { %v4797_v11 = vmul.f32 1.442695, %v4768_v57 }
 0xf71   : > { %v7319_v36 = vpop.permute.xlu1 %7318 }
 0xf72   : > { %7720 = vpow2.f32 %v4797_v11  ;;  %v7321_v5 = vunpack.i.h.bf16 %v7319_v36  ;;  %v7320_v0 = vunpack.i.l.bf16 %v7319_v36 }
 0xf74   : > { %v6660_v41 = vpack.c.bf16 %v7321_v5, %v7321_v5  ;;  %v10062_v32 = vpack.c.bf16 %v7321_v5, %v7320_v0  ;;  %v6659_v51 = vpack.c.bf16 %v7320_v0, %v7320_v0 }
 0xf76   : > { %6428 = vst.msk [vmem:[%s8152_s2 + $0x74] sm:$0xf] %vm1858_vm1, %v6660_v41  ;;  %6427 = vst.msk [vmem:[%s8152_s2 + $0x70] sm:$0xf] %vm1858_vm1, %v6659_v51  ;;  %7161 = vmatprep.subr.bf16.mxu1 %v10062_v32 }
 0xf78   : > { %v10069_v29 = vpop.eup %7718 }
 0xf79   : > { %v4848_v12 = vsel %vm1955_vm3, %v10069_v29, 0.0 }
 0xf7a   : > { %4849 = vadd.xlane.f32.xlu1 %v4848_v12 }
 0xf7c   : > { %v10073_v23 = vpop.eup %7720 }
 0xf7d   : > { %v4842_v20 = vsel %vm1955_vm3, %v10073_v23, 0.0 }
 0xf7e   : > { %4843 = vadd.xlane.f32.xlu1 %v4842_v20 }
 0xf8f   : > { %7328 = vrot.lane.b32.xlu1 %v10554_v10, %s10538_s5 }
 0xfa2   : > { %v4814_v50 = vpop.xlane.xlu1 %4813 }
 0xfa3   : > { %7722 = vrcp.f32 %v4814_v50 }
 0xfa4   : > { %7724 = vrcp.f32 %v4805_v3 }
 0xfa5   : > { %7726 = vrcp.f32 %v4811_v42 }
 0xfa6   : > { %v4808_v56 = vpop.xlane.xlu1 %4807 }
 0xfa7   : > { %7728 = vrcp.f32 %v4808_v56 }
 0xfad   : > { %v7723_v6 = vpop.eup %7722 }
 0xfae   : > { %v7725_v26 = vpop.eup %7724  ;;  %v4870_v33 = vmul.f32 %v7723_v6, %v9985_v53 }
 0xfaf   : > { %v7727_v43 = vpop.eup %7726  ;;  %v4867_v8 = vmul.f32 %v7725_v26, %v9975_v2 }
 0xfb0   : > { %v4869_v10 = vmul.f32 %v7727_v43, %v9966_v28 }
 0xfb1   : > { %v7729_v61 = vpop.eup %7728 }
 0xfb2   : > { %v4868_v9 = vmul.f32 %v7729_v61, %v9989_v60  ;;  %v4884_v34 = vpack.c.bf16 %v4870_v33, %v4869_v10  ;;  %v10556_v33 = vmov 0  }
 0xfb4   : > { %v4883_v21 = vpack.c.bf16 %v4868_v9, %v4867_v8 }
 0xfb6   : > { %7141 = vmatprep.mubr.msk.bf16.mxu0 %vm1955_vm3, %v4883_v21 }
 0xfb7   : > { %7142 = vmatmul.mubr.msk.bf16.vlgmr.msra.gmra.mrb[44].mxu0 %vm1955_vm3, %v4884_v34  ;;  %v7491_v34 = vld [vmem:[%s10557_s21 + $0x48] sm:$0xff]  }
 0xfb8   : > { %7154 = vmatpush3.bf16.msra.mxu0 %v10029_v45  ;;  %v4823_v16 = vpop.xlane.xlu0 %4822 }
 0xfba   : > { %v4826_v38 = vpop.xlane.xlu1 %4825 }
 0xfbb   : > { %7730 = vrcp.f32 %v4826_v38 }
 0xfc4   : > { %v4835_v40 = vpop.xlane.xlu0 %4834 }
 0xfc5   : > { %v7731_v54 = vpop.eup %7730 }
 0xfc6   : > { %v4838_v37 = vpop.xlane.xlu1 %4837  ;;  %v4874_v27 = vmul.f32 %v7731_v54, %v10001_v4  ;;  %v7493_v54 = vld [vmem:[%s10557_s21 + $0x58] sm:$0xff]  }
 0xfc8   : > { %v4817_v53 = vpop.xlane.xlu0 %4816 }
 0xfc9   : > { %7732 = vrcp.f32 %v4817_v53 }
 0xfca   : > { %7734 = vrcp.f32 %v4823_v16  ;;  %v4820_v2 = vpop.xlane.xlu1 %4819 }
 0xfcb   : > { %7736 = vrcp.f32 %v4820_v2 }
 0xfcc   : > { %v4829_v60 = vpop.xlane.xlu0 %4828  ;;  %7738 = vrcp.f32 %v4838_v37  ;;  %v7492_v37 = vld [vmem:[%s10557_s21 + $0x50] sm:$0xff]  }
 0xfcd   : > { %7740 = vrcp.f32 %v4829_v60 }
 0xfce   : > { %v4832_v28 = vpop.xlane.xlu1 %4831 }
 0xfcf   : > { %7742 = vrcp.f32 %v4832_v28 }
 0xfd0   : > { %v4847_v59 = vpop.xlane.xlu0 %4846  ;;  %7744 = vrcp.f32 %v4835_v40 }
 0xfd3   : > { %v7733_v15 = vpop.eup %7732 }
 0xfd4   : > { %v7735_v45 = vpop.eup %7734  ;;  %v4871_v7 = vmul.f32 %v7733_v15, %v10019_v31 }
 0xfd5   : > { %v7737_v30 = vpop.eup %7736  ;;  %v4841_v18 = vpop.xlane.xlu0 %4840  ;;  %v4873_v19 = vmul.f32 %v7735_v45, %v9996_v48  ;;  %v7494_v45 = vld [vmem:[%s10557_s21 + $0x60] sm:$0xff]  }
 0xfd6   : > { %v4872_v17 = vmul.f32 %v7737_v30, %v10027_v47  ;;  %v7739_v39 = vpop.eup %7738  ;;  %v7495_v30 = vld [vmem:[%s10557_s21 + $0x68] sm:$0xff]  }
 0xfd7   : > { %v7741_v22 = vpop.eup %7740  ;;  %v4886_v14 = vpack.c.bf16 %v4874_v27, %v4873_v19  ;;  %v4878_v48 = vmul.f32 %v7739_v39, %v10014_v44  ;;  %v7496_v27 = vld [vmem:[%s10557_s21 + $0x70] sm:$0xff]  }
 0xfd8   : > { %v4885_v63 = vpack.c.bf16 %v4872_v17, %v4871_v7  ;;  %v4875_v31 = vmul.f32 %v7741_v22, %v10033_v62 }
 0xfd9   : > { %v7743_v52 = vpop.eup %7742  ;;  %v7324_v25 = vpop.permute.xlu0 %7323 }
 0xfda   : > { %v7326_v49 = vunpack.i.h.bf16 %v7324_v25  ;;  %v7325_v35 = vunpack.i.l.bf16 %v7324_v25  ;;  %7149 = vmatprep.mubr.msk.bf16.mxu1 %vm1955_vm3, %v4885_v63  ;;  %v4876_v4 = vmul.f32 %v7743_v52, %v10042_v58  ;;  %v7745_v55 = vpop.eup %7744 }
 0xfdb   : > { %7150 = vmatmul.mubr.msk.bf16.vlgmr.msra.gmra.mrb[60].mxu1 %vm1955_vm3, %v4886_v14  ;;  %v4877_v36 = vmul.f32 %v7745_v55, %v10010_v46 }
 0xfdc   : > { %v6658_v47 = vpack.c.bf16 %v7326_v49, %v7326_v49  ;;  %v4306_v13 = vpack.c.bf16 %v7326_v49, %v7325_v35  ;;  %v6657_v57 = vpack.c.bf16 %v7325_v35, %v7325_v35  ;;  %7162 = vmatpush3.bf16.msra.mxu1 %v10062_v32  ;;  %v4887_v11 = vpack.c.bf16 %v4876_v4, %v4875_v31 }
 0xfdd   : > { %v4888_v58 = vpack.c.bf16 %v4878_v48, %v4877_v36 }
 0xfde   : > { %6426 = vst.msk [vmem:[%s8152_s2 + $0x6c] sm:$0xf] %vm1858_vm1, %v6658_v47  ;;  %6425 = vst.msk [vmem:[%s8152_s2 + $0x68] sm:$0xf] %vm1858_vm1, %v6657_v57  ;;  %7155 = vmatprep.subr.bf16.mxu0 %v4306_v13  ;;  %7157 = vmatprep.mubr.msk.bf16.mxu0 %vm1955_vm3, %v4887_v11 }
 0xfdf   : > { %7156 = vmatpush3.bf16.msra.mxu0 %v4306_v13 }
 0xfe2   : > { %7158 = vmatmul.mubr.msk.bf16.vlgmr.msra.gmra.mrb[48].mxu0 %vm1955_vm3, %v4888_v58 }
0x1007   : > { %v4850_v44 = vpop.xlane.xlu1 %4849 }
0x1008   : > { %7746 = vrcp.f32 %v4850_v44 }
0x1009   : > { %7748 = vrcp.f32 %v4841_v18  ;;  %v7497_v18 = vld [vmem:[%s10557_s21 + $0x78] sm:$0xff]  }
0x100a   : > { %7750 = vrcp.f32 %v4847_v59 }
0x100b   : > { %v4844_v62 = vpop.xlane.xlu1 %4843 }
0x100c   : > { %7752 = vrcp.f32 %v4844_v62 }
0x100f   : > { %v7329_v46 = vpop.permute.xlu1 %7328 }
0x1010   : > { %v7331_v5 = vunpack.i.h.bf16 %v7329_v46  ;;  %v7330_v0 = vunpack.i.l.bf16 %v7329_v46 }
0x1012   : > { %v6662_v41 = vpack.c.bf16 %v7331_v5, %v7331_v5  ;;  %v4308_v32 = vpack.c.bf16 %v7331_v5, %v7330_v0  ;;  %v6661_v51 = vpack.c.bf16 %v7330_v0, %v7330_v0  ;;  %v7747_v12 = vpop.eup %7746 }
0x1013   : > { %v7749_v20 = vpop.eup %7748  ;;  %v4882_v50 = vmul.f32 %v7747_v12, %v10069_v29 }
0x1014   : > { %6430 = vst.msk [vmem:[%s8152_s2 + $0x7c] sm:$0xf] %vm1858_vm1, %v6662_v41  ;;  %6429 = vst.msk [vmem:[%s8152_s2 + $0x78] sm:$0xf] %vm1858_vm1, %v6661_v51  ;;  %7163 = vmatprep.subr.bf16.mxu1 %v4308_v32  ;;  %v7751_v42 = vpop.eup %7750  ;;  %v4879_v56 = vmul.f32 %v7749_v20, %v10054_v24 }
0x1015   : > { %7164 = vmatpush3.bf16.msra.mxu1 %v4308_v32  ;;  %v4881_v26 = vmul.f32 %v7751_v42, %v10050_v1  ;;  %v7490_v1 = vld [vmem:[%s10557_s21 + $0x40] sm:$0xff]  }
0x1016   : > { %v7753_v3 = vpop.eup %7752  ;;  %7169 = vmatprep.subr.bf16.mxu0 %v7490_v1 }
0x1017   : > { %v4880_v6 = vmul.f32 %v7753_v3, %v10073_v23  ;;  %v4890_v61 = vpack.c.bf16 %v4882_v50, %v4881_v26  ;;  %7170 = vmatpush3.bf16.msra.mxu0 %v7490_v1  ;;  %v7512_v1 = vld [vmem:[%s10441_s15 + $0xa4] ss:$8 sps:$4 sm:$0xff]  }
0x1018   : > { %7171 = vmatprep.subr.bf16.mxu0 %v7491_v34 }
0x1019   : > { %v4889_v43 = vpack.c.bf16 %v4880_v6, %v4879_v56 }
0x101b   : > { %7165 = vmatprep.mubr.msk.bf16.mxu1 %vm1955_vm3, %v4889_v43  ;;  %7172 = vmatpush3.bf16.msra.mxu0 %v7491_v34  ;;  %v7515_v34 = vld [vmem:[%s10442_s16 + $0xa4] ss:$8 sps:$4 sm:$0xff]  }
0x101c   : > { %7166 = vmatmul.mubr.msk.bf16.vlgmr.msra.gmra.mrb[64].mxu1 %vm1955_vm3, %v4890_v61  ;;  %7173 = vmatprep.subr.bf16.mxu0 %v7492_v37  ;;  %v7498_v61 = vld [vmem:[%s10441_s15 + $0x80] ss:$8 sps:$4 sm:$0xff]  }
0x101d   : > { %5462 = vmatprep.mubr.bf16.mxu1 %v10556_v33 }
0x101f   : > { %7174 = vmatpush3.bf16.msra.mxu0 %v7492_v37 }
0x1020   : > { %7175 = vmatprep.subr.bf16.mxu0 %v7493_v54 }
0x1023   : > { %7176 = vmatpush3.bf16.msra.mxu0 %v7493_v54 }
0x1024   : > { %7177 = vmatprep.subr.bf16.mxu0 %v7494_v45 }
0x1027   : > { %7178 = vmatpush3.bf16.msra.mxu0 %v7494_v45  ;;  %v10560_v45 = vld [vmem:[#allocation8_spill] sm:$0xff] }
0x1028   : > { %7179 = vmatprep.subr.bf16.mxu0 %v7495_v30 }
0x102b   : > { %7180 = vmatpush3.bf16.msra.mxu0 %v7495_v30 }
0x102c   : > { %7181 = vmatprep.subr.bf16.mxu0 %v7496_v27 }
0x102f   : > { %7182 = vmatpush3.bf16.msra.mxu0 %v7496_v27 }
0x1030   : > { %7183 = vmatprep.subr.bf16.mxu0 %v7497_v18 }
0x1033   : > { %7184 = vmatpush3.bf16.msra.mxu0 %v7497_v18  ;;  %v10561_v18 = vld [vmem:[#allocation5_spill] sm:$0xff] }
0x108a   : > { %v10114_v8 = vpop.f32.mrb[44].mxu0 }
0x108b   : > { %v10116_v9 = vpop.f32.mrb[45].mxu0 }
0x108c   : > { %v10118_v10 = vpop.f32.mrb[46].mxu0 }
0x108d   : > { %v10120_v29 = vpop.f32.mrb[47].mxu0 }
0x10ae   : > { %v7151_v24 = vpop.f32.mrb[60].mxu1 }
0x10af   : > { %v4986_v23 = vpop.f32.mrb[61].mxu1 }
0x10b0   : > { %v7152_v21 = vpop.f32.mrb[62].mxu1 }
0x10b1   : > { %v7332_v16 = vpack.i.bf16 %v7152_v21, %v7151_v24  ;;  %v4989_v38 = vpop.f32.mrb[63].mxu1  ;;  %v7509_v24 = vld [vmem:[%s10442_s16 + $0x94] ss:$8 sps:$4 sm:$0xff]   ;;  %v7507_v21 = vld [vmem:[%s10442_s16 + $0x90] ss:$8 sps:$4 sm:$0xff]  }
0x10b2   : > { %v7342_v40 = vpack.i.bf16 %v4989_v38, %v4986_v23  ;;  %v7504_v23 = vld [vmem:[%s10441_s15 + $0x90] ss:$8 sps:$4 sm:$0xff]   ;;  %v7513_v38 = vld [vmem:[%s10442_s16 + $0xa0] ss:$8 sps:$4 sm:$0xff]  }
0x10b3   : > { %7333 = vrot.lane.b32.xlu1 %v7332_v16, %s10538_s5  ;;  %v7510_v16 = vld [vmem:[%s10441_s15 + $0xa0] ss:$8 sps:$4 sm:$0xff]  }
0x10b4   : > { %7343 = vrot.lane.b32.xlu0 %v7342_v40, %s10538_s5  ;;  %s10563_s5 = sld [smem:[#allocation24_spill]] }
0x10b5   : > { %v7159_v53 = vpop.f32.mrb[48].mxu0 }
0x10b6   : > { %v5041_v2 = vpop.f32.mrb[49].mxu0 }
0x10b7   : > { %v7160_v60 = vpop.f32.mrb[50].mxu0 }
0x10b8   : > { %v7337_v28 = vpack.i.bf16 %v7160_v60, %v7159_v53  ;;  %v5044_v59 = vpop.f32.mrb[51].mxu0  ;;  %v10558_v53 = vld [vmem:[#allocation7_spill] sm:$0xff] }
0x10b9   : > { %v7347_v15 = vpack.i.bf16 %v5044_v59, %v5041_v2  ;;  %v10559_v59 = vld [vmem:[#allocation4_spill] sm:$0xff] }
0x10ba   : > { %7338 = vrot.lane.b32.xlu1 %v7337_v28, %s10536_s1 }
0x10bb   : > { %7348 = vrot.lane.b32.xlu0 %v7347_v15, %s10536_s1  ;;  %s723_s1 = scalar_lea.vmem %s10568_s3, %s10567_s28 }
0x10ef   : > { %v7167_v7 = vpop.f32.mrb[64].mxu1 }
0x10f0   : > { %v5096_v17 = vpop.f32.mrb[65].mxu1 }
0x10f1   : > { %v7168_v39 = vpop.f32.mrb[66].mxu1 }
0x10f2   : > { %v7357_v19 = vpack.i.bf16 %v7168_v39, %v7167_v7  ;;  %v5099_v22 = vpop.f32.mrb[67].mxu1 }
0x10f3   : > { %v7352_v63 = vpack.i.bf16 %v5099_v22, %v5096_v17  ;;  %v7521_v22 = vld [vmem:[%s10442_s16 + $0xb4] ss:$8 sps:$4 sm:$0xff]  }
0x10f4   : > { %7358 = vrot.lane.b32.xlu1 %v7357_v19, %s10534_s23  ;;  %v7518_v19 = vld [vmem:[%s10441_s15 + $0xb4] ss:$8 sps:$4 sm:$0xff]  }
0x10f5   : > { %7353 = vrot.lane.b32.xlu0 %v7352_v63, %s10534_s23  ;;  %v7516_v63 = vld [vmem:[%s10441_s15 + $0xb0] ss:$8 sps:$4 sm:$0xff]  }
0x1125   : > { %v7334_v52 = vpop.permute.xlu1 %7333 }
0x1126   : > { %v7344_v25 = vpop.permute.xlu0 %7343  ;;  %v7336_v49 = vunpack.i.h.bf16 %v7334_v52  ;;  %v7335_v35 = vunpack.i.l.bf16 %v7334_v52  ;;  %v7519_v52 = vld [vmem:[%s10442_s16 + $0xb0] ss:$8 sps:$4 sm:$0xff]  }
0x1127   : > { %v7346_v55 = vunpack.i.h.bf16 %v7344_v25  ;;  %v7345_v31 = vunpack.i.l.bf16 %v7344_v25  ;;  %v7522_v25 = vld [vmem:[%s10441_s15 + $0xc0] ss:$8 sps:$4 sm:$0xff]  }
0x1128   : > { %v5162_v11 = vsel %vm1955_vm3, %v10118_v10, %v7336_v49  ;;  %v5161_v36 = vsel %vm1955_vm3, %v10114_v8, %v7335_v35  ;;  %v7500_v8 = vld [vmem:[%s10441_s15 + $0x84] ss:$8 sps:$4 sm:$0xff]   ;;  %v7525_v49 = vld [vmem:[%s10442_s16 + $0xc0] ss:$8 sps:$4 sm:$0xff]  }
0x1129   : > { %v5160_v44 = vsel %vm1955_vm3, %v10120_v29, %v7346_v55  ;;  %v5159_v62 = vsel %vm1955_vm3, %v10116_v9, %v7345_v31  ;;  %v7501_v9 = vld [vmem:[%s10442_s16 + $0x80] ss:$8 sps:$4 sm:$0xff]   ;;  %v7503_v10 = vld [vmem:[%s10442_s16 + $0x84] ss:$8 sps:$4 sm:$0xff]   ;;  %v7506_v29 = vld [vmem:[%s10441_s15 + $0x94] ss:$8 sps:$4 sm:$0xff]   ;;  %5430 = vmatprep.subr.bf16.mxu1 %v7500_v8 }
0x112a   : > { %5580 = vmatprep.subr.bf16.mxu0 %v7503_v10  ;;  %5431 = vmatpush1.bf16.msra.mxu1 %v7498_v61  ;;  %v7527_v35 = vld [vmem:[%s10442_s16 + $0xc4] ss:$8 sps:$4 sm:$0xff]   ;;  %v7530_v55 = vld [vmem:[%s10441_s15 + $0xd4] ss:$8 sps:$4 sm:$0xff]   ;;  %v7531_v31 = vld [vmem:[%s10442_s16 + $0xd0] ss:$8 sps:$4 sm:$0xff]  }
0x112b   : > { %5432 = vmatprep.subr.bf16.mxu1 %v7506_v29  ;;  %v6472_v8 = vld [vmem:[%s10440_s14 + $0x1] ss:$0 sm:$0xff] }
0x112c   : > { %v7339_v14 = vpop.permute.xlu1 %7338 }
0x112d   : > { %v7349_v4 = vpop.permute.xlu0 %7348  ;;  %v7341_v48 = vunpack.i.h.bf16 %v7339_v14  ;;  %v7340_v47 = vunpack.i.l.bf16 %v7339_v14  ;;  %v7524_v14 = vld [vmem:[%s10441_s15 + $0xc4] ss:$8 sps:$4 sm:$0xff]  }
0x112e   : > { %v7351_v13 = vunpack.i.h.bf16 %v7349_v4  ;;  %v7350_v57 = vunpack.i.l.bf16 %v7349_v4  ;;  %5433 = vmatpush1.bf16.msra.mxu1 %v7504_v23  ;;  %v7528_v4 = vld [vmem:[%s10441_s15 + $0xd0] ss:$8 sps:$4 sm:$0xff]  }
0x112f   : > { %v5165_v41 = vsel %vm2656_vm8, %v5161_v36, %v7340_v47  ;;  %v5166_v32 = vsel %vm2656_vm8, %v5162_v11, %v7341_v48  ;;  %5434 = vmatprep.subr.bf16.mxu1 %v7512_v1  ;;  %v7533_v48 = vld [vmem:[%s10442_s16 + $0xd4] ss:$8 sps:$4 sm:$0xff]   ;;  %v7536_v47 = vld [vmem:[%s10441_s15 + $0xe4] ss:$8 sps:$4 sm:$0xff]   ;;  %v7537_v11 = vld [vmem:[%s10442_s16 + $0xe0] ss:$8 sps:$4 sm:$0xff]  }
0x1130   : > { %v5163_v20 = vsel %vm2656_vm8, %v5159_v62, %v7350_v57  ;;  %v5164_v42 = vsel %vm2656_vm8, %v5160_v44, %v7351_v13  ;;  %v7539_v13 = vld [vmem:[%s10442_s16 + $0xe4] ss:$8 sps:$4 sm:$0xff]   ;;  %v7534_v57 = vld [vmem:[%s10441_s15 + $0xe0] ss:$8 sps:$4 sm:$0xff]   ;;  %v7542_v36 = vld [vmem:[%s10441_s15 + $0xf4] ss:$8 sps:$4 sm:$0xff]  }
0x1131   : > { %v7540_v44 = vld [vmem:[%s10441_s15 + $0xf0] ss:$8 sps:$4 sm:$0xff]  }
0x1132   : > { %5435 = vmatpush1.bf16.msra.mxu1 %v7510_v16  ;;  %v7543_v62 = vld [vmem:[%s10442_s16 + $0xf0] ss:$8 sps:$4 sm:$0xff]  }
0x1133   : > { %5436 = vmatprep.subr.bf16.mxu1 %v7518_v19  ;;  %v7561_v19 = vld [vmem:[%s10443_s17 + $0xb8] sm:$0xff]  }
0x1136   : > { %5437 = vmatpush1.bf16.msra.mxu1 %v7516_v63 }
0x1137   : > { %5438 = vmatprep.subr.bf16.mxu1 %v7524_v14 }
0x113a   : > { %5439 = vmatpush1.bf16.msra.mxu1 %v7522_v25 }
0x113b   : > { %5440 = vmatprep.subr.bf16.mxu1 %v7530_v55 }
0x113e   : > { %5441 = vmatpush1.bf16.msra.mxu1 %v7528_v4 }
0x113f   : > { %5442 = vmatprep.subr.bf16.mxu1 %v7536_v47 }
0x1142   : > { %5443 = vmatpush1.bf16.msra.mxu1 %v7534_v57 }
0x1143   : > { %5444 = vmatprep.subr.bf16.mxu1 %v7542_v36 }
0x1146   : > { %5445 = vmatpush1.bf16.msra.mxu1 %v7540_v44 }
0x1166   : > { %v7359_v58 = vpop.permute.xlu1 %7358 }
0x1167   : > { %v7361_v46 = vunpack.i.h.bf16 %v7359_v58  ;;  %v7360_v5 = vunpack.i.l.bf16 %v7359_v58  ;;  %v7354_v0 = vpop.permute.xlu0 %7353  ;;  %v7545_v58 = vld [vmem:[%s10442_s16 + $0xf4] ss:$8 sps:$4 sm:$0xff]  }
0x1168   : > { %v7356_v51 = vunpack.i.h.bf16 %v7354_v0  ;;  %v7355_v12 = vunpack.i.l.bf16 %v7354_v0 }
0x1169   : > { %v5170_v3 = vsel %vm2661_vm9, %v5166_v32, %v7361_v46  ;;  %v5169_v50 = vsel %vm2661_vm9, %v5165_v41, %v7360_v5  ;;  %v10562_v46 = vmov 0.0  }
0x116a   : > { %v5189_v56 = vpack.c.bf16 %v5170_v3, %v5169_v50  ;;  %v5167_v6 = vsel %vm2661_vm9, %v5163_v20, %v7355_v12  ;;  %v5168_v26 = vsel %vm2661_vm9, %v5164_v42, %v7356_v51 }
0x116b   : > { %v5188_v43 = vpack.c.bf16 %v5168_v26, %v5167_v6 }
0x116d   : > { %7185 = vmatprep.mubr.bf16.mxu0 %v5188_v43 }
0x116e   : > { %7186 = vmatmul.mubr.bf16.vlgmr.msra.gmra.mrb[52].mxu0 %v5189_v56 }
0x116f   : > { %5612 = vmatprep.mubr.bf16.mxu0 %v10556_v33  ;;  %5581 = vmatpush1.bf16.msra.mxu0 %v7501_v9 }
0x1170   : > { %5582 = vmatprep.subr.bf16.mxu0 %v7509_v24 }
0x1173   : > { %5583 = vmatpush1.bf16.msra.mxu0 %v7507_v21 }
0x1174   : > { %5584 = vmatprep.subr.bf16.mxu0 %v7515_v34 }
0x1177   : > { %5585 = vmatpush1.bf16.msra.mxu0 %v7513_v38 }
0x1178   : > { %5586 = vmatprep.subr.bf16.mxu0 %v7521_v22 }
0x117b   : > { %5587 = vmatpush1.bf16.msra.mxu0 %v7519_v52 }
0x117c   : > { %5588 = vmatprep.subr.bf16.mxu0 %v7527_v35 }
0x117f   : > { %5589 = vmatpush1.bf16.msra.mxu0 %v7525_v49 }
0x1180   : > { %5590 = vmatprep.subr.bf16.mxu0 %v7533_v48 }
0x1183   : > { %5591 = vmatpush1.bf16.msra.mxu0 %v7531_v31 }
0x1184   : > { %5592 = vmatprep.subr.bf16.mxu0 %v7539_v13 }
0x1187   : > { %5593 = vmatpush1.bf16.msra.mxu0 %v7537_v11 }
0x1188   : > { %5594 = vmatprep.subr.bf16.mxu0 %v7545_v58 }
0x118b   : > { %5595 = vmatpush1.bf16.msra.mxu0 %v7543_v62 }
0x118c   : > { %7189 = vmatprep.subr.bf16.mxu0 %v10562_v46 }
0x1241   : > { %v7187_v40 = vpop.f32.mrb[52].mxu0 }
0x1242   : > { %v5272_v37 = vpop.f32.mrb[53].mxu0  ;;  %v10209_v54 = vadd.f32 %v7187_v40, %v10559_v59  ;;  %v7552_v59 = vld [vmem:[%s10443_s17 + $0xd8] sm:$0xff]  }
0x1243   : > { %v10206_v2 = vadd.f32 %v5272_v37, %v10558_v53  ;;  %v7188_v60 = vpop.f32.mrb[54].mxu0  ;;  %v7546_v37 = vld [vmem:[%s10443_s17 + $0xc0] sm:$0xff]  }
0x1244   : > { %v5275_v28 = vpop.f32.mrb[55].mxu0  ;;  %v10219_v7 = vadd.f32 %v7188_v60, %v10561_v18  ;;  %v5295_v17 = vmul.f32 %v10209_v54, %v10209_v54  ;;  %v7547_v53 = vld [vmem:[%s10443_s17 + $0x80] sm:$0xff]   ;;  %6844 = vmatprep.subr.bf16.mxu1 %v7546_v37  ;;  %v7550_v60 = vld [vmem:[%s10443_s17 + $0xd0] sm:$0xff]   ;;  %v7557_v18 = vld [vmem:[%s10443_s17 + $0xa8] sm:$0xff]  }
0x1245   : > { %v5293_v15 = vmul.f32 %v10206_v2, %v10206_v2  ;;  %v10214_v30 = vadd.f32 %v5275_v28, %v10560_v45  ;;  %v7551_v28 = vld [vmem:[%s10443_s17 + $0x90] sm:$0xff]   ;;  %v7554_v45 = vld [vmem:[%s10443_s17 + $0xe0] sm:$0xff]  }
0x1246   : > { %v5296_v39 = vmul.f32 %v10219_v7, %v10219_v7 }
0x1247   : > { %v5294_v27 = vmul.f32 %v10214_v30, %v10214_v30  ;;  %5297 = vadd.xlane.f32.xlu0 %v5293_v15  ;;  %v7553_v15 = vld [vmem:[%s10443_s17 + $0x98] sm:$0xff]  }
0x1249   : > { %5299 = vadd.xlane.f32.xlu1 %v5294_v27  ;;  %v7556_v27 = vld [vmem:[%s10443_s17 + $0xe8] sm:$0xff]  }
0x124b   : > { %5301 = vadd.xlane.f32.xlu0 %v5295_v17  ;;  %v7559_v17 = vld [vmem:[%s10443_s17 + $0xb0] sm:$0xff]  }
0x124f   : > { %5303 = vadd.xlane.f32.xlu0 %v5296_v39  ;;  %v7560_v39 = vld [vmem:[%s10443_s17 + $0xf8] sm:$0xff]  }
0x12d4   : > { %v5298_v5 = vpop.xlane.xlu0 %5297 }
0x12d5   : > { %v5305_v0 = vmul.f32 0.0078125, %v5298_v5 }
0x12d6   : > { %v5300_v41 = vpop.xlane.xlu1 %5299 }
0x12d7   : > { %v5309_v32 = vadd.f32 1e-06, %v5305_v0  ;;  %v5306_v51 = vmul.f32 0.0078125, %v5300_v41 }
0x12d8   : > { %v5302_v12 = vpop.xlane.xlu0 %5301 }
0x12d9   : > { %7754 = vrsqrt.f32 %v5309_v32  ;;  %v5310_v20 = vadd.f32 1e-06, %v5306_v51  ;;  %v5307_v42 = vmul.f32 0.0078125, %v5302_v12 }
0x12db   : > { %7756 = vrsqrt.f32 %v5310_v20  ;;  %v5311_v3 = vadd.f32 1e-06, %v5307_v42 }
0x12dc   : > { %v5304_v50 = vpop.xlane.xlu0 %5303 }
0x12dd   : > { %v5308_v56 = vmul.f32 0.0078125, %v5304_v50  ;;  %7758 = vrsqrt.f32 %v5311_v3 }
0x12df   : > { %v5312_v6 = vadd.f32 1e-06, %v5308_v56 }
0x12e1   : > { %7760 = vrsqrt.f32 %v5312_v6 }
0x12e3   : > { %v7755_v26 = vpop.eup %7754 }
0x12e4   : > { %v5317_v43 = vmul.f32 %v7755_v26, %v10206_v2  ;;  %v7549_v2 = vld [vmem:[%s10443_s17 + $0x88] sm:$0xff]  }
0x12e5   : > { %v7757_v61 = vpop.eup %7756 }
0x12e6   : > { %v5318_v9 = vmul.f32 %v7757_v61, %v10214_v30  ;;  %v5327_v10 = vmul.f32 %v6472_v8, %v5317_v43  ;;  %v7555_v30 = vld [vmem:[%s10443_s17 + $0xa0] sm:$0xff]  }
0x12e7   : > { %v7759_v24 = vpop.eup %7758 }
0x12e8   : > { %v5328_v29 = vmul.f32 %v6472_v8, %v5318_v9  ;;  %v5319_v1 = vmul.f32 %v7759_v24, %v10209_v54 }
0x12ea   : > { %v5348_v23 = vpack.c.bf16 %v5328_v29, %v5327_v10  ;;  %v5329_v38 = vmul.f32 %v6472_v8, %v5319_v1 }
0x12eb   : > { %v7761_v21 = vpop.eup %7760 }
0x12ec   : > { %5463 = vmatmul.mubr.bf16.vlgmr.msra.gmra.mrb[68].mxu1 %v5348_v23  ;;  %5613 = vmatmul.mubr.bf16.vlgmr.msra.gmra.mrb[56].mxu0 %v5348_v23  ;;  %v5320_v34 = vmul.f32 %v7761_v21, %v10219_v7  ;;  %v7558_v7 = vld [vmem:[%s10443_s17 + $0xf0] sm:$0xff]  }
0x12ed   : > { %5472 = vmatprep.mubr.bf16.mxu1 %v10556_v33  ;;  %5622 = vmatprep.mubr.bf16.mxu0 %v10556_v33  ;;  %v7548_v33 = vld [vmem:[%s10443_s17 + $0xc8] sm:$0xff]  }
0x12ee   : > { %v5330_v16 = vmul.f32 %v6472_v8, %v5320_v34  ;;  %6845 = vmatpush3.bf16.msra.mxu1 %v7547_v53 }
0x12ef   : > { %6846 = vmatprep.subr.bf16.mxu1 %v7548_v33 }
0x12f0   : > { %v5349_v40 = vpack.c.bf16 %v5330_v16, %v5329_v38 }
0x12f2   : > { %6847 = vmatpush3.bf16.msra.mxu1 %v7549_v2 }
0x12f3   : > { %6848 = vmatprep.subr.bf16.mxu1 %v7550_v60 }
0x12f4   : > { %5473 = vmatmul.mubr.bf16.gmra.mrb[72].mxu1 %v5349_v40  ;;  %5623 = vmatmul.mubr.bf16.gmra.mrb[60].mxu0 %v5349_v40 }
0x12f5   : > { %7205 = vmatprep.mubr.msk.bf16.mxu0 %vm7814_vm0, %v10562_v46 }
0x12f6   : > { %6849 = vmatpush3.bf16.msra.mxu1 %v7551_v28 }
0x12f7   : > { %6850 = vmatprep.subr.bf16.mxu1 %v7552_v59 }
0x12fa   : > { %6851 = vmatpush3.bf16.msra.mxu1 %v7553_v15 }
0x12fb   : > { %6852 = vmatprep.subr.bf16.mxu1 %v7554_v45 }
0x12fe   : > { %6853 = vmatpush3.bf16.msra.mxu1 %v7555_v30 }
0x12ff   : > { %6854 = vmatprep.subr.bf16.mxu1 %v7556_v27 }
0x1302   : > { %6855 = vmatpush3.bf16.msra.mxu1 %v7557_v18 }
0x1303   : > { %6856 = vmatprep.subr.bf16.mxu1 %v7558_v7 }
0x1306   : > { %6857 = vmatpush3.bf16.msra.mxu1 %v7559_v17 }
0x1307   : > { %6858 = vmatprep.subr.bf16.mxu1 %v7560_v39 }
0x130a   : > { %6859 = vmatpush3.bf16.msra.mxu1 %v7561_v19 }
0x13bf   : > { %v10345_v22 = vpop.f32.mrb[68].mxu1  ;;  %v10347_v63 = vpop.f32.mrb[56].mxu0 }
0x13c0   : > { %v5633_v52 = vsub.f32 0.0, %v10345_v22  ;;  %v10350_v25 = vpop.f32.mrb[69].mxu1  ;;  %v10352_v14 = vpop.f32.mrb[57].mxu0 }
0x13c1   : > { %v5634_v49 = vsub.f32 0.0, %v10350_v25  ;;  %v10355_v35 = vpop.f32.mrb[70].mxu1  ;;  %v10357_v4 = vpop.f32.mrb[58].mxu0 }
0x13c2   : > { %v5641_v55 = vmul.f32 1.442695, %v5633_v52  ;;  %v5635_v31 = vsub.f32 0.0, %v10355_v35  ;;  %v10360_v48 = vpop.f32.mrb[71].mxu1  ;;  %v10362_v47 = vpop.f32.mrb[59].mxu0 }
0x13c3   : > { %v5643_v13 = vmul.f32 1.442695, %v5634_v49  ;;  %v5636_v57 = vsub.f32 0.0, %v10360_v48 }
0x13c4   : > { %7762 = vpow2.f32 %v5641_v55  ;;  %v5645_v11 = vmul.f32 1.442695, %v5635_v31 }
0x13c5   : > { %7764 = vpow2.f32 %v5643_v13  ;;  %v5647_v36 = vmul.f32 1.442695, %v5636_v57 }
0x13c6   : > { %7766 = vpow2.f32 %v5645_v11  ;;  %v7562_v11 = vld [vmem:[%s10563_s5] sm:$0xff]  }
0x13c7   : > { %7768 = vpow2.f32 %v5647_v36  ;;  %v5474_v58 = vpop.f32.mrb[72].mxu1  ;;  %v10365_v44 = vpop.f32.mrb[60].mxu0  ;;  %7190 = vmatpush3.bf16.msra.mxu0 %v7562_v11  ;;  %v7563_v36 = vld [vmem:[%s10563_s5 + $0x8] sm:$0xff]  }
0x13c8   : > { %v5637_v62 = vsub.f32 0.0, %v5474_v58  ;;  %v5476_v5 = vpop.f32.mrb[73].mxu1  ;;  %v10367_v0 = vpop.f32.mrb[61].mxu0  ;;  %7191 = vmatprep.subr.bf16.mxu0 %v10562_v46 }
0x13c9   : > { %v5638_v41 = vsub.f32 0.0, %v5476_v5  ;;  %v5478_v32 = vpop.f32.mrb[74].mxu1  ;;  %v10369_v51 = vpop.f32.mrb[62].mxu0 }
0x13ca   : > { %v5649_v12 = vmul.f32 1.442695, %v5637_v62  ;;  %v5639_v20 = vsub.f32 0.0, %v5478_v32  ;;  %v5480_v42 = vpop.f32.mrb[75].mxu1  ;;  %v5630_v3 = vpop.f32.mrb[63].mxu0 }
0x13cb   : > { %v5651_v50 = vmul.f32 1.442695, %v5638_v41  ;;  %v5640_v56 = vsub.f32 0.0, %v5480_v42  ;;  %7192 = vmatpush3.bf16.msra.mxu0 %v7563_v36 }
0x13cc   : > { %7770 = vpow2.f32 %v5649_v12  ;;  %v5653_v6 = vmul.f32 1.442695, %v5639_v20  ;;  %7193 = vmatprep.subr.bf16.mxu0 %v10562_v46 }
0x13cd   : > { %7772 = vpow2.f32 %v5651_v50  ;;  %v5655_v26 = vmul.f32 1.442695, %v5640_v56  ;;  %v7564_v50 = vld [vmem:[%s10563_s5 + $0x10] sm:$0xff]   ;;  %v7565_v56 = vld [vmem:[%s10563_s5 + $0x18] sm:$0xff]  }
0x13ce   : > { %v7763_v43 = vpop.eup %7762  ;;  %7774 = vpow2.f32 %v5653_v6  ;;  %v7567_v6 = vld [vmem:[%s10563_s5 + $0x28] sm:$0xff]  }
0x13cf   : > { %v7765_v61 = vpop.eup %7764  ;;  %v5657_v8 = vadd.f32 1.0, %v7763_v43  ;;  %7776 = vpow2.f32 %v5655_v26  ;;  %7194 = vmatpush3.bf16.msra.mxu0 %v7564_v50  ;;  %v7568_v26 = vld [vmem:[%s10563_s5 + $0x30] sm:$0xff]   ;;  %v7569_v43 = vld [vmem:[%s10563_s5 + $0x38] sm:$0xff]  }
0x13d0   : > { %v7767_v9 = vpop.eup %7766  ;;  %v5658_v10 = vadd.f32 1.0, %v7765_v61  ;;  %7195 = vmatprep.subr.bf16.mxu0 %v10562_v46 }
0x13d1   : > { %v7769_v29 = vpop.eup %7768  ;;  %7778 = vrcp.f32 %v5657_v8  ;;  %v5659_v24 = vadd.f32 1.0, %v7767_v9 }
0x13d2   : > { %7780 = vrcp.f32 %v5658_v10  ;;  %v5660_v23 = vadd.f32 1.0, %v7769_v29  ;;  %v6585_v29 = vld [vmem:[%s10565_s18] ss:$0 sm:$0xff] }
0x13d3   : > { %7782 = vrcp.f32 %v5659_v24  ;;  %7196 = vmatpush3.bf16.msra.mxu0 %v7565_v56 }
0x13d4   : > { %7784 = vrcp.f32 %v5660_v23  ;;  %7197 = vmatprep.subr.bf16.mxu0 %v10562_v46 }
0x13d6   : > { %v7771_v21 = vpop.eup %7770 }
0x13d7   : > { %v7773_v1 = vpop.eup %7772  ;;  %v5661_v34 = vadd.f32 1.0, %v7771_v21 }
0x13d8   : > { %v7775_v16 = vpop.eup %7774  ;;  %v5662_v38 = vadd.f32 1.0, %v7773_v1 }
0x13d9   : > { %v7777_v40 = vpop.eup %7776  ;;  %7786 = vrcp.f32 %v5661_v34  ;;  %v5663_v37 = vadd.f32 1.0, %v7775_v16  ;;  %v10566_v16 = vld [vmem:[#allocation9_spill] sm:$0xff] }
0x13da   : > { %7788 = vrcp.f32 %v5662_v38  ;;  %v5664_v53 = vadd.f32 1.0, %v7777_v40  ;;  %v5998_v38 = vsub.s32 0, %v10566_v16 }
0x13db   : > { %v7779_v33 = vpop.eup %7778  ;;  %7790 = vrcp.f32 %v5663_v37 }
0x13dc   : > { %v7781_v2 = vpop.eup %7780  ;;  %v5673_v60 = vmul.f32 %v7779_v33, %v10345_v22  ;;  %7792 = vrcp.f32 %v5664_v53 }
0x13dd   : > { %v7783_v28 = vpop.eup %7782  ;;  %v5674_v59 = vmul.f32 %v7781_v2, %v10350_v25 }
0x13de   : > { %v7785_v15 = vpop.eup %7784  ;;  %v5681_v45 = vmul.f32 %v5673_v60, %v10347_v63  ;;  %v5675_v30 = vmul.f32 %v7783_v28, %v10355_v35 }
0x13df   : > { %v5682_v27 = vmul.f32 %v5674_v59, %v10352_v14  ;;  %v5676_v18 = vmul.f32 %v7785_v15, %v10360_v48 }
0x13e0   : > { %v5683_v7 = vmul.f32 %v5675_v30, %v10357_v4 }
0x13e1   : > { %v5684_v17 = vmul.f32 %v5676_v18, %v10362_v47 }
0x13e2   : > { %v5722_v39 = vpack.c.bf16 %v5683_v7, %v5681_v45 }
0x13e3   : > { %v7787_v19 = vpop.eup %7786  ;;  %v5723_v22 = vpack.c.bf16 %v5684_v17, %v5682_v27 }
0x13e4   : > { %v7789_v52 = vpop.eup %7788  ;;  %v5677_v49 = vmul.f32 %v7787_v19, %v5474_v58 }
0x13e5   : > { %v7791_v55 = vpop.eup %7790  ;;  %v5678_v25 = vmul.f32 %v7789_v52, %v5476_v5  ;;  %5854 = vmatprep.mubr.bf16.mxu1 %v5723_v22 }
0x13e6   : > { %v7793_v31 = vpop.eup %7792  ;;  %v5685_v63 = vmul.f32 %v5677_v49, %v10365_v44  ;;  %v5679_v35 = vmul.f32 %v7791_v55, %v5478_v32  ;;  %5855 = vmatmul.mubr.bf16.vlgmr.msra.gmra.mrb[76].mxu1 %v5722_v39 }
0x13e7   : > { %v5686_v14 = vmul.f32 %v5678_v25, %v10367_v0  ;;  %v5680_v48 = vmul.f32 %v7793_v31, %v5480_v42 }
0x13e8   : > { %v5687_v4 = vmul.f32 %v5679_v35, %v10369_v51 }
0x13e9   : > { %v5688_v13 = vmul.f32 %v5680_v48, %v5630_v3 }
0x13ea   : > { %v5724_v47 = vpack.c.bf16 %v5687_v4, %v5685_v63 }
0x13eb   : > { %v5725_v57 = vpack.c.bf16 %v5688_v13, %v5686_v14 }
0x13ed   : > { %5860 = vmatprep.mubr.bf16.mxu1 %v5725_v57 }
0x13ee   : > { %5861 = vmatmul.mubr.bf16.gmra.mrb[80].mxu1 %v5724_v47 }
0x14b9   : > { %v6860_v58 = vpop.f32.mrb[76].mxu1 }
0x14ba   : > { %v6861_v44 = vpop.f32.mrb[77].mxu1 }
0x14bb   : > { %v6863_v62 = vpop.f32.mrb[78].mxu1 }
0x14bc   : > { %v6864_v5 = vpop.f32.mrb[79].mxu1 }
0x14c1   : > { %v6866_v0 = vpop.f32.mrb[80].mxu1 }
0x14c2   : > { %v6867_v41 = vpop.f32.mrb[81].mxu1 }
0x14c3   : > { %v6868_v32 = vadd.f32 %v6867_v41, %v6866_v0  ;;  %v6869_v51 = vpop.f32.mrb[82].mxu1 }
0x14c4   : > { %v6870_v12 = vpop.f32.mrb[83].mxu1 }
0x14c5   : > { %v5868_v20 = vadd.f32 %v6868_v32, %v10209_v54  ;;  %v7566_v54 = vld [vmem:[%s10563_s5 + $0x20] sm:$0xff]  }
0x14c6   : > { %7198 = vmatpush3.bf16.msra.mxu0 %v7566_v54 }
0x14c7   : > { %v5870_v42 = vmul.f32 %v5868_v20, %v5868_v20  ;;  %7199 = vmatprep.subr.bf16.mxu0 %v10562_v46 }
0x14c9   : > { %v5872_v3 = vsel %vm5871_vm10, %v5870_v42, 0.0 }
0x14ca   : > { %5873 = vadd.xlane.f32.xlu0 %v5872_v3  ;;  %7200 = vmatpush3.bf16.msra.mxu0 %v7567_v6 }
0x14cb   : > { %7201 = vmatprep.subr.bf16.mxu0 %v10562_v46 }
0x14ce   : > { %7202 = vmatpush3.bf16.msra.mxu0 %v7568_v26 }
0x14cf   : > { %7203 = vmatprep.subr.bf16.mxu0 %v10562_v46 }
0x14d2   : > { %7204 = vmatpush3.bf16.msra.mxu0 %v7569_v43 }
0x1557   : > { %v5874_v61 = vpop.xlane.xlu0 %5873 }
0x1558   : > { %v5875_v8 = vmul.f32 0.0078125, %v5874_v61 }
0x155a   : > { %v5876_v9 = vadd.f32 1e-06, %v5875_v8 }
0x155c   : > { %7794 = vrsqrt.f32 %v5876_v9 }
0x1566   : > { %v7795_v10 = vpop.eup %7794 }
0x1567   : > { %v5878_v24 = vmul.f32 %v7795_v10, %v5868_v20 }
0x1569   : > { %v5885_v23 = vmul.f32 %v6585_v29, %v5878_v24 }
0x156b   : > { %v5902_v21 = vpack.c.bf16 %v5885_v23, %v5885_v23 }
0x156d   : > { %v5904_v1 = vshrl.u32 %v5902_v21, 16 }
0x156f   : > { %v5906_v34 = vrot.slane %v5904_v1, 3 }
0x1571   : > { %7206 = vmatmul.mubr.bf16.vlgmr.msra.gmra.mrb[64].mxu0 %v5906_v34 }
0x1644   : > { %v5990_v46 = vpop.f32.mrb[64].mxu0 }
0x1645   : > { %v5999_v40 = vrot.slane %v5990_v46, %v5998_v38  ;;  %v7207_v37 = vpop.f32.mrb[65].mxu0 }
0x1646   : > { %v5993_v53 = vpop.f32.mrb[66].mxu0 }
0x1647   : > { %6000 = vst [vmem:[%s723_s1] sm:$0xff] %v5999_v40  ;;  %v7208_v33 = vpop.f32.mrb[67].mxu0 }
0x1648 PF: > { %s10569_s26 = sld [smem:[#allocation2_spill]] }
0x164e   : > { %s33_s3 = sadd.s32 1, %s10569_s26  }
0x164f   : > { %p30_p4 = scmp.ge.s32.totalorder %s33_s3, 4  }
0x1651   :  { %32 = sbr.rel (!%p30_p4) target bundleno = 14 (0xe), region = 171 }

</bundles_post_ra>
